<compile_context>
chip_gen: v5e
topology: v5e:2x2
jax: 0.10.0
libtpu: 0.0.40
codegen_flags: <defaults>
</compile_context>

<pallas_src>
import functools

import jax
import jax.numpy as jnp
from jax.experimental import pallas as pl
from jax.experimental.pallas import tpu as pltpu


def _round_up(x, m):
    return ((x + m - 1) // m) * m


_VMEM_LIMIT = 64 * 1024 * 1024   # explicit scoped-VMEM budget (v5e default is 16 MiB)


# ----------------------------------------------------------------------------
# Fused stride-1 3x3x3 conv: banded-weight implicit GEMM (no im2col in HBM)
# ----------------------------------------------------------------------------

def _fused_conv_kernel(*refs, To, Hop, kt, kh, relu, has_skip):
    if has_skip:
        x_ref, w_ref, b_ref, skip_ref, o_ref = refs
    else:
        x_ref, w_ref, b_ref, o_ref = refs
        skip_ref = None
    WpC = x_ref.shape[-1]
    WoC = o_ref.shape[-1]
    # Widen once to f32: slicing at unaligned sublane offsets (dh in {0,1,2}) is the
    # best-supported relayout path in f32; operands are narrowed back to bf16 for the MXU.
    xv = x_ref[0].astype(jnp.float32)                 # (Tp, Hp, WpC)
    acc = jnp.zeros((To * Hop, WoC), jnp.float32)
    for dt in range(kt):
        for dh in range(kh):
            a = xv[dt:dt + To, dh:dh + Hop, :].reshape(To * Hop, WpC)
            acc = acc + jnp.dot(a.astype(jnp.bfloat16), w_ref[dt * kh + dh],
                                preferred_element_type=jnp.float32)
    acc = acc + b_ref[...]
    if has_skip:
        acc = acc + skip_ref[0].astype(jnp.float32)
    if relu:
        acc = jnp.maximum(acc, 0.0)
    o_ref[0] = acc.astype(o_ref.dtype)


def _banded_weight(w, Wp, Wo, sw):
    """w: [Cout, Cin, kt, kh, kw] -> banded [kt*kh, Wp*Cin, Wo*Cout].

    The kw horizontal taps (and the W stride sw) are absorbed into a banded matrix so
    each (dt, dh) tap becomes one GEMM over the full padded-W row."""
    Cout, Cin, kt, kh, kw = w.shape
    wt = jnp.transpose(w, (2, 3, 4, 1, 0))            # (kt, kh, kw, Cin, Cout)
    B = jnp.zeros((kt, kh, Wp, Cin, Wo, Cout), w.dtype)
    for wo in range(Wo):
        for dw in range(kw):
            B = B.at[:, :, wo * sw + dw, :, wo, :].set(wt[:, :, dw])
    return B.reshape(kt * kh, Wp * Cin, Wo * Cout)


def conv3d_fused(x, w, b, *, relu=False, skip=None):
    """Fused 'same' 3x3x3 conv, stride 1, channel-last.

    x: [N, T, H, W, Cin] bf16; w: [Cout, Cin, 3, 3, 3] (PyTorch layout); b: [Cout].
    Optional skip [N, T, H, W, Cout] is added (+ReLU) in the epilogue.
    Returns [N, T, H, W, Cout] bf16.  No im2col patches ever hit HBM."""
    N, T, H, W, Cin = x.shape
    Cout, Cin2, kt, kh, kw = w.shape
    assert Cin == Cin2 and (kt, kh, kw) == (3, 3, 3)
    To, Ho, Wo = T, H, W
    Hop = _round_up(Ho, 8)   # keep the in-kernel (To, Hop) -> rows collapse tile-aligned
    pt, ph, pw = 1, 1, 1
    xp = jnp.pad(x.astype(jnp.bfloat16),
                 ((0, 0), (pt, pt), (ph, ph + Hop - Ho), (pw, pw), (0, 0)))
    Tp, Hp, Wp = T + 2 * pt, Hop + 2 * ph, W + 2 * pw
    WpC, WoC = Wp * Cin, Wo * Cout
    x4 = xp.reshape(N, Tp, Hp, WpC)
    bw = _banded_weight(w, Wp, Wo, 1).astype(jnp.bfloat16)
    bias = jnp.tile(b.astype(jnp.float32), Wo).reshape(1, WoC)

    in_arrays = [x4, bw, bias]
    in_specs = [
        pl.BlockSpec((1, Tp, Hp, WpC), lambda n: (n, 0, 0, 0)),
        pl.BlockSpec((kt * kh, WpC, WoC), lambda n: (0, 0, 0)),
        pl.BlockSpec((1, WoC), lambda n: (0, 0)),
    ]
    if skip is not None:
        skip_p = jnp.pad(skip.astype(jnp.bfloat16),
                         ((0, 0), (0, 0), (0, Hop - Ho), (0, 0), (0, 0)))
        in_arrays.append(skip_p.reshape(N, To * Hop, WoC))
        in_specs.append(pl.BlockSpec((1, To * Hop, WoC), lambda n: (n, 0, 0)))

    out = pl.pallas_call(
        functools.partial(_fused_conv_kernel, To=To, Hop=Hop, kt=kt, kh=kh,
                          relu=(relu or skip is not None),
                          has_skip=skip is not None),
        out_shape=jax.ShapeDtypeStruct((N, To * Hop, WoC), jnp.bfloat16),
        grid_spec=pltpu.PrefetchScalarGridSpec(
            num_scalar_prefetch=0,
            grid=(N,),
            in_specs=in_specs,
            out_specs=pl.BlockSpec((1, To * Hop, WoC), lambda n: (n, 0, 0)),
        ),
        compiler_params=pltpu.CompilerParams(
            dimension_semantics=("parallel",),
            vmem_limit_bytes=_VMEM_LIMIT),
    )(*in_arrays)

    out = out.reshape(N, To, Hop, Wo, Cout)
    if Hop != Ho:
        out = out[:, :, :Ho]
    return out


# ----------------------------------------------------------------------------
# Fallback for strided convs: channel-last im2col (JAX glue) + fused GEMM kernel
# ----------------------------------------------------------------------------

def _gemm_bias_kernel(a_ref, w_ref, b_ref, o_ref, *, relu):
    acc = jnp.dot(a_ref[...], w_ref[...], preferred_element_type=jnp.float32)
    acc = acc + b_ref[...]
    if relu:
        acc = jnp.maximum(acc, 0.0)
    o_ref[...] = acc.astype(o_ref.dtype)


def pallas_conv_gemm(a, w2, bias, *, relu, out_dtype=jnp.bfloat16):
    """a: [M, K] patches, w2: [K, Cout], bias: [Cout]; full K/Cout resident in VMEM."""
    M, K = a.shape
    K2, Cout = w2.shape
    assert K == K2
    a = a.astype(jnp.bfloat16)
    w2 = w2.astype(jnp.bfloat16)
    bias2 = bias.reshape(1, Cout).astype(jnp.float32)
    # Big-tile selection: pad M up to a tile multiple instead of shrinking the tile
    # (>= 4 grid steps in the regime where v7x megacore + pipelining matter).
    if M >= 2048:
        tm = 512
    elif M >= 512:
        tm = 256
    else:
        tm = _round_up(M, 16)
    Mp = _round_up(M, tm)
    if Mp != M:
        a = jnp.pad(a, ((0, Mp - M), (0, 0)))

    out = pl.pallas_call(
        functools.partial(_gemm_bias_kernel, relu=relu),
        out_shape=jax.ShapeDtypeStruct((Mp, Cout), out_dtype),
        grid_spec=pltpu.PrefetchScalarGridSpec(
            num_scalar_prefetch=0,
            grid=(Mp // tm,),
            in_specs=[
                pl.BlockSpec((tm, K), lambda i: (i, 0)),
                pl.BlockSpec((K, Cout), lambda i: (0, 0)),
                pl.BlockSpec((1, Cout), lambda i: (0, 0)),
            ],
            out_specs=pl.BlockSpec((tm, Cout), lambda i: (i, 0)),
        ),
        compiler_params=pltpu.CompilerParams(
            dimension_semantics=("parallel",),
            vmem_limit_bytes=_VMEM_LIMIT),
    )(a, w2, bias2)
    if Mp != M:
        out = out[:M]
    return out


def _im2col_3d_cl(x, ksize, stride, pad):
    """x: [N, T, H, W, C] -> patches [N*To*Ho*Wo, kt*kh*kw*C], (To, Ho, Wo)."""
    N, T, H, W, C = x.shape
    kt, kh, kw = ksize
    st, sh, sw = stride
    pt, ph, pw = pad
    xp = jnp.pad(x, ((0, 0), (pt, pt), (ph, ph), (pw, pw), (0, 0)))
    To = (T + 2 * pt - kt) // st + 1
    Ho = (H + 2 * ph - kh) // sh + 1
    Wo = (W + 2 * pw - kw) // sw + 1
    cols = []
    for dt in range(kt):
        for dh in range(kh):
            for dw in range(kw):
                cols.append(xp[:,
                               dt:dt + To * st:st,
                               dh:dh + Ho * sh:sh,
                               dw:dw + Wo * sw:sw,
                               :])
    patches = jnp.stack(cols, axis=4).reshape(N * To * Ho * Wo, kt * kh * kw * C)
    return patches, (To, Ho, Wo)


def conv3d_im2col(x, w, b, *, stride, pad, relu=False):
    """Strided conv path: x [N,T,H,W,Cin] bf16, w [Cout,Cin,kt,kh,kw], b [Cout]."""
    N = x.shape[0]
    Cout, Cin, kt, kh, kw = w.shape
    patches, (To, Ho, Wo) = _im2col_3d_cl(x, (kt, kh, kw), stride, pad)
    w2 = w.transpose(2, 3, 4, 1, 0).reshape(kt * kh * kw * Cin, Cout)
    out = pallas_conv_gemm(patches, w2, b, relu=relu)
    return out.reshape(N, To, Ho, Wo, Cout)


# ----------------------------------------------------------------------------
# Fused global average pool (tiled over the pooled axis) + fc8
# ----------------------------------------------------------------------------

def _pool_fc_kernel(x_ref, w_ref, b_ref, o_ref, acc_ref, *, inv_s):
    @pl.when(pl.program_id(0) == 0)
    def _():
        acc_ref[...] = jnp.zeros_like(acc_ref)

    acc_ref[...] += jnp.sum(x_ref[...].astype(jnp.float32), axis=1)

    @pl.when(pl.program_id(0) == pl.num_programs(0) - 1)
    def _():
        mean = acc_ref[...] * inv_s
        o_ref[...] = (jnp.dot(mean, w_ref[...],
                              preferred_element_type=jnp.float32) + b_ref[...])


def pallas_pool_fc(h, w, b, *, ts_max=512):
    """h: [N, To, Ho, Wo, C] bf16 -> logits [N, O] f32 (avg-pool over T*H*W + fc8)."""
    N, To, Ho, Wo, C = h.shape
    S = To * Ho * Wo
    O = w.shape[1]
    x = h.reshape(N, S, C).astype(jnp.bfloat16)
    ts = min(ts_max, _round_up(S, 8))
    Sp = _round_up(S, ts)
    if Sp != S:
        x = jnp.pad(x, ((0, 0), (0, Sp - S), (0, 0)))   # zero rows don't change the sum
    wf = w.astype(jnp.float32)
    bf = b.reshape(1, O).astype(jnp.float32)
    return pl.pallas_call(
        functools.partial(_pool_fc_kernel, inv_s=1.0 / S),
        out_shape=jax.ShapeDtypeStruct((N, O), jnp.float32),
        grid_spec=pltpu.PrefetchScalarGridSpec(
            num_scalar_prefetch=0,
            grid=(Sp // ts,),
            in_specs=[
                pl.BlockSpec((N, ts, C), lambda s: (0, s, 0)),
                pl.BlockSpec((C, O), lambda s: (0, 0)),
                pl.BlockSpec((1, O), lambda s: (0, 0)),
            ],
            out_specs=pl.BlockSpec((N, O), lambda s: (0, 0)),
            scratch_shapes=[pltpu.VMEM((N, C), jnp.float32)],
        ),
        compiler_params=pltpu.CompilerParams(
            dimension_semantics=("arbitrary",),
            vmem_limit_bytes=_VMEM_LIMIT),
    )(x, wf, bf)


# ----------------------------------------------------------------------------
# C3D_tf forward (C3DRes18-style feature extractor + fc8)
# ----------------------------------------------------------------------------

def init_params(key):
    def w_init(k, shape):
        return jax.random.normal(k, shape, jnp.float32) * 0.05

    keys = jax.random.split(key, 16)
    p = {}
    # stem: 3 -> 16, k=3, stride (1,2,2)
    p["stem_w"] = w_init(keys[0], (16, 3, 3, 3, 3))
    p["stem_b"] = w_init(keys[1], (16,))
    # stage1 basic block (16 -> 16)
    p["b1_w1"] = w_init(keys[2], (16, 16, 3, 3, 3))
    p["b1_b1"] = w_init(keys[3], (16,))
    p["b1_w2"] = w_init(keys[4], (16, 16, 3, 3, 3))
    p["b1_b2"] = w_init(keys[5], (16,))
    # stage2 downsample block (16 -> 32, stride 2) with 1x1x1 projection skip
    p["b2_w1"] = w_init(keys[6], (32, 16, 3, 3, 3))
    p["b2_b1"] = w_init(keys[7], (32,))
    p["b2_w2"] = w_init(keys[8], (32, 32, 3, 3, 3))
    p["b2_b2"] = w_init(keys[9], (32,))
    p["b2_ws"] = w_init(keys[10], (32, 16, 1, 1, 1))
    p["b2_bs"] = w_init(keys[11], (32,))
    # stage2 basic block (32 -> 32)
    p["b3_w1"] = w_init(keys[12], (32, 32, 3, 3, 3))
    p["b3_b1"] = w_init(keys[13], (32,))
    p["b3_w2"] = w_init(keys[14], (32, 32, 3, 3, 3))
    p["b3_b2"] = w_init(keys[15], (32,))
    # fc8: Linear(feature_size=32 -> num_classes=10)
    k_fc = jax.random.split(keys[0], 3)
    p["fc8_w"] = w_init(k_fc[1], (32, 10))
    p["fc8_b"] = w_init(k_fc[2], (10,))
    return p


def c3d_tf_forward(params, x):
    """x: [N, 3, T, H, W] (NCDHW, like PyTorch Conv3d) -> logits [N, 10]."""
    # NCDHW -> NDHWC channel-last, bf16 activations.
    x = jnp.transpose(x, (0, 2, 3, 4, 1)).astype(jnp.bfloat16)

    # stem (spatial stride 2): im2col fallback (strided); Cin=3 so patches stay small.
    h = conv3d_im2col(x, params["stem_w"], params["stem_b"],
                      stride=(1, 2, 2), pad=(1, 1, 1), relu=True)
    # stage1 basic block: fused convs, residual add + ReLU in the GEMM epilogue.
    y = conv3d_fused(h, params["b1_w1"], params["b1_b1"], relu=True)
    h = conv3d_fused(y, params["b1_w2"], params["b1_b2"], skip=h)
    # stage2 downsample block (stride-2 convs on the im2col fallback).
    y = conv3d_im2col(h, params["b2_w1"], params["b2_b1"],
                      stride=(2, 2, 2), pad=(1, 1, 1), relu=True)
    skip = conv3d_im2col(h, params["b2_ws"], params["b2_bs"],
                         stride=(2, 2, 2), pad=(0, 0, 0), relu=False)
    h = conv3d_fused(y, params["b2_w2"], params["b2_b2"], skip=skip)
    # stage2 basic block.
    y = conv3d_fused(h, params["b3_w1"], params["b3_b1"], relu=True)
    h = conv3d_fused(y, params["b3_w2"], params["b3_b2"], skip=h)
    # fused global average pool over (T, H, W) + fc8 linear layer.
    return pallas_pool_fc(h, params["fc8_w"], params["fc8_b"])


if __name__ == "__main__":
    key = jax.random.PRNGKey(0)
    k_param, k_x = jax.random.split(key)
    params = init_params(k_param)

    # Small video clip: batch=2, RGB channels=3, num_segments(T)=8, spatial 16x16.
    x = jax.random.normal(k_x, (2, 3, 8, 16, 16), jnp.float32)

    out = jax.jit(c3d_tf_forward)(params, x)
    out = jax.block_until_ready(out)
    assert out.shape == (2, 10)
    assert jnp.all(jnp.isfinite(out))
    print("KERNEL_OK")
</pallas_src>

<mosaic_0001>
module attributes {stable_mosaic.version = 11 : i64} {
  func.func @_gemm_bias_kernel(%arg0: i32, %arg1: memref<256x81xbf16, #tpu.memory_space<vmem>>, %arg2: memref<81x16xbf16, #tpu.memory_space<vmem>>, %arg3: memref<1x16xf32, #tpu.memory_space<vmem>>, %arg4: memref<256x16xbf16, #tpu.memory_space<vmem>>) attributes {dimension_semantics = [#tpu.dimension_semantics<parallel>], iteration_bounds = array<i64: 4>, scalar_prefetch = 0 : i64, scratch_operands = 0 : i64, tpu.core_type = #tpu.core_type<tc>, window_params = [{transform_indices = @transform_0, window_bounds = array<i64: 256, 81>}, {pipeline_mode = #tpu.pipeline_mode<synchronous>, transform_indices = @transform_1, window_bounds = array<i64: 81, 16>}, {pipeline_mode = #tpu.pipeline_mode<synchronous>, transform_indices = @transform_2, window_bounds = array<i64: 1, 16>}, {transform_indices = @transform_3, window_bounds = array<i64: 256, 16>}]} {
    %c0 = arith.constant 0 : index
    %c0_0 = arith.constant 0 : index
    %0 = vector.load %arg1[%c0, %c0_0] : memref<256x81xbf16, #tpu.memory_space<vmem>>, vector<256x81xbf16>
    %c0_1 = arith.constant 0 : index
    %c0_2 = arith.constant 0 : index
    %1 = vector.load %arg2[%c0_1, %c0_2] : memref<81x16xbf16, #tpu.memory_space<vmem>>, vector<81x16xbf16>
    %cst = arith.constant dense<0.000000e+00> : vector<256x16xf32>
    %2 = tpu.matmul %0, %1, %cst {dimension_numbers = #tpu.dot_dimension_numbers<[1], [0], [0], [1], [0, 0, 1, 1], [], []>} : vector<256x81xbf16>, vector<81x16xbf16>, vector<256x16xf32> -> vector<256x16xf32>
    %c0_3 = arith.constant 0 : index
    %c0_4 = arith.constant 0 : index
    %3 = vector.load %arg3[%c0_3, %c0_4] : memref<1x16xf32, #tpu.memory_space<vmem>>, vector<1x16xf32>
    %4 = vector.broadcast %3 : vector<1x16xf32> to vector<256x16xf32>
    %5 = arith.addf %2, %4 : vector<256x16xf32>
    %cst_5 = arith.constant 0.000000e+00 : f32
    %6 = vector.broadcast %cst_5 : f32 to vector<256x16xf32>
    %7 = arith.maximumf %5, %6 : vector<256x16xf32>
    %8 = arith.truncf %7 : vector<256x16xf32> to vector<256x16xbf16>
    %c0_6 = arith.constant 0 : index
    %c0_7 = arith.constant 0 : index
    %9 = vector.load %arg4[%c0_6, %c0_7] : memref<256x16xbf16, #tpu.memory_space<vmem>>, vector<256x16xbf16>
    tpu.vector_store %arg4[%c0_6, %c0_7], %8 {strides = array<i32>} : memref<256x16xbf16, #tpu.memory_space<vmem>>, vector<256x16xbf16>,
    return
  }
  func.func @transform_0(%arg0: i32) -> (i32, i32) {
    %c0_i32 = arith.constant 0 : i32
    %c0_i32_0 = arith.constant 0 : i32
    return %arg0, %c0_i32 : i32, i32
  }
  func.func @transform_1(%arg0: i32) -> (i32, i32) {
    %c0_i32 = arith.constant 0 : i32
    %c0_i32_0 = arith.constant 0 : i32
    %c0_i32_1 = arith.constant 0 : i32
    return %c0_i32, %c0_i32_0 : i32, i32
  }
  func.func @transform_2(%arg0: i32) -> (i32, i32) {
    %c0_i32 = arith.constant 0 : i32
    %c0_i32_0 = arith.constant 0 : i32
    %c0_i32_1 = arith.constant 0 : i32
    return %c0_i32, %c0_i32_0 : i32, i32
  }
  func.func @transform_3(%arg0: i32) -> (i32, i32) {
    %c0_i32 = arith.constant 0 : i32
    %c0_i32_0 = arith.constant 0 : i32
    return %arg0, %c0_i32 : i32, i32
  }
}

module attributes {stable_mosaic.version = 11 : i64} {
  func.func @_fused_conv_kernel(%arg0: i32, %arg1: memref<1x10x10x160xbf16, #tpu.memory_space<vmem>>, %arg2: memref<9x160x128xbf16, #tpu.memory_space<vmem>>, %arg3: memref<1x128xf32, #tpu.memory_space<vmem>>, %arg4: memref<1x64x128xbf16, #tpu.memory_space<vmem>>) attributes {dimension_semantics = [#tpu.dimension_semantics<parallel>], iteration_bounds = array<i64: 2>, scalar_prefetch = 0 : i64, scratch_operands = 0 : i64, tpu.core_type = #tpu.core_type<tc>, window_params = [{transform_indices = @transform_0, window_bounds = array<i64: 1, 10, 10, 160>}, {pipeline_mode = #tpu.pipeline_mode<synchronous>, transform_indices = @transform_1, window_bounds = array<i64: 9, 160, 128>}, {pipeline_mode = #tpu.pipeline_mode<synchronous>, transform_indices = @transform_2, window_bounds = array<i64: 1, 128>}, {transform_indices = @transform_3, window_bounds = array<i64: 1, 64, 128>}]} {
    %c0 = arith.constant 0 : index
    %c0_0 = arith.constant 0 : index
    %c0_1 = arith.constant 0 : index
    %c0_2 = arith.constant 0 : index
    %0 = vector.load %arg1[%c0, %c0_0, %c0_1, %c0_2] : memref<1x10x10x160xbf16, #tpu.memory_space<vmem>>, vector<1x10x10x160xbf16>
    %1 = vector.shape_cast %0 : vector<1x10x10x160xbf16> to vector<10x10x160xbf16>
    %2 = arith.extf %1 : vector<10x10x160xbf16> to vector<10x10x160xf32>
    %cst = arith.constant 0.000000e+00 : f32
    %3 = vector.broadcast %cst : f32 to vector<64x128xf32>
    %4 = vector.extract_strided_slice %2 {offsets = [0, 0, 0], sizes = [8, 8, 160], strides = [1, 1, 1]} : vector<10x10x160xf32> to vector<8x8x160xf32>
    %5 = vector.shape_cast %4 : vector<8x8x160xf32> to vector<64x160xf32>
    %6 = arith.truncf %5 : vector<64x160xf32> to vector<64x160xbf16>
    %c0_3 = arith.constant 0 : index
    %c0_4 = arith.constant 0 : index
    %c0_5 = arith.constant 0 : index
    %7 = vector.load %arg2[%c0_3, %c0_4, %c0_5] : memref<9x160x128xbf16, #tpu.memory_space<vmem>>, vector<1x160x128xbf16>
    %8 = vector.shape_cast %7 : vector<1x160x128xbf16> to vector<160x128xbf16>
    %cst_6 = arith.constant dense<0.000000e+00> : vector<64x128xf32>
    %9 = tpu.matmul %6, %8, %cst_6 {dimension_numbers = #tpu.dot_dimension_numbers<[1], [0], [0], [1], [0, 0, 1, 1], [], []>} : vector<64x160xbf16>, vector<160x128xbf16>, vector<64x128xf32> -> vector<64x128xf32>
    %10 = arith.addf %3, %9 : vector<64x128xf32>
    %11 = vector.extract_strided_slice %2 {offsets = [0, 1, 0], sizes = [8, 8, 160], strides = [1, 1, 1]} : vector<10x10x160xf32> to vector<8x8x160xf32>
    %12 = vector.shape_cast %11 : vector<8x8x160xf32> to vector<64x160xf32>
    %13 = arith.truncf %12 : vector<64x160xf32> to vector<64x160xbf16>
    %c1 = arith.constant 1 : index
    %c0_7 = arith.constant 0 : index
    %c0_8 = arith.constant 0 : index
    %14 = vector.load %arg2[%c1, %c0_7, %c0_8] : memref<9x160x128xbf16, #tpu.memory_space<vmem>>, vector<1x160x128xbf16>
    %15 = vector.shape_cast %14 : vector<1x160x128xbf16> to vector<160x128xbf16>
    %cst_9 = arith.constant dense<0.000000e+00> : vector<64x128xf32>
    %16 = tpu.matmul %13, %15, %cst_9 {dimension_numbers = #tpu.dot_dimension_numbers<[1], [0], [0], [1], [0, 0, 1, 1], [], []>} : vector<64x160xbf16>, vector<160x128xbf16>, vector<64x128xf32> -> vector<64x128xf32>
    %17 = arith.addf %10, %16 : vector<64x128xf32>
    %18 = vector.extract_strided_slice %2 {offsets = [0, 2, 0], sizes = [8, 8, 160], strides = [1, 1, 1]} : vector<10x10x160xf32> to vector<8x8x160xf32>
    %19 = vector.shape_cast %18 : vector<8x8x160xf32> to vector<64x160xf32>
    %20 = arith.truncf %19 : vector<64x160xf32> to vector<64x160xbf16>
    %c2 = arith.constant 2 : index
    %c0_10 = arith.constant 0 : index
    %c0_11 = arith.constant 0 : index
    %21 = vector.load %arg2[%c2, %c0_10, %c0_11] : memref<9x160x128xbf16, #tpu.memory_space<vmem>>, vector<1x160x128xbf16>
    %22 = vector.shape_cast %21 : vector<1x160x128xbf16> to vector<160x128xbf16>
    %cst_12 = arith.constant dense<0.000000e+00> : vector<64x128xf32>
    %23 = tpu.matmul %20, %22, %cst_12 {dimension_numbers = #tpu.dot_dimension_numbers<[1], [0], [0], [1], [0, 0, 1, 1], [], []>} : vector<64x160xbf16>, vector<160x128xbf16>, vector<64x128xf32> -> vector<64x128xf32>
    %24 = arith.addf %17, %23 : vector<64x128xf32>
    %25 = vector.extract_strided_slice %2 {offsets = [1, 0, 0], sizes = [8, 8, 160], strides = [1, 1, 1]} : vector<10x10x160xf32> to vector<8x8x160xf32>
    %26 = vector.shape_cast %25 : vector<8x8x160xf32> to vector<64x160xf32>
    %27 = arith.truncf %26 : vector<64x160xf32> to vector<64x160xbf16>
    %c3 = arith.constant 3 : index
    %c0_13 = arith.constant 0 : index
    %c0_14 = arith.constant 0 : index
    %28 = vector.load %arg2[%c3, %c0_13, %c0_14] : memref<9x160x128xbf16, #tpu.memory_space<vmem>>, vector<1x160x128xbf16>
    %29 = vector.shape_cast %28 : vector<1x160x128xbf16> to vector<160x128xbf16>
    %cst_15 = arith.constant dense<0.000000e+00> : vector<64x128xf32>
    %30 = tpu.matmul %27, %29, %cst_15 {dimension_numbers = #tpu.dot_dimension_numbers<[1], [0], [0], [1], [0, 0, 1, 1], [], []>} : vector<64x160xbf16>, vector<160x128xbf16>, vector<64x128xf32> -> vector<64x128xf32>
    %31 = arith.addf %24, %30 : vector<64x128xf32>
    %32 = vector.extract_strided_slice %2 {offsets = [1, 1, 0], sizes = [8, 8, 160], strides = [1, 1, 1]} : vector<10x10x160xf32> to vector<8x8x160xf32>
    %33 = vector.shape_cast %32 : vector<8x8x160xf32> to vector<64x160xf32>
    %34 = arith.truncf %33 : vector<64x160xf32> to vector<64x160xbf16>
    %c4 = arith.constant 4 : index
    %c0_16 = arith.constant 0 : index
    %c0_17 = arith.constant 0 : index
    %35 = vector.load %arg2[%c4, %c0_16, %c0_17] : memref<9x160x128xbf16, #tpu.memory_space<vmem>>, vector<1x160x128xbf16>
    %36 = vector.shape_cast %35 : vector<1x160x128xbf16> to vector<160x128xbf16>
    %cst_18 = arith.constant dense<0.000000e+00> : vector<64x128xf32>
    %37 = tpu.matmul %34, %36, %cst_18 {dimension_numbers = #tpu.dot_dimension_numbers<[1], [0], [0], [1], [0, 0, 1, 1], [], []>} : vector<64x160xbf16>, vector<160x128xbf16>, vector<64x128xf32> -> vector<64x128xf32>
    %38 = arith.addf %31, %37 : vector<64x128xf32>
    %39 = vector.extract_strided_slice %2 {offsets = [1, 2, 0], sizes = [8, 8, 160], strides = [1, 1, 1]} : vector<10x10x160xf32> to vector<8x8x160xf32>
    %40 = vector.shape_cast %39 : vector<8x8x160xf32> to vector<64x160xf32>
    %41 = arith.truncf %40 : vector<64x160xf32> to vector<64x160xbf16>
    %c5 = arith.constant 5 : index
    %c0_19 = arith.constant 0 : index
    %c0_20 = arith.constant 0 : index
    %42 = vector.load %arg2[%c5, %c0_19, %c0_20] : memref<9x160x128xbf16, #tpu.memory_space<vmem>>, vector<1x160x128xbf16>
    %43 = vector.shape_cast %42 : vector<1x160x128xbf16> to vector<160x128xbf16>
    %cst_21 = arith.constant dense<0.000000e+00> : vector<64x128xf32>
    %44 = tpu.matmul %41, %43, %cst_21 {dimension_numbers = #tpu.dot_dimension_numbers<[1], [0], [0], [1], [0, 0, 1, 1], [], []>} : vector<64x160xbf16>, vector<160x128xbf16>, vector<64x128xf32> -> vector<64x128xf32>
    %45 = arith.addf %38, %44 : vector<64x128xf32>
    %46 = vector.extract_strided_slice %2 {offsets = [2, 0, 0], sizes = [8, 8, 160], strides = [1, 1, 1]} : vector<10x10x160xf32> to vector<8x8x160xf32>
    %47 = vector.shape_cast %46 : vector<8x8x160xf32> to vector<64x160xf32>
    %48 = arith.truncf %47 : vector<64x160xf32> to vector<64x160xbf16>
    %c6 = arith.constant 6 : index
    %c0_22 = arith.constant 0 : index
    %c0_23 = arith.constant 0 : index
    %49 = vector.load %arg2[%c6, %c0_22, %c0_23] : memref<9x160x128xbf16, #tpu.memory_space<vmem>>, vector<1x160x128xbf16>
    %50 = vector.shape_cast %49 : vector<1x160x128xbf16> to vector<160x128xbf16>
    %cst_24 = arith.constant dense<0.000000e+00> : vector<64x128xf32>
    %51 = tpu.matmul %48, %50, %cst_24 {dimension_numbers = #tpu.dot_dimension_numbers<[1], [0], [0], [1], [0, 0, 1, 1], [], []>} : vector<64x160xbf16>, vector<160x128xbf16>, vector<64x128xf32> -> vector<64x128xf32>
    %52 = arith.addf %45, %51 : vector<64x128xf32>
    %53 = vector.extract_strided_slice %2 {offsets = [2, 1, 0], sizes = [8, 8, 160], strides = [1, 1, 1]} : vector<10x10x160xf32> to vector<8x8x160xf32>
    %54 = vector.shape_cast %53 : vector<8x8x160xf32> to vector<64x160xf32>
    %55 = arith.truncf %54 : vector<64x160xf32> to vector<64x160xbf16>
    %c7 = arith.constant 7 : index
    %c0_25 = arith.constant 0 : index
    %c0_26 = arith.constant 0 : index
    %56 = vector.load %arg2[%c7, %c0_25, %c0_26] : memref<9x160x128xbf16, #tpu.memory_space<vmem>>, vector<1x160x128xbf16>
    %57 = vector.shape_cast %56 : vector<1x160x128xbf16> to vector<160x128xbf16>
    %cst_27 = arith.constant dense<0.000000e+00> : vector<64x128xf32>
    %58 = tpu.matmul %55, %57, %cst_27 {dimension_numbers = #tpu.dot_dimension_numbers<[1], [0], [0], [1], [0, 0, 1, 1], [], []>} : vector<64x160xbf16>, vector<160x128xbf16>, vector<64x128xf32> -> vector<64x128xf32>
    %59 = arith.addf %52, %58 : vector<64x128xf32>
    %60 = vector.extract_strided_slice %2 {offsets = [2, 2, 0], sizes = [8, 8, 160], strides = [1, 1, 1]} : vector<10x10x160xf32> to vector<8x8x160xf32>
    %61 = vector.shape_cast %60 : vector<8x8x160xf32> to vector<64x160xf32>
    %62 = arith.truncf %61 : vector<64x160xf32> to vector<64x160xbf16>
    %c8 = arith.constant 8 : index
    %c0_28 = arith.constant 0 : index
    %c0_29 = arith.constant 0 : index
    %63 = vector.load %arg2[%c8, %c0_28, %c0_29] : memref<9x160x128xbf16, #tpu.memory_space<vmem>>, vector<1x160x128xbf16>
    %64 = vector.shape_cast %63 : vector<1x160x128xbf16> to vector<160x128xbf16>
    %cst_30 = arith.constant dense<0.000000e+00> : vector<64x128xf32>
    %65 = tpu.matmul %62, %64, %cst_30 {dimension_numbers = #tpu.dot_dimension_numbers<[1], [0], [0], [1], [0, 0, 1, 1], [], []>} : vector<64x160xbf16>, vector<160x128xbf16>, vector<64x128xf32> -> vector<64x128xf32>
    %66 = arith.addf %59, %65 : vector<64x128xf32>
    %c0_31 = arith.constant 0 : index
    %c0_32 = arith.constant 0 : index
    %67 = vector.load %arg3[%c0_31, %c0_32] : memref<1x128xf32, #tpu.memory_space<vmem>>, vector<1x128xf32>
    %68 = vector.broadcast %67 : vector<1x128xf32> to vector<64x128xf32>
    %69 = arith.addf %66, %68 : vector<64x128xf32>
    %cst_33 = arith.constant 0.000000e+00 : f32
    %70 = vector.broadcast %cst_33 : f32 to vector<64x128xf32>
    %71 = arith.maximumf %69, %70 : vector<64x128xf32>
    %72 = arith.truncf %71 : vector<64x128xf32> to vector<64x128xbf16>
    %c0_34 = arith.constant 0 : index
    %c0_35 = arith.constant 0 : index
    %c0_36 = arith.constant 0 : index
    %73 = vector.load %arg4[%c0_34, %c0_35, %c0_36] : memref<1x64x128xbf16, #tpu.memory_space<vmem>>, vector<1x64x128xbf16>
    %74 = vector.shape_cast %73 : vector<1x64x128xbf16> to vector<64x128xbf16>
    %75 = vector.shape_cast %72 : vector<64x128xbf16> to vector<1x64x128xbf16>
    tpu.vector_store %arg4[%c0_34, %c0_35, %c0_36], %75 {strides = array<i32>} : memref<1x64x128xbf16, #tpu.memory_space<vmem>>, vector<1x64x128xbf16>,
    return
  }
  func.func @transform_0(%arg0: i32) -> (i32, i32, i32, i32) {
    %c0_i32 = arith.constant 0 : i32
    %c0_i32_0 = arith.constant 0 : i32
    %c0_i32_1 = arith.constant 0 : i32
    %c0_i32_2 = arith.constant 0 : i32
    return %arg0, %c0_i32, %c0_i32_0, %c0_i32_1 : i32, i32, i32, i32
  }
  func.func @transform_1(%arg0: i32) -> (i32, i32, i32) {
    %c0_i32 = arith.constant 0 : i32
    %c0_i32_0 = arith.constant 0 : i32
    %c0_i32_1 = arith.constant 0 : i32
    %c0_i32_2 = arith.constant 0 : i32
    return %c0_i32, %c0_i32_0, %c0_i32_1 : i32, i32, i32
  }
  func.func @transform_2(%arg0: i32) -> (i32, i32) {
    %c0_i32 = arith.constant 0 : i32
    %c0_i32_0 = arith.constant 0 : i32
    %c0_i32_1 = arith.constant 0 : i32
    return %c0_i32, %c0_i32_0 : i32, i32
  }
  func.func @transform_3(%arg0: i32) -> (i32, i32, i32) {
    %c0_i32 = arith.constant 0 : i32
    %c0_i32_0 = arith.constant 0 : i32
    %c0_i32_1 = arith.constant 0 : i32
    return %arg0, %c0_i32, %c0_i32_0 : i32, i32, i32
  }
}

module attributes {stable_mosaic.version = 11 : i64} {
  func.func @_fused_conv_kernel(%arg0: i32, %arg1: memref<1x10x10x160xbf16, #tpu.memory_space<vmem>>, %arg2: memref<9x160x128xbf16, #tpu.memory_space<vmem>>, %arg3: memref<1x128xf32, #tpu.memory_space<vmem>>, %arg4: memref<1x64x128xbf16, #tpu.memory_space<vmem>>, %arg5: memref<1x64x128xbf16, #tpu.memory_space<vmem>>) attributes {dimension_semantics = [#tpu.dimension_semantics<parallel>], iteration_bounds = array<i64: 2>, scalar_prefetch = 0 : i64, scratch_operands = 0 : i64, tpu.core_type = #tpu.core_type<tc>, window_params = [{transform_indices = @transform_0, window_bounds = array<i64: 1, 10, 10, 160>}, {pipeline_mode = #tpu.pipeline_mode<synchronous>, transform_indices = @transform_1, window_bounds = array<i64: 9, 160, 128>}, {pipeline_mode = #tpu.pipeline_mode<synchronous>, transform_indices = @transform_2, window_bounds = array<i64: 1, 128>}, {transform_indices = @transform_3, window_bounds = array<i64: 1, 64, 128>}, {transform_indices = @transform_4, window_bounds = array<i64: 1, 64, 128>}]} {
    %c0 = arith.constant 0 : index
    %c0_0 = arith.constant 0 : index
    %c0_1 = arith.constant 0 : index
    %c0_2 = arith.constant 0 : index
    %0 = vector.load %arg1[%c0, %c0_0, %c0_1, %c0_2] : memref<1x10x10x160xbf16, #tpu.memory_space<vmem>>, vector<1x10x10x160xbf16>
    %1 = vector.shape_cast %0 : vector<1x10x10x160xbf16> to vector<10x10x160xbf16>
    %2 = arith.extf %1 : vector<10x10x160xbf16> to vector<10x10x160xf32>
    %cst = arith.constant 0.000000e+00 : f32
    %3 = vector.broadcast %cst : f32 to vector<64x128xf32>
    %4 = vector.extract_strided_slice %2 {offsets = [0, 0, 0], sizes = [8, 8, 160], strides = [1, 1, 1]} : vector<10x10x160xf32> to vector<8x8x160xf32>
    %5 = vector.shape_cast %4 : vector<8x8x160xf32> to vector<64x160xf32>
    %6 = arith.truncf %5 : vector<64x160xf32> to vector<64x160xbf16>
    %c0_3 = arith.constant 0 : index
    %c0_4 = arith.constant 0 : index
    %c0_5 = arith.constant 0 : index
    %7 = vector.load %arg2[%c0_3, %c0_4, %c0_5] : memref<9x160x128xbf16, #tpu.memory_space<vmem>>, vector<1x160x128xbf16>
    %8 = vector.shape_cast %7 : vector<1x160x128xbf16> to vector<160x128xbf16>
    %cst_6 = arith.constant dense<0.000000e+00> : vector<64x128xf32>
    %9 = tpu.matmul %6, %8, %cst_6 {dimension_numbers = #tpu.dot_dimension_numbers<[1], [0], [0], [1], [0, 0, 1, 1], [], []>} : vector<64x160xbf16>, vector<160x128xbf16>, vector<64x128xf32> -> vector<64x128xf32>
    %10 = arith.addf %3, %9 : vector<64x128xf32>
    %11 = vector.extract_strided_slice %2 {offsets = [0, 1, 0], sizes = [8, 8, 160], strides = [1, 1, 1]} : vector<10x10x160xf32> to vector<8x8x160xf32>
    %12 = vector.shape_cast %11 : vector<8x8x160xf32> to vector<64x160xf32>
    %13 = arith.truncf %12 : vector<64x160xf32> to vector<64x160xbf16>
    %c1 = arith.constant 1 : index
    %c0_7 = arith.constant 0 : index
    %c0_8 = arith.constant 0 : index
    %14 = vector.load %arg2[%c1, %c0_7, %c0_8] : memref<9x160x128xbf16, #tpu.memory_space<vmem>>, vector<1x160x128xbf16>
    %15 = vector.shape_cast %14 : vector<1x160x128xbf16> to vector<160x128xbf16>
    %cst_9 = arith.constant dense<0.000000e+00> : vector<64x128xf32>
    %16 = tpu.matmul %13, %15, %cst_9 {dimension_numbers = #tpu.dot_dimension_numbers<[1], [0], [0], [1], [0, 0, 1, 1], [], []>} : vector<64x160xbf16>, vector<160x128xbf16>, vector<64x128xf32> -> vector<64x128xf32>
    %17 = arith.addf %10, %16 : vector<64x128xf32>
    %18 = vector.extract_strided_slice %2 {offsets = [0, 2, 0], sizes = [8, 8, 160], strides = [1, 1, 1]} : vector<10x10x160xf32> to vector<8x8x160xf32>
    %19 = vector.shape_cast %18 : vector<8x8x160xf32> to vector<64x160xf32>
    %20 = arith.truncf %19 : vector<64x160xf32> to vector<64x160xbf16>
    %c2 = arith.constant 2 : index
    %c0_10 = arith.constant 0 : index
    %c0_11 = arith.constant 0 : index
    %21 = vector.load %arg2[%c2, %c0_10, %c0_11] : memref<9x160x128xbf16, #tpu.memory_space<vmem>>, vector<1x160x128xbf16>
    %22 = vector.shape_cast %21 : vector<1x160x128xbf16> to vector<160x128xbf16>
    %cst_12 = arith.constant dense<0.000000e+00> : vector<64x128xf32>
    %23 = tpu.matmul %20, %22, %cst_12 {dimension_numbers = #tpu.dot_dimension_numbers<[1], [0], [0], [1], [0, 0, 1, 1], [], []>} : vector<64x160xbf16>, vector<160x128xbf16>, vector<64x128xf32> -> vector<64x128xf32>
    %24 = arith.addf %17, %23 : vector<64x128xf32>
    %25 = vector.extract_strided_slice %2 {offsets = [1, 0, 0], sizes = [8, 8, 160], strides = [1, 1, 1]} : vector<10x10x160xf32> to vector<8x8x160xf32>
    %26 = vector.shape_cast %25 : vector<8x8x160xf32> to vector<64x160xf32>
    %27 = arith.truncf %26 : vector<64x160xf32> to vector<64x160xbf16>
    %c3 = arith.constant 3 : index
    %c0_13 = arith.constant 0 : index
    %c0_14 = arith.constant 0 : index
    %28 = vector.load %arg2[%c3, %c0_13, %c0_14] : memref<9x160x128xbf16, #tpu.memory_space<vmem>>, vector<1x160x128xbf16>
    %29 = vector.shape_cast %28 : vector<1x160x128xbf16> to vector<160x128xbf16>
    %cst_15 = arith.constant dense<0.000000e+00> : vector<64x128xf32>
    %30 = tpu.matmul %27, %29, %cst_15 {dimension_numbers = #tpu.dot_dimension_numbers<[1], [0], [0], [1], [0, 0, 1, 1], [], []>} : vector<64x160xbf16>, vector<160x128xbf16>, vector<64x128xf32> -> vector<64x128xf32>
    %31 = arith.addf %24, %30 : vector<64x128xf32>
    %32 = vector.extract_strided_slice %2 {offsets = [1, 1, 0], sizes = [8, 8, 160], strides = [1, 1, 1]} : vector<10x10x160xf32> to vector<8x8x160xf32>
    %33 = vector.shape_cast %32 : vector<8x8x160xf32> to vector<64x160xf32>
    %34 = arith.truncf %33 : vector<64x160xf32> to vector<64x160xbf16>
    %c4 = arith.constant 4 : index
    %c0_16 = arith.constant 0 : index
    %c0_17 = arith.constant 0 : index
    %35 = vector.load %arg2[%c4, %c0_16, %c0_17] : memref<9x160x128xbf16, #tpu.memory_space<vmem>>, vector<1x160x128xbf16>
    %36 = vector.shape_cast %35 : vector<1x160x128xbf16> to vector<160x128xbf16>
    %cst_18 = arith.constant dense<0.000000e+00> : vector<64x128xf32>
    %37 = tpu.matmul %34, %36, %cst_18 {dimension_numbers = #tpu.dot_dimension_numbers<[1], [0], [0], [1], [0, 0, 1, 1], [], []>} : vector<64x160xbf16>, vector<160x128xbf16>, vector<64x128xf32> -> vector<64x128xf32>
    %38 = arith.addf %31, %37 : vector<64x128xf32>
    %39 = vector.extract_strided_slice %2 {offsets = [1, 2, 0], sizes = [8, 8, 160], strides = [1, 1, 1]} : vector<10x10x160xf32> to vector<8x8x160xf32>
    %40 = vector.shape_cast %39 : vector<8x8x160xf32> to vector<64x160xf32>
    %41 = arith.truncf %40 : vector<64x160xf32> to vector<64x160xbf16>
    %c5 = arith.constant 5 : index
    %c0_19 = arith.constant 0 : index
    %c0_20 = arith.constant 0 : index
    %42 = vector.load %arg2[%c5, %c0_19, %c0_20] : memref<9x160x128xbf16, #tpu.memory_space<vmem>>, vector<1x160x128xbf16>
    %43 = vector.shape_cast %42 : vector<1x160x128xbf16> to vector<160x128xbf16>
    %cst_21 = arith.constant dense<0.000000e+00> : vector<64x128xf32>
    %44 = tpu.matmul %41, %43, %cst_21 {dimension_numbers = #tpu.dot_dimension_numbers<[1], [0], [0], [1], [0, 0, 1, 1], [], []>} : vector<64x160xbf16>, vector<160x128xbf16>, vector<64x128xf32> -> vector<64x128xf32>
    %45 = arith.addf %38, %44 : vector<64x128xf32>
    %46 = vector.extract_strided_slice %2 {offsets = [2, 0, 0], sizes = [8, 8, 160], strides = [1, 1, 1]} : vector<10x10x160xf32> to vector<8x8x160xf32>
    %47 = vector.shape_cast %46 : vector<8x8x160xf32> to vector<64x160xf32>
    %48 = arith.truncf %47 : vector<64x160xf32> to vector<64x160xbf16>
    %c6 = arith.constant 6 : index
    %c0_22 = arith.constant 0 : index
    %c0_23 = arith.constant 0 : index
    %49 = vector.load %arg2[%c6, %c0_22, %c0_23] : memref<9x160x128xbf16, #tpu.memory_space<vmem>>, vector<1x160x128xbf16>
    %50 = vector.shape_cast %49 : vector<1x160x128xbf16> to vector<160x128xbf16>
    %cst_24 = arith.constant dense<0.000000e+00> : vector<64x128xf32>
    %51 = tpu.matmul %48, %50, %cst_24 {dimension_numbers = #tpu.dot_dimension_numbers<[1], [0], [0], [1], [0, 0, 1, 1], [], []>} : vector<64x160xbf16>, vector<160x128xbf16>, vector<64x128xf32> -> vector<64x128xf32>
    %52 = arith.addf %45, %51 : vector<64x128xf32>
    %53 = vector.extract_strided_slice %2 {offsets = [2, 1, 0], sizes = [8, 8, 160], strides = [1, 1, 1]} : vector<10x10x160xf32> to vector<8x8x160xf32>
    %54 = vector.shape_cast %53 : vector<8x8x160xf32> to vector<64x160xf32>
    %55 = arith.truncf %54 : vector<64x160xf32> to vector<64x160xbf16>
    %c7 = arith.constant 7 : index
    %c0_25 = arith.constant 0 : index
    %c0_26 = arith.constant 0 : index
    %56 = vector.load %arg2[%c7, %c0_25, %c0_26] : memref<9x160x128xbf16, #tpu.memory_space<vmem>>, vector<1x160x128xbf16>
    %57 = vector.shape_cast %56 : vector<1x160x128xbf16> to vector<160x128xbf16>
    %cst_27 = arith.constant dense<0.000000e+00> : vector<64x128xf32>
    %58 = tpu.matmul %55, %57, %cst_27 {dimension_numbers = #tpu.dot_dimension_numbers<[1], [0], [0], [1], [0, 0, 1, 1], [], []>} : vector<64x160xbf16>, vector<160x128xbf16>, vector<64x128xf32> -> vector<64x128xf32>
    %59 = arith.addf %52, %58 : vector<64x128xf32>
    %60 = vector.extract_strided_slice %2 {offsets = [2, 2, 0], sizes = [8, 8, 160], strides = [1, 1, 1]} : vector<10x10x160xf32> to vector<8x8x160xf32>
    %61 = vector.shape_cast %60 : vector<8x8x160xf32> to vector<64x160xf32>
    %62 = arith.truncf %61 : vector<64x160xf32> to vector<64x160xbf16>
    %c8 = arith.constant 8 : index
    %c0_28 = arith.constant 0 : index
    %c0_29 = arith.constant 0 : index
    %63 = vector.load %arg2[%c8, %c0_28, %c0_29] : memref<9x160x128xbf16, #tpu.memory_space<vmem>>, vector<1x160x128xbf16>
    %64 = vector.shape_cast %63 : vector<1x160x128xbf16> to vector<160x128xbf16>
    %cst_30 = arith.constant dense<0.000000e+00> : vector<64x128xf32>
    %65 = tpu.matmul %62, %64, %cst_30 {dimension_numbers = #tpu.dot_dimension_numbers<[1], [0], [0], [1], [0, 0, 1, 1], [], []>} : vector<64x160xbf16>, vector<160x128xbf16>, vector<64x128xf32> -> vector<64x128xf32>
    %66 = arith.addf %59, %65 : vector<64x128xf32>
    %c0_31 = arith.constant 0 : index
    %c0_32 = arith.constant 0 : index
    %67 = vector.load %arg3[%c0_31, %c0_32] : memref<1x128xf32, #tpu.memory_space<vmem>>, vector<1x128xf32>
    %68 = vector.broadcast %67 : vector<1x128xf32> to vector<64x128xf32>
    %69 = arith.addf %66, %68 : vector<64x128xf32>
    %c0_33 = arith.constant 0 : index
    %c0_34 = arith.constant 0 : index
    %c0_35 = arith.constant 0 : index
    %70 = vector.load %arg4[%c0_33, %c0_34, %c0_35] : memref<1x64x128xbf16, #tpu.memory_space<vmem>>, vector<1x64x128xbf16>
    %71 = vector.shape_cast %70 : vector<1x64x128xbf16> to vector<64x128xbf16>
    %72 = arith.extf %71 : vector<64x128xbf16> to vector<64x128xf32>
    %73 = arith.addf %69, %72 : vector<64x128xf32>
    %cst_36 = arith.constant 0.000000e+00 : f32
    %74 = vector.broadcast %cst_36 : f32 to vector<64x128xf32>
    %75 = arith.maximumf %73, %74 : vector<64x128xf32>
    %76 = arith.truncf %75 : vector<64x128xf32> to vector<64x128xbf16>
    %c0_37 = arith.constant 0 : index
    %c0_38 = arith.constant 0 : index
    %c0_39 = arith.constant 0 : index
    %77 = vector.load %arg5[%c0_37, %c0_38, %c0_39] : memref<1x64x128xbf16, #tpu.memory_space<vmem>>, vector<1x64x128xbf16>
    %78 = vector.shape_cast %77 : vector<1x64x128xbf16> to vector<64x128xbf16>
    %79 = vector.shape_cast %76 : vector<64x128xbf16> to vector<1x64x128xbf16>
    tpu.vector_store %arg5[%c0_37, %c0_38, %c0_39], %79 {strides = array<i32>} : memref<1x64x128xbf16, #tpu.memory_space<vmem>>, vector<1x64x128xbf16>,
    return
  }
  func.func @transform_0(%arg0: i32) -> (i32, i32, i32, i32) {
    %c0_i32 = arith.constant 0 : i32
    %c0_i32_0 = arith.constant 0 : i32
    %c0_i32_1 = arith.constant 0 : i32
    %c0_i32_2 = arith.constant 0 : i32
    return %arg0, %c0_i32, %c0_i32_0, %c0_i32_1 : i32, i32, i32, i32
  }
  func.func @transform_1(%arg0: i32) -> (i32, i32, i32) {
    %c0_i32 = arith.constant 0 : i32
    %c0_i32_0 = arith.constant 0 : i32
    %c0_i32_1 = arith.constant 0 : i32
    %c0_i32_2 = arith.constant 0 : i32
    return %c0_i32, %c0_i32_0, %c0_i32_1 : i32, i32, i32
  }
  func.func @transform_2(%arg0: i32) -> (i32, i32) {
    %c0_i32 = arith.constant 0 : i32
    %c0_i32_0 = arith.constant 0 : i32
    %c0_i32_1 = arith.constant 0 : i32
    return %c0_i32, %c0_i32_0 : i32, i32
  }
  func.func @transform_3(%arg0: i32) -> (i32, i32, i32) {
    %c0_i32 = arith.constant 0 : i32
    %c0_i32_0 = arith.constant 0 : i32
    %c0_i32_1 = arith.constant 0 : i32
    return %arg0, %c0_i32, %c0_i32_0 : i32, i32, i32
  }
  func.func @transform_4(%arg0: i32) -> (i32, i32, i32) {
    %c0_i32 = arith.constant 0 : i32
    %c0_i32_0 = arith.constant 0 : i32
    %c0_i32_1 = arith.constant 0 : i32
    return %arg0, %c0_i32, %c0_i32_0 : i32, i32, i32
  }
}

module attributes {stable_mosaic.version = 11 : i64} {
  func.func @_gemm_bias_kernel(%arg0: i32, %arg1: memref<128x432xbf16, #tpu.memory_space<vmem>>, %arg2: memref<432x32xbf16, #tpu.memory_space<vmem>>, %arg3: memref<1x32xf32, #tpu.memory_space<vmem>>, %arg4: memref<128x32xbf16, #tpu.memory_space<vmem>>) attributes {dimension_semantics = [#tpu.dimension_semantics<parallel>], iteration_bounds = array<i64: 1>, scalar_prefetch = 0 : i64, scratch_operands = 0 : i64, tpu.core_type = #tpu.core_type<tc>, window_params = [{transform_indices = @transform_0, window_bounds = array<i64: 128, 432>}, {pipeline_mode = #tpu.pipeline_mode<synchronous>, transform_indices = @transform_1, window_bounds = array<i64: 432, 32>}, {pipeline_mode = #tpu.pipeline_mode<synchronous>, transform_indices = @transform_2, window_bounds = array<i64: 1, 32>}, {transform_indices = @transform_3, window_bounds = array<i64: 128, 32>}]} {
    %c0 = arith.constant 0 : index
    %c0_0 = arith.constant 0 : index
    %0 = vector.load %arg1[%c0, %c0_0] : memref<128x432xbf16, #tpu.memory_space<vmem>>, vector<128x432xbf16>
    %c0_1 = arith.constant 0 : index
    %c0_2 = arith.constant 0 : index
    %1 = vector.load %arg2[%c0_1, %c0_2] : memref<432x32xbf16, #tpu.memory_space<vmem>>, vector<432x32xbf16>
    %cst = arith.constant dense<0.000000e+00> : vector<128x32xf32>
    %2 = tpu.matmul %0, %1, %cst {dimension_numbers = #tpu.dot_dimension_numbers<[1], [0], [0], [1], [0, 0, 1, 1], [], []>} : vector<128x432xbf16>, vector<432x32xbf16>, vector<128x32xf32> -> vector<128x32xf32>
    %c0_3 = arith.constant 0 : index
    %c0_4 = arith.constant 0 : index
    %3 = vector.load %arg3[%c0_3, %c0_4] : memref<1x32xf32, #tpu.memory_space<vmem>>, vector<1x32xf32>
    %4 = vector.broadcast %3 : vector<1x32xf32> to vector<128x32xf32>
    %5 = arith.addf %2, %4 : vector<128x32xf32>
    %cst_5 = arith.constant 0.000000e+00 : f32
    %6 = vector.broadcast %cst_5 : f32 to vector<128x32xf32>
    %7 = arith.maximumf %5, %6 : vector<128x32xf32>
    %8 = arith.truncf %7 : vector<128x32xf32> to vector<128x32xbf16>
    %c0_6 = arith.constant 0 : index
    %c0_7 = arith.constant 0 : index
    %9 = vector.load %arg4[%c0_6, %c0_7] : memref<128x32xbf16, #tpu.memory_space<vmem>>, vector<128x32xbf16>
    tpu.vector_store %arg4[%c0_6, %c0_7], %8 {strides = array<i32>} : memref<128x32xbf16, #tpu.memory_space<vmem>>, vector<128x32xbf16>,
    return
  }
  func.func @transform_0(%arg0: i32) -> (i32, i32) {
    %c0_i32 = arith.constant 0 : i32
    %c0_i32_0 = arith.constant 0 : i32
    return %arg0, %c0_i32 : i32, i32
  }
  func.func @transform_1(%arg0: i32) -> (i32, i32) {
    %c0_i32 = arith.constant 0 : i32
    %c0_i32_0 = arith.constant 0 : i32
    %c0_i32_1 = arith.constant 0 : i32
    return %c0_i32, %c0_i32_0 : i32, i32
  }
  func.func @transform_2(%arg0: i32) -> (i32, i32) {
    %c0_i32 = arith.constant 0 : i32
    %c0_i32_0 = arith.constant 0 : i32
    %c0_i32_1 = arith.constant 0 : i32
    return %c0_i32, %c0_i32_0 : i32, i32
  }
  func.func @transform_3(%arg0: i32) -> (i32, i32) {
    %c0_i32 = arith.constant 0 : i32
    %c0_i32_0 = arith.constant 0 : i32
    return %arg0, %c0_i32 : i32, i32
  }
}

module attributes {stable_mosaic.version = 11 : i64} {
  func.func @_gemm_bias_kernel(%arg0: i32, %arg1: memref<128x16xbf16, #tpu.memory_space<vmem>>, %arg2: memref<16x32xbf16, #tpu.memory_space<vmem>>, %arg3: memref<1x32xf32, #tpu.memory_space<vmem>>, %arg4: memref<128x32xbf16, #tpu.memory_space<vmem>>) attributes {dimension_semantics = [#tpu.dimension_semantics<parallel>], iteration_bounds = array<i64: 1>, scalar_prefetch = 0 : i64, scratch_operands = 0 : i64, tpu.core_type = #tpu.core_type<tc>, window_params = [{transform_indices = @transform_0, window_bounds = array<i64: 128, 16>}, {pipeline_mode = #tpu.pipeline_mode<synchronous>, transform_indices = @transform_1, window_bounds = array<i64: 16, 32>}, {pipeline_mode = #tpu.pipeline_mode<synchronous>, transform_indices = @transform_2, window_bounds = array<i64: 1, 32>}, {transform_indices = @transform_3, window_bounds = array<i64: 128, 32>}]} {
    %c0 = arith.constant 0 : index
    %c0_0 = arith.constant 0 : index
    %0 = vector.load %arg1[%c0, %c0_0] : memref<128x16xbf16, #tpu.memory_space<vmem>>, vector<128x16xbf16>
    %c0_1 = arith.constant 0 : index
    %c0_2 = arith.constant 0 : index
    %1 = vector.load %arg2[%c0_1, %c0_2] : memref<16x32xbf16, #tpu.memory_space<vmem>>, vector<16x32xbf16>
    %cst = arith.constant dense<0.000000e+00> : vector<128x32xf32>
    %2 = tpu.matmul %0, %1, %cst {dimension_numbers = #tpu.dot_dimension_numbers<[1], [0], [0], [1], [0, 0, 1, 1], [], []>} : vector<128x16xbf16>, vector<16x32xbf16>, vector<128x32xf32> -> vector<128x32xf32>
    %c0_3 = arith.constant 0 : index
    %c0_4 = arith.constant 0 : index
    %3 = vector.load %arg3[%c0_3, %c0_4] : memref<1x32xf32, #tpu.memory_space<vmem>>, vector<1x32xf32>
    %4 = vector.broadcast %3 : vector<1x32xf32> to vector<128x32xf32>
    %5 = arith.addf %2, %4 : vector<128x32xf32>
    %6 = arith.truncf %5 : vector<128x32xf32> to vector<128x32xbf16>
    %c0_5 = arith.constant 0 : index
    %c0_6 = arith.constant 0 : index
    %7 = vector.load %arg4[%c0_5, %c0_6] : memref<128x32xbf16, #tpu.memory_space<vmem>>, vector<128x32xbf16>
    tpu.vector_store %arg4[%c0_5, %c0_6], %6 {strides = array<i32>} : memref<128x32xbf16, #tpu.memory_space<vmem>>, vector<128x32xbf16>,
    return
  }
  func.func @transform_0(%arg0: i32) -> (i32, i32) {
    %c0_i32 = arith.constant 0 : i32
    %c0_i32_0 = arith.constant 0 : i32
    return %arg0, %c0_i32 : i32, i32
  }
  func.func @transform_1(%arg0: i32) -> (i32, i32) {
    %c0_i32 = arith.constant 0 : i32
    %c0_i32_0 = arith.constant 0 : i32
    %c0_i32_1 = arith.constant 0 : i32
    return %c0_i32, %c0_i32_0 : i32, i32
  }
  func.func @transform_2(%arg0: i32) -> (i32, i32) {
    %c0_i32 = arith.constant 0 : i32
    %c0_i32_0 = arith.constant 0 : i32
    %c0_i32_1 = arith.constant 0 : i32
    return %c0_i32, %c0_i32_0 : i32, i32
  }
  func.func @transform_3(%arg0: i32) -> (i32, i32) {
    %c0_i32 = arith.constant 0 : i32
    %c0_i32_0 = arith.constant 0 : i32
    return %arg0, %c0_i32 : i32, i32
  }
}

module attributes {stable_mosaic.version = 11 : i64} {
  func.func @_fused_conv_kernel(%arg0: i32, %arg1: memref<1x6x10x192xbf16, #tpu.memory_space<vmem>>, %arg2: memref<9x192x128xbf16, #tpu.memory_space<vmem>>, %arg3: memref<1x128xf32, #tpu.memory_space<vmem>>, %arg4: memref<1x32x128xbf16, #tpu.memory_space<vmem>>, %arg5: memref<1x32x128xbf16, #tpu.memory_space<vmem>>) attributes {dimension_semantics = [#tpu.dimension_semantics<parallel>], iteration_bounds = array<i64: 2>, scalar_prefetch = 0 : i64, scratch_operands = 0 : i64, tpu.core_type = #tpu.core_type<tc>, window_params = [{transform_indices = @transform_0, window_bounds = array<i64: 1, 6, 10, 192>}, {pipeline_mode = #tpu.pipeline_mode<synchronous>, transform_indices = @transform_1, window_bounds = array<i64: 9, 192, 128>}, {pipeline_mode = #tpu.pipeline_mode<synchronous>, transform_indices = @transform_2, window_bounds = array<i64: 1, 128>}, {transform_indices = @transform_3, window_bounds = array<i64: 1, 32, 128>}, {transform_indices = @transform_4, window_bounds = array<i64: 1, 32, 128>}]} {
    %c0 = arith.constant 0 : index
    %c0_0 = arith.constant 0 : index
    %c0_1 = arith.constant 0 : index
    %c0_2 = arith.constant 0 : index
    %0 = vector.load %arg1[%c0, %c0_0, %c0_1, %c0_2] : memref<1x6x10x192xbf16, #tpu.memory_space<vmem>>, vector<1x6x10x192xbf16>
    %1 = vector.shape_cast %0 : vector<1x6x10x192xbf16> to vector<6x10x192xbf16>
    %2 = arith.extf %1 : vector<6x10x192xbf16> to vector<6x10x192xf32>
    %cst = arith.constant 0.000000e+00 : f32
    %3 = vector.broadcast %cst : f32 to vector<32x128xf32>
    %4 = vector.extract_strided_slice %2 {offsets = [0, 0, 0], sizes = [4, 8, 192], strides = [1, 1, 1]} : vector<6x10x192xf32> to vector<4x8x192xf32>
    %5 = vector.shape_cast %4 : vector<4x8x192xf32> to vector<32x192xf32>
    %6 = arith.truncf %5 : vector<32x192xf32> to vector<32x192xbf16>
    %c0_3 = arith.constant 0 : index
    %c0_4 = arith.constant 0 : index
    %c0_5 = arith.constant 0 : index
    %7 = vector.load %arg2[%c0_3, %c0_4, %c0_5] : memref<9x192x128xbf16, #tpu.memory_space<vmem>>, vector<1x192x128xbf16>
    %8 = vector.shape_cast %7 : vector<1x192x128xbf16> to vector<192x128xbf16>
    %cst_6 = arith.constant dense<0.000000e+00> : vector<32x128xf32>
    %9 = tpu.matmul %6, %8, %cst_6 {dimension_numbers = #tpu.dot_dimension_numbers<[1], [0], [0], [1], [0, 0, 1, 1], [], []>} : vector<32x192xbf16>, vector<192x128xbf16>, vector<32x128xf32> -> vector<32x128xf32>
    %10 = arith.addf %3, %9 : vector<32x128xf32>
    %11 = vector.extract_strided_slice %2 {offsets = [0, 1, 0], sizes = [4, 8, 192], strides = [1, 1, 1]} : vector<6x10x192xf32> to vector<4x8x192xf32>
    %12 = vector.shape_cast %11 : vector<4x8x192xf32> to vector<32x192xf32>
    %13 = arith.truncf %12 : vector<32x192xf32> to vector<32x192xbf16>
    %c1 = arith.constant 1 : index
    %c0_7 = arith.constant 0 : index
    %c0_8 = arith.constant 0 : index
    %14 = vector.load %arg2[%c1, %c0_7, %c0_8] : memref<9x192x128xbf16, #tpu.memory_space<vmem>>, vector<1x192x128xbf16>
    %15 = vector.shape_cast %14 : vector<1x192x128xbf16> to vector<192x128xbf16>
    %cst_9 = arith.constant dense<0.000000e+00> : vector<32x128xf32>
    %16 = tpu.matmul %13, %15, %cst_9 {dimension_numbers = #tpu.dot_dimension_numbers<[1], [0], [0], [1], [0, 0, 1, 1], [], []>} : vector<32x192xbf16>, vector<192x128xbf16>, vector<32x128xf32> -> vector<32x128xf32>
    %17 = arith.addf %10, %16 : vector<32x128xf32>
    %18 = vector.extract_strided_slice %2 {offsets = [0, 2, 0], sizes = [4, 8, 192], strides = [1, 1, 1]} : vector<6x10x192xf32> to vector<4x8x192xf32>
    %19 = vector.shape_cast %18 : vector<4x8x192xf32> to vector<32x192xf32>
    %20 = arith.truncf %19 : vector<32x192xf32> to vector<32x192xbf16>
    %c2 = arith.constant 2 : index
    %c0_10 = arith.constant 0 : index
    %c0_11 = arith.constant 0 : index
    %21 = vector.load %arg2[%c2, %c0_10, %c0_11] : memref<9x192x128xbf16, #tpu.memory_space<vmem>>, vector<1x192x128xbf16>
    %22 = vector.shape_cast %21 : vector<1x192x128xbf16> to vector<192x128xbf16>
    %cst_12 = arith.constant dense<0.000000e+00> : vector<32x128xf32>
    %23 = tpu.matmul %20, %22, %cst_12 {dimension_numbers = #tpu.dot_dimension_numbers<[1], [0], [0], [1], [0, 0, 1, 1], [], []>} : vector<32x192xbf16>, vector<192x128xbf16>, vector<32x128xf32> -> vector<32x128xf32>
    %24 = arith.addf %17, %23 : vector<32x128xf32>
    %25 = vector.extract_strided_slice %2 {offsets = [1, 0, 0], sizes = [4, 8, 192], strides = [1, 1, 1]} : vector<6x10x192xf32> to vector<4x8x192xf32>
    %26 = vector.shape_cast %25 : vector<4x8x192xf32> to vector<32x192xf32>
    %27 = arith.truncf %26 : vector<32x192xf32> to vector<32x192xbf16>
    %c3 = arith.constant 3 : index
    %c0_13 = arith.constant 0 : index
    %c0_14 = arith.constant 0 : index
    %28 = vector.load %arg2[%c3, %c0_13, %c0_14] : memref<9x192x128xbf16, #tpu.memory_space<vmem>>, vector<1x192x128xbf16>
    %29 = vector.shape_cast %28 : vector<1x192x128xbf16> to vector<192x128xbf16>
    %cst_15 = arith.constant dense<0.000000e+00> : vector<32x128xf32>
    %30 = tpu.matmul %27, %29, %cst_15 {dimension_numbers = #tpu.dot_dimension_numbers<[1], [0], [0], [1], [0, 0, 1, 1], [], []>} : vector<32x192xbf16>, vector<192x128xbf16>, vector<32x128xf32> -> vector<32x128xf32>
    %31 = arith.addf %24, %30 : vector<32x128xf32>
    %32 = vector.extract_strided_slice %2 {offsets = [1, 1, 0], sizes = [4, 8, 192], strides = [1, 1, 1]} : vector<6x10x192xf32> to vector<4x8x192xf32>
    %33 = vector.shape_cast %32 : vector<4x8x192xf32> to vector<32x192xf32>
    %34 = arith.truncf %33 : vector<32x192xf32> to vector<32x192xbf16>
    %c4 = arith.constant 4 : index
    %c0_16 = arith.constant 0 : index
    %c0_17 = arith.constant 0 : index
    %35 = vector.load %arg2[%c4, %c0_16, %c0_17] : memref<9x192x128xbf16, #tpu.memory_space<vmem>>, vector<1x192x128xbf16>
    %36 = vector.shape_cast %35 : vector<1x192x128xbf16> to vector<192x128xbf16>
    %cst_18 = arith.constant dense<0.000000e+00> : vector<32x128xf32>
    %37 = tpu.matmul %34, %36, %cst_18 {dimension_numbers = #tpu.dot_dimension_numbers<[1], [0], [0], [1], [0, 0, 1, 1], [], []>} : vector<32x192xbf16>, vector<192x128xbf16>, vector<32x128xf32> -> vector<32x128xf32>
    %38 = arith.addf %31, %37 : vector<32x128xf32>
    %39 = vector.extract_strided_slice %2 {offsets = [1, 2, 0], sizes = [4, 8, 192], strides = [1, 1, 1]} : vector<6x10x192xf32> to vector<4x8x192xf32>
    %40 = vector.shape_cast %39 : vector<4x8x192xf32> to vector<32x192xf32>
    %41 = arith.truncf %40 : vector<32x192xf32> to vector<32x192xbf16>
    %c5 = arith.constant 5 : index
    %c0_19 = arith.constant 0 : index
    %c0_20 = arith.constant 0 : index
    %42 = vector.load %arg2[%c5, %c0_19, %c0_20] : memref<9x192x128xbf16, #tpu.memory_space<vmem>>, vector<1x192x128xbf16>
    %43 = vector.shape_cast %42 : vector<1x192x128xbf16> to vector<192x128xbf16>
    %cst_21 = arith.constant dense<0.000000e+00> : vector<32x128xf32>
    %44 = tpu.matmul %41, %43, %cst_21 {dimension_numbers = #tpu.dot_dimension_numbers<[1], [0], [0], [1], [0, 0, 1, 1], [], []>} : vector<32x192xbf16>, vector<192x128xbf16>, vector<32x128xf32> -> vector<32x128xf32>
    %45 = arith.addf %38, %44 : vector<32x128xf32>
    %46 = vector.extract_strided_slice %2 {offsets = [2, 0, 0], sizes = [4, 8, 192], strides = [1, 1, 1]} : vector<6x10x192xf32> to vector<4x8x192xf32>
    %47 = vector.shape_cast %46 : vector<4x8x192xf32> to vector<32x192xf32>
    %48 = arith.truncf %47 : vector<32x192xf32> to vector<32x192xbf16>
    %c6 = arith.constant 6 : index
    %c0_22 = arith.constant 0 : index
    %c0_23 = arith.constant 0 : index
    %49 = vector.load %arg2[%c6, %c0_22, %c0_23] : memref<9x192x128xbf16, #tpu.memory_space<vmem>>, vector<1x192x128xbf16>
    %50 = vector.shape_cast %49 : vector<1x192x128xbf16> to vector<192x128xbf16>
    %cst_24 = arith.constant dense<0.000000e+00> : vector<32x128xf32>
    %51 = tpu.matmul %48, %50, %cst_24 {dimension_numbers = #tpu.dot_dimension_numbers<[1], [0], [0], [1], [0, 0, 1, 1], [], []>} : vector<32x192xbf16>, vector<192x128xbf16>, vector<32x128xf32> -> vector<32x128xf32>
    %52 = arith.addf %45, %51 : vector<32x128xf32>
    %53 = vector.extract_strided_slice %2 {offsets = [2, 1, 0], sizes = [4, 8, 192], strides = [1, 1, 1]} : vector<6x10x192xf32> to vector<4x8x192xf32>
    %54 = vector.shape_cast %53 : vector<4x8x192xf32> to vector<32x192xf32>
    %55 = arith.truncf %54 : vector<32x192xf32> to vector<32x192xbf16>
    %c7 = arith.constant 7 : index
    %c0_25 = arith.constant 0 : index
    %c0_26 = arith.constant 0 : index
    %56 = vector.load %arg2[%c7, %c0_25, %c0_26] : memref<9x192x128xbf16, #tpu.memory_space<vmem>>, vector<1x192x128xbf16>
    %57 = vector.shape_cast %56 : vector<1x192x128xbf16> to vector<192x128xbf16>
    %cst_27 = arith.constant dense<0.000000e+00> : vector<32x128xf32>
    %58 = tpu.matmul %55, %57, %cst_27 {dimension_numbers = #tpu.dot_dimension_numbers<[1], [0], [0], [1], [0, 0, 1, 1], [], []>} : vector<32x192xbf16>, vector<192x128xbf16>, vector<32x128xf32> -> vector<32x128xf32>
    %59 = arith.addf %52, %58 : vector<32x128xf32>
    %60 = vector.extract_strided_slice %2 {offsets = [2, 2, 0], sizes = [4, 8, 192], strides = [1, 1, 1]} : vector<6x10x192xf32> to vector<4x8x192xf32>
    %61 = vector.shape_cast %60 : vector<4x8x192xf32> to vector<32x192xf32>
    %62 = arith.truncf %61 : vector<32x192xf32> to vector<32x192xbf16>
    %c8 = arith.constant 8 : index
    %c0_28 = arith.constant 0 : index
    %c0_29 = arith.constant 0 : index
    %63 = vector.load %arg2[%c8, %c0_28, %c0_29] : memref<9x192x128xbf16, #tpu.memory_space<vmem>>, vector<1x192x128xbf16>
    %64 = vector.shape_cast %63 : vector<1x192x128xbf16> to vector<192x128xbf16>
    %cst_30 = arith.constant dense<0.000000e+00> : vector<32x128xf32>
    %65 = tpu.matmul %62, %64, %cst_30 {dimension_numbers = #tpu.dot_dimension_numbers<[1], [0], [0], [1], [0, 0, 1, 1], [], []>} : vector<32x192xbf16>, vector<192x128xbf16>, vector<32x128xf32> -> vector<32x128xf32>
    %66 = arith.addf %59, %65 : vector<32x128xf32>
    %c0_31 = arith.constant 0 : index
    %c0_32 = arith.constant 0 : index
    %67 = vector.load %arg3[%c0_31, %c0_32] : memref<1x128xf32, #tpu.memory_space<vmem>>, vector<1x128xf32>
    %68 = vector.broadcast %67 : vector<1x128xf32> to vector<32x128xf32>
    %69 = arith.addf %66, %68 : vector<32x128xf32>
    %c0_33 = arith.constant 0 : index
    %c0_34 = arith.constant 0 : index
    %c0_35 = arith.constant 0 : index
    %70 = vector.load %arg4[%c0_33, %c0_34, %c0_35] : memref<1x32x128xbf16, #tpu.memory_space<vmem>>, vector<1x32x128xbf16>
    %71 = vector.shape_cast %70 : vector<1x32x128xbf16> to vector<32x128xbf16>
    %72 = arith.extf %71 : vector<32x128xbf16> to vector<32x128xf32>
    %73 = arith.addf %69, %72 : vector<32x128xf32>
    %cst_36 = arith.constant 0.000000e+00 : f32
    %74 = vector.broadcast %cst_36 : f32 to vector<32x128xf32>
    %75 = arith.maximumf %73, %74 : vector<32x128xf32>
    %76 = arith.truncf %75 : vector<32x128xf32> to vector<32x128xbf16>
    %c0_37 = arith.constant 0 : index
    %c0_38 = arith.constant 0 : index
    %c0_39 = arith.constant 0 : index
    %77 = vector.load %arg5[%c0_37, %c0_38, %c0_39] : memref<1x32x128xbf16, #tpu.memory_space<vmem>>, vector<1x32x128xbf16>
    %78 = vector.shape_cast %77 : vector<1x32x128xbf16> to vector<32x128xbf16>
    %79 = vector.shape_cast %76 : vector<32x128xbf16> to vector<1x32x128xbf16>
    tpu.vector_store %arg5[%c0_37, %c0_38, %c0_39], %79 {strides = array<i32>} : memref<1x32x128xbf16, #tpu.memory_space<vmem>>, vector<1x32x128xbf16>,
    return
  }
  func.func @transform_0(%arg0: i32) -> (i32, i32, i32, i32) {
    %c0_i32 = arith.constant 0 : i32
    %c0_i32_0 = arith.constant 0 : i32
    %c0_i32_1 = arith.constant 0 : i32
    %c0_i32_2 = arith.constant 0 : i32
    return %arg0, %c0_i32, %c0_i32_0, %c0_i32_1 : i32, i32, i32, i32
  }
  func.func @transform_1(%arg0: i32) -> (i32, i32, i32) {
    %c0_i32 = arith.constant 0 : i32
    %c0_i32_0 = arith.constant 0 : i32
    %c0_i32_1 = arith.constant 0 : i32
    %c0_i32_2 = arith.constant 0 : i32
    return %c0_i32, %c0_i32_0, %c0_i32_1 : i32, i32, i32
  }
  func.func @transform_2(%arg0: i32) -> (i32, i32) {
    %c0_i32 = arith.constant 0 : i32
    %c0_i32_0 = arith.constant 0 : i32
    %c0_i32_1 = arith.constant 0 : i32
    return %c0_i32, %c0_i32_0 : i32, i32
  }
  func.func @transform_3(%arg0: i32) -> (i32, i32, i32) {
    %c0_i32 = arith.constant 0 : i32
    %c0_i32_0 = arith.constant 0 : i32
    %c0_i32_1 = arith.constant 0 : i32
    return %arg0, %c0_i32, %c0_i32_0 : i32, i32, i32
  }
  func.func @transform_4(%arg0: i32) -> (i32, i32, i32) {
    %c0_i32 = arith.constant 0 : i32
    %c0_i32_0 = arith.constant 0 : i32
    %c0_i32_1 = arith.constant 0 : i32
    return %arg0, %c0_i32, %c0_i32_0 : i32, i32, i32
  }
}

module attributes {stable_mosaic.version = 11 : i64} {
  func.func @_fused_conv_kernel(%arg0: i32, %arg1: memref<1x6x10x192xbf16, #tpu.memory_space<vmem>>, %arg2: memref<9x192x128xbf16, #tpu.memory_space<vmem>>, %arg3: memref<1x128xf32, #tpu.memory_space<vmem>>, %arg4: memref<1x32x128xbf16, #tpu.memory_space<vmem>>) attributes {dimension_semantics = [#tpu.dimension_semantics<parallel>], iteration_bounds = array<i64: 2>, scalar_prefetch = 0 : i64, scratch_operands = 0 : i64, tpu.core_type = #tpu.core_type<tc>, window_params = [{transform_indices = @transform_0, window_bounds = array<i64: 1, 6, 10, 192>}, {pipeline_mode = #tpu.pipeline_mode<synchronous>, transform_indices = @transform_1, window_bounds = array<i64: 9, 192, 128>}, {pipeline_mode = #tpu.pipeline_mode<synchronous>, transform_indices = @transform_2, window_bounds = array<i64: 1, 128>}, {transform_indices = @transform_3, window_bounds = array<i64: 1, 32, 128>}]} {
    %c0 = arith.constant 0 : index
    %c0_0 = arith.constant 0 : index
    %c0_1 = arith.constant 0 : index
    %c0_2 = arith.constant 0 : index
    %0 = vector.load %arg1[%c0, %c0_0, %c0_1, %c0_2] : memref<1x6x10x192xbf16, #tpu.memory_space<vmem>>, vector<1x6x10x192xbf16>
    %1 = vector.shape_cast %0 : vector<1x6x10x192xbf16> to vector<6x10x192xbf16>
    %2 = arith.extf %1 : vector<6x10x192xbf16> to vector<6x10x192xf32>
    %cst = arith.constant 0.000000e+00 : f32
    %3 = vector.broadcast %cst : f32 to vector<32x128xf32>
    %4 = vector.extract_strided_slice %2 {offsets = [0, 0, 0], sizes = [4, 8, 192], strides = [1, 1, 1]} : vector<6x10x192xf32> to vector<4x8x192xf32>
    %5 = vector.shape_cast %4 : vector<4x8x192xf32> to vector<32x192xf32>
    %6 = arith.truncf %5 : vector<32x192xf32> to vector<32x192xbf16>
    %c0_3 = arith.constant 0 : index
    %c0_4 = arith.constant 0 : index
    %c0_5 = arith.constant 0 : index
    %7 = vector.load %arg2[%c0_3, %c0_4, %c0_5] : memref<9x192x128xbf16, #tpu.memory_space<vmem>>, vector<1x192x128xbf16>
    %8 = vector.shape_cast %7 : vector<1x192x128xbf16> to vector<192x128xbf16>
    %cst_6 = arith.constant dense<0.000000e+00> : vector<32x128xf32>
    %9 = tpu.matmul %6, %8, %cst_6 {dimension_numbers = #tpu.dot_dimension_numbers<[1], [0], [0], [1], [0, 0, 1, 1], [], []>} : vector<32x192xbf16>, vector<192x128xbf16>, vector<32x128xf32> -> vector<32x128xf32>
    %10 = arith.addf %3, %9 : vector<32x128xf32>
    %11 = vector.extract_strided_slice %2 {offsets = [0, 1, 0], sizes = [4, 8, 192], strides = [1, 1, 1]} : vector<6x10x192xf32> to vector<4x8x192xf32>
    %12 = vector.shape_cast %11 : vector<4x8x192xf32> to vector<32x192xf32>
    %13 = arith.truncf %12 : vector<32x192xf32> to vector<32x192xbf16>
    %c1 = arith.constant 1 : index
    %c0_7 = arith.constant 0 : index
    %c0_8 = arith.constant 0 : index
    %14 = vector.load %arg2[%c1, %c0_7, %c0_8] : memref<9x192x128xbf16, #tpu.memory_space<vmem>>, vector<1x192x128xbf16>
    %15 = vector.shape_cast %14 : vector<1x192x128xbf16> to vector<192x128xbf16>
    %cst_9 = arith.constant dense<0.000000e+00> : vector<32x128xf32>
    %16 = tpu.matmul %13, %15, %cst_9 {dimension_numbers = #tpu.dot_dimension_numbers<[1], [0], [0], [1], [0, 0, 1, 1], [], []>} : vector<32x192xbf16>, vector<192x128xbf16>, vector<32x128xf32> -> vector<32x128xf32>
    %17 = arith.addf %10, %16 : vector<32x128xf32>
    %18 = vector.extract_strided_slice %2 {offsets = [0, 2, 0], sizes = [4, 8, 192], strides = [1, 1, 1]} : vector<6x10x192xf32> to vector<4x8x192xf32>
    %19 = vector.shape_cast %18 : vector<4x8x192xf32> to vector<32x192xf32>
    %20 = arith.truncf %19 : vector<32x192xf32> to vector<32x192xbf16>
    %c2 = arith.constant 2 : index
    %c0_10 = arith.constant 0 : index
    %c0_11 = arith.constant 0 : index
    %21 = vector.load %arg2[%c2, %c0_10, %c0_11] : memref<9x192x128xbf16, #tpu.memory_space<vmem>>, vector<1x192x128xbf16>
    %22 = vector.shape_cast %21 : vector<1x192x128xbf16> to vector<192x128xbf16>
    %cst_12 = arith.constant dense<0.000000e+00> : vector<32x128xf32>
    %23 = tpu.matmul %20, %22, %cst_12 {dimension_numbers = #tpu.dot_dimension_numbers<[1], [0], [0], [1], [0, 0, 1, 1], [], []>} : vector<32x192xbf16>, vector<192x128xbf16>, vector<32x128xf32> -> vector<32x128xf32>
    %24 = arith.addf %17, %23 : vector<32x128xf32>
    %25 = vector.extract_strided_slice %2 {offsets = [1, 0, 0], sizes = [4, 8, 192], strides = [1, 1, 1]} : vector<6x10x192xf32> to vector<4x8x192xf32>
    %26 = vector.shape_cast %25 : vector<4x8x192xf32> to vector<32x192xf32>
    %27 = arith.truncf %26 : vector<32x192xf32> to vector<32x192xbf16>
    %c3 = arith.constant 3 : index
    %c0_13 = arith.constant 0 : index
    %c0_14 = arith.constant 0 : index
    %28 = vector.load %arg2[%c3, %c0_13, %c0_14] : memref<9x192x128xbf16, #tpu.memory_space<vmem>>, vector<1x192x128xbf16>
    %29 = vector.shape_cast %28 : vector<1x192x128xbf16> to vector<192x128xbf16>
    %cst_15 = arith.constant dense<0.000000e+00> : vector<32x128xf32>
    %30 = tpu.matmul %27, %29, %cst_15 {dimension_numbers = #tpu.dot_dimension_numbers<[1], [0], [0], [1], [0, 0, 1, 1], [], []>} : vector<32x192xbf16>, vector<192x128xbf16>, vector<32x128xf32> -> vector<32x128xf32>
    %31 = arith.addf %24, %30 : vector<32x128xf32>
    %32 = vector.extract_strided_slice %2 {offsets = [1, 1, 0], sizes = [4, 8, 192], strides = [1, 1, 1]} : vector<6x10x192xf32> to vector<4x8x192xf32>
    %33 = vector.shape_cast %32 : vector<4x8x192xf32> to vector<32x192xf32>
    %34 = arith.truncf %33 : vector<32x192xf32> to vector<32x192xbf16>
    %c4 = arith.constant 4 : index
    %c0_16 = arith.constant 0 : index
    %c0_17 = arith.constant 0 : index
    %35 = vector.load %arg2[%c4, %c0_16, %c0_17] : memref<9x192x128xbf16, #tpu.memory_space<vmem>>, vector<1x192x128xbf16>
    %36 = vector.shape_cast %35 : vector<1x192x128xbf16> to vector<192x128xbf16>
    %cst_18 = arith.constant dense<0.000000e+00> : vector<32x128xf32>
    %37 = tpu.matmul %34, %36, %cst_18 {dimension_numbers = #tpu.dot_dimension_numbers<[1], [0], [0], [1], [0, 0, 1, 1], [], []>} : vector<32x192xbf16>, vector<192x128xbf16>, vector<32x128xf32> -> vector<32x128xf32>
    %38 = arith.addf %31, %37 : vector<32x128xf32>
    %39 = vector.extract_strided_slice %2 {offsets = [1, 2, 0], sizes = [4, 8, 192], strides = [1, 1, 1]} : vector<6x10x192xf32> to vector<4x8x192xf32>
    %40 = vector.shape_cast %39 : vector<4x8x192xf32> to vector<32x192xf32>
    %41 = arith.truncf %40 : vector<32x192xf32> to vector<32x192xbf16>
    %c5 = arith.constant 5 : index
    %c0_19 = arith.constant 0 : index
    %c0_20 = arith.constant 0 : index
    %42 = vector.load %arg2[%c5, %c0_19, %c0_20] : memref<9x192x128xbf16, #tpu.memory_space<vmem>>, vector<1x192x128xbf16>
    %43 = vector.shape_cast %42 : vector<1x192x128xbf16> to vector<192x128xbf16>
    %cst_21 = arith.constant dense<0.000000e+00> : vector<32x128xf32>
    %44 = tpu.matmul %41, %43, %cst_21 {dimension_numbers = #tpu.dot_dimension_numbers<[1], [0], [0], [1], [0, 0, 1, 1], [], []>} : vector<32x192xbf16>, vector<192x128xbf16>, vector<32x128xf32> -> vector<32x128xf32>
    %45 = arith.addf %38, %44 : vector<32x128xf32>
    %46 = vector.extract_strided_slice %2 {offsets = [2, 0, 0], sizes = [4, 8, 192], strides = [1, 1, 1]} : vector<6x10x192xf32> to vector<4x8x192xf32>
    %47 = vector.shape_cast %46 : vector<4x8x192xf32> to vector<32x192xf32>
    %48 = arith.truncf %47 : vector<32x192xf32> to vector<32x192xbf16>
    %c6 = arith.constant 6 : index
    %c0_22 = arith.constant 0 : index
    %c0_23 = arith.constant 0 : index
    %49 = vector.load %arg2[%c6, %c0_22, %c0_23] : memref<9x192x128xbf16, #tpu.memory_space<vmem>>, vector<1x192x128xbf16>
    %50 = vector.shape_cast %49 : vector<1x192x128xbf16> to vector<192x128xbf16>
    %cst_24 = arith.constant dense<0.000000e+00> : vector<32x128xf32>
    %51 = tpu.matmul %48, %50, %cst_24 {dimension_numbers = #tpu.dot_dimension_numbers<[1], [0], [0], [1], [0, 0, 1, 1], [], []>} : vector<32x192xbf16>, vector<192x128xbf16>, vector<32x128xf32> -> vector<32x128xf32>
    %52 = arith.addf %45, %51 : vector<32x128xf32>
    %53 = vector.extract_strided_slice %2 {offsets = [2, 1, 0], sizes = [4, 8, 192], strides = [1, 1, 1]} : vector<6x10x192xf32> to vector<4x8x192xf32>
    %54 = vector.shape_cast %53 : vector<4x8x192xf32> to vector<32x192xf32>
    %55 = arith.truncf %54 : vector<32x192xf32> to vector<32x192xbf16>
    %c7 = arith.constant 7 : index
    %c0_25 = arith.constant 0 : index
    %c0_26 = arith.constant 0 : index
    %56 = vector.load %arg2[%c7, %c0_25, %c0_26] : memref<9x192x128xbf16, #tpu.memory_space<vmem>>, vector<1x192x128xbf16>
    %57 = vector.shape_cast %56 : vector<1x192x128xbf16> to vector<192x128xbf16>
    %cst_27 = arith.constant dense<0.000000e+00> : vector<32x128xf32>
    %58 = tpu.matmul %55, %57, %cst_27 {dimension_numbers = #tpu.dot_dimension_numbers<[1], [0], [0], [1], [0, 0, 1, 1], [], []>} : vector<32x192xbf16>, vector<192x128xbf16>, vector<32x128xf32> -> vector<32x128xf32>
    %59 = arith.addf %52, %58 : vector<32x128xf32>
    %60 = vector.extract_strided_slice %2 {offsets = [2, 2, 0], sizes = [4, 8, 192], strides = [1, 1, 1]} : vector<6x10x192xf32> to vector<4x8x192xf32>
    %61 = vector.shape_cast %60 : vector<4x8x192xf32> to vector<32x192xf32>
    %62 = arith.truncf %61 : vector<32x192xf32> to vector<32x192xbf16>
    %c8 = arith.constant 8 : index
    %c0_28 = arith.constant 0 : index
    %c0_29 = arith.constant 0 : index
    %63 = vector.load %arg2[%c8, %c0_28, %c0_29] : memref<9x192x128xbf16, #tpu.memory_space<vmem>>, vector<1x192x128xbf16>
    %64 = vector.shape_cast %63 : vector<1x192x128xbf16> to vector<192x128xbf16>
    %cst_30 = arith.constant dense<0.000000e+00> : vector<32x128xf32>
    %65 = tpu.matmul %62, %64, %cst_30 {dimension_numbers = #tpu.dot_dimension_numbers<[1], [0], [0], [1], [0, 0, 1, 1], [], []>} : vector<32x192xbf16>, vector<192x128xbf16>, vector<32x128xf32> -> vector<32x128xf32>
    %66 = arith.addf %59, %65 : vector<32x128xf32>
    %c0_31 = arith.constant 0 : index
    %c0_32 = arith.constant 0 : index
    %67 = vector.load %arg3[%c0_31, %c0_32] : memref<1x128xf32, #tpu.memory_space<vmem>>, vector<1x128xf32>
    %68 = vector.broadcast %67 : vector<1x128xf32> to vector<32x128xf32>
    %69 = arith.addf %66, %68 : vector<32x128xf32>
    %cst_33 = arith.constant 0.000000e+00 : f32
    %70 = vector.broadcast %cst_33 : f32 to vector<32x128xf32>
    %71 = arith.maximumf %69, %70 : vector<32x128xf32>
    %72 = arith.truncf %71 : vector<32x128xf32> to vector<32x128xbf16>
    %c0_34 = arith.constant 0 : index
    %c0_35 = arith.constant 0 : index
    %c0_36 = arith.constant 0 : index
    %73 = vector.load %arg4[%c0_34, %c0_35, %c0_36] : memref<1x32x128xbf16, #tpu.memory_space<vmem>>, vector<1x32x128xbf16>
    %74 = vector.shape_cast %73 : vector<1x32x128xbf16> to vector<32x128xbf16>
    %75 = vector.shape_cast %72 : vector<32x128xbf16> to vector<1x32x128xbf16>
    tpu.vector_store %arg4[%c0_34, %c0_35, %c0_36], %75 {strides = array<i32>} : memref<1x32x128xbf16, #tpu.memory_space<vmem>>, vector<1x32x128xbf16>,
    return
  }
  func.func @transform_0(%arg0: i32) -> (i32, i32, i32, i32) {
    %c0_i32 = arith.constant 0 : i32
    %c0_i32_0 = arith.constant 0 : i32
    %c0_i32_1 = arith.constant 0 : i32
    %c0_i32_2 = arith.constant 0 : i32
    return %arg0, %c0_i32, %c0_i32_0, %c0_i32_1 : i32, i32, i32, i32
  }
  func.func @transform_1(%arg0: i32) -> (i32, i32, i32) {
    %c0_i32 = arith.constant 0 : i32
    %c0_i32_0 = arith.constant 0 : i32
    %c0_i32_1 = arith.constant 0 : i32
    %c0_i32_2 = arith.constant 0 : i32
    return %c0_i32, %c0_i32_0, %c0_i32_1 : i32, i32, i32
  }
  func.func @transform_2(%arg0: i32) -> (i32, i32) {
    %c0_i32 = arith.constant 0 : i32
    %c0_i32_0 = arith.constant 0 : i32
    %c0_i32_1 = arith.constant 0 : i32
    return %c0_i32, %c0_i32_0 : i32, i32
  }
  func.func @transform_3(%arg0: i32) -> (i32, i32, i32) {
    %c0_i32 = arith.constant 0 : i32
    %c0_i32_0 = arith.constant 0 : i32
    %c0_i32_1 = arith.constant 0 : i32
    return %arg0, %c0_i32, %c0_i32_0 : i32, i32, i32
  }
}

module attributes {stable_mosaic.version = 11 : i64} {
  func.func @_pool_fc_kernel(%arg0: i32, %arg1: memref<2x64x32xbf16, #tpu.memory_space<vmem>>, %arg2: memref<32x10xf32, #tpu.memory_space<vmem>>, %arg3: memref<1x10xf32, #tpu.memory_space<vmem>>, %arg4: memref<2x10xf32, #tpu.memory_space<vmem>>, %arg5: memref<2x32xf32, #tpu.memory_space<vmem>>) attributes {dimension_semantics = [#tpu.dimension_semantics<arbitrary>], iteration_bounds = array<i64: 1>, scalar_prefetch = 0 : i64, scratch_operands = 1 : i64, tpu.core_type = #tpu.core_type<tc>, window_params = [{transform_indices = @transform_0, window_bounds = array<i64: 2, 64, 32>}, {pipeline_mode = #tpu.pipeline_mode<synchronous>, transform_indices = @transform_1, window_bounds = array<i64: 32, 10>}, {pipeline_mode = #tpu.pipeline_mode<synchronous>, transform_indices = @transform_2, window_bounds = array<i64: 1, 10>}, {pipeline_mode = #tpu.pipeline_mode<synchronous>, transform_indices = @transform_3, window_bounds = array<i64: 2, 10>}]} {
    %c0_i32 = arith.constant 0 : i32
    %0 = arith.cmpi eq, %arg0, %c0_i32 : i32
    %1 = arith.extui %0 : i1 to i32
    %c0_i32_0 = arith.constant 0 : i32
    %2 = arith.cmpi ne, %1, %c0_i32_0 : i32
    scf.if %2 {
      %cst_9 = arith.constant 0.000000e+00 : f32
      %12 = vector.broadcast %cst_9 : f32 to vector<2x32xf32>
      %c0_10 = arith.constant 0 : index
      %c0_11 = arith.constant 0 : index
      %13 = vector.load %arg5[%c0_10, %c0_11] : memref<2x32xf32, #tpu.memory_space<vmem>>, vector<2x32xf32>
      tpu.vector_store %arg5[%c0_10, %c0_11], %12 {strides = array<i32>} : memref<2x32xf32, #tpu.memory_space<vmem>>, vector<2x32xf32>,
    } else {
    }
    %c0 = arith.constant 0 : index
    %c0_1 = arith.constant 0 : index
    %3 = vector.load %arg5[%c0, %c0_1] : memref<2x32xf32, #tpu.memory_space<vmem>>, vector<2x32xf32>
    %c0_2 = arith.constant 0 : index
    %c0_3 = arith.constant 0 : index
    %c0_4 = arith.constant 0 : index
    %4 = vector.load %arg1[%c0_2, %c0_3, %c0_4] : memref<2x64x32xbf16, #tpu.memory_space<vmem>>, vector<2x64x32xbf16>
    %5 = arith.extf %4 : vector<2x64x32xbf16> to vector<2x64x32xf32>
    %cst = arith.constant dense<0.000000e+00> : vector<2x32xf32>
    %6 = vector.multi_reduction <add>, %5, %cst [1] : vector<2x64x32xf32> to vector<2x32xf32>
    %7 = arith.addf %3, %6 : vector<2x32xf32>
    %c0_5 = arith.constant 0 : index
    %c0_6 = arith.constant 0 : index
    %8 = vector.load %arg5[%c0_5, %c0_6] : memref<2x32xf32, #tpu.memory_space<vmem>>, vector<2x32xf32>
    tpu.vector_store %arg5[%c0_5, %c0_6], %7 {strides = array<i32>} : memref<2x32xf32, #tpu.memory_space<vmem>>, vector<2x32xf32>,
    %c0_i32_7 = arith.constant 0 : i32
    %9 = arith.cmpi eq, %arg0, %c0_i32_7 : i32
    %10 = arith.extui %9 : i1 to i32
    %c0_i32_8 = arith.constant 0 : i32
    %11 = arith.cmpi ne, %10, %c0_i32_8 : i32
    scf.if %11 {
      %c0_9 = arith.constant 0 : index
      %c0_10 = arith.constant 0 : index
      %12 = vector.load %arg5[%c0_9, %c0_10] : memref<2x32xf32, #tpu.memory_space<vmem>>, vector<2x32xf32>
      %cst_11 = arith.constant 1.562500e-02 : f32
      %13 = vector.broadcast %cst_11 : f32 to vector<2x32xf32>
      %14 = arith.mulf %12, %13 : vector<2x32xf32>
      %c0_12 = arith.constant 0 : index
      %c0_13 = arith.constant 0 : index
      %15 = vector.load %arg2[%c0_12, %c0_13] : memref<32x10xf32, #tpu.memory_space<vmem>>, vector<32x10xf32>
      %cst_14 = arith.constant dense<0.000000e+00> : vector<2x10xf32>
      %16 = tpu.matmul %14, %15, %cst_14 {dimension_numbers = #tpu.dot_dimension_numbers<[1], [0], [0], [1], [0, 0, 1, 1], [], []>} : vector<2x32xf32>, vector<32x10xf32>, vector<2x10xf32> -> vector<2x10xf32>
      %c0_15 = arith.constant 0 : index
      %c0_16 = arith.constant 0 : index
      %17 = vector.load %arg3[%c0_15, %c0_16] : memref<1x10xf32, #tpu.memory_space<vmem>>, vector<1x10xf32>
      %18 = vector.broadcast %17 : vector<1x10xf32> to vector<2x10xf32>
      %19 = arith.addf %16, %18 : vector<2x10xf32>
      %c0_17 = arith.constant 0 : index
      %c0_18 = arith.constant 0 : index
      %20 = vector.load %arg4[%c0_17, %c0_18] : memref<2x10xf32, #tpu.memory_space<vmem>>, vector<2x10xf32>
      tpu.vector_store %arg4[%c0_17, %c0_18], %19 {strides = array<i32>} : memref<2x10xf32, #tpu.memory_space<vmem>>, vector<2x10xf32>,
    } else {
    }
    return
  }
  func.func @transform_0(%arg0: i32) -> (i32, i32, i32) {
    %c0_i32 = arith.constant 0 : i32
    %c0_i32_0 = arith.constant 0 : i32
    %c0_i32_1 = arith.constant 0 : i32
    return %c0_i32, %arg0, %c0_i32_0 : i32, i32, i32
  }
  func.func @transform_1(%arg0: i32) -> (i32, i32) {
    %c0_i32 = arith.constant 0 : i32
    %c0_i32_0 = arith.constant 0 : i32
    %c0_i32_1 = arith.constant 0 : i32
    return %c0_i32, %c0_i32_0 : i32, i32
  }
  func.func @transform_2(%arg0: i32) -> (i32, i32) {
    %c0_i32 = arith.constant 0 : i32
    %c0_i32_0 = arith.constant 0 : i32
    %c0_i32_1 = arith.constant 0 : i32
    return %c0_i32, %c0_i32_0 : i32, i32
  }
  func.func @transform_3(%arg0: i32) -> (i32, i32) {
    %c0_i32 = arith.constant 0 : i32
    %c0_i32_0 = arith.constant 0 : i32
    %c0_i32_1 = arith.constant 0 : i32
    return %c0_i32, %c0_i32_0 : i32, i32
  }
}

</mosaic_0001>

<bundles_post_ra>
// kernel: c3d_tf_forward.9
= control target key start
LH: loop header
LB: loop body
LE: loop exit
PB: predicated region body
PF: predicated region fallthrough
CT: control target
= control target key end

     0   :  { %s821_s12 = smov 0   ;;  %s1000_s0 = inlined_call_operand.vmem [shape: bf16[1024,81], index: 0, kind: input, shape index: {}]   ;;  %s1001_s1 = inlined_call_operand.vmem [shape: bf16[81,16], index: 1, kind: input, shape index: {}]   ;;  %s1002_s2 = inlined_call_operand.vmem [shape: f32[1,16], index: 2, kind: input, shape index: {}]   ;;  %s1003_s3 = inlined_call_operand.vmem [shape: bf16[1024,16], index: 3, kind: output, shape index: {}]  }
   0x1 LB: > { %s632_s13 = sadd.s32 4294967295, %s798_s12   ;;  %p636_p0 = scmp.ge.s32.totalorder %s798_s12, 1  ;;  %s798_s12 = sphi %s821_s12, %s13_s12  }
   0x2   : > { %p138_p1 = scmp.lt.s32.totalorder %s798_s12, 5 }
   0x4   : > { %p139_p2 = pnand %p636_p0, %p138_p1 }
   0x5   : > { %s637_s18 = sshll.u32 (!%p139_p2), %s632_s13, 5 }
   0x6   : > { %142 = sbr.rel (%p139_p2) target bundleno = 238 (0xee), region = 32  ;;  %p163_p3 = scmp.lt.s32.totalorder (!%p139_p2), %s637_s18, 127 }
   0xb   : > { %v217_v0 = vld [vmem:[%s1001_s1 + $0x28] sm:$0x1]  ;;  %vm384_vm0 = vcmask 1040384   ;;  %v800_v2 = vmov 0   ;;  %v763_v6 = vld [vmem:[%s1001_s1 + $0x20] sm:$0xff]  ;;  %v762_v7 = vld [vmem:[%s1001_s1 + $0x18] sm:$0xff] }
   0xc   : > { %v323_v1 = vunpack.c.l.b16 %v217_v0  ;;  %v386_v3 = vsel %vm384_vm0, 65535, %v800_v2  ;;  %v761_v8 = vld [vmem:[%s1001_s1 + $0x10] sm:$0xff]  ;;  %s1005_s18 = smov (!%p163_p3, %s637_s18), 127  ;;  %v760_v9 = vld [vmem:[%s1001_s1 + $0x8] sm:$0xff]  ;;  %v759_v10 = vld [vmem:[%s1001_s1] sm:$0xff]  ;;  %vm335_vm1 = vcmask 662528  }
   0xd   : > { %s638_s25 = sshll.u32 %s1005_s18, 2  ;;  %v892_v27 = vld [vmem:[%s1002_s2] ss:$0 sm:$0xff]  ;;  %vm543_vm2 = vcmask 125952  }
   0xe   : > { %v329_v4 = vpack.c.b16 %v323_v1, %v323_v1  ;;  %s855_s30 = scalar_lea.vmem %s1000_s0, %s638_s25  ;;  %s901_s8 = scalar_lea.vmem %s1003_s3, %s638_s25 }
   0xf   : > { %v743_v11 = vld [vmem:[%s855_s30] sm:$0xff]  ;;  %v744_v15 = vld [vmem:[%s855_s30 + $0x8] sm:$0xff]  ;;  %v745_v19 = vld [vmem:[%s855_s30 + $0x10] sm:$0xff] }
  0x10   : > { %v388_v5 = vand.u32 %v386_v3, %v329_v4  ;;  %v747_v12 = vld [vmem:[%s855_s30 + $0x20] sm:$0xff]  ;;  %v748_v16 = vld [vmem:[%s855_s30 + $0x28] sm:$0xff]  ;;  %v749_v20 = vld [vmem:[%s855_s30 + $0x30] sm:$0xff] }
  0x11   : > { %v751_v13 = vld [vmem:[%s855_s30 + $0x40] sm:$0xff]  ;;  %v752_v17 = vld [vmem:[%s855_s30 + $0x48] sm:$0xff]  ;;  %v753_v21 = vld [vmem:[%s855_s30 + $0x50] sm:$0xff] }
  0x12   : > { %392 = vmatpush.bf16.msra.mxu0 %v388_v5  ;;  %764 = vmatpush.bf16.msra.mxu1 %v388_v5  ;;  %v755_v14 = vld [vmem:[%s855_s30 + $0x60] sm:$0xff]  ;;  %v756_v18 = vld [vmem:[%s855_s30 + $0x68] sm:$0xff]  ;;  %v757_v22 = vld [vmem:[%s855_s30 + $0x70] sm:$0xff] }
  0x13   : > { %765 = vmatpush.bf16.msra.mxu2 %v388_v5  ;;  %766 = vmatpush.bf16.msra.mxu3 %v388_v5  ;;  %v746_v23 = vld [vmem:[%s855_s30 + $0x18] sm:$0xff] }
  0x14   : > { %v750_v24 = vld [vmem:[%s855_s30 + $0x38] sm:$0xff] }
  0x15   : > { %v754_v25 = vld [vmem:[%s855_s30 + $0x58] sm:$0xff] }
  0x16   : > { %393 = vmatpush.bf16.msra.mxu0 %v763_v6  ;;  %767 = vmatpush.bf16.msra.mxu1 %v763_v6  ;;  %v758_v26 = vld [vmem:[%s855_s30 + $0x78] sm:$0xff] }
  0x17   : > { %768 = vmatpush.bf16.msra.mxu2 %v763_v6  ;;  %769 = vmatpush.bf16.msra.mxu3 %v763_v6 }
  0x1a   : > { %394 = vmatpush.bf16.msra.mxu0 %v762_v7  ;;  %770 = vmatpush.bf16.msra.mxu1 %v762_v7 }
  0x1b   : > { %771 = vmatpush.bf16.msra.mxu2 %v762_v7  ;;  %772 = vmatpush.bf16.msra.mxu3 %v762_v7 }
  0x1e   : > { %395 = vmatpush.bf16.msra.mxu0 %v761_v8  ;;  %773 = vmatpush.bf16.msra.mxu1 %v761_v8 }
  0x1f   : > { %774 = vmatpush.bf16.msra.mxu2 %v761_v8  ;;  %775 = vmatpush.bf16.msra.mxu3 %v761_v8 }
  0x22   : > { %396 = vmatpush.bf16.msra.mxu0 %v760_v9  ;;  %776 = vmatpush.bf16.msra.mxu1 %v760_v9 }
  0x23   : > { %777 = vmatpush.bf16.msra.mxu2 %v760_v9  ;;  %778 = vmatpush.bf16.msra.mxu3 %v760_v9 }
  0x26   : > { %397 = vmatpush.bf16.msra.mxu0 %v759_v10  ;;  %779 = vmatpush.bf16.msra.mxu1 %v759_v10 }
  0x27   : > { %780 = vmatpush.bf16.msra.mxu2 %v759_v10  ;;  %781 = vmatpush.bf16.msra.mxu3 %v759_v10 }
  0x29   : > { %725 = vmatmul.msk.bf16.vlgmr.msra.gmra.mxu0 %vm335_vm1, %v743_v11  ;;  %729 = vmatmul.msk.bf16.vlgmr.msra.gmra.mxu1 %vm335_vm1, %v747_v12 }
  0x2a   : > { %733 = vmatmul.msk.bf16.vlgmr.msra.gmra.mxu2 %vm335_vm1, %v751_v13  ;;  %737 = vmatmul.msk.bf16.vlgmr.msra.gmra.mxu3 %vm335_vm1, %v755_v14 }
  0x39   : > { %726 = vmatmul.msk.bf16.gmra.mxu0 %vm335_vm1, %v744_v15  ;;  %730 = vmatmul.msk.bf16.gmra.mxu1 %vm335_vm1, %v748_v16 }
  0x3a   : > { %734 = vmatmul.msk.bf16.gmra.mxu2 %vm335_vm1, %v752_v17  ;;  %738 = vmatmul.msk.bf16.gmra.mxu3 %vm335_vm1, %v756_v18 }
  0x49   : > { %727 = vmatmul.msk.bf16.gmra.mxu0 %vm335_vm1, %v745_v19  ;;  %731 = vmatmul.msk.bf16.gmra.mxu1 %vm335_vm1, %v749_v20 }
  0x4a   : > { %735 = vmatmul.msk.bf16.gmra.mxu2 %vm335_vm1, %v753_v21  ;;  %739 = vmatmul.msk.bf16.gmra.mxu3 %vm335_vm1, %v757_v22 }
  0x59   : > { %728 = vmatmul.msk.bf16.gmra.mxu0 %vm335_vm1, %v746_v23  ;;  %732 = vmatmul.msk.bf16.gmra.mxu1 %vm335_vm1, %v750_v24 }
  0x5a   : > { %736 = vmatmul.msk.bf16.gmra.mxu2 %vm335_vm1, %v754_v25  ;;  %740 = vmatmul.msk.bf16.gmra.mxu3 %vm335_vm1, %v758_v26 }
  0xa6   : > { %v399_v28 = vpop.f32.mrf.mxu0  ;;  %v419_v29 = vpop.f32.mrf.mxu1 }
  0xa7   : > { %v400_v30 = vadd.f32 %v892_v27, %v399_v28  ;;  %v420_v31 = vadd.f32 %v892_v27, %v419_v29 }
  0xa9   : > { %v479_v32 = vmax.f32 %v400_v30, 0.0  ;;  %v487_v33 = vmax.f32 %v420_v31, 0.0 }
  0xab   : > { %v511_v34 = vpack.c.bf16 %v479_v32, %v479_v32  ;;  %v519_v35 = vpack.c.bf16 %v487_v33, %v487_v33 }
  0xad   : > { %544 = vst.msk [vmem:[%s901_s8] sm:$0xf] %vm543_vm2, %v511_v34  ;;  %v439_v36 = vpop.f32.mrf.mxu2  ;;  %v459_v37 = vpop.f32.mrf.mxu3 }
  0xae   : > { %552 = vst.msk [vmem:[%s901_s8 + $0x20] sm:$0xf] %vm543_vm2, %v519_v35  ;;  %v440_v38 = vadd.f32 %v892_v27, %v439_v36  ;;  %v460_v39 = vadd.f32 %v892_v27, %v459_v37  ;;  %v401_v40 = vpop.f32.mrf.mxu0  ;;  %v421_v41 = vpop.f32.mrf.mxu1 }
  0xaf   : > { %v402_v42 = vadd.f32 %v892_v27, %v401_v40  ;;  %v422_v43 = vadd.f32 %v892_v27, %v421_v41 }
  0xb0   : > { %v495_v44 = vmax.f32 %v440_v38, 0.0  ;;  %v503_v45 = vmax.f32 %v460_v39, 0.0 }
  0xb1   : > { %v480_v46 = vmax.f32 %v402_v42, 0.0  ;;  %v488_v47 = vmax.f32 %v422_v43, 0.0 }
  0xb2   : > { %v527_v48 = vpack.c.bf16 %v495_v44, %v495_v44  ;;  %v535_v49 = vpack.c.bf16 %v503_v45, %v503_v45 }
  0xb3   : > { %v512_v50 = vpack.c.bf16 %v480_v46, %v480_v46  ;;  %v520_v51 = vpack.c.bf16 %v488_v47, %v488_v47 }
  0xb4   : > { %560 = vst.msk [vmem:[%s901_s8 + $0x40] sm:$0xf] %vm543_vm2, %v527_v48 }
  0xb5   : > { %568 = vst.msk [vmem:[%s901_s8 + $0x60] sm:$0xf] %vm543_vm2, %v535_v49  ;;  %v441_v52 = vpop.f32.mrf.mxu2  ;;  %v461_v53 = vpop.f32.mrf.mxu3 }
  0xb6   : > { %545 = vst.msk [vmem:[%s901_s8 + $0x4] sm:$0xf] %vm543_vm2, %v512_v50  ;;  %v442_v54 = vadd.f32 %v892_v27, %v441_v52  ;;  %v462_v55 = vadd.f32 %v892_v27, %v461_v53  ;;  %v404_v56 = vpop.f32.mrf.mxu0  ;;  %v424_v57 = vpop.f32.mrf.mxu1 }
  0xb7   : > { %553 = vst.msk [vmem:[%s901_s8 + $0x24] sm:$0xf] %vm543_vm2, %v520_v51  ;;  %v405_v58 = vadd.f32 %v892_v27, %v404_v56  ;;  %v425_v59 = vadd.f32 %v892_v27, %v424_v57 }
  0xb8   : > { %v496_v60 = vmax.f32 %v442_v54, 0.0  ;;  %v504_v61 = vmax.f32 %v462_v55, 0.0 }
  0xb9   : > { %v481_v62 = vmax.f32 %v405_v58, 0.0  ;;  %v489_v63 = vmax.f32 %v425_v59, 0.0 }
  0xba   : > { %v528_v0 = vpack.c.bf16 %v496_v60, %v496_v60  ;;  %v536_v1 = vpack.c.bf16 %v504_v61, %v504_v61 }
  0xbb   : > { %v513_v2 = vpack.c.bf16 %v481_v62, %v481_v62  ;;  %v521_v3 = vpack.c.bf16 %v489_v63, %v489_v63 }
  0xbc   : > { %561 = vst.msk [vmem:[%s901_s8 + $0x44] sm:$0xf] %vm543_vm2, %v528_v0 }
  0xbd   : > { %569 = vst.msk [vmem:[%s901_s8 + $0x64] sm:$0xf] %vm543_vm2, %v536_v1  ;;  %v444_v4 = vpop.f32.mrf.mxu2  ;;  %v464_v5 = vpop.f32.mrf.mxu3 }
  0xbe   : > { %546 = vst.msk [vmem:[%s901_s8 + $0x8] sm:$0xf] %vm543_vm2, %v513_v2  ;;  %v445_v6 = vadd.f32 %v892_v27, %v444_v4  ;;  %v465_v7 = vadd.f32 %v892_v27, %v464_v5  ;;  %v406_v8 = vpop.f32.mrf.mxu0  ;;  %v426_v9 = vpop.f32.mrf.mxu1 }
  0xbf   : > { %554 = vst.msk [vmem:[%s901_s8 + $0x28] sm:$0xf] %vm543_vm2, %v521_v3  ;;  %v407_v10 = vadd.f32 %v892_v27, %v406_v8  ;;  %v427_v11 = vadd.f32 %v892_v27, %v426_v9 }
  0xc0   : > { %v497_v12 = vmax.f32 %v445_v6, 0.0  ;;  %v505_v13 = vmax.f32 %v465_v7, 0.0 }
  0xc1   : > { %v482_v14 = vmax.f32 %v407_v10, 0.0  ;;  %v490_v15 = vmax.f32 %v427_v11, 0.0 }
  0xc2   : > { %v529_v16 = vpack.c.bf16 %v497_v12, %v497_v12  ;;  %v537_v17 = vpack.c.bf16 %v505_v13, %v505_v13 }
  0xc3   : > { %v514_v18 = vpack.c.bf16 %v482_v14, %v482_v14  ;;  %v522_v19 = vpack.c.bf16 %v490_v15, %v490_v15 }
  0xc4   : > { %562 = vst.msk [vmem:[%s901_s8 + $0x48] sm:$0xf] %vm543_vm2, %v529_v16 }
  0xc5   : > { %570 = vst.msk [vmem:[%s901_s8 + $0x68] sm:$0xf] %vm543_vm2, %v537_v17  ;;  %v446_v20 = vpop.f32.mrf.mxu2  ;;  %v466_v21 = vpop.f32.mrf.mxu3 }
  0xc6   : > { %547 = vst.msk [vmem:[%s901_s8 + $0xc] sm:$0xf] %vm543_vm2, %v514_v18  ;;  %v447_v22 = vadd.f32 %v892_v27, %v446_v20  ;;  %v467_v23 = vadd.f32 %v892_v27, %v466_v21  ;;  %v409_v24 = vpop.f32.mrf.mxu0  ;;  %v429_v25 = vpop.f32.mrf.mxu1 }
  0xc7   : > { %555 = vst.msk [vmem:[%s901_s8 + $0x2c] sm:$0xf] %vm543_vm2, %v522_v19  ;;  %v410_v26 = vadd.f32 %v892_v27, %v409_v24  ;;  %v430_v28 = vadd.f32 %v892_v27, %v429_v25 }
  0xc8   : > { %v498_v29 = vmax.f32 %v447_v22, 0.0  ;;  %v506_v30 = vmax.f32 %v467_v23, 0.0 }
  0xc9   : > { %v483_v31 = vmax.f32 %v410_v26, 0.0  ;;  %v491_v32 = vmax.f32 %v430_v28, 0.0 }
  0xca   : > { %v530_v33 = vpack.c.bf16 %v498_v29, %v498_v29  ;;  %v538_v34 = vpack.c.bf16 %v506_v30, %v506_v30 }
  0xcb   : > { %v515_v35 = vpack.c.bf16 %v483_v31, %v483_v31  ;;  %v523_v36 = vpack.c.bf16 %v491_v32, %v491_v32 }
  0xcc   : > { %563 = vst.msk [vmem:[%s901_s8 + $0x4c] sm:$0xf] %vm543_vm2, %v530_v33 }
  0xcd   : > { %571 = vst.msk [vmem:[%s901_s8 + $0x6c] sm:$0xf] %vm543_vm2, %v538_v34  ;;  %v449_v37 = vpop.f32.mrf.mxu2  ;;  %v469_v38 = vpop.f32.mrf.mxu3 }
  0xce   : > { %548 = vst.msk [vmem:[%s901_s8 + $0x10] sm:$0xf] %vm543_vm2, %v515_v35  ;;  %v450_v39 = vadd.f32 %v892_v27, %v449_v37  ;;  %v470_v40 = vadd.f32 %v892_v27, %v469_v38  ;;  %v411_v41 = vpop.f32.mrf.mxu0  ;;  %v431_v42 = vpop.f32.mrf.mxu1 }
  0xcf   : > { %556 = vst.msk [vmem:[%s901_s8 + $0x30] sm:$0xf] %vm543_vm2, %v523_v36  ;;  %v412_v43 = vadd.f32 %v892_v27, %v411_v41  ;;  %v432_v44 = vadd.f32 %v892_v27, %v431_v42 }
  0xd0   : > { %v499_v45 = vmax.f32 %v450_v39, 0.0  ;;  %v507_v46 = vmax.f32 %v470_v40, 0.0 }
  0xd1   : > { %v484_v47 = vmax.f32 %v412_v43, 0.0  ;;  %v492_v48 = vmax.f32 %v432_v44, 0.0 }
  0xd2   : > { %v531_v49 = vpack.c.bf16 %v499_v45, %v499_v45  ;;  %v539_v50 = vpack.c.bf16 %v507_v46, %v507_v46 }
  0xd3   : > { %v516_v51 = vpack.c.bf16 %v484_v47, %v484_v47  ;;  %v524_v52 = vpack.c.bf16 %v492_v48, %v492_v48 }
  0xd4   : > { %564 = vst.msk [vmem:[%s901_s8 + $0x50] sm:$0xf] %vm543_vm2, %v531_v49 }
  0xd5   : > { %572 = vst.msk [vmem:[%s901_s8 + $0x70] sm:$0xf] %vm543_vm2, %v539_v50  ;;  %v451_v53 = vpop.f32.mrf.mxu2  ;;  %v471_v54 = vpop.f32.mrf.mxu3 }
  0xd6   : > { %549 = vst.msk [vmem:[%s901_s8 + $0x14] sm:$0xf] %vm543_vm2, %v516_v51  ;;  %v452_v55 = vadd.f32 %v892_v27, %v451_v53  ;;  %v472_v56 = vadd.f32 %v892_v27, %v471_v54  ;;  %v414_v57 = vpop.f32.mrf.mxu0  ;;  %v434_v58 = vpop.f32.mrf.mxu1 }
  0xd7   : > { %557 = vst.msk [vmem:[%s901_s8 + $0x34] sm:$0xf] %vm543_vm2, %v524_v52  ;;  %v415_v59 = vadd.f32 %v892_v27, %v414_v57  ;;  %v435_v60 = vadd.f32 %v892_v27, %v434_v58 }
  0xd8   : > { %v500_v61 = vmax.f32 %v452_v55, 0.0  ;;  %v508_v62 = vmax.f32 %v472_v56, 0.0 }
  0xd9   : > { %v485_v63 = vmax.f32 %v415_v59, 0.0  ;;  %v493_v0 = vmax.f32 %v435_v60, 0.0 }
  0xda   : > { %v532_v1 = vpack.c.bf16 %v500_v61, %v500_v61  ;;  %v540_v2 = vpack.c.bf16 %v508_v62, %v508_v62 }
  0xdb   : > { %v517_v3 = vpack.c.bf16 %v485_v63, %v485_v63  ;;  %v525_v4 = vpack.c.bf16 %v493_v0, %v493_v0 }
  0xdc   : > { %565 = vst.msk [vmem:[%s901_s8 + $0x54] sm:$0xf] %vm543_vm2, %v532_v1 }
  0xdd   : > { %573 = vst.msk [vmem:[%s901_s8 + $0x74] sm:$0xf] %vm543_vm2, %v540_v2  ;;  %v454_v5 = vpop.f32.mrf.mxu2  ;;  %v474_v6 = vpop.f32.mrf.mxu3 }
  0xde   : > { %550 = vst.msk [vmem:[%s901_s8 + $0x18] sm:$0xf] %vm543_vm2, %v517_v3  ;;  %v455_v7 = vadd.f32 %v892_v27, %v454_v5  ;;  %v475_v8 = vadd.f32 %v892_v27, %v474_v6  ;;  %v416_v9 = vpop.f32.mrf.mxu0  ;;  %v436_v10 = vpop.f32.mrf.mxu1 }
  0xdf   : > { %558 = vst.msk [vmem:[%s901_s8 + $0x38] sm:$0xf] %vm543_vm2, %v525_v4  ;;  %v417_v11 = vadd.f32 %v892_v27, %v416_v9  ;;  %v437_v12 = vadd.f32 %v892_v27, %v436_v10 }
  0xe0   : > { %v501_v13 = vmax.f32 %v455_v7, 0.0  ;;  %v509_v14 = vmax.f32 %v475_v8, 0.0 }
  0xe1   : > { %v486_v15 = vmax.f32 %v417_v11, 0.0  ;;  %v494_v16 = vmax.f32 %v437_v12, 0.0 }
  0xe2   : > { %v533_v17 = vpack.c.bf16 %v501_v13, %v501_v13  ;;  %v541_v18 = vpack.c.bf16 %v509_v14, %v509_v14 }
  0xe3   : > { %v518_v19 = vpack.c.bf16 %v486_v15, %v486_v15  ;;  %v526_v20 = vpack.c.bf16 %v494_v16, %v494_v16 }
  0xe4   : > { %566 = vst.msk [vmem:[%s901_s8 + $0x58] sm:$0xf] %vm543_vm2, %v533_v17 }
  0xe5   : > { %574 = vst.msk [vmem:[%s901_s8 + $0x78] sm:$0xf] %vm543_vm2, %v541_v18  ;;  %v456_v21 = vpop.f32.mrf.mxu2  ;;  %v476_v22 = vpop.f32.mrf.mxu3 }
  0xe6   : > { %551 = vst.msk [vmem:[%s901_s8 + $0x1c] sm:$0xf] %vm543_vm2, %v518_v19  ;;  %v457_v23 = vadd.f32 %v892_v27, %v456_v21  ;;  %v477_v24 = vadd.f32 %v892_v27, %v476_v22 }
  0xe7   : > { %559 = vst.msk [vmem:[%s901_s8 + $0x3c] sm:$0xf] %vm543_vm2, %v526_v20 }
  0xe8   : > { %v502_v25 = vmax.f32 %v457_v23, 0.0  ;;  %v510_v26 = vmax.f32 %v477_v24, 0.0 }
  0xea   : > { %v534_v28 = vpack.c.bf16 %v502_v25, %v502_v25  ;;  %v542_v29 = vpack.c.bf16 %v510_v26, %v510_v26 }
  0xec   : > { %567 = vst.msk [vmem:[%s901_s8 + $0x5c] sm:$0xf] %vm543_vm2, %v534_v28 }
  0xed   : > { %575 = vst.msk [vmem:[%s901_s8 + $0x7c] sm:$0xf] %vm543_vm2, %v542_v29 }
  0xee PF: > { %s13_s12 = sadd.s32 1, %s798_s12  }
  0xef   : > { %p10_p4 = scmp.ge.s32.totalorder %s13_s12, 6  }
  0xf1   :  { %12 = sbr.rel (!%p10_p4) target bundleno = 1 (0x1), region = 62 }

// kernel: tile.28
= control target key start
LH: loop header
LB: loop body
LE: loop exit
PB: predicated region body
PF: predicated region fallthrough
CT: control target
= control target key end

     0   :  { %s22_s0 = inlined_call_operand.vmem [shape: f32[16], index: 0, kind: input, shape index: {}]   ;;  %s23_s1 = inlined_call_operand.vmem [shape: f32[8,16], index: 1, kind: output, shape index: {}]  }
   0x1   :  { %v4_v0 = vld [vmem:[%s22_s0] ss:$0 sm:$0xff] }
   0x2   :  { %5 = vst [vmem:[%s23_s1] sm:$0xff] %v4_v0 }

// kernel: tile.29
= control target key start
LH: loop header
LB: loop body
LE: loop exit
PB: predicated region body
PF: predicated region fallthrough
CT: control target
= control target key end

     0   :  { %s67_s10 = smov 112   ;;  %s68_s11 = smov 80   ;;  %vm3_vm0 = vcmask 130048   ;;  %vm9_vm1 = vcmask 1048448   ;;  %vm15_vm2 = vcmask 917248   ;;  %vm21_vm3 = vcmask 786048   ;;  %s111_s0 = inlined_call_operand.vmem [shape: f32[8,16], index: 0, kind: input, shape index: {}]   ;;  %s112_s1 = inlined_call_operand.vmem [shape: f32[1,128], index: 1, kind: output, shape index: {}]  }
   0x1   :  { %v53_v0 = vld [vmem:[%s111_s0 + $0x7] sm:$0x1]   ;;  %v55_v1 = vld [vmem:[%s111_s0 + $0x5] sm:$0x1]   ;;  %v57_v2 = vld [vmem:[%s111_s0 + $0x3] sm:$0x1]  }
   0x2   :  { %7 = vrot.lane.b32.xlu0 %v53_v0, %s67_s10  ;;  %19 = vrot.lane.b32.xlu1 %v55_v1, %s68_s11  ;;  %s69_s14 = smov 48   ;;  %v54_v3 = vld [vmem:[%s111_s0 + $0x6] sm:$0x1]   ;;  %v56_v4 = vld [vmem:[%s111_s0 + $0x4] sm:$0x1]   ;;  %s70_s21 = smov 96  }
   0x3   :  { %31 = vrot.lane.b32.xlu2 %v57_v2, %s69_s14  ;;  %v58_v5 = vld [vmem:[%s111_s0 + $0x2] sm:$0x1]   ;;  %s71_s22 = smov 64   ;;  %s72_s23 = smov 32   ;;  %v59_v6 = vld [vmem:[%s111_s0 + $0x1] sm:$0x1]  }
   0x4   :  { %s73_s26 = smov 16   ;;  %v2_v7 = vld [vmem:[%s111_s0] sm:$0x1]   ;;  %vm27_vm4 = vcmask 654848   ;;  %vm33_vm5 = vcmask 523648   ;;  %vm39_vm6 = vcmask 392448  }
   0x5   :  { %4 = vst.msk [vmem:[#allocation0] sm:$0x1] %vm3_vm0, %v2_v7   ;;  %vm45_vm7 = vcmask 261248  }
   0xa   :  { %13 = vrot.lane.b32.xlu0 %v54_v3, %s70_s21  ;;  %25 = vrot.lane.b32.xlu1 %v56_v4, %s71_s22 }
   0xb   :  { %37 = vrot.lane.b32.xlu2 %v58_v5, %s72_s23 }
  0x12   :  { %43 = vrot.lane.b32.xlu0 %v59_v6, %s73_s26 }
  0x5d   :  { %v32_v8 = vpop.permute.xlu2 %31  }
  0x65   :  { %v38_v9 = vpop.permute.xlu2 %37  }
  0x74   :  { %v8_v10 = vpop.permute.xlu0 %7   ;;  %v20_v11 = vpop.permute.xlu1 %19  }
  0x75   :  { %10 = vst.msk [vmem:[#allocation0] sm:$0x1] %vm9_vm1, %v8_v10  }
  0x7c   :  { %v14_v12 = vpop.permute.xlu0 %13   ;;  %v26_v13 = vpop.permute.xlu1 %25  }
  0x7d   :  { %16 = vst.msk [vmem:[#allocation0] sm:$0x1] %vm15_vm2, %v14_v12  }
  0x7e   :  { %22 = vst.msk [vmem:[#allocation0] sm:$0x1] %vm21_vm3, %v20_v11  }
  0x7f   :  { %28 = vst.msk [vmem:[#allocation0] sm:$0x1] %vm27_vm4, %v26_v13  }
  0x80   :  { %34 = vst.msk [vmem:[#allocation0] sm:$0x1] %vm33_vm5, %v32_v8  }
  0x81   :  { %40 = vst.msk [vmem:[#allocation0] sm:$0x1] %vm39_vm6, %v38_v9  }
  0x84   :  { %v44_v14 = vpop.permute.xlu0 %43  }
  0x85   :  { %46 = vst.msk [vmem:[#allocation0] sm:$0x1] %vm45_vm7, %v44_v14  }
  0x8c   :  { %v49_v15 = vld [vmem:[#allocation0] sm:$0x1] }
  0x8d   :  { %52 = vst [vmem:[%s112_s1] sm:$0x1] %v49_v15 }

// kernel: c3d_tf_forward.10
= control target key start
LH: loop header
LB: loop body
LE: loop exit
PB: predicated region body
PF: predicated region fallthrough
CT: control target
= control target key end

     0   :  { %s2695_s12 = smov 0   ;;  %s3629_s0 = inlined_call_operand.vmem [shape: bf16[2,10,10,160], index: 0, kind: input, shape index: {}]   ;;  %s3630_s1 = inlined_call_operand.vmem [shape: bf16[9,160,128], index: 1, kind: input, shape index: {}]   ;;  %s3631_s2 = inlined_call_operand.vmem [shape: f32[1,128], index: 2, kind: input, shape index: {}]   ;;  %s3632_s3 = inlined_call_operand.vmem [shape: bf16[2,64,128], index: 3, kind: output, shape index: {}]  }
   0x1 LB: > { %s1967_s13 = sadd.s32 4294967295, %s2673_s12   ;;  %p1971_p0 = scmp.ge.s32.totalorder %s2673_s12, 1  ;;  %s2673_s12 = sphi %s2695_s12, %s13_s12  }
   0x2   : > { %p137_p1 = scmp.lt.s32.totalorder %s2673_s12, 3 }
   0x4   : > { %p138_p2 = pnand %p1971_p0, %p137_p1 }
   0x6   : > { %141 = sbr.rel (%p138_p2) target bundleno = 461 (0x1cd), region = 32 }
   0xb   : > { %v2551_v0 = vld [vmem:[%s3630_s1 + $0x88] sm:$0xff]  ;;  %v2541_v1 = vld [vmem:[%s3630_s1 + $0x38] sm:$0xff]  ;;  %p161_p3 = scmp.lt.s32.totalorder %s1967_s13, 1  ;;  %v2550_v4 = vld [vmem:[%s3630_s1 + $0x80] sm:$0xff]  ;;  %vm446_vm0 = vcmask 261120   ;;  %vm292_vm1 = vcmask 1046528  }
   0xc   : > { %v2712_v2 = vld [vmem:[%s3630_s1 + $0x48] sm:$0xff]  ;;  %v2553_v3 = vld [vmem:[%s3630_s1 + $0x98] sm:$0xff]  ;;  %459 = vmatpush.bf16.msra.mxu0 %v2551_v0  ;;  %589 = vmatpush.bf16.msra.mxu2 %v2541_v1  ;;  %v2540_v5 = vld [vmem:[%s3630_s1 + $0x30] sm:$0xff]  ;;  %vm647_vm2 = vcmask 1045504  }
   0xd   : > { %s3666_s13 = smov (!%p161_p3, %s1967_s13), 1  ;;  %2647 = vmatpush.bf16.msra.mxu3 %v2712_v2  ;;  %494 = vmatpush.bf16.msra.mxu1 %v2553_v3  ;;  %v2729_v6 = vld [vmem:[%s3630_s1 + $0x40] sm:$0xff]  ;;  %v2552_v7 = vld [vmem:[%s3630_s1 + $0x90] sm:$0xff]  ;;  %v2563_v8 = vld [vmem:[%s3630_s1 + $0xe8] sm:$0xff] }
   0xe   : > { %s2657_s30 = smul.u32 160, %s3666_s13  ;;  %v2561_v9 = vld [vmem:[%s3630_s1 + $0xd8] sm:$0xff]  ;;  %v2539_v11 = vld [vmem:[%s3630_s1 + $0x28] sm:$0xff]  ;;  %v2560_v12 = vld [vmem:[%s3630_s1 + $0xd0] sm:$0xff] }
   0xf   : > { %v2549_v10 = vld [vmem:[%s3630_s1 + $0x78] sm:$0xff]  ;;  %v2548_v26 = vld [vmem:[%s3630_s1 + $0x70] sm:$0xff]  ;;  %v2538_v27 = vld [vmem:[%s3630_s1 + $0x20] sm:$0xff] }
  0x10   : > { %460 = vmatpush.bf16.msra.mxu0 %v2550_v4  ;;  %590 = vmatpush.bf16.msra.mxu2 %v2540_v5  ;;  %s2750_s16 = scalar_lea.vmem %s3629_s0, %s2657_s30  ;;  %v2562_v33 = vld [vmem:[%s3630_s1 + $0xe0] sm:$0xff]  ;;  %v2547_v38 = vld [vmem:[%s3630_s1 + $0x68] sm:$0xff]  ;;  %v2537_v41 = vld [vmem:[%s3630_s1 + $0x18] sm:$0xff]  ;;  %s2533_s30 = sshll.u32 %s3666_s13, 5 }
  0x11   : > { %2648 = vmatpush.bf16.msra.mxu3 %v2729_v6  ;;  %495 = vmatpush.bf16.msra.mxu1 %v2552_v7  ;;  %v176_v13 = vld [vmem:[%s2750_s16 + $0x20] sm:$0xff]  ;;  %v2758_v14 = vld [vmem:[%s2750_s16 + $0x30] sm:$0xff]  ;;  %v2767_v18 = vld [vmem:[%s2750_s16 + $0x8] sm:$0x11]  ;;  %s3608_s6 = scalar_lea.vmem %s3632_s3, %s2533_s30 }
  0x12   : > { %v172_v15 = vld [vmem:[%s2750_s16] sm:$0xff]  ;;  %v2761_v16 = vunpack.c.h.bf16 %v176_v13  ;;  %v2764_v17 = vunpack.c.h.bf16 %v2758_v14  ;;  %v174_v19 = vld [vmem:[%s2750_s16 + $0x10] sm:$0xff]  ;;  %v2771_v20 = vld [vmem:[%s2750_s16 + $0x18] sm:$0x11]  ;;  %v195_v22 = vunpack.c.h.bf16 %v2767_v18  ;;  %v2843_v52 = vunpack.c.l.bf16 %v176_v13 }
  0x13   : > { %v2773_v21 = vunpack.c.h.bf16 %v172_v15  ;;  %v2776_v23 = vunpack.c.h.bf16 %v174_v19  ;;  %v199_v24 = vunpack.c.h.bf16 %v2771_v20  ;;  %v2790_v28 = vld [vmem:[%s2750_s16 + $0x28] sm:$0x11]  ;;  %v2820_v42 = vld [vmem:[%s2750_s16 + $0x38] sm:$0x11]  ;;  %v2826_v44 = vld [vmem:[%s2750_s16 + $0x40] sm:$0xff]  ;;  %v2831_v46 = vunpack.c.l.bf16 %v174_v19 }
  0x14   : > { %461 = vmatpush.bf16.msra.mxu0 %v2549_v10  ;;  %591 = vmatpush.bf16.msra.mxu2 %v2539_v11  ;;  %v2781_v25 = vpack.c.bf16 %v2764_v17, %v2761_v16  ;;  %v297_v30 = vrot.slane %v195_v22, 1  ;;  %v203_v34 = vunpack.c.h.bf16 %v2790_v28  ;;  %v308_v35 = vrot.slane %v2761_v16, 1  ;;  %v2559_v39 = vld [vmem:[%s3630_s1 + $0xc8] sm:$0xff]  ;;  %v2835_v48 = vld [vmem:[%s2750_s16 + $0x50] sm:$0xff]  ;;  %v2558_v51 = vld [vmem:[%s3630_s1 + $0xc0] sm:$0xff] }
  0x15   : > { %848 = vmatpush.bf16.msrb.mxu3 %v2563_v8  ;;  %813 = vmatpush.bf16.msrb.mxu1 %v2561_v9  ;;  %v296_v29 = vrot.slane %v2773_v21, 1  ;;  %v302_v31 = vrot.slane %v2776_v23, 1  ;;  %v303_v32 = vrot.slane %v199_v24, 1  ;;  %v198_v47 = vunpack.c.l.bf16 %v2771_v20  ;;  %v2546_v53 = vld [vmem:[%s3630_s1 + $0x60] sm:$0xff]  ;;  %v2536_v54 = vld [vmem:[%s3630_s1 + $0x10] sm:$0xff]  ;;  %v2557_v0 = vld [vmem:[%s3630_s1 + $0xb8] sm:$0xff] }
  0x16   : > { %2080 = vmatmul.msk.bf16.vlgmr.msra.gmra.mxu3 %vm446_vm0, %v2781_v25  ;;  %v309_v43 = vrot.slane %v203_v34, 1  ;;  %v207_v49 = vunpack.c.h.bf16 %v2820_v42  ;;  %v2851_v55 = vunpack.c.l.bf16 %v172_v15  ;;  %v194_v56 = vunpack.c.l.bf16 %v2767_v18  ;;  %v2545_v1 = vld [vmem:[%s3630_s1 + $0x58] sm:$0xff]  ;;  %v2535_v3 = vld [vmem:[%s3630_s1 + $0x8] sm:$0xff]  ;;  %v2556_v15 = vld [vmem:[%s3630_s1 + $0xb0] sm:$0xff] }
  0x17   : > { %v298_v36 = vsel %vm292_vm1, %v296_v29, %v297_v30  ;;  %v2807_v37 = vsel %vm292_vm1, %v302_v31, %v303_v32  ;;  %v2855_v57 = vunpack.c.h.bf16 %v2826_v44  ;;  %v2858_v58 = vunpack.c.h.bf16 %v2835_v48  ;;  %v2544_v19 = vld [vmem:[%s3630_s1 + $0x50] sm:$0xff]  ;;  %v2571_v29 = vld [vmem:[%s3630_s1 + $0x128] sm:$0xff] }
  0x18   : > { %462 = vmatpush.bf16.msra.mxu0 %v2548_v26  ;;  %v358_v40 = vpack.c.bf16 %v2807_v37, %v298_v36  ;;  %592 = vmatpush.bf16.msra.mxu2 %v2538_v27  ;;  %v2829_v45 = vsel %vm292_vm1, %v308_v35, %v309_v43  ;;  %v299_v59 = vrot.slane %v2831_v46, 1  ;;  %v300_v60 = vrot.slane %v198_v47, 1  ;;  %v2534_v26 = vld [vmem:[%s3630_s1] sm:$0xff]  ;;  %v2583_v31 = vld [vmem:[%s3630_s1 + $0x188] sm:$0xff]  ;;  %v2926_v36 = vld [vmem:[%s2750_s16 + $0x58] sm:$0x11] }
  0x19   : > { %814 = vmatpush.bf16.msrb.mxu1 %v2560_v12  ;;  %849 = vmatpush.bf16.msrb.mxu3 %v2562_v33  ;;  %v202_v61 = vunpack.c.l.bf16 %v2790_v28  ;;  %v314_v62 = vrot.slane %v2764_v17, 1  ;;  %v315_v63 = vrot.slane %v207_v49, 1  ;;  %v293_v4 = vrot.slane %v2851_v55, 1  ;;  %v2923_v35 = vld [vmem:[%s2750_s16 + $0x48] sm:$0x11]  ;;  %v2564_v28 = vld [vmem:[%s3630_s1 + $0xf0] sm:$0xff] }
  0x1a   : > { %2035 = vmatmul.msk.bf16.vlgmr.msra.gmra.mxu1 %vm446_vm0, %v358_v40  ;;  %v294_v5 = vrot.slane %v194_v56, 1  ;;  %v305_v7 = vrot.slane %v2843_v52, 1  ;;  %v2884_v9 = vpack.c.bf16 %v2858_v58, %v2855_v57  ;;  %v2887_v10 = vsel %vm292_vm1, %v299_v59, %v300_v60  ;;  %v2938_v40 = vld [vmem:[%s2750_s16 + $0x70] sm:$0xff]  ;;  %v2554_v59 = vld [vmem:[%s3630_s1 + $0xa0] sm:$0xff] }
  0x1b   : > { %v306_v8 = vrot.slane %v202_v61, 1  ;;  %v2893_v12 = vsel %vm292_vm1, %v314_v62, %v315_v63  ;;  %v232_v33 = vpack.c.bf16 %v2831_v46, %v2851_v55  ;;  %v3637_v43 = vunpack.c.h.bf16 %v2926_v36 }
  0x1c   : > { %463 = vmatpush.bf16.msra.mxu0 %v2547_v38  ;;  %593 = vmatpush.bf16.msra.mxu2 %v2537_v41  ;;  %v295_v27 = vsel %vm292_vm1, %v293_v4, %v294_v5  ;;  %v2914_v30 = vpack.c.bf16 %v2893_v12, %v2829_v45  ;;  %v2570_v38 = vld [vmem:[%s3630_s1 + $0x120] sm:$0xff]  ;;  %v211_v41 = vunpack.c.h.bf16 %v2923_v35  ;;  %v2959_v62 = vunpack.c.h.bf16 %v2938_v40 }
  0x1d   : > { %815 = vmatpush.bf16.msrb.mxu1 %v2559_v39  ;;  %v2890_v11 = vsel %vm292_vm1, %v305_v7, %v306_v8  ;;  %v357_v32 = vpack.c.bf16 %v2887_v10, %v295_v27  ;;  %1194 = vmatpush.bf16.msra.mxu3 %v2583_v31  ;;  %v2935_v39 = vld [vmem:[%s2750_s16 + $0x60] sm:$0xff]  ;;  %v657_v5 = vrot.slane %v2776_v23, 2  ;;  %v2568_v7 = vld [vmem:[%s3630_s1 + $0x110] sm:$0xff]  ;;  %v663_v8 = vrot.slane %v2761_v16, 2 }
  0x1e   : > { %v2956_v60 = vunpack.c.h.bf16 %v2935_v39  ;;  %v321_v63 = vrot.slane %v211_v41, 1 }
  0x20   : > { %464 = vmatpush.bf16.msra.mxu0 %v2546_v53  ;;  %594 = vmatpush.bf16.msra.mxu2 %v2536_v54  ;;  %v3635_v53 = vunpack.c.l.bf16 %v2820_v42  ;;  %v2569_v54 = vld [vmem:[%s3630_s1 + $0x118] sm:$0xff] }
  0x21   : > { %816 = vmatpush.bf16.msrb.mxu1 %v2558_v51  ;;  %v2946_v51 = vunpack.c.l.bf16 %v2758_v14  ;;  %v320_v14 = vrot.slane %v2855_v57, 1 }
  0x22   : > { %v312_v4 = vrot.slane %v3635_v53, 1 }
  0x24   : > { %465 = vmatpush.bf16.msra.mxu0 %v2545_v1  ;;  %595 = vmatpush.bf16.msra.mxu2 %v2535_v3  ;;  %v327_v1 = vrot.slane %v3637_v43, 1  ;;  %v311_v3 = vrot.slane %v2946_v51, 1 }
  0x25   : > { %817 = vmatpush.bf16.msrb.mxu1 %v2557_v0  ;;  %v326_v0 = vrot.slane %v2858_v58, 1 }
  0x26   : > { %2081 = vmatmul.msk.bf16.gmra.mxu3 %vm446_vm0, %v2884_v9  ;;  %v2991_v27 = vsel %vm292_vm1, %v311_v3, %v312_v4  ;;  %v2581_v3 = vld [vmem:[%s3630_s1 + $0x178] sm:$0xff]  ;;  %v3037_v4 = vunpack.c.l.bf16 %v2826_v44 }
  0x28   : > { %466 = vmatpush.bf16.msra.mxu0 %v2544_v19  ;;  %596 = vmatpush.bf16.msra.mxu2 %v2534_v26  ;;  %v2982_v19 = vpack.c.bf16 %v2959_v62, %v2956_v60  ;;  %v2988_v26 = vsel %vm292_vm1, %v326_v0, %v327_v1  ;;  %v2567_v1 = vld [vmem:[%s3630_s1 + $0x108] sm:$0xff] }
  0x29   : > { %818 = vmatpush.bf16.msrb.mxu1 %v2556_v15  ;;  %v664_v15 = vrot.slane %v203_v34, 2 }
  0x2a   : > { %2036 = vmatmul.msk.bf16.gmra.mxu1 %vm446_vm0, %v2914_v30 }
  0x2b   : > { %467 = vmatmul.bf16.vlgmr.msra.gmra.mxu0 %v357_v32  ;;  %597 = vmatmul.bf16.vlgmr.msra.gmra.mxu2 %v232_v33  ;;  %v2997_v34 = vsel %vm647_vm2, %v663_v8, %v664_v15  ;;  %v3009_v33 = vpack.c.bf16 %v2991_v27, %v2890_v11  ;;  %v2580_v8 = vld [vmem:[%s3630_s1 + $0x170] sm:$0xff]  ;;  %v332_v15 = vrot.slane %v2956_v60, 1  ;;  %v338_v32 = vrot.slane %v2959_v62, 1 }
  0x2c   : > { %624 = vmatpush.bf16.msrb.mxu2 %v2712_v2  ;;  %980 = vmatpush.bf16.msrb.mxu0 %v2571_v29  ;;  %v2555_v2 = vld [vmem:[%s3630_s1 + $0xa8] sm:$0xff] }
  0x2d   : > { %819 = vmatpush.bf16.msrb.mxu1 %v2555_v2  ;;  %v3016_v2 = vld [vmem:[%s2750_s16 + $0x68] sm:$0x11] }
  0x30   : > { %981 = vmatpush.bf16.msrb.mxu0 %v2570_v38  ;;  %625 = vmatpush.bf16.msrb.mxu2 %v2729_v6  ;;  %v658_v6 = vrot.slane %v199_v24, 2  ;;  %v2985_v24 = vsel %vm292_vm1, %v320_v14, %v321_v63  ;;  %v3013_v38 = vpack.c.bf16 %v2946_v51, %v2843_v52  ;;  %v652_v14 = vrot.slane %v195_v22, 2 }
  0x31   : > { %820 = vmatpush.bf16.msrb.mxu1 %v2554_v59  ;;  %v3003_v31 = vpack.c.bf16 %v2988_v26, %v2985_v24  ;;  %v651_v59 = vrot.slane %v2773_v21, 2  ;;  %v3633_v63 = vunpack.c.h.bf16 %v3016_v2  ;;  %v3040_v22 = vunpack.c.l.bf16 %v2835_v48 }
  0x32   : > { %v2994_v29 = vsel %vm647_vm2, %v657_v5, %v658_v6  ;;  %v3636_v5 = vunpack.c.l.bf16 %v2923_v35  ;;  %v3640_v6 = vunpack.c.l.bf16 %v2926_v36 }
  0x33   : > { %3645 = vst [vmem:[#allocation2_spill] sm:$0xff] %v3003_v31  ;;  %v653_v44 = vsel %vm647_vm2, %v651_v59, %v652_v14  ;;  %v333_v48 = vrot.slane %v3633_v63, 1  ;;  %v323_v50 = vrot.slane %v3040_v22, 1  ;;  %v2565_v14 = vld [vmem:[%s3630_s1 + $0xf8] sm:$0xff] }
  0x34   : > { %982 = vmatpush.bf16.msrb.mxu0 %v2569_v54  ;;  %v3019_v54 = vld [vmem:[%s2750_s16 + $0x78] sm:$0x11]  ;;  %v318_v13 = vrot.slane %v3636_v5, 1  ;;  %v324_v59 = vrot.slane %v3640_v6, 1  ;;  %v713_v63 = vpack.c.bf16 %v2994_v29, %v653_v44  ;;  %v660_v44 = vrot.slane %v2843_v52, 2 }
  0x35   : > { %v3634_v0 = vunpack.c.h.bf16 %v3019_v54  ;;  %1159 = vmatpush.bf16.msra.mxu1 %v2581_v3  ;;  %v317_v3 = vrot.slane %v3037_v4, 1  ;;  %v3648_v6 = vunpack.c.l.bf16 %v2820_v42  ;;  %v2603_v42 = vld [vmem:[%s3630_s1 + $0x228] sm:$0xff] }
  0x36   : > { %2082 = vmatmul.msk.bf16.gmra.mxu3 %vm446_vm0, %v2982_v19  ;;  %v3077_v43 = vsel %vm292_vm1, %v323_v50, %v324_v59  ;;  %v2582_v50 = vld [vmem:[%s3630_s1 + $0x180] sm:$0xff]  ;;  %v2573_v59 = vld [vmem:[%s3630_s1 + $0x138] sm:$0xff] }
  0x37   : > { %v3074_v5 = vsel %vm292_vm1, %v317_v3, %v318_v13  ;;  %1195 = vmatpush.bf16.msra.mxu3 %v2582_v50  ;;  %v2579_v3 = vld [vmem:[%s3630_s1 + $0x168] sm:$0xff]  ;;  %1015 = vmatpush.bf16.msra.mxu2 %v2573_v59  ;;  %v648_v50 = vrot.slane %v2851_v55, 2 }
  0x38   : > { %983 = vmatpush.bf16.msrb.mxu0 %v2568_v7  ;;  %v2566_v7 = vld [vmem:[%s3630_s1 + $0x100] sm:$0xff]  ;;  %v3095_v20 = vpack.c.bf16 %v3077_v43, %v3074_v5 }
  0x39   : > { %1160 = vmatpush.bf16.msra.mxu1 %v2580_v8  ;;  %v655_v8 = vrot.slane %v198_v47, 2  ;;  %v3099_v47 = vpack.c.bf16 %v3040_v22, %v3037_v4 }
  0x3a   : > { %2037 = vmatmul.msk.bf16.gmra.mxu1 %vm446_vm0, %v3003_v31 }
  0x3b   : > { %472 = vmatmul.bf16.gmra.mxu0 %v3009_v33  ;;  %602 = vmatmul.bf16.gmra.mxu2 %v3013_v38 }
  0x3c   : > { %984 = vmatpush.bf16.msrb.mxu0 %v2567_v1  ;;  %v339_v1 = vrot.slane %v3634_v0, 1  ;;  %v3068_v0 = vsel %vm292_vm1, %v332_v15, %v333_v48  ;;  %v661_v15 = vrot.slane %v202_v61, 2  ;;  %v669_v48 = vrot.slane %v2764_v17, 2 }
  0x3d   : > { %1161 = vmatpush.bf16.msra.mxu1 %v2579_v3 }
  0x3e   : > { %v3071_v53 = vsel %vm292_vm1, %v338_v32, %v339_v1  ;;  %v3108_v32 = vsel %vm647_vm2, %v660_v44, %v661_v15  ;;  %v670_v1 = vrot.slane %v207_v49, 2  ;;  %v3638_v44 = vunpack.c.l.bf16 %v3019_v54  ;;  %v2578_v49 = vld [vmem:[%s3630_s1 + $0x160] sm:$0xff] }
  0x3f   : > { %v3088_v13 = vpack.c.bf16 %v3071_v53, %v3068_v0 }
  0x40   : > { %985 = vmatpush.bf16.msrb.mxu0 %v2566_v7  ;;  %v654_v7 = vrot.slane %v2831_v46, 2  ;;  %v3137_v15 = vsel %vm647_vm2, %v669_v48, %v670_v1  ;;  %v336_v59 = vrot.slane %v3638_v44, 1 }
  0x41   : > { %3646 = vst [vmem:[#allocation3_spill] sm:$0xff] %v3088_v13  ;;  %1162 = vmatpush.bf16.msra.mxu1 %v2578_v49  ;;  %v3150_v48 = vpack.c.bf16 %v3137_v15, %v2997_v34 }
  0x42   : > { %v3105_v61 = vsel %vm647_vm2, %v654_v7, %v655_v8  ;;  %v3129_v7 = vunpack.c.l.bf16 %v2938_v40  ;;  %v3639_v8 = vunpack.c.l.bf16 %v3016_v2 }
  0x44   : > { %986 = vmatpush.bf16.msrb.mxu0 %v2565_v14  ;;  %v3126_v14 = vunpack.c.l.bf16 %v2935_v39  ;;  %v649_v39 = vrot.slane %v194_v56, 2  ;;  %v335_v3 = vrot.slane %v3129_v7, 1 }
  0x46   : > { %2143 = vmatmul.msk.bf16.vlgmr.msrb.gmra.mxu3 %vm446_vm0, %v713_v63  ;;  %v329_v40 = vrot.slane %v3126_v14, 1  ;;  %v650_v55 = vsel %vm647_vm2, %v648_v50, %v649_v39  ;;  %v3157_v56 = vsel %vm292_vm1, %v335_v3, %v336_v59  ;;  %v3168_v63 = vpack.c.bf16 %v3129_v7, %v3126_v14  ;;  %v2572_v50 = vld [vmem:[%s3630_s1 + $0x130] sm:$0xff] }
  0x47   : > { %v712_v1 = vpack.c.bf16 %v3105_v61, %v650_v55  ;;  %1016 = vmatpush.bf16.msra.mxu2 %v2572_v50  ;;  %v675_v39 = vrot.slane %v2855_v57, 2  ;;  %v3647_v3 = vunpack.c.h.bf16 %v2926_v36  ;;  %v2577_v55 = vld [vmem:[%s3630_s1 + $0x158] sm:$0xff]  ;;  %v2576_v50 = vld [vmem:[%s3630_s1 + $0x150] sm:$0xff]  ;;  %1521 = vmatpush.bf16.msrb.mxu3 %v2603_v42  ;;  %v2574_v42 = vld [vmem:[%s3630_s1 + $0x140] sm:$0xff] }
  0x48   : > { %987 = vmatpush.bf16.msrb.mxu0 %v2564_v28  ;;  %v330_v28 = vrot.slane %v3639_v8, 1  ;;  %1163 = vmatpush.bf16.msra.mxu1 %v2577_v55  ;;  %v666_v8 = vrot.slane %v2946_v51, 2  ;;  %v667_v55 = vrot.slane %v3648_v6, 2  ;;  %v233_v6 = vpack.c.bf16 %v2776_v23, %v2773_v21 }
  0x49   : > { %v682_v59 = vrot.slane %v3647_v3, 2 }
  0x4a   : > { %2038 = vmatmul.msk.bf16.gmra.mxu1 %vm446_vm0, %v3088_v13  ;;  %v3154_v18 = vsel %vm292_vm1, %v329_v40, %v330_v28  ;;  %v676_v40 = vrot.slane %v211_v41, 2  ;;  %v681_v28 = vrot.slane %v2858_v58, 2  ;;  %v2590_v41 = vld [vmem:[%s3630_s1 + $0x1c0] sm:$0xff]  ;;  %v3207_v13 = vsel %vm647_vm2, %v666_v8, %v667_v55  ;;  %v2593_v8 = vld [vmem:[%s3630_s1 + $0x1d8] sm:$0xff] }
  0x4b   : > { %477 = vmatmul.bf16.gmra.mxu0 %v3095_v20  ;;  %607 = vmatmul.bf16.gmra.mxu2 %v3099_v47  ;;  %v3164_v49 = vpack.c.bf16 %v3157_v56, %v3154_v18  ;;  %v3652_v55 = vunpack.c.h.bf16 %v3019_v54 }
  0x4c   : > { %v3194_v3 = vsel %vm647_vm2, %v675_v39, %v676_v40  ;;  %v3197_v44 = vsel %vm647_vm2, %v681_v28, %v682_v59  ;;  %1164 = vmatpush.bf16.msra.mxu1 %v2576_v50  ;;  %v3213_v39 = vpack.c.bf16 %v3207_v13, %v3108_v32  ;;  %v879_v40 = vpack.c.bf16 %v2843_v52, %v2831_v46  ;;  %v2575_v46 = vld [vmem:[%s3630_s1 + $0x148] sm:$0xff]  ;;  %v2589_v52 = vld [vmem:[%s3630_s1 + $0x1b8] sm:$0xff] }
  0x4d   : > { %v687_v28 = vrot.slane %v2956_v60, 2  ;;  %v3651_v59 = vunpack.c.h.bf16 %v3016_v2  ;;  %v694_v21 = vrot.slane %v3652_v55, 2  ;;  %v672_v55 = vrot.slane %v3037_v4, 2 }
  0x4e   : > { %3650 = vst [vmem:[#allocation5_spill] sm:$0xff] %v3213_v39 }
  0x4f   : > { %v688_v50 = vrot.slane %v3651_v59, 2 }
  0x50   : > { %1165 = vmatpush.bf16.msra.mxu1 %v2575_v46 }
  0x54   : > { %1166 = vmatpush.bf16.msra.mxu1 %v2574_v42 }
  0x56   : > { %2144 = vmatmul.msk.bf16.gmra.mxu3 %vm446_vm0, %v3150_v48 }
  0x5a   : > { %821 = vmatmul.bf16.vlgmr.msrb.gmra.mxu1 %v712_v1  ;;  %v2591_v1 = vld [vmem:[%s3630_s1 + $0x1c8] sm:$0xff] }
  0x5b   : > { %482 = vmatmul.bf16.gmra.mxu0 %v3164_v49  ;;  %612 = vmatmul.bf16.gmra.mxu2 %v3168_v63 }
  0x5c   : > { %1334 = vmatpush.bf16.msra.mxu0 %v2591_v1  ;;  %v3204_v1 = vpack.c.bf16 %v3197_v44, %v3194_v3 }
  0x5e   : > { %3649 = vst [vmem:[#allocation4_spill] sm:$0xff] %v3204_v1 }
  0x60   : > { %1335 = vmatpush.bf16.msra.mxu0 %v2590_v41  ;;  %v693_v41 = vrot.slane %v2959_v62, 2 }
  0x62   : > { %v3249_v59 = vsel %vm647_vm2, %v693_v41, %v694_v21  ;;  %v2601_v41 = vld [vmem:[%s3630_s1 + $0x218] sm:$0xff]  ;;  %v3656_v21 = vunpack.c.l.bf16 %v3019_v54 }
  0x63   : > { %1486 = vmatpush.bf16.msrb.mxu1 %v2601_v41  ;;  %v2602_v41 = vld [vmem:[%s3630_s1 + $0x220] sm:$0xff] }
  0x64   : > { %1336 = vmatpush.bf16.msra.mxu0 %v2589_v52  ;;  %v678_v52 = vrot.slane %v3040_v22, 2  ;;  %v691_v42 = vrot.slane %v3656_v21, 2  ;;  %1522 = vmatpush.bf16.msrb.mxu3 %v2602_v41  ;;  %v3658_v21 = vpack.c.bf16 %v2890_v11, %v2887_v10  ;;  %v2596_v10 = vld [vmem:[%s3630_s1 + $0x1f0] sm:$0xff]  ;;  %v2610_v11 = vld [vmem:[%s3630_s1 + $0x260] sm:$0xff] }
  0x66   : > { %2145 = vmatmul.msk.bf16.gmra.mxu3 %vm446_vm0, %v3204_v1 }
  0x6a   : > { %826 = vmatmul.bf16.gmra.mxu1 %v3213_v39  ;;  %v3654_v39 = vunpack.c.l.bf16 %v2926_v36  ;;  %v881_v36 = vpack.c.bf16 %v3037_v4, %v2946_v51  ;;  %v684_v51 = vrot.slane %v3126_v14, 2  ;;  %v3655_v4 = vunpack.c.l.bf16 %v3016_v2  ;;  %v2585_v2 = vld [vmem:[%s3630_s1 + $0x198] sm:$0xff] }
  0x6b   : > { %2079 = vmatmul.msk.bf16.vlgmr.msrb.gmra.mxu2 %vm446_vm0, %v233_v6  ;;  %988 = vmatmul.bf16.vlgmr.msrb.gmra.mxu0 %v879_v40  ;;  %v2588_v6 = vld [vmem:[%s3630_s1 + $0x1b0] sm:$0xff]  ;;  %v3246_v40 = vsel %vm647_vm2, %v687_v28, %v688_v50 }
  0x6c   : > { %1369 = vmatpush.bf16.msrb.mxu2 %v2593_v8  ;;  %v3653_v8 = vunpack.c.l.bf16 %v2923_v35  ;;  %v679_v1 = vrot.slane %v3654_v39, 2  ;;  %1337 = vmatpush.bf16.msra.mxu0 %v2588_v6  ;;  %v3259_v31 = vpack.c.bf16 %v3249_v59, %v3246_v40  ;;  %v880_v39 = vpack.c.bf16 %v2761_v16, %v2776_v23  ;;  %v2586_v6 = vld [vmem:[%s3630_s1 + $0x1a0] sm:$0xff] }
  0x6d   : > { %v685_v16 = vrot.slane %v3655_v4, 2  ;;  %v690_v23 = vrot.slane %v3129_v7, 2 }
  0x6e   : > { %v673_v46 = vrot.slane %v3653_v8, 2  ;;  %v3265_v50 = vsel %vm647_vm2, %v678_v52, %v679_v1  ;;  %v2587_v1 = vld [vmem:[%s3630_s1 + $0x1a8] sm:$0xff]  ;;  %v2600_v8 = vld [vmem:[%s3630_s1 + $0x210] sm:$0xff]  ;;  %v3657_v52 = vpack.c.bf16 %v2829_v45, %v2807_v37 }
  0x6f   : > { %v3304_v54 = vsel %vm647_vm2, %v684_v51, %v685_v16  ;;  %1487 = vmatpush.bf16.msrb.mxu1 %v2600_v8  ;;  %v2584_v37 = vld [vmem:[%s3630_s1 + $0x190] sm:$0xff]  ;;  %v2599_v45 = vld [vmem:[%s3630_s1 + $0x208] sm:$0xff]  ;;  %v884_v16 = vpack.c.bf16 %v2956_v60, %v2858_v58  ;;  %v1060_v8 = vpack.c.bf16 %v3074_v5, %v2991_v27  ;;  %v3659_v27 = vpack.c.bf16 %v3108_v32, %v3105_v61 }
  0x70   : > { %v3262_v28 = vsel %vm647_vm2, %v672_v55, %v673_v46  ;;  %1338 = vmatpush.bf16.msra.mxu0 %v2587_v1  ;;  %v2592_v55 = vld [vmem:[%s3630_s1 + $0x1d0] sm:$0xff]  ;;  %v3307_v46 = vsel %vm647_vm2, %v690_v23, %v691_v42  ;;  %v882_v1 = vpack.c.bf16 %v2855_v57, %v2764_v17  ;;  %v188_v17 = vld [vmem:[%s2750_s16 + $0x80] sm:$0xff]  ;;  %v1063_v42 = vpack.c.bf16 %v3068_v0, %v2988_v26  ;;  %v2623_v26 = vld [vmem:[%s3630_s1 + $0x2c8] sm:$0xff] }
  0x71   : > { %v3271_v35 = vpack.c.bf16 %v3265_v50, %v3262_v28  ;;  %1370 = vmatpush.bf16.msrb.mxu2 %v2592_v55  ;;  %v2598_v57 = vld [vmem:[%s3630_s1 + $0x200] sm:$0xff]  ;;  %v3373_v55 = vld [vmem:[%s2750_s16 + $0x88] sm:$0x11] }
  0x73   : > { %1488 = vmatpush.bf16.msrb.mxu1 %v2599_v45  ;;  %v2609_v45 = vld [vmem:[%s3630_s1 + $0x258] sm:$0xff] }
  0x74   : > { %1339 = vmatpush.bf16.msra.mxu0 %v2586_v6  ;;  %v3370_v6 = vunpack.c.h.bf16 %v188_v17 }
  0x76   : > { %2146 = vmatmul.msk.bf16.gmra.mxu3 %vm446_vm0, %v3259_v31  ;;  %v1053_v5 = vrot.slane %v3370_v6, 1 }
  0x77   : > { %1489 = vmatpush.bf16.msrb.mxu1 %v2598_v57 }
  0x78   : > { %1340 = vmatpush.bf16.msra.mxu0 %v2585_v2  ;;  %v227_v2 = vunpack.c.h.bf16 %v3373_v55 }
  0x7a   : > { %831 = vmatmul.bf16.gmra.mxu1 %v3271_v35 }
  0x7b   : > { %993 = vmatmul.bf16.gmra.mxu0 %v881_v36  ;;  %2207 = vmatmul.msk.bf16.vlgmr.msra.gmra.mxu2 %vm446_vm0, %v880_v39  ;;  %v3315_v36 = vpack.c.bf16 %v3307_v46, %v3304_v54  ;;  %v883_v39 = vpack.c.bf16 %v3126_v14, %v3040_v22  ;;  %v1061_v22 = vpack.c.bf16 %v2985_v24, %v2893_v12  ;;  %v3338_v14 = vunpack.c.l.bf16 %v188_v17  ;;  %v2597_v12 = vld [vmem:[%s3630_s1 + $0x1f8] sm:$0xff]  ;;  %v2611_v24 = vld [vmem:[%s3630_s1 + $0x268] sm:$0xff] }
  0x7c   : > { %1341 = vmatpush.bf16.msra.mxu0 %v2584_v37  ;;  %1490 = vmatpush.bf16.msrb.mxu1 %v2597_v12  ;;  %v2595_v37 = vld [vmem:[%s3630_s1 + $0x1e8] sm:$0xff] }
  0x7d   : > { %v885_v4 = vpack.c.bf16 %v3338_v14, %v3129_v7  ;;  %v2613_v7 = vld [vmem:[%s3630_s1 + $0x278] sm:$0xff] }
  0x7e   : > { %1685 = vmatpush.bf16.msra.mxu2 %v2613_v7  ;;  %v1235_v7 = vpack.c.bf16 %v3262_v28, %v3207_v13  ;;  %v2621_v13 = vld [vmem:[%s3630_s1 + $0x2b8] sm:$0xff] }
  0x80   : > { %1650 = vmatpush.bf16.msrb.mxu0 %v2611_v24  ;;  %1491 = vmatpush.bf16.msrb.mxu1 %v2596_v10 }
  0x84   : > { %1651 = vmatpush.bf16.msrb.mxu0 %v2610_v11  ;;  %1492 = vmatpush.bf16.msrb.mxu1 %v2595_v37  ;;  %v2612_v37 = vld [vmem:[%s3630_s1 + $0x270] sm:$0xff] }
  0x85   : > { %1686 = vmatpush.bf16.msra.mxu2 %v2612_v37 }
  0x86   : > { %2271 = vmatmul.msk.bf16.vlgmr.msra.gmra.mxu3 %vm446_vm0, %v3657_v52 }
  0x87   : > { %1845 = vmatpush.bf16.msra.mxu3 %v2623_v26  ;;  %v226_v26 = vunpack.c.l.bf16 %v3373_v55 }
  0x88   : > { %1652 = vmatpush.bf16.msrb.mxu0 %v2609_v45  ;;  %v2620_v45 = vld [vmem:[%s3630_s1 + $0x2b0] sm:$0xff] }
  0x8a   : > { %836 = vmatmul.bf16.gmra.mxu1 %v3315_v36 }
  0x8b   : > { %998 = vmatmul.bf16.gmra.mxu0 %v883_v39  ;;  %2208 = vmatmul.msk.bf16.gmra.mxu2 %vm446_vm0, %v882_v1  ;;  %v886_v39 = vpack.c.bf16 %v3370_v6, %v2959_v62  ;;  %v1054_v62 = vrot.slane %v227_v2, 1 }
  0x8d   : > { %v3402_v61 = vsel %vm292_vm1, %v1053_v5, %v1054_v62 }
  0x8e   : > { %v1065_v12 = vpack.c.bf16 %v3402_v61, %v3071_v53  ;;  %v3660_v53 = vpack.c.bf16 %v2997_v34, %v2994_v29  ;;  %v1051_v29 = vrot.slane %v226_v26, 1  ;;  %v2606_v34 = vld [vmem:[%s3630_s1 + $0x240] sm:$0xff] }
  0x96   : > { %2272 = vmatmul.msk.bf16.gmra.mxu3 %vm446_vm0, %v1061_v22 }
  0x97   : > { %v497_v51 = vpop.f32.mrf.mxu1 }
  0x99   : > { %v3345_v23 = vpop.f32.mrf.mxu3 }
  0x9a   : > { %1167 = vmatmul.bf16.vlgmr.msra.gmra.mxu1 %v3658_v21  ;;  %v2608_v21 = vld [vmem:[%s3630_s1 + $0x250] sm:$0xff] }
  0x9b   : > { %1003 = vmatmul.bf16.gmra.mxu0 %v885_v4  ;;  %2209 = vmatmul.msk.bf16.gmra.mxu2 %vm446_vm0, %v884_v16  ;;  %v2594_v16 = vld [vmem:[%s3630_s1 + $0x1e0] sm:$0xff] }
  0x9c   : > { %1493 = vmatpush.bf16.msrb.mxu1 %v2594_v16  ;;  %1653 = vmatpush.bf16.msrb.mxu0 %v2608_v21  ;;  %v1237_v21 = vpack.c.bf16 %v3304_v54, %v3265_v50 }
  0x9f   : > { %v499_v58 = vpop.f32.mrf.mxu1 }
  0xa0   : > { %2649 = vmatpush.bf16.msra.mxu1 %v2621_v13 }
  0xa1   : > { %v3357_v60 = vpop.f32.mrf.mxu3 }
  0xa4   : > { %2650 = vmatpush.bf16.msra.mxu1 %v2620_v45 }
  0xa6   : > { %2273 = vmatmul.msk.bf16.gmra.mxu3 %vm446_vm0, %v1063_v42 }
  0xa7   : > { %v502_v52 = vpop.f32.mrf.mxu1 }
  0xa8   : > { %v468_v0 = vpop.f32.mrf.mxu0 }
  0xa9   : > { %v498_v1 = vadd.f32 %v497_v51, %v468_v0  ;;  %v3384_v41 = vpop.f32.mrf.mxu3  ;;  %v1050_v0 = vrot.slane %v3338_v14, 1 }
  0xaa   : > { %1172 = vmatmul.bf16.gmra.mxu1 %v1060_v8 }
  0xab   : > { %2210 = vmatmul.msk.bf16.gmra.mxu2 %vm446_vm0, %v886_v39  ;;  %1342 = vmatmul.bf16.vlgmr.msra.gmra.mxu0 %v3659_v27 }
  0xae   : > { %v598_v17 = vpop.f32.mrf.mxu2 }
  0xaf   : > { %v504_v57 = vpop.f32.mrf.mxu1  ;;  %v3399_v22 = vadd.f32 %v598_v17, %v498_v1  ;;  %v2605_v17 = vld [vmem:[%s3630_s1 + $0x238] sm:$0xff] }
  0xb0   : > { %v470_v32 = vpop.f32.mrf.mxu0 }
  0xb1   : > { %v500_v51 = vadd.f32 %v499_v58, %v470_v32  ;;  %v3404_v4 = vpop.f32.mrf.mxu3  ;;  %v1062_v58 = vpack.c.bf16 %v3154_v18, %v3077_v43  ;;  %v2607_v43 = vld [vmem:[%s3630_s1 + $0x248] sm:$0xff]  ;;  %v3453_v32 = vsel %vm292_vm1, %v1050_v0, %v1051_v29 }
  0xb2   : > { %1654 = vmatpush.bf16.msrb.mxu0 %v2607_v43 }
  0xb6   : > { %2274 = vmatmul.msk.bf16.gmra.mxu3 %vm446_vm0, %v1065_v12  ;;  %v600_v24 = vpop.f32.mrf.mxu2  ;;  %1655 = vmatpush.bf16.msrb.mxu0 %v2606_v34  ;;  %v1236_v12 = vpack.c.bf16 %v3194_v3, %v3137_v15  ;;  %v2619_v15 = vld [vmem:[%s3630_s1 + $0x2a8] sm:$0xff] }
  0xb7   : > { %v507_v10 = vpop.f32.mrf.mxu1  ;;  %v3417_v11 = vadd.f32 %v600_v24, %v500_v51  ;;  %v2604_v24 = vld [vmem:[%s3630_s1 + $0x230] sm:$0xff]  ;;  %2651 = vmatpush.bf16.msra.mxu1 %v2619_v15 }
  0xb8   : > { %v473_v42 = vpop.f32.mrf.mxu0 }
  0xb9   : > { %v503_v8 = vadd.f32 %v502_v52, %v473_v42  ;;  %v3421_v39 = vpop.f32.mrf.mxu3 }
  0xba   : > { %1177 = vmatmul.bf16.gmra.mxu1 %v1062_v58  ;;  %1656 = vmatpush.bf16.msrb.mxu0 %v2605_v17  ;;  %v1228_v17 = vrot.slane %v3370_v6, 2 }
  0xbb   : > { %1347 = vmatmul.bf16.gmra.mxu0 %v1235_v7  ;;  %2335 = vmatmul.msk.bf16.vlgmr.msrb.gmra.mxu2 %vm446_vm0, %v3660_v53 }
  0xbe   : > { %v603_v18 = vpop.f32.mrf.mxu2  ;;  %1657 = vmatpush.bf16.msrb.mxu0 %v2604_v24 }
  0xbf   : > { %v509_v28 = vpop.f32.mrf.mxu1  ;;  %v604_v52 = vadd.f32 %v603_v18, %v503_v8  ;;  %v1226_v8 = vrot.slane %v226_v26, 2  ;;  %v2618_v18 = vld [vmem:[%s3630_s1 + $0x2a0] sm:$0xff] }
  0xc0   : > { %v475_v1 = vpop.f32.mrf.mxu0  ;;  %2652 = vmatpush.bf16.msra.mxu1 %v2618_v18 }
  0xc1   : > { %v3439_v27 = vadd.f32 %v3345_v23, %v604_v52  ;;  %v505_v5 = vadd.f32 %v504_v57, %v475_v1  ;;  %v3441_v62 = vpop.f32.mrf.mxu3  ;;  %v1064_v57 = vpack.c.bf16 %v3453_v32, %v3157_v56  ;;  %v2622_v56 = vld [vmem:[%s3630_s1 + $0x2c0] sm:$0xff] }
  0xc2   : > { %1810 = vmatpush.bf16.msra.mxu0 %v2621_v13  ;;  %1846 = vmatpush.bf16.msra.mxu3 %v2622_v56 }
  0xc6   : > { %2399 = vmatmul.msk.bf16.vlgmr.msrb.gmra.mxu3 %vm446_vm0, %v2781_v25  ;;  %v605_v23 = vpop.f32.mrf.mxu2  ;;  %1811 = vmatpush.bf16.msra.mxu0 %v2620_v45 }
  0xc7   : > { %v512_v51 = vpop.f32.mrf.mxu1  ;;  %v606_v16 = vadd.f32 %v605_v23, %v505_v5 }
  0xc8   : > { %v478_v58 = vpop.f32.mrf.mxu0 }
  0xc9   : > { %v3467_v7 = vadd.f32 %v3357_v60, %v606_v16  ;;  %v508_v25 = vadd.f32 %v507_v10, %v478_v58  ;;  %v851_v42 = vpop.f32.mrf.mxu3  ;;  %v1225_v10 = vrot.slane %v3338_v14, 2 }
  0xca   : > { %1182 = vmatmul.bf16.gmra.mxu1 %v1064_v57  ;;  %1812 = vmatpush.bf16.msra.mxu0 %v2619_v15 }
  0xcb   : > { %1352 = vmatmul.bf16.gmra.mxu0 %v1237_v21  ;;  %2336 = vmatmul.msk.bf16.gmra.mxu2 %vm446_vm0, %v1236_v12  ;;  %v3484_v52 = vsel %vm647_vm2, %v1225_v10, %v1226_v8  ;;  %v2616_v21 = vld [vmem:[%s3630_s1 + $0x290] sm:$0xff] }
  0xce   : > { %v608_v3 = vpop.f32.mrf.mxu2  ;;  %1813 = vmatpush.bf16.msra.mxu0 %v2618_v18 }
  0xcf   : > { %v514_v50 = vpop.f32.mrf.mxu1  ;;  %v609_v54 = vadd.f32 %v608_v3, %v508_v25  ;;  %v190_v3 = vld [vmem:[%s2750_s16 + $0x90] sm:$0xff] }
  0xd0   : > { %v480_v60 = vpop.f32.mrf.mxu0 }
  0xd1   : > { %v3478_v53 = vadd.f32 %v3384_v41, %v609_v54  ;;  %v510_v43 = vadd.f32 %v509_v28, %v480_v60  ;;  %v853_v13 = vpop.f32.mrf.mxu3  ;;  %v1239_v41 = vpack.c.bf16 %v3484_v52, %v3307_v46  ;;  %v1238_v28 = vpack.c.bf16 %v3246_v40, %v3197_v44 }
  0xd6   : > { %2400 = vmatmul.msk.bf16.gmra.mxu3 %vm446_vm0, %v2884_v9  ;;  %v610_v0 = vpop.f32.mrf.mxu2  ;;  %v2617_v9 = vld [vmem:[%s3630_s1 + $0x298] sm:$0xff] }
  0xd7   : > { %v822_v26 = vpop.f32.mrf.mxu1  ;;  %v611_v29 = vadd.f32 %v610_v0, %v510_v43  ;;  %2653 = vmatpush.bf16.msra.mxu1 %v2617_v9  ;;  %1814 = vmatpush.bf16.msra.mxu0 %v2617_v9  ;;  %v2614_v43 = vld [vmem:[%s3630_s1 + $0x280] sm:$0xff]  ;;  %v3545_v9 = vunpack.c.l.bf16 %v190_v3 }
  0xd8   : > { %v852_v34 = vadd.f32 %v851_v42, %v822_v26  ;;  %v483_v1 = vpop.f32.mrf.mxu0 }
  0xd9   : > { %v3493_v5 = vadd.f32 %v3404_v4, %v611_v29  ;;  %v513_v37 = vadd.f32 %v512_v51, %v483_v1  ;;  %v856_v45 = vpop.f32.mrf.mxu3  ;;  %v1229_v4 = vrot.slane %v227_v2, 2 }
  0xda   : > { %1494 = vmatmul.bf16.vlgmr.msrb.gmra.mxu1 %v3013_v38 }
  0xdb   : > { %1357 = vmatmul.bf16.gmra.mxu0 %v1239_v41  ;;  %2337 = vmatmul.msk.bf16.gmra.mxu2 %vm446_vm0, %v1238_v28  ;;  %v3510_v12 = vsel %vm647_vm2, %v1228_v17, %v1229_v4  ;;  %v191_v17 = vld [vmem:[%s2750_s16 + $0x98] sm:$0x11] }
  0xdc   : > { %2654 = vmatpush.bf16.msra.mxu1 %v2616_v21  ;;  %1815 = vmatpush.bf16.msra.mxu0 %v2616_v21  ;;  %v1240_v2 = vpack.c.bf16 %v3510_v12, %v3249_v59  ;;  %v3529_v59 = vunpack.c.h.bf16 %v190_v3  ;;  %v1556_v21 = vrot.slane %v3545_v9, 1 }
  0xde   : > { %v613_v46 = vpop.f32.mrf.mxu2 }
  0xdf   : > { %v824_v44 = vpop.f32.mrf.mxu1  ;;  %v614_v40 = vadd.f32 %v613_v46, %v513_v37 }
  0xe0   : > { %v854_v23 = vadd.f32 %v853_v13, %v824_v44  ;;  %v485_v57 = vpop.f32.mrf.mxu0 }
  0xe1   : > { %v3504_v38 = vadd.f32 %v3421_v39, %v614_v40  ;;  %v515_v51 = vadd.f32 %v514_v50, %v485_v57  ;;  %v858_v16 = vpop.f32.mrf.mxu3 }
  0xe6   : > { %2401 = vmatmul.msk.bf16.gmra.mxu3 %vm446_vm0, %v2982_v19  ;;  %v615_v55 = vpop.f32.mrf.mxu2  ;;  %v2615_v19 = vld [vmem:[%s3630_s1 + $0x288] sm:$0xff] }
  0xe7   : > { %v827_v39 = vpop.f32.mrf.mxu1  ;;  %v616_v24 = vadd.f32 %v615_v55, %v515_v51  ;;  %2655 = vmatpush.bf16.msra.mxu1 %v2615_v19  ;;  %1816 = vmatpush.bf16.msra.mxu0 %v2615_v19 }
  0xe8   : > { %v857_v58 = vadd.f32 %v856_v45, %v827_v39  ;;  %v989_v25 = vpop.f32.mrf.mxu0 }
  0xe9   : > { %v3517_v42 = vadd.f32 %v3441_v62, %v616_v24  ;;  %v861_v56 = vpop.f32.mrf.mxu3 }
  0xea   : > { %v3520_v15 = vadd.f32 %v857_v58, %v3439_v27  ;;  %1499 = vmatmul.bf16.gmra.mxu1 %v3099_v47 }
  0xeb   : > { %2338 = vmatmul.msk.bf16.gmra.mxu2 %vm446_vm0, %v1240_v2  ;;  %1658 = vmatmul.bf16.vlgmr.msrb.gmra.mxu0 %v3009_v33  ;;  %v1401_v33 = vpack.c.bf16 %v3529_v59, %v3370_v6 }
  0xec   : > { %2656 = vmatpush.bf16.msra.mxu1 %v2614_v43  ;;  %1817 = vmatpush.bf16.msra.mxu0 %v2614_v43 }
  0xee   : > { %v627_v62 = vpop.f32.mrf.mxu2 }
  0xef   : > { %v829_v50 = vpop.f32.mrf.mxu1  ;;  %v628_v27 = vadd.f32 %v627_v62, %v3399_v22 }
  0xf0   : > { %v859_v54 = vadd.f32 %v858_v16, %v829_v50  ;;  %v991_v60 = vpop.f32.mrf.mxu0 }
  0xf1   : > { %v871_v47 = vadd.f32 %v852_v34, %v628_v27  ;;  %v863_v10 = vpop.f32.mrf.mxu3 }
  0xf2   : > { %v874_v8 = vadd.f32 %v859_v54, %v3467_v7 }
  0xf6   : > { %2402 = vmatmul.msk.bf16.gmra.mxu3 %vm446_vm0, %v1401_v33  ;;  %v629_v13 = vpop.f32.mrf.mxu2 }
  0xf7   : > { %v832_v18 = vpop.f32.mrf.mxu1  ;;  %v630_v22 = vadd.f32 %v629_v13, %v3417_v11  ;;  %v1559_v13 = vrot.slane %v3529_v59, 1 }
  0xf8   : > { %v862_v0 = vadd.f32 %v861_v56, %v832_v18  ;;  %v994_v26 = vpop.f32.mrf.mxu0 }
  0xf9   : > { %v872_v29 = vadd.f32 %v854_v23, %v630_v22  ;;  %v866_v41 = vpop.f32.mrf.mxu3 }
  0xfa   : > { %v875_v7 = vadd.f32 %v862_v0, %v3478_v53  ;;  %1504 = vmatmul.bf16.gmra.mxu1 %v3168_v63 }
  0xfb   : > { %1663 = vmatmul.bf16.gmra.mxu0 %v3095_v20  ;;  %2463 = vmatmul.msk.bf16.vlgmr.msra.gmra.mxu2 %vm446_vm0, %v2914_v30  ;;  %v1400_v20 = vpack.c.bf16 %v3545_v9, %v3338_v14 }
  0xfe   : > { %v1018_v6 = vpop.f32.mrf.mxu2 }
  0xff   : > { %v834_v28 = vpop.f32.mrf.mxu1  ;;  %v1019_v34 = vadd.f32 %v1018_v6, %v989_v25 }
 0x100   : > { %v864_v1 = vadd.f32 %v863_v10, %v834_v28  ;;  %v996_v37 = vpop.f32.mrf.mxu0 }
 0x101   : > { %v1038_v11 = vadd.f32 %v1019_v34, %v871_v47  ;;  %v868_v45 = vpop.f32.mrf.mxu3 }
 0x102   : > { %v876_v46 = vadd.f32 %v864_v1, %v3493_v5  ;;  %v3661_v5 = vld [vmem:[#allocation2_spill] sm:$0xff] }
 0x106   : > { %2527 = vmatmul.msk.bf16.vlgmr.msra.gmra.mxu3 %vm446_vm0, %v3150_v48  ;;  %v1020_v63 = vpop.f32.mrf.mxu2  ;;  %v230_v48 = vunpack.c.l.bf16 %v191_v17 }
 0x107   : > { %v837_v30 = vpop.f32.mrf.mxu1  ;;  %v1021_v53 = vadd.f32 %v1020_v63, %v991_v60  ;;  %v1719_v63 = vrot.slane %v3529_v59, 2 }
 0x108   : > { %v867_v44 = vadd.f32 %v866_v41, %v837_v30  ;;  %v999_v40 = vpop.f32.mrf.mxu0  ;;  %v1557_v55 = vrot.slane %v230_v48, 1  ;;  %v1716_v30 = vrot.slane %v3545_v9, 2 }
 0x109   : > { %v1039_v4 = vadd.f32 %v1021_v53, %v872_v29  ;;  %v1197_v23 = vpop.f32.mrf.mxu3 }
 0x10a   : > { %v3554_v57 = vadd.f32 %v867_v44, %v3504_v38  ;;  %1509 = vmatmul.bf16.gmra.mxu1 %v1400_v20  ;;  %v1558_v25 = vsel %vm292_vm1, %v1556_v21, %v1557_v55 }
 0x10b   : > { %1668 = vmatmul.bf16.gmra.mxu0 %v3164_v49  ;;  %2464 = vmatmul.msk.bf16.gmra.mxu2 %vm446_vm0, %v3661_v5  ;;  %v3662_v49 = vld [vmem:[#allocation4_spill] sm:$0xff]  ;;  %v1564_v3 = vpack.c.bf16 %v1558_v25, %v3453_v32 }
 0x10e   : > { %v1023_v51 = vpop.f32.mrf.mxu2 }
 0x10f   : > { %v839_v16 = vpop.f32.mrf.mxu1  ;;  %v1024_v14 = vadd.f32 %v1023_v51, %v994_v26 }
 0x110   : > { %v869_v2 = vadd.f32 %v868_v45, %v839_v16  ;;  %v1001_v39 = vpop.f32.mrf.mxu0 }
 0x111   : > { %v1040_v24 = vadd.f32 %v1024_v14, %v3520_v15  ;;  %v1199_v58 = vpop.f32.mrf.mxu3  ;;  %v3663_v15 = vld [vmem:[#allocation3_spill] sm:$0xff] }
 0x112   : > { %v878_v38 = vadd.f32 %v869_v2, %v3517_v42  ;;  %v231_v42 = vunpack.c.h.bf16 %v191_v17 }
 0x114   : > { %v1560_v32 = vrot.slane %v231_v42, 1  ;;  %v1720_v20 = vrot.slane %v231_v42, 2 }
 0x116   : > { %2528 = vmatmul.msk.bf16.gmra.mxu3 %vm446_vm0, %v3662_v49  ;;  %v1025_v56 = vpop.f32.mrf.mxu2  ;;  %v1561_v29 = vsel %vm292_vm1, %v1559_v13, %v1560_v32 }
 0x117   : > { %v1168_v19 = vpop.f32.mrf.mxu1  ;;  %v1026_v62 = vadd.f32 %v1025_v56, %v996_v37  ;;  %v1565_v41 = vpack.c.bf16 %v1561_v29, %v3402_v61  ;;  %v1717_v61 = vrot.slane %v230_v48, 2 }
 0x118   : > { %v1198_v50 = vadd.f32 %v1197_v23, %v1168_v19  ;;  %v1004_v27 = vpop.f32.mrf.mxu0 }
 0x119   : > { %v1041_v54 = vadd.f32 %v1026_v62, %v874_v8  ;;  %v1202_v60 = vpop.f32.mrf.mxu3  ;;  %v1718_v51 = vsel %vm647_vm2, %v1716_v30, %v1717_v61 }
 0x11a   : > { %v1217_v47 = vadd.f32 %v1198_v50, %v1038_v11  ;;  %1823 = vmatmul.bf16.vlgmr.msra.gmra.mxu1 %v3271_v35  ;;  %v1724_v59 = vpack.c.bf16 %v1718_v51, %v3484_v52 }
 0x11b   : > { %1673 = vmatmul.bf16.gmra.mxu0 %v1564_v3  ;;  %2465 = vmatmul.msk.bf16.gmra.mxu2 %vm446_vm0, %v3663_v15 }
 0x11e   : > { %v1028_v10 = vpop.f32.mrf.mxu2 }
 0x11f   : > { %v1170_v33 = vpop.f32.mrf.mxu1  ;;  %v1029_v43 = vadd.f32 %v1028_v10, %v999_v40  ;;  %v1721_v40 = vsel %vm647_vm2, %v1719_v63, %v1720_v20 }
 0x120   : > { %v1200_v18 = vadd.f32 %v1199_v58, %v1170_v33  ;;  %v1006_v22 = vpop.f32.mrf.mxu0  ;;  %v1725_v5 = vpack.c.bf16 %v1721_v40, %v3510_v12 }
 0x121   : > { %v1042_v0 = vadd.f32 %v1029_v43, %v875_v7  ;;  %v1204_v26 = vpop.f32.mrf.mxu3  ;;  %v3664_v7 = vld [vmem:[#allocation5_spill] sm:$0xff] }
 0x122   : > { %v1218_v8 = vadd.f32 %v1200_v18, %v1039_v4 }
 0x126   : > { %2529 = vmatmul.msk.bf16.gmra.mxu3 %vm446_vm0, %v3259_v31  ;;  %v1030_v35 = vpop.f32.mrf.mxu2 }
 0x127   : > { %v1173_v6 = vpop.f32.mrf.mxu1  ;;  %v1031_v28 = vadd.f32 %v1030_v35, %v1001_v39 }
 0x128   : > { %v1203_v34 = vadd.f32 %v1202_v60, %v1173_v6  ;;  %v1343_v1 = vpop.f32.mrf.mxu0 }
 0x129   : > { %v1043_v37 = vadd.f32 %v1031_v28, %v876_v46  ;;  %v1207_v11 = vpop.f32.mrf.mxu3 }
 0x12a   : > { %v1219_v45 = vadd.f32 %v1203_v34, %v1040_v24  ;;  %1828 = vmatmul.bf16.gmra.mxu1 %v3315_v36 }
 0x12b   : > { %2466 = vmatmul.msk.bf16.gmra.mxu2 %vm446_vm0, %v1565_v41  ;;  %1818 = vmatmul.bf16.vlgmr.msra.gmra.mxu0 %v3664_v7 }
 0x12e   : > { %v1033_v31 = vpop.f32.mrf.mxu2 }
 0x12f   : > { %v1175_v53 = vpop.f32.mrf.mxu1  ;;  %v1034_v44 = vadd.f32 %v1033_v31, %v1004_v27 }
 0x130   : > { %v1205_v46 = vadd.f32 %v1204_v26, %v1175_v53  ;;  %v1345_v17 = vpop.f32.mrf.mxu0 }
 0x131   : > { %v1044_v4 = vadd.f32 %v1034_v44, %v3554_v57  ;;  %v1209_v36 = vpop.f32.mrf.mxu3 }
 0x132   : > { %v1220_v23 = vadd.f32 %v1205_v46, %v1041_v54 }
 0x136   : > { %2530 = vmatmul.msk.bf16.gmra.mxu3 %vm446_vm0, %v1725_v5  ;;  %v1035_v9 = vpop.f32.mrf.mxu2 }
 0x137   : > { %v1178_v48 = vpop.f32.mrf.mxu1  ;;  %v1036_v16 = vadd.f32 %v1035_v9, %v1006_v22 }
 0x138   : > { %v1208_v14 = vadd.f32 %v1207_v11, %v1178_v48  ;;  %v1348_v21 = vpop.f32.mrf.mxu0 }
 0x139   : > { %v1045_v55 = vadd.f32 %v1036_v16, %v878_v38  ;;  %v1212_v2 = vpop.f32.mrf.mxu3 }
 0x13a   : > { %v1221_v39 = vadd.f32 %v1208_v14, %v1042_v0  ;;  %1833 = vmatmul.bf16.gmra.mxu1 %v1724_v59 }
 0x13e   : > { %v1372_v57 = vpop.f32.mrf.mxu2 }
 0x13f   : > { %v1180_v24 = vpop.f32.mrf.mxu1  ;;  %v1373_v58 = vadd.f32 %v1372_v57, %v1343_v1 }
 0x140   : > { %v1210_v25 = vadd.f32 %v1209_v36, %v1180_v24  ;;  %v1350_v12 = vpop.f32.mrf.mxu0 }
 0x141   : > { %v1392_v49 = vadd.f32 %v1373_v58, %v1217_v47  ;;  %v1214_v56 = vpop.f32.mrf.mxu3 }
 0x142   : > { %v1222_v3 = vadd.f32 %v1210_v25, %v1043_v37 }
 0x146   : > { %v1374_v52 = vpop.f32.mrf.mxu2 }
 0x147   : > { %v1183_v19 = vpop.f32.mrf.mxu1  ;;  %v1375_v62 = vadd.f32 %v1374_v52, %v1345_v17 }
 0x148   : > { %v1213_v50 = vadd.f32 %v1212_v2, %v1183_v19  ;;  %v1353_v27 = vpop.f32.mrf.mxu0 }
 0x149   : > { %v1393_v54 = vadd.f32 %v1375_v62, %v1218_v8  ;;  %v1524_v60 = vpop.f32.mrf.mxu3 }
 0x14a   : > { %v1223_v15 = vadd.f32 %v1213_v50, %v1044_v4 }
 0x14e   : > { %v1377_v38 = vpop.f32.mrf.mxu2 }
 0x14f   : > { %v1185_v42 = vpop.f32.mrf.mxu1  ;;  %v1378_v10 = vadd.f32 %v1377_v38, %v1348_v21 }
 0x150   : > { %v1215_v33 = vadd.f32 %v1214_v56, %v1185_v42  ;;  %v1355_v43 = vpop.f32.mrf.mxu0 }
 0x151   : > { %v1394_v13 = vadd.f32 %v1378_v10, %v1219_v45  ;;  %v1526_v32 = vpop.f32.mrf.mxu3 }
 0x152   : > { %v1224_v18 = vadd.f32 %v1215_v33, %v1045_v55 }
 0x156   : > { %v1379_v22 = vpop.f32.mrf.mxu2 }
 0x157   : > { %v1495_v47 = vpop.f32.mrf.mxu1  ;;  %v1380_v0 = vadd.f32 %v1379_v22, %v1350_v12 }
 0x158   : > { %v1525_v26 = vadd.f32 %v1524_v60, %v1495_v47  ;;  %v1358_v29 = vpop.f32.mrf.mxu0 }
 0x159   : > { %v1395_v35 = vadd.f32 %v1380_v0, %v1220_v23  ;;  %v1529_v41 = vpop.f32.mrf.mxu3 }
 0x15a   : > { %v1544_v6 = vadd.f32 %v1525_v26, %v1392_v49  ;;  %v3600_v26 = vld [vmem:[%s3631_s2] ss:$0 sm:$0xff] }
 0x15e   : > { %v1382_v28 = vpop.f32.mrf.mxu2 }
 0x15f   : > { %v1497_v8 = vpop.f32.mrf.mxu1  ;;  %v1383_v34 = vadd.f32 %v1382_v28, %v1353_v27 }
 0x160   : > { %v1527_v1 = vadd.f32 %v1526_v32, %v1497_v8  ;;  %v1360_v37 = vpop.f32.mrf.mxu0 }
 0x161   : > { %v1396_v11 = vadd.f32 %v1383_v34, %v1221_v39  ;;  %v1531_v7 = vpop.f32.mrf.mxu3 }
 0x162   : > { %v3585_v63 = vadd.f32 %v1527_v1, %v1393_v54 }
 0x166   : > { %v1384_v45 = vpop.f32.mrf.mxu2 }
 0x167   : > { %v1500_v20 = vpop.f32.mrf.mxu1  ;;  %v1385_v31 = vadd.f32 %v1384_v45, %v1355_v43 }
 0x168   : > { %v1530_v30 = vadd.f32 %v1529_v41, %v1500_v20  ;;  %v1659_v61 = vpop.f32.mrf.mxu0 }
 0x169   : > { %v3587_v53 = vadd.f32 %v1385_v31, %v1222_v3  ;;  %v1534_v44 = vpop.f32.mrf.mxu3 }
 0x16a   : > { %v1546_v40 = vadd.f32 %v1530_v30, %v1394_v13 }
 0x16e   : > { %v1387_v46 = vpop.f32.mrf.mxu2 }
 0x16f   : > { %v1502_v17 = vpop.f32.mrf.mxu1  ;;  %v1388_v4 = vadd.f32 %v1387_v46, %v1358_v29 }
 0x170   : > { %v1661_v36 = vpop.f32.mrf.mxu0  ;;  %v1532_v33 = vadd.f32 %v1531_v7, %v1502_v17 }
 0x171   : > { %v1398_v23 = vadd.f32 %v1388_v4, %v1223_v15  ;;  %v1536_v5 = vpop.f32.mrf.mxu3 }
 0x172   : > { %v1547_v47 = vadd.f32 %v1532_v33, %v1395_v35 }
 0x176   : > { %v1389_v51 = vpop.f32.mrf.mxu2 }
 0x177   : > { %v1505_v59 = vpop.f32.mrf.mxu1  ;;  %v1390_v9 = vadd.f32 %v1389_v51, %v1360_v37 }
 0x178   : > { %v1535_v48 = vadd.f32 %v1534_v44, %v1505_v59  ;;  %v1664_v16 = vpop.f32.mrf.mxu0 }
 0x179   : > { %v3589_v14 = vadd.f32 %v1390_v9, %v1224_v18  ;;  %v1539_v21 = vpop.f32.mrf.mxu3 }
 0x17a   : > { %v1548_v55 = vadd.f32 %v1535_v48, %v1396_v11 }
 0x17e   : > { %v1688_v2 = vpop.f32.mrf.mxu2 }
 0x17f   : > { %v1507_v39 = vpop.f32.mrf.mxu1  ;;  %v1689_v57 = vadd.f32 %v1688_v2, %v1659_v61 }
 0x180   : > { %v1666_v24 = vpop.f32.mrf.mxu0  ;;  %v1537_v44 = vadd.f32 %v1536_v5, %v1507_v39 }
 0x181   : > { %v1708_v58 = vadd.f32 %v1689_v57, %v1544_v6  ;;  %v3591_v25 = vpop.f32.mrf.mxu3 }
 0x182   : > { %v1549_v59 = vadd.f32 %v1537_v44, %v3587_v53 }
 0x186   : > { %v1690_v12 = vpop.f32.mrf.mxu2 }
 0x187   : > { %v1510_v49 = vpop.f32.mrf.mxu1  ;;  %v1691_v46 = vadd.f32 %v1690_v12, %v1661_v36 }
 0x188   : > { %v1540_v56 = vadd.f32 %v1539_v21, %v1510_v49  ;;  %v1669_v3 = vpop.f32.mrf.mxu0 }
 0x189   : > { %v1848_v52 = vpop.f32.mrf.mxu3 }
 0x18a   : > { %v3593_v19 = vadd.f32 %v1540_v56, %v1398_v23 }
 0x18e   : > { %v1693_v62 = vpop.f32.mrf.mxu2 }
 0x18f   : > { %v3595_v50 = vpop.f32.mrf.mxu1  ;;  %v1694_v10 = vadd.f32 %v1693_v62, %v1664_v16  ;;  %v1709_v16 = vadd.f32 %v1691_v46, %v3585_v63 }
 0x190   : > { %v1671_v27 = vpop.f32.mrf.mxu0 }
 0x191   : > { %v1850_v54 = vpop.f32.mrf.mxu3  ;;  %v1710_v13 = vadd.f32 %v1694_v10, %v1546_v40 }
 0x196   : > { %v1695_v60 = vpop.f32.mrf.mxu2 }
 0x197   : > { %v1824_v15 = vpop.f32.mrf.mxu1  ;;  %v1696_v32 = vadd.f32 %v1695_v60, %v1666_v24 }
 0x198   : > { %v1674_v38 = vpop.f32.mrf.mxu0 }
 0x199   : > { %v1853_v42 = vpop.f32.mrf.mxu3  ;;  %v1711_v6 = vadd.f32 %v1696_v32, %v1547_v47 }
 0x19a   : > { %v1854_v43 = vadd.f32 %v1853_v42, %v1824_v15  ;;  %v1542_v42 = vadd.f32 %v3591_v25, %v3595_v50 }
 0x19c   : > { %v1870_v0 = vadd.f32 %v1854_v43, %v1710_v13  ;;  %v1551_v13 = vadd.f32 %v1542_v42, %v3589_v14 }
 0x19e   : > { %v1698_v18 = vpop.f32.mrf.mxu2  ;;  %v1882_v8 = vadd.f32 %v3600_v26, %v1870_v0 }
 0x19f   : > { %v1826_v22 = vpop.f32.mrf.mxu1  ;;  %v1699_v31 = vadd.f32 %v1698_v18, %v1669_v3 }
 0x1a0   : > { %v1676_v29 = vpop.f32.mrf.mxu0  ;;  %v1890_v7 = vmax.f32 %v1882_v8, 0.0 }
 0x1a1   : > { %v1855_v41 = vpop.f32.mrf.mxu3  ;;  %v1712_v17 = vadd.f32 %v1699_v31, %v1548_v55 }
 0x1a2   : > { %v1856_v28 = vadd.f32 %v1855_v41, %v1826_v22 }
 0x1a4   : > { %v1871_v34 = vadd.f32 %v1856_v28, %v1711_v6 }
 0x1a6   : > { %v1883_v1 = vadd.f32 %v3600_v26, %v1871_v34  ;;  %v1700_v11 = vpop.f32.mrf.mxu2 }
 0x1a7   : > { %v1829_v37 = vpop.f32.mrf.mxu1  ;;  %v1701_v4 = vadd.f32 %v1700_v11, %v1671_v27 }
 0x1a8   : > { %v1891_v35 = vmax.f32 %v1883_v1, 0.0  ;;  %v1819_v45 = vpop.f32.mrf.mxu0 }
 0x1a9   : > { %v1858_v20 = vpop.f32.mrf.mxu3  ;;  %v1849_v61 = vadd.f32 %v1848_v52, %v1819_v45  ;;  %v1713_v24 = vadd.f32 %v1701_v4, %v1549_v59 }
 0x1aa   : > { %v2632_v30 = vpack.c.bf16 %v1891_v35, %v1890_v7  ;;  %v1859_v40 = vadd.f32 %v1858_v20, %v1829_v37 }
 0x1ab   : > { %v1868_v23 = vadd.f32 %v1849_v61, %v1708_v58 }
 0x1ac   : > { %2644 = vst [vmem:[%s3608_s6 + $0x8] sm:$0xff] %v2632_v30   ;;  %v1872_v9 = vadd.f32 %v1859_v40, %v1712_v17 }
 0x1ad   : > { %v1880_v5 = vadd.f32 %v3600_v26, %v1868_v23 }
 0x1ae   : > { %v1703_v21 = vpop.f32.mrf.mxu2  ;;  %v1884_v36 = vadd.f32 %v3600_v26, %v1872_v9 }
 0x1af   : > { %v1831_v51 = vpop.f32.mrf.mxu1  ;;  %v1888_v12 = vmax.f32 %v1880_v5, 0.0 }
 0x1b0   : > { %v1821_v48 = vpop.f32.mrf.mxu0  ;;  %v1892_v3 = vmax.f32 %v1884_v36, 0.0 }
 0x1b1   : > { %v1851_v2 = vadd.f32 %v1850_v54, %v1821_v48  ;;  %v1860_v57 = vpop.f32.mrf.mxu3  ;;  %v1704_v54 = vadd.f32 %v1703_v21, %v1674_v38 }
 0x1b2   : > { %v1861_v49 = vadd.f32 %v1860_v57, %v1831_v51 }
 0x1b3   : > { %v1869_v39 = vadd.f32 %v1851_v2, %v1709_v16  ;;  %v1714_v33 = vadd.f32 %v1704_v54, %v3593_v19 }
 0x1b4   : > { %v1873_v55 = vadd.f32 %v1861_v49, %v1713_v24 }
 0x1b5   : > { %v1881_v58 = vadd.f32 %v3600_v26, %v1869_v39 }
 0x1b6   : > { %v1885_v53 = vadd.f32 %v3600_v26, %v1873_v55  ;;  %v1705_v15 = vpop.f32.mrf.mxu2 }
 0x1b7   : > { %v1889_v56 = vmax.f32 %v1881_v58, 0.0  ;;  %v1834_v63 = vpop.f32.mrf.mxu1  ;;  %v1706_v43 = vadd.f32 %v1705_v15, %v1676_v29 }
 0x1b8   : > { %v1893_v52 = vmax.f32 %v1885_v53, 0.0 }
 0x1b9   : > { %v2627_v62 = vpack.c.bf16 %v1889_v56, %v1888_v12  ;;  %v1863_v27 = vpop.f32.mrf.mxu3  ;;  %v1715_v47 = vadd.f32 %v1706_v43, %v1551_v13 }
 0x1ba   : > { %v2637_v60 = vpack.c.bf16 %v1893_v52, %v1892_v3  ;;  %v1864_v10 = vadd.f32 %v1863_v27, %v1834_v63 }
 0x1bb   : > { %2628 = vst [vmem:[%s3608_s6] sm:$0xff] %v2627_v62  }
 0x1bc   : > { %2645 = vst [vmem:[%s3608_s6 + $0x10] sm:$0xff] %v2637_v60   ;;  %v1874_v32 = vadd.f32 %v1864_v10, %v1714_v33 }
 0x1be   : > { %v1886_v38 = vadd.f32 %v3600_v26, %v1874_v32 }
 0x1bf   : > { %v1836_v18 = vpop.f32.mrf.mxu1 }
 0x1c0   : > { %v1894_v28 = vmax.f32 %v1886_v38, 0.0 }
 0x1c1   : > { %v1865_v22 = vpop.f32.mrf.mxu3 }
 0x1c2   : > { %v1866_v0 = vadd.f32 %v1865_v22, %v1836_v18 }
 0x1c4   : > { %v1875_v41 = vadd.f32 %v1866_v0, %v1715_v47 }
 0x1c6   : > { %v1887_v6 = vadd.f32 %v3600_v26, %v1875_v41 }
 0x1c8   : > { %v1895_v25 = vmax.f32 %v1887_v6, 0.0 }
 0x1ca   : > { %v2642_v50 = vpack.c.bf16 %v1895_v25, %v1894_v28 }
 0x1cc   : > { %2646 = vst [vmem:[%s3608_s6 + $0x18] sm:$0xff] %v2642_v50  }
 0x1cd PF: > { %s13_s12 = sadd.s32 1, %s2673_s12  }
 0x1ce   : > { %p10_p4 = scmp.ge.s32.totalorder %s13_s12, 4  }
 0x1d0   :  { %12 = sbr.rel (!%p10_p4) target bundleno = 1 (0x1), region = 70 }

// kernel: c3d_tf_forward.11
= control target key start
LH: loop header
LB: loop body
LE: loop exit
PB: predicated region body
PF: predicated region fallthrough
CT: control target
= control target key end

     0   :  { %s2805_s15 = smov 0   ;;  %s3767_s0 = inlined_call_operand.vmem [shape: bf16[2,10,10,160], index: 0, kind: input, shape index: {}]   ;;  %s3768_s1 = inlined_call_operand.vmem [shape: bf16[9,160,128], index: 1, kind: input, shape index: {}]   ;;  %s3769_s2 = inlined_call_operand.vmem [shape: f32[1,128], index: 2, kind: input, shape index: {}]   ;;  %s3770_s3 = inlined_call_operand.vmem [shape: bf16[2,64,128], index: 3, kind: input, shape index: {}]   ;;  %s3771_s4 = inlined_call_operand.vmem [shape: bf16[2,64,128], index: 4, kind: output, shape index: {}]  }
   0x1 LB: > { %s2050_s16 = sadd.s32 4294967295, %s2778_s15   ;;  %p2054_p0 = scmp.ge.s32.totalorder %s2778_s15, 1  ;;  %s2778_s15 = sphi %s2805_s15, %s14_s15  }
   0x2   : > { %p172_p1 = scmp.lt.s32.totalorder %s2778_s15, 3 }
   0x4   : > { %p173_p2 = pnand %p2054_p0, %p172_p1 }
   0x6   : > { %176 = sbr.rel (%p173_p2) target bundleno = 463 (0x1cf), region = 36 }
   0xb   : > { %v2637_v0 = vld [vmem:[%s3768_s1 + $0x88] sm:$0xff]  ;;  %v2627_v1 = vld [vmem:[%s3768_s1 + $0x38] sm:$0xff]  ;;  %p203_p3 = scmp.lt.s32.totalorder %s2050_s16, 1  ;;  %v2636_v4 = vld [vmem:[%s3768_s1 + $0x80] sm:$0xff]  ;;  %vm493_vm0 = vcmask 261120   ;;  %vm339_vm1 = vcmask 1046528  }
   0xc   : > { %v2822_v2 = vld [vmem:[%s3768_s1 + $0x48] sm:$0xff]  ;;  %v2639_v3 = vld [vmem:[%s3768_s1 + $0x98] sm:$0xff]  ;;  %506 = vmatpush.bf16.msra.mxu0 %v2637_v0  ;;  %636 = vmatpush.bf16.msra.mxu2 %v2627_v1  ;;  %v2626_v5 = vld [vmem:[%s3768_s1 + $0x30] sm:$0xff]  ;;  %vm694_vm2 = vcmask 1045504  }
   0xd   : > { %s3805_s16 = smov (!%p203_p3, %s2050_s16), 1  ;;  %2752 = vmatpush.bf16.msra.mxu3 %v2822_v2  ;;  %541 = vmatpush.bf16.msra.mxu1 %v2639_v3  ;;  %v2839_v6 = vld [vmem:[%s3768_s1 + $0x40] sm:$0xff]  ;;  %v2638_v7 = vld [vmem:[%s3768_s1 + $0x90] sm:$0xff]  ;;  %v2649_v8 = vld [vmem:[%s3768_s1 + $0xe8] sm:$0xff] }
   0xe   : > { %s2762_s7 = smul.u32 160, %s3805_s16  ;;  %v2647_v9 = vld [vmem:[%s3768_s1 + $0xd8] sm:$0xff]  ;;  %v2625_v11 = vld [vmem:[%s3768_s1 + $0x28] sm:$0xff]  ;;  %v2646_v12 = vld [vmem:[%s3768_s1 + $0xd0] sm:$0xff] }
   0xf   : > { %v2635_v10 = vld [vmem:[%s3768_s1 + $0x78] sm:$0xff]  ;;  %v2634_v26 = vld [vmem:[%s3768_s1 + $0x70] sm:$0xff]  ;;  %v2624_v27 = vld [vmem:[%s3768_s1 + $0x20] sm:$0xff] }
  0x10   : > { %507 = vmatpush.bf16.msra.mxu0 %v2636_v4  ;;  %637 = vmatpush.bf16.msra.mxu2 %v2626_v5  ;;  %s2860_s20 = scalar_lea.vmem %s3767_s0, %s2762_s7  ;;  %v2648_v33 = vld [vmem:[%s3768_s1 + $0xe0] sm:$0xff]  ;;  %v2633_v38 = vld [vmem:[%s3768_s1 + $0x68] sm:$0xff]  ;;  %v2623_v41 = vld [vmem:[%s3768_s1 + $0x18] sm:$0xff] }
  0x11   : > { %2753 = vmatpush.bf16.msra.mxu3 %v2839_v6  ;;  %542 = vmatpush.bf16.msra.mxu1 %v2638_v7  ;;  %v223_v13 = vld [vmem:[%s2860_s20 + $0x20] sm:$0xff]  ;;  %v2868_v14 = vld [vmem:[%s2860_s20 + $0x30] sm:$0xff]  ;;  %v2877_v18 = vld [vmem:[%s2860_s20 + $0x8] sm:$0x11] }
  0x12   : > { %v219_v15 = vld [vmem:[%s2860_s20] sm:$0xff]  ;;  %v2871_v16 = vunpack.c.h.bf16 %v223_v13  ;;  %v2874_v17 = vunpack.c.h.bf16 %v2868_v14  ;;  %v221_v19 = vld [vmem:[%s2860_s20 + $0x10] sm:$0xff]  ;;  %v2881_v20 = vld [vmem:[%s2860_s20 + $0x18] sm:$0x11]  ;;  %v242_v22 = vunpack.c.h.bf16 %v2877_v18  ;;  %v2953_v52 = vunpack.c.l.bf16 %v223_v13 }
  0x13   : > { %v2883_v21 = vunpack.c.h.bf16 %v219_v15  ;;  %v2886_v23 = vunpack.c.h.bf16 %v221_v19  ;;  %v246_v24 = vunpack.c.h.bf16 %v2881_v20  ;;  %v2900_v28 = vld [vmem:[%s2860_s20 + $0x28] sm:$0x11]  ;;  %v2930_v42 = vld [vmem:[%s2860_s20 + $0x38] sm:$0x11]  ;;  %v2936_v44 = vld [vmem:[%s2860_s20 + $0x40] sm:$0xff]  ;;  %v2941_v46 = vunpack.c.l.bf16 %v221_v19 }
  0x14   : > { %508 = vmatpush.bf16.msra.mxu0 %v2635_v10  ;;  %638 = vmatpush.bf16.msra.mxu2 %v2625_v11  ;;  %v2891_v25 = vpack.c.bf16 %v2874_v17, %v2871_v16  ;;  %v344_v30 = vrot.slane %v242_v22, 1  ;;  %v250_v34 = vunpack.c.h.bf16 %v2900_v28  ;;  %v355_v35 = vrot.slane %v2871_v16, 1  ;;  %v2645_v39 = vld [vmem:[%s3768_s1 + $0xc8] sm:$0xff]  ;;  %v2945_v48 = vld [vmem:[%s2860_s20 + $0x50] sm:$0xff]  ;;  %v2644_v51 = vld [vmem:[%s3768_s1 + $0xc0] sm:$0xff] }
  0x15   : > { %895 = vmatpush.bf16.msrb.mxu3 %v2649_v8  ;;  %860 = vmatpush.bf16.msrb.mxu1 %v2647_v9  ;;  %v343_v29 = vrot.slane %v2883_v21, 1  ;;  %v349_v31 = vrot.slane %v2886_v23, 1  ;;  %v350_v32 = vrot.slane %v246_v24, 1  ;;  %v245_v47 = vunpack.c.l.bf16 %v2881_v20  ;;  %v2632_v53 = vld [vmem:[%s3768_s1 + $0x60] sm:$0xff]  ;;  %v2622_v54 = vld [vmem:[%s3768_s1 + $0x10] sm:$0xff]  ;;  %v2643_v0 = vld [vmem:[%s3768_s1 + $0xb8] sm:$0xff] }
  0x16   : > { %2165 = vmatmul.msk.bf16.vlgmr.msra.gmra.mxu3 %vm493_vm0, %v2891_v25  ;;  %v356_v43 = vrot.slane %v250_v34, 1  ;;  %v254_v49 = vunpack.c.h.bf16 %v2930_v42  ;;  %v2961_v55 = vunpack.c.l.bf16 %v219_v15  ;;  %v241_v56 = vunpack.c.l.bf16 %v2877_v18  ;;  %v2631_v1 = vld [vmem:[%s3768_s1 + $0x58] sm:$0xff]  ;;  %v2621_v3 = vld [vmem:[%s3768_s1 + $0x8] sm:$0xff]  ;;  %v2642_v15 = vld [vmem:[%s3768_s1 + $0xb0] sm:$0xff] }
  0x17   : > { %v345_v36 = vsel %vm339_vm1, %v343_v29, %v344_v30  ;;  %v2917_v37 = vsel %vm339_vm1, %v349_v31, %v350_v32  ;;  %v2965_v57 = vunpack.c.h.bf16 %v2936_v44  ;;  %v2968_v58 = vunpack.c.h.bf16 %v2945_v48  ;;  %v2630_v19 = vld [vmem:[%s3768_s1 + $0x50] sm:$0xff]  ;;  %v2657_v29 = vld [vmem:[%s3768_s1 + $0x128] sm:$0xff] }
  0x18   : > { %509 = vmatpush.bf16.msra.mxu0 %v2634_v26  ;;  %v405_v40 = vpack.c.bf16 %v2917_v37, %v345_v36  ;;  %639 = vmatpush.bf16.msra.mxu2 %v2624_v27  ;;  %v2939_v45 = vsel %vm339_vm1, %v355_v35, %v356_v43  ;;  %v346_v59 = vrot.slane %v2941_v46, 1  ;;  %v347_v60 = vrot.slane %v245_v47, 1  ;;  %v2620_v26 = vld [vmem:[%s3768_s1] sm:$0xff]  ;;  %v2669_v31 = vld [vmem:[%s3768_s1 + $0x188] sm:$0xff]  ;;  %v3036_v36 = vld [vmem:[%s2860_s20 + $0x58] sm:$0x11] }
  0x19   : > { %861 = vmatpush.bf16.msrb.mxu1 %v2646_v12  ;;  %896 = vmatpush.bf16.msrb.mxu3 %v2648_v33  ;;  %v249_v61 = vunpack.c.l.bf16 %v2900_v28  ;;  %v361_v62 = vrot.slane %v2874_v17, 1  ;;  %v362_v63 = vrot.slane %v254_v49, 1  ;;  %v340_v4 = vrot.slane %v2961_v55, 1  ;;  %v3033_v35 = vld [vmem:[%s2860_s20 + $0x48] sm:$0x11]  ;;  %v2650_v28 = vld [vmem:[%s3768_s1 + $0xf0] sm:$0xff] }
  0x1a   : > { %2120 = vmatmul.msk.bf16.vlgmr.msra.gmra.mxu1 %vm493_vm0, %v405_v40  ;;  %v341_v5 = vrot.slane %v241_v56, 1  ;;  %v352_v7 = vrot.slane %v2953_v52, 1  ;;  %v2994_v9 = vpack.c.bf16 %v2968_v58, %v2965_v57  ;;  %v2997_v10 = vsel %vm339_vm1, %v346_v59, %v347_v60  ;;  %v3048_v40 = vld [vmem:[%s2860_s20 + $0x70] sm:$0xff]  ;;  %v2640_v59 = vld [vmem:[%s3768_s1 + $0xa0] sm:$0xff] }
  0x1b   : > { %v353_v8 = vrot.slane %v249_v61, 1  ;;  %v3003_v12 = vsel %vm339_vm1, %v361_v62, %v362_v63  ;;  %v279_v33 = vpack.c.bf16 %v2941_v46, %v2961_v55  ;;  %v3776_v43 = vunpack.c.h.bf16 %v3036_v36 }
  0x1c   : > { %510 = vmatpush.bf16.msra.mxu0 %v2633_v38  ;;  %640 = vmatpush.bf16.msra.mxu2 %v2623_v41  ;;  %v342_v27 = vsel %vm339_vm1, %v340_v4, %v341_v5  ;;  %v3024_v30 = vpack.c.bf16 %v3003_v12, %v2939_v45  ;;  %v2656_v38 = vld [vmem:[%s3768_s1 + $0x120] sm:$0xff]  ;;  %v258_v41 = vunpack.c.h.bf16 %v3033_v35  ;;  %v3069_v62 = vunpack.c.h.bf16 %v3048_v40 }
  0x1d   : > { %862 = vmatpush.bf16.msrb.mxu1 %v2645_v39  ;;  %v3000_v11 = vsel %vm339_vm1, %v352_v7, %v353_v8  ;;  %v404_v32 = vpack.c.bf16 %v2997_v10, %v342_v27  ;;  %1241 = vmatpush.bf16.msra.mxu3 %v2669_v31  ;;  %v3045_v39 = vld [vmem:[%s2860_s20 + $0x60] sm:$0xff]  ;;  %v704_v5 = vrot.slane %v2886_v23, 2  ;;  %v2654_v7 = vld [vmem:[%s3768_s1 + $0x110] sm:$0xff]  ;;  %v710_v8 = vrot.slane %v2871_v16, 2 }
  0x1e   : > { %v3066_v60 = vunpack.c.h.bf16 %v3045_v39  ;;  %v368_v63 = vrot.slane %v258_v41, 1 }
  0x20   : > { %511 = vmatpush.bf16.msra.mxu0 %v2632_v53  ;;  %641 = vmatpush.bf16.msra.mxu2 %v2622_v54  ;;  %v3774_v53 = vunpack.c.l.bf16 %v2930_v42  ;;  %v2655_v54 = vld [vmem:[%s3768_s1 + $0x118] sm:$0xff] }
  0x21   : > { %863 = vmatpush.bf16.msrb.mxu1 %v2644_v51  ;;  %v3056_v51 = vunpack.c.l.bf16 %v2868_v14  ;;  %v367_v14 = vrot.slane %v2965_v57, 1 }
  0x22   : > { %v359_v4 = vrot.slane %v3774_v53, 1 }
  0x24   : > { %512 = vmatpush.bf16.msra.mxu0 %v2631_v1  ;;  %642 = vmatpush.bf16.msra.mxu2 %v2621_v3  ;;  %v374_v1 = vrot.slane %v3776_v43, 1  ;;  %v358_v3 = vrot.slane %v3056_v51, 1 }
  0x25   : > { %864 = vmatpush.bf16.msrb.mxu1 %v2643_v0  ;;  %v373_v0 = vrot.slane %v2968_v58, 1 }
  0x26   : > { %2166 = vmatmul.msk.bf16.gmra.mxu3 %vm493_vm0, %v2994_v9  ;;  %v3101_v27 = vsel %vm339_vm1, %v358_v3, %v359_v4  ;;  %v2667_v3 = vld [vmem:[%s3768_s1 + $0x178] sm:$0xff]  ;;  %v3147_v4 = vunpack.c.l.bf16 %v2936_v44 }
  0x28   : > { %513 = vmatpush.bf16.msra.mxu0 %v2630_v19  ;;  %643 = vmatpush.bf16.msra.mxu2 %v2620_v26  ;;  %v3092_v19 = vpack.c.bf16 %v3069_v62, %v3066_v60  ;;  %v3098_v26 = vsel %vm339_vm1, %v373_v0, %v374_v1  ;;  %v2653_v1 = vld [vmem:[%s3768_s1 + $0x108] sm:$0xff] }
  0x29   : > { %865 = vmatpush.bf16.msrb.mxu1 %v2642_v15  ;;  %v711_v15 = vrot.slane %v250_v34, 2 }
  0x2a   : > { %2121 = vmatmul.msk.bf16.gmra.mxu1 %vm493_vm0, %v3024_v30 }
  0x2b   : > { %514 = vmatmul.bf16.vlgmr.msra.gmra.mxu0 %v404_v32  ;;  %644 = vmatmul.bf16.vlgmr.msra.gmra.mxu2 %v279_v33  ;;  %v3107_v34 = vsel %vm694_vm2, %v710_v8, %v711_v15  ;;  %v3119_v33 = vpack.c.bf16 %v3101_v27, %v3000_v11  ;;  %v2666_v8 = vld [vmem:[%s3768_s1 + $0x170] sm:$0xff]  ;;  %v379_v15 = vrot.slane %v3066_v60, 1  ;;  %v385_v32 = vrot.slane %v3069_v62, 1 }
  0x2c   : > { %671 = vmatpush.bf16.msrb.mxu2 %v2822_v2  ;;  %1027 = vmatpush.bf16.msrb.mxu0 %v2657_v29  ;;  %v2641_v2 = vld [vmem:[%s3768_s1 + $0xa8] sm:$0xff] }
  0x2d   : > { %866 = vmatpush.bf16.msrb.mxu1 %v2641_v2  ;;  %v3126_v2 = vld [vmem:[%s2860_s20 + $0x68] sm:$0x11] }
  0x30   : > { %1028 = vmatpush.bf16.msrb.mxu0 %v2656_v38  ;;  %672 = vmatpush.bf16.msrb.mxu2 %v2839_v6  ;;  %v705_v6 = vrot.slane %v246_v24, 2  ;;  %v3095_v24 = vsel %vm339_vm1, %v367_v14, %v368_v63  ;;  %v3123_v38 = vpack.c.bf16 %v3056_v51, %v2953_v52  ;;  %v699_v14 = vrot.slane %v242_v22, 2 }
  0x31   : > { %867 = vmatpush.bf16.msrb.mxu1 %v2640_v59  ;;  %v3113_v31 = vpack.c.bf16 %v3098_v26, %v3095_v24  ;;  %v698_v59 = vrot.slane %v2883_v21, 2  ;;  %v3772_v63 = vunpack.c.h.bf16 %v3126_v2  ;;  %v3150_v22 = vunpack.c.l.bf16 %v2945_v48 }
  0x32   : > { %v3104_v29 = vsel %vm694_vm2, %v704_v5, %v705_v6  ;;  %v3775_v5 = vunpack.c.l.bf16 %v3033_v35  ;;  %v3779_v6 = vunpack.c.l.bf16 %v3036_v36 }
  0x33   : > { %3784 = vst [vmem:[#allocation2_spill] sm:$0xff] %v3113_v31  ;;  %v700_v44 = vsel %vm694_vm2, %v698_v59, %v699_v14  ;;  %v380_v48 = vrot.slane %v3772_v63, 1  ;;  %v370_v50 = vrot.slane %v3150_v22, 1  ;;  %v2651_v14 = vld [vmem:[%s3768_s1 + $0xf8] sm:$0xff] }
  0x34   : > { %1029 = vmatpush.bf16.msrb.mxu0 %v2655_v54  ;;  %v3129_v54 = vld [vmem:[%s2860_s20 + $0x78] sm:$0x11]  ;;  %v365_v13 = vrot.slane %v3775_v5, 1  ;;  %v371_v59 = vrot.slane %v3779_v6, 1  ;;  %v760_v63 = vpack.c.bf16 %v3104_v29, %v700_v44  ;;  %v707_v44 = vrot.slane %v2953_v52, 2 }
  0x35   : > { %v3773_v0 = vunpack.c.h.bf16 %v3129_v54  ;;  %1206 = vmatpush.bf16.msra.mxu1 %v2667_v3  ;;  %v364_v3 = vrot.slane %v3147_v4, 1  ;;  %v3787_v6 = vunpack.c.l.bf16 %v2930_v42  ;;  %v2689_v42 = vld [vmem:[%s3768_s1 + $0x228] sm:$0xff] }
  0x36   : > { %2167 = vmatmul.msk.bf16.gmra.mxu3 %vm493_vm0, %v3092_v19  ;;  %v3187_v43 = vsel %vm339_vm1, %v370_v50, %v371_v59  ;;  %v2668_v50 = vld [vmem:[%s3768_s1 + $0x180] sm:$0xff]  ;;  %v2659_v59 = vld [vmem:[%s3768_s1 + $0x138] sm:$0xff] }
  0x37   : > { %v3184_v5 = vsel %vm339_vm1, %v364_v3, %v365_v13  ;;  %1242 = vmatpush.bf16.msra.mxu3 %v2668_v50  ;;  %v2665_v3 = vld [vmem:[%s3768_s1 + $0x168] sm:$0xff]  ;;  %1062 = vmatpush.bf16.msra.mxu2 %v2659_v59  ;;  %v695_v50 = vrot.slane %v2961_v55, 2 }
  0x38   : > { %1030 = vmatpush.bf16.msrb.mxu0 %v2654_v7  ;;  %v2652_v7 = vld [vmem:[%s3768_s1 + $0x100] sm:$0xff]  ;;  %v3205_v20 = vpack.c.bf16 %v3187_v43, %v3184_v5 }
  0x39   : > { %1207 = vmatpush.bf16.msra.mxu1 %v2666_v8  ;;  %v702_v8 = vrot.slane %v245_v47, 2  ;;  %v3209_v47 = vpack.c.bf16 %v3150_v22, %v3147_v4 }
  0x3a   : > { %2122 = vmatmul.msk.bf16.gmra.mxu1 %vm493_vm0, %v3113_v31 }
  0x3b   : > { %519 = vmatmul.bf16.gmra.mxu0 %v3119_v33  ;;  %649 = vmatmul.bf16.gmra.mxu2 %v3123_v38 }
  0x3c   : > { %1031 = vmatpush.bf16.msrb.mxu0 %v2653_v1  ;;  %v386_v1 = vrot.slane %v3773_v0, 1  ;;  %v3178_v0 = vsel %vm339_vm1, %v379_v15, %v380_v48  ;;  %v708_v15 = vrot.slane %v249_v61, 2  ;;  %v716_v48 = vrot.slane %v2874_v17, 2 }
  0x3d   : > { %1208 = vmatpush.bf16.msra.mxu1 %v2665_v3 }
  0x3e   : > { %v3181_v53 = vsel %vm339_vm1, %v385_v32, %v386_v1  ;;  %v3218_v32 = vsel %vm694_vm2, %v707_v44, %v708_v15  ;;  %v717_v1 = vrot.slane %v254_v49, 2  ;;  %v3777_v44 = vunpack.c.l.bf16 %v3129_v54  ;;  %v2664_v49 = vld [vmem:[%s3768_s1 + $0x160] sm:$0xff] }
  0x3f   : > { %v3198_v13 = vpack.c.bf16 %v3181_v53, %v3178_v0 }
  0x40   : > { %1032 = vmatpush.bf16.msrb.mxu0 %v2652_v7  ;;  %v701_v7 = vrot.slane %v2941_v46, 2  ;;  %v3247_v15 = vsel %vm694_vm2, %v716_v48, %v717_v1  ;;  %v383_v59 = vrot.slane %v3777_v44, 1 }
  0x41   : > { %3785 = vst [vmem:[#allocation3_spill] sm:$0xff] %v3198_v13  ;;  %1209 = vmatpush.bf16.msra.mxu1 %v2664_v49  ;;  %v3260_v48 = vpack.c.bf16 %v3247_v15, %v3107_v34 }
  0x42   : > { %v3215_v61 = vsel %vm694_vm2, %v701_v7, %v702_v8  ;;  %v3239_v7 = vunpack.c.l.bf16 %v3048_v40  ;;  %v3778_v8 = vunpack.c.l.bf16 %v3126_v2 }
  0x44   : > { %1033 = vmatpush.bf16.msrb.mxu0 %v2651_v14  ;;  %v3236_v14 = vunpack.c.l.bf16 %v3045_v39  ;;  %v696_v39 = vrot.slane %v241_v56, 2  ;;  %v382_v3 = vrot.slane %v3239_v7, 1 }
  0x46   : > { %2228 = vmatmul.msk.bf16.vlgmr.msrb.gmra.mxu3 %vm493_vm0, %v760_v63  ;;  %v376_v40 = vrot.slane %v3236_v14, 1  ;;  %v697_v55 = vsel %vm694_vm2, %v695_v50, %v696_v39  ;;  %v3267_v56 = vsel %vm339_vm1, %v382_v3, %v383_v59  ;;  %v3278_v63 = vpack.c.bf16 %v3239_v7, %v3236_v14  ;;  %v2658_v50 = vld [vmem:[%s3768_s1 + $0x130] sm:$0xff] }
  0x47   : > { %v759_v1 = vpack.c.bf16 %v3215_v61, %v697_v55  ;;  %1063 = vmatpush.bf16.msra.mxu2 %v2658_v50  ;;  %v722_v39 = vrot.slane %v2965_v57, 2  ;;  %v3786_v3 = vunpack.c.h.bf16 %v3036_v36  ;;  %v2663_v55 = vld [vmem:[%s3768_s1 + $0x158] sm:$0xff]  ;;  %v2662_v50 = vld [vmem:[%s3768_s1 + $0x150] sm:$0xff]  ;;  %1568 = vmatpush.bf16.msrb.mxu3 %v2689_v42  ;;  %v2660_v42 = vld [vmem:[%s3768_s1 + $0x140] sm:$0xff] }
  0x48   : > { %1034 = vmatpush.bf16.msrb.mxu0 %v2650_v28  ;;  %v377_v28 = vrot.slane %v3778_v8, 1  ;;  %1210 = vmatpush.bf16.msra.mxu1 %v2663_v55  ;;  %v713_v8 = vrot.slane %v3056_v51, 2  ;;  %v714_v55 = vrot.slane %v3787_v6, 2  ;;  %v280_v6 = vpack.c.bf16 %v2886_v23, %v2883_v21 }
  0x49   : > { %v729_v59 = vrot.slane %v3786_v3, 2 }
  0x4a   : > { %2123 = vmatmul.msk.bf16.gmra.mxu1 %vm493_vm0, %v3198_v13  ;;  %v3264_v18 = vsel %vm339_vm1, %v376_v40, %v377_v28  ;;  %v723_v40 = vrot.slane %v258_v41, 2  ;;  %v728_v28 = vrot.slane %v2968_v58, 2  ;;  %v2676_v41 = vld [vmem:[%s3768_s1 + $0x1c0] sm:$0xff]  ;;  %v3317_v13 = vsel %vm694_vm2, %v713_v8, %v714_v55  ;;  %v2679_v8 = vld [vmem:[%s3768_s1 + $0x1d8] sm:$0xff] }
  0x4b   : > { %524 = vmatmul.bf16.gmra.mxu0 %v3205_v20  ;;  %654 = vmatmul.bf16.gmra.mxu2 %v3209_v47  ;;  %v3274_v49 = vpack.c.bf16 %v3267_v56, %v3264_v18  ;;  %v3791_v55 = vunpack.c.h.bf16 %v3129_v54 }
  0x4c   : > { %v3304_v3 = vsel %vm694_vm2, %v722_v39, %v723_v40  ;;  %v3307_v44 = vsel %vm694_vm2, %v728_v28, %v729_v59  ;;  %1211 = vmatpush.bf16.msra.mxu1 %v2662_v50  ;;  %v3323_v39 = vpack.c.bf16 %v3317_v13, %v3218_v32  ;;  %v926_v40 = vpack.c.bf16 %v2953_v52, %v2941_v46  ;;  %v2661_v46 = vld [vmem:[%s3768_s1 + $0x148] sm:$0xff]  ;;  %v2675_v52 = vld [vmem:[%s3768_s1 + $0x1b8] sm:$0xff] }
  0x4d   : > { %v734_v28 = vrot.slane %v3066_v60, 2  ;;  %v3790_v59 = vunpack.c.h.bf16 %v3126_v2  ;;  %v741_v21 = vrot.slane %v3791_v55, 2  ;;  %v719_v55 = vrot.slane %v3147_v4, 2 }
  0x4e   : > { %3789 = vst [vmem:[#allocation5_spill] sm:$0xff] %v3323_v39 }
  0x4f   : > { %v735_v50 = vrot.slane %v3790_v59, 2 }
  0x50   : > { %1212 = vmatpush.bf16.msra.mxu1 %v2661_v46 }
  0x54   : > { %1213 = vmatpush.bf16.msra.mxu1 %v2660_v42 }
  0x56   : > { %2229 = vmatmul.msk.bf16.gmra.mxu3 %vm493_vm0, %v3260_v48 }
  0x5a   : > { %868 = vmatmul.bf16.vlgmr.msrb.gmra.mxu1 %v759_v1  ;;  %v2677_v1 = vld [vmem:[%s3768_s1 + $0x1c8] sm:$0xff] }
  0x5b   : > { %529 = vmatmul.bf16.gmra.mxu0 %v3274_v49  ;;  %659 = vmatmul.bf16.gmra.mxu2 %v3278_v63 }
  0x5c   : > { %1381 = vmatpush.bf16.msra.mxu0 %v2677_v1  ;;  %v3314_v1 = vpack.c.bf16 %v3307_v44, %v3304_v3 }
  0x5e   : > { %3788 = vst [vmem:[#allocation4_spill] sm:$0xff] %v3314_v1 }
  0x60   : > { %1382 = vmatpush.bf16.msra.mxu0 %v2676_v41  ;;  %v740_v41 = vrot.slane %v3069_v62, 2 }
  0x62   : > { %v3359_v59 = vsel %vm694_vm2, %v740_v41, %v741_v21  ;;  %v2687_v41 = vld [vmem:[%s3768_s1 + $0x218] sm:$0xff]  ;;  %v3795_v21 = vunpack.c.l.bf16 %v3129_v54 }
  0x63   : > { %1533 = vmatpush.bf16.msrb.mxu1 %v2687_v41  ;;  %v2688_v41 = vld [vmem:[%s3768_s1 + $0x220] sm:$0xff] }
  0x64   : > { %1383 = vmatpush.bf16.msra.mxu0 %v2675_v52  ;;  %v725_v52 = vrot.slane %v3150_v22, 2  ;;  %v738_v42 = vrot.slane %v3795_v21, 2  ;;  %1569 = vmatpush.bf16.msrb.mxu3 %v2688_v41  ;;  %v3797_v21 = vpack.c.bf16 %v3000_v11, %v2997_v10  ;;  %v2682_v10 = vld [vmem:[%s3768_s1 + $0x1f0] sm:$0xff]  ;;  %v2696_v11 = vld [vmem:[%s3768_s1 + $0x260] sm:$0xff] }
  0x66   : > { %2230 = vmatmul.msk.bf16.gmra.mxu3 %vm493_vm0, %v3314_v1 }
  0x6a   : > { %873 = vmatmul.bf16.gmra.mxu1 %v3323_v39  ;;  %v3793_v39 = vunpack.c.l.bf16 %v3036_v36  ;;  %v928_v36 = vpack.c.bf16 %v3147_v4, %v3056_v51  ;;  %v731_v51 = vrot.slane %v3236_v14, 2  ;;  %v3794_v4 = vunpack.c.l.bf16 %v3126_v2  ;;  %v2671_v2 = vld [vmem:[%s3768_s1 + $0x198] sm:$0xff] }
  0x6b   : > { %2164 = vmatmul.msk.bf16.vlgmr.msrb.gmra.mxu2 %vm493_vm0, %v280_v6  ;;  %1035 = vmatmul.bf16.vlgmr.msrb.gmra.mxu0 %v926_v40  ;;  %v2674_v6 = vld [vmem:[%s3768_s1 + $0x1b0] sm:$0xff]  ;;  %v3356_v40 = vsel %vm694_vm2, %v734_v28, %v735_v50 }
  0x6c   : > { %1416 = vmatpush.bf16.msrb.mxu2 %v2679_v8  ;;  %v3792_v8 = vunpack.c.l.bf16 %v3033_v35  ;;  %v726_v1 = vrot.slane %v3793_v39, 2  ;;  %1384 = vmatpush.bf16.msra.mxu0 %v2674_v6  ;;  %v3369_v31 = vpack.c.bf16 %v3359_v59, %v3356_v40  ;;  %v927_v39 = vpack.c.bf16 %v2871_v16, %v2886_v23  ;;  %v2672_v6 = vld [vmem:[%s3768_s1 + $0x1a0] sm:$0xff] }
  0x6d   : > { %v732_v16 = vrot.slane %v3794_v4, 2  ;;  %v737_v23 = vrot.slane %v3239_v7, 2 }
  0x6e   : > { %v720_v46 = vrot.slane %v3792_v8, 2  ;;  %v3375_v50 = vsel %vm694_vm2, %v725_v52, %v726_v1  ;;  %v2673_v1 = vld [vmem:[%s3768_s1 + $0x1a8] sm:$0xff]  ;;  %v2686_v8 = vld [vmem:[%s3768_s1 + $0x210] sm:$0xff]  ;;  %v3796_v52 = vpack.c.bf16 %v2939_v45, %v2917_v37 }
  0x6f   : > { %v3414_v54 = vsel %vm694_vm2, %v731_v51, %v732_v16  ;;  %1534 = vmatpush.bf16.msrb.mxu1 %v2686_v8  ;;  %v2670_v37 = vld [vmem:[%s3768_s1 + $0x190] sm:$0xff]  ;;  %v2685_v45 = vld [vmem:[%s3768_s1 + $0x208] sm:$0xff]  ;;  %v931_v16 = vpack.c.bf16 %v3066_v60, %v2968_v58  ;;  %v1107_v8 = vpack.c.bf16 %v3184_v5, %v3101_v27  ;;  %v3798_v27 = vpack.c.bf16 %v3218_v32, %v3215_v61 }
  0x70   : > { %v3372_v28 = vsel %vm694_vm2, %v719_v55, %v720_v46  ;;  %1385 = vmatpush.bf16.msra.mxu0 %v2673_v1  ;;  %v2678_v55 = vld [vmem:[%s3768_s1 + $0x1d0] sm:$0xff]  ;;  %v3417_v46 = vsel %vm694_vm2, %v737_v23, %v738_v42  ;;  %v929_v1 = vpack.c.bf16 %v2965_v57, %v2874_v17  ;;  %v235_v17 = vld [vmem:[%s2860_s20 + $0x80] sm:$0xff]  ;;  %v1110_v42 = vpack.c.bf16 %v3178_v0, %v3098_v26  ;;  %v2709_v26 = vld [vmem:[%s3768_s1 + $0x2c8] sm:$0xff] }
  0x71   : > { %v3381_v35 = vpack.c.bf16 %v3375_v50, %v3372_v28  ;;  %1417 = vmatpush.bf16.msrb.mxu2 %v2678_v55  ;;  %v2684_v57 = vld [vmem:[%s3768_s1 + $0x200] sm:$0xff]  ;;  %v3483_v55 = vld [vmem:[%s2860_s20 + $0x88] sm:$0x11] }
  0x73   : > { %1535 = vmatpush.bf16.msrb.mxu1 %v2685_v45  ;;  %v2695_v45 = vld [vmem:[%s3768_s1 + $0x258] sm:$0xff] }
  0x74   : > { %1386 = vmatpush.bf16.msra.mxu0 %v2672_v6  ;;  %v3480_v6 = vunpack.c.h.bf16 %v235_v17 }
  0x76   : > { %2231 = vmatmul.msk.bf16.gmra.mxu3 %vm493_vm0, %v3369_v31  ;;  %v1100_v5 = vrot.slane %v3480_v6, 1 }
  0x77   : > { %1536 = vmatpush.bf16.msrb.mxu1 %v2684_v57 }
  0x78   : > { %1387 = vmatpush.bf16.msra.mxu0 %v2671_v2  ;;  %v274_v2 = vunpack.c.h.bf16 %v3483_v55 }
  0x7a   : > { %878 = vmatmul.bf16.gmra.mxu1 %v3381_v35 }
  0x7b   : > { %1040 = vmatmul.bf16.gmra.mxu0 %v928_v36  ;;  %2292 = vmatmul.msk.bf16.vlgmr.msra.gmra.mxu2 %vm493_vm0, %v927_v39  ;;  %v3425_v36 = vpack.c.bf16 %v3417_v46, %v3414_v54  ;;  %v930_v39 = vpack.c.bf16 %v3236_v14, %v3150_v22  ;;  %v1108_v22 = vpack.c.bf16 %v3095_v24, %v3003_v12  ;;  %v3448_v14 = vunpack.c.l.bf16 %v235_v17  ;;  %v2683_v12 = vld [vmem:[%s3768_s1 + $0x1f8] sm:$0xff]  ;;  %v2697_v24 = vld [vmem:[%s3768_s1 + $0x268] sm:$0xff] }
  0x7c   : > { %1388 = vmatpush.bf16.msra.mxu0 %v2670_v37  ;;  %1537 = vmatpush.bf16.msrb.mxu1 %v2683_v12  ;;  %v2681_v37 = vld [vmem:[%s3768_s1 + $0x1e8] sm:$0xff] }
  0x7d   : > { %v932_v4 = vpack.c.bf16 %v3448_v14, %v3239_v7  ;;  %v2699_v7 = vld [vmem:[%s3768_s1 + $0x278] sm:$0xff] }
  0x7e   : > { %1732 = vmatpush.bf16.msra.mxu2 %v2699_v7  ;;  %v1282_v7 = vpack.c.bf16 %v3372_v28, %v3317_v13  ;;  %v2707_v13 = vld [vmem:[%s3768_s1 + $0x2b8] sm:$0xff] }
  0x80   : > { %1697 = vmatpush.bf16.msrb.mxu0 %v2697_v24  ;;  %1538 = vmatpush.bf16.msrb.mxu1 %v2682_v10 }
  0x84   : > { %1698 = vmatpush.bf16.msrb.mxu0 %v2696_v11  ;;  %1539 = vmatpush.bf16.msrb.mxu1 %v2681_v37  ;;  %v2698_v37 = vld [vmem:[%s3768_s1 + $0x270] sm:$0xff] }
  0x85   : > { %1733 = vmatpush.bf16.msra.mxu2 %v2698_v37 }
  0x86   : > { %2356 = vmatmul.msk.bf16.vlgmr.msra.gmra.mxu3 %vm493_vm0, %v3796_v52 }
  0x87   : > { %1892 = vmatpush.bf16.msra.mxu3 %v2709_v26  ;;  %v273_v26 = vunpack.c.l.bf16 %v3483_v55 }
  0x88   : > { %1699 = vmatpush.bf16.msrb.mxu0 %v2695_v45  ;;  %v2706_v45 = vld [vmem:[%s3768_s1 + $0x2b0] sm:$0xff] }
  0x8a   : > { %883 = vmatmul.bf16.gmra.mxu1 %v3425_v36 }
  0x8b   : > { %1045 = vmatmul.bf16.gmra.mxu0 %v930_v39  ;;  %2293 = vmatmul.msk.bf16.gmra.mxu2 %vm493_vm0, %v929_v1  ;;  %v933_v39 = vpack.c.bf16 %v3480_v6, %v3069_v62  ;;  %v1101_v62 = vrot.slane %v274_v2, 1 }
  0x8d   : > { %v3512_v61 = vsel %vm339_vm1, %v1100_v5, %v1101_v62 }
  0x8e   : > { %v1112_v12 = vpack.c.bf16 %v3512_v61, %v3181_v53  ;;  %v3799_v53 = vpack.c.bf16 %v3107_v34, %v3104_v29  ;;  %v1098_v29 = vrot.slane %v273_v26, 1  ;;  %v2692_v34 = vld [vmem:[%s3768_s1 + $0x240] sm:$0xff] }
  0x96   : > { %2357 = vmatmul.msk.bf16.gmra.mxu3 %vm493_vm0, %v1108_v22 }
  0x97   : > { %v544_v51 = vpop.f32.mrf.mxu1 }
  0x99   : > { %v3455_v23 = vpop.f32.mrf.mxu3 }
  0x9a   : > { %1214 = vmatmul.bf16.vlgmr.msra.gmra.mxu1 %v3797_v21  ;;  %v2694_v21 = vld [vmem:[%s3768_s1 + $0x250] sm:$0xff] }
  0x9b   : > { %1050 = vmatmul.bf16.gmra.mxu0 %v932_v4  ;;  %2294 = vmatmul.msk.bf16.gmra.mxu2 %vm493_vm0, %v931_v16  ;;  %v2680_v16 = vld [vmem:[%s3768_s1 + $0x1e0] sm:$0xff] }
  0x9c   : > { %1540 = vmatpush.bf16.msrb.mxu1 %v2680_v16  ;;  %1700 = vmatpush.bf16.msrb.mxu0 %v2694_v21  ;;  %v1284_v21 = vpack.c.bf16 %v3414_v54, %v3375_v50 }
  0x9f   : > { %v546_v58 = vpop.f32.mrf.mxu1 }
  0xa0   : > { %2754 = vmatpush.bf16.msra.mxu1 %v2707_v13 }
  0xa1   : > { %v3467_v60 = vpop.f32.mrf.mxu3 }
  0xa4   : > { %2755 = vmatpush.bf16.msra.mxu1 %v2706_v45 }
  0xa6   : > { %2358 = vmatmul.msk.bf16.gmra.mxu3 %vm493_vm0, %v1110_v42 }
  0xa7   : > { %v549_v52 = vpop.f32.mrf.mxu1 }
  0xa8   : > { %v515_v0 = vpop.f32.mrf.mxu0 }
  0xa9   : > { %v545_v1 = vadd.f32 %v544_v51, %v515_v0  ;;  %v3494_v41 = vpop.f32.mrf.mxu3  ;;  %v1097_v0 = vrot.slane %v3448_v14, 1 }
  0xaa   : > { %1219 = vmatmul.bf16.gmra.mxu1 %v1107_v8 }
  0xab   : > { %2295 = vmatmul.msk.bf16.gmra.mxu2 %vm493_vm0, %v933_v39  ;;  %1389 = vmatmul.bf16.vlgmr.msra.gmra.mxu0 %v3798_v27 }
  0xae   : > { %v645_v17 = vpop.f32.mrf.mxu2 }
  0xaf   : > { %v551_v57 = vpop.f32.mrf.mxu1  ;;  %v3509_v22 = vadd.f32 %v645_v17, %v545_v1  ;;  %v2691_v17 = vld [vmem:[%s3768_s1 + $0x238] sm:$0xff] }
  0xb0   : > { %v517_v32 = vpop.f32.mrf.mxu0 }
  0xb1   : > { %v547_v51 = vadd.f32 %v546_v58, %v517_v32  ;;  %v3514_v4 = vpop.f32.mrf.mxu3  ;;  %v1109_v58 = vpack.c.bf16 %v3264_v18, %v3187_v43  ;;  %v2693_v43 = vld [vmem:[%s3768_s1 + $0x248] sm:$0xff]  ;;  %v3563_v32 = vsel %vm339_vm1, %v1097_v0, %v1098_v29 }
  0xb2   : > { %1701 = vmatpush.bf16.msrb.mxu0 %v2693_v43 }
  0xb6   : > { %2359 = vmatmul.msk.bf16.gmra.mxu3 %vm493_vm0, %v1112_v12  ;;  %v647_v24 = vpop.f32.mrf.mxu2  ;;  %1702 = vmatpush.bf16.msrb.mxu0 %v2692_v34  ;;  %v1283_v12 = vpack.c.bf16 %v3304_v3, %v3247_v15  ;;  %v2705_v15 = vld [vmem:[%s3768_s1 + $0x2a8] sm:$0xff] }
  0xb7   : > { %v554_v10 = vpop.f32.mrf.mxu1  ;;  %v3527_v11 = vadd.f32 %v647_v24, %v547_v51  ;;  %v2690_v24 = vld [vmem:[%s3768_s1 + $0x230] sm:$0xff]  ;;  %2756 = vmatpush.bf16.msra.mxu1 %v2705_v15 }
  0xb8   : > { %v520_v42 = vpop.f32.mrf.mxu0 }
  0xb9   : > { %v550_v8 = vadd.f32 %v549_v52, %v520_v42  ;;  %v3531_v39 = vpop.f32.mrf.mxu3 }
  0xba   : > { %1224 = vmatmul.bf16.gmra.mxu1 %v1109_v58  ;;  %1703 = vmatpush.bf16.msrb.mxu0 %v2691_v17  ;;  %v1275_v17 = vrot.slane %v3480_v6, 2 }
  0xbb   : > { %1394 = vmatmul.bf16.gmra.mxu0 %v1282_v7  ;;  %2420 = vmatmul.msk.bf16.vlgmr.msrb.gmra.mxu2 %vm493_vm0, %v3799_v53 }
  0xbe   : > { %v650_v18 = vpop.f32.mrf.mxu2  ;;  %1704 = vmatpush.bf16.msrb.mxu0 %v2690_v24 }
  0xbf   : > { %v556_v28 = vpop.f32.mrf.mxu1  ;;  %v651_v52 = vadd.f32 %v650_v18, %v550_v8  ;;  %v1273_v8 = vrot.slane %v273_v26, 2  ;;  %v2704_v18 = vld [vmem:[%s3768_s1 + $0x2a0] sm:$0xff] }
  0xc0   : > { %v522_v1 = vpop.f32.mrf.mxu0  ;;  %2757 = vmatpush.bf16.msra.mxu1 %v2704_v18 }
  0xc1   : > { %v3549_v27 = vadd.f32 %v3455_v23, %v651_v52  ;;  %v552_v5 = vadd.f32 %v551_v57, %v522_v1  ;;  %v3551_v62 = vpop.f32.mrf.mxu3  ;;  %v1111_v57 = vpack.c.bf16 %v3563_v32, %v3267_v56  ;;  %v2708_v56 = vld [vmem:[%s3768_s1 + $0x2c0] sm:$0xff] }
  0xc2   : > { %1857 = vmatpush.bf16.msra.mxu0 %v2707_v13  ;;  %1893 = vmatpush.bf16.msra.mxu3 %v2708_v56 }
  0xc6   : > { %2484 = vmatmul.msk.bf16.vlgmr.msrb.gmra.mxu3 %vm493_vm0, %v2891_v25  ;;  %v652_v23 = vpop.f32.mrf.mxu2  ;;  %1858 = vmatpush.bf16.msra.mxu0 %v2706_v45 }
  0xc7   : > { %v559_v51 = vpop.f32.mrf.mxu1  ;;  %v653_v16 = vadd.f32 %v652_v23, %v552_v5 }
  0xc8   : > { %v525_v58 = vpop.f32.mrf.mxu0 }
  0xc9   : > { %v3577_v7 = vadd.f32 %v3467_v60, %v653_v16  ;;  %v555_v25 = vadd.f32 %v554_v10, %v525_v58  ;;  %v898_v42 = vpop.f32.mrf.mxu3  ;;  %v1272_v10 = vrot.slane %v3448_v14, 2 }
  0xca   : > { %1229 = vmatmul.bf16.gmra.mxu1 %v1111_v57  ;;  %1859 = vmatpush.bf16.msra.mxu0 %v2705_v15 }
  0xcb   : > { %1399 = vmatmul.bf16.gmra.mxu0 %v1284_v21  ;;  %2421 = vmatmul.msk.bf16.gmra.mxu2 %vm493_vm0, %v1283_v12  ;;  %v3594_v52 = vsel %vm694_vm2, %v1272_v10, %v1273_v8  ;;  %v2702_v21 = vld [vmem:[%s3768_s1 + $0x290] sm:$0xff] }
  0xce   : > { %v655_v3 = vpop.f32.mrf.mxu2  ;;  %1860 = vmatpush.bf16.msra.mxu0 %v2704_v18 }
  0xcf   : > { %v561_v50 = vpop.f32.mrf.mxu1  ;;  %v656_v54 = vadd.f32 %v655_v3, %v555_v25  ;;  %v237_v3 = vld [vmem:[%s2860_s20 + $0x90] sm:$0xff] }
  0xd0   : > { %v527_v60 = vpop.f32.mrf.mxu0 }
  0xd1   : > { %v3588_v53 = vadd.f32 %v3494_v41, %v656_v54  ;;  %v557_v43 = vadd.f32 %v556_v28, %v527_v60  ;;  %v900_v13 = vpop.f32.mrf.mxu3  ;;  %v1286_v41 = vpack.c.bf16 %v3594_v52, %v3417_v46  ;;  %v1285_v28 = vpack.c.bf16 %v3356_v40, %v3307_v44 }
  0xd6   : > { %2485 = vmatmul.msk.bf16.gmra.mxu3 %vm493_vm0, %v2994_v9  ;;  %v657_v0 = vpop.f32.mrf.mxu2  ;;  %v2703_v9 = vld [vmem:[%s3768_s1 + $0x298] sm:$0xff] }
  0xd7   : > { %v869_v26 = vpop.f32.mrf.mxu1  ;;  %v658_v29 = vadd.f32 %v657_v0, %v557_v43  ;;  %2758 = vmatpush.bf16.msra.mxu1 %v2703_v9  ;;  %1861 = vmatpush.bf16.msra.mxu0 %v2703_v9  ;;  %v2700_v43 = vld [vmem:[%s3768_s1 + $0x280] sm:$0xff]  ;;  %v3655_v9 = vunpack.c.l.bf16 %v237_v3 }
  0xd8   : > { %v899_v34 = vadd.f32 %v898_v42, %v869_v26  ;;  %v530_v1 = vpop.f32.mrf.mxu0 }
  0xd9   : > { %v3603_v5 = vadd.f32 %v3514_v4, %v658_v29  ;;  %v560_v37 = vadd.f32 %v559_v51, %v530_v1  ;;  %v903_v45 = vpop.f32.mrf.mxu3  ;;  %v1276_v4 = vrot.slane %v274_v2, 2 }
  0xda   : > { %1541 = vmatmul.bf16.vlgmr.msrb.gmra.mxu1 %v3123_v38 }
  0xdb   : > { %1404 = vmatmul.bf16.gmra.mxu0 %v1286_v41  ;;  %2422 = vmatmul.msk.bf16.gmra.mxu2 %vm493_vm0, %v1285_v28  ;;  %v3620_v12 = vsel %vm694_vm2, %v1275_v17, %v1276_v4  ;;  %v238_v17 = vld [vmem:[%s2860_s20 + $0x98] sm:$0x11]  ;;  %s2618_s20 = sshll.u32 %s3805_s16, 5 }
  0xdc   : > { %2759 = vmatpush.bf16.msra.mxu1 %v2702_v21  ;;  %1862 = vmatpush.bf16.msra.mxu0 %v2702_v21  ;;  %v1287_v2 = vpack.c.bf16 %v3620_v12, %v3359_v59  ;;  %v3639_v59 = vunpack.c.h.bf16 %v237_v3  ;;  %v1603_v21 = vrot.slane %v3655_v9, 1  ;;  %s3721_s17 = scalar_lea.vmem %s3770_s3, %s2618_s20  ;;  %s3739_s23 = scalar_lea.vmem %s3771_s4, %s2618_s20 }
  0xde   : > { %v660_v46 = vpop.f32.mrf.mxu2 }
  0xdf   : > { %v871_v44 = vpop.f32.mrf.mxu1  ;;  %v661_v40 = vadd.f32 %v660_v46, %v560_v37 }
  0xe0   : > { %v901_v23 = vadd.f32 %v900_v13, %v871_v44  ;;  %v532_v57 = vpop.f32.mrf.mxu0 }
  0xe1   : > { %v3614_v38 = vadd.f32 %v3531_v39, %v661_v40  ;;  %v562_v51 = vadd.f32 %v561_v50, %v532_v57  ;;  %v905_v16 = vpop.f32.mrf.mxu3 }
  0xe6   : > { %2486 = vmatmul.msk.bf16.gmra.mxu3 %vm493_vm0, %v3092_v19  ;;  %v662_v55 = vpop.f32.mrf.mxu2  ;;  %v2701_v19 = vld [vmem:[%s3768_s1 + $0x288] sm:$0xff] }
  0xe7   : > { %v874_v39 = vpop.f32.mrf.mxu1  ;;  %v663_v24 = vadd.f32 %v662_v55, %v562_v51  ;;  %2760 = vmatpush.bf16.msra.mxu1 %v2701_v19  ;;  %1863 = vmatpush.bf16.msra.mxu0 %v2701_v19 }
  0xe8   : > { %v904_v58 = vadd.f32 %v903_v45, %v874_v39  ;;  %v1036_v25 = vpop.f32.mrf.mxu0 }
  0xe9   : > { %v3627_v42 = vadd.f32 %v3551_v62, %v663_v24  ;;  %v908_v56 = vpop.f32.mrf.mxu3 }
  0xea   : > { %v3630_v15 = vadd.f32 %v904_v58, %v3549_v27  ;;  %1546 = vmatmul.bf16.gmra.mxu1 %v3209_v47 }
  0xeb   : > { %2423 = vmatmul.msk.bf16.gmra.mxu2 %vm493_vm0, %v1287_v2  ;;  %1705 = vmatmul.bf16.vlgmr.msrb.gmra.mxu0 %v3119_v33  ;;  %v1448_v33 = vpack.c.bf16 %v3639_v59, %v3480_v6 }
  0xec   : > { %2761 = vmatpush.bf16.msra.mxu1 %v2700_v43  ;;  %1864 = vmatpush.bf16.msra.mxu0 %v2700_v43 }
  0xee   : > { %v674_v62 = vpop.f32.mrf.mxu2 }
  0xef   : > { %v876_v50 = vpop.f32.mrf.mxu1  ;;  %v675_v27 = vadd.f32 %v674_v62, %v3509_v22 }
  0xf0   : > { %v906_v54 = vadd.f32 %v905_v16, %v876_v50  ;;  %v1038_v60 = vpop.f32.mrf.mxu0 }
  0xf1   : > { %v918_v47 = vadd.f32 %v899_v34, %v675_v27  ;;  %v910_v10 = vpop.f32.mrf.mxu3 }
  0xf2   : > { %v921_v8 = vadd.f32 %v906_v54, %v3577_v7 }
  0xf6   : > { %2487 = vmatmul.msk.bf16.gmra.mxu3 %vm493_vm0, %v1448_v33  ;;  %v676_v13 = vpop.f32.mrf.mxu2 }
  0xf7   : > { %v879_v18 = vpop.f32.mrf.mxu1  ;;  %v677_v22 = vadd.f32 %v676_v13, %v3527_v11  ;;  %v1606_v13 = vrot.slane %v3639_v59, 1 }
  0xf8   : > { %v909_v0 = vadd.f32 %v908_v56, %v879_v18  ;;  %v1041_v26 = vpop.f32.mrf.mxu0 }
  0xf9   : > { %v919_v29 = vadd.f32 %v901_v23, %v677_v22  ;;  %v913_v41 = vpop.f32.mrf.mxu3 }
  0xfa   : > { %v922_v7 = vadd.f32 %v909_v0, %v3588_v53  ;;  %1551 = vmatmul.bf16.gmra.mxu1 %v3278_v63 }
  0xfb   : > { %1710 = vmatmul.bf16.gmra.mxu0 %v3205_v20  ;;  %2548 = vmatmul.msk.bf16.vlgmr.msra.gmra.mxu2 %vm493_vm0, %v3024_v30  ;;  %v1447_v20 = vpack.c.bf16 %v3655_v9, %v3448_v14 }
  0xfe   : > { %v1065_v6 = vpop.f32.mrf.mxu2 }
  0xff   : > { %v881_v28 = vpop.f32.mrf.mxu1  ;;  %v1066_v34 = vadd.f32 %v1065_v6, %v1036_v25 }
 0x100   : > { %v911_v1 = vadd.f32 %v910_v10, %v881_v28  ;;  %v1043_v37 = vpop.f32.mrf.mxu0 }
 0x101   : > { %v1085_v11 = vadd.f32 %v1066_v34, %v918_v47  ;;  %v915_v45 = vpop.f32.mrf.mxu3 }
 0x102   : > { %v923_v46 = vadd.f32 %v911_v1, %v3603_v5  ;;  %v3800_v5 = vld [vmem:[#allocation2_spill] sm:$0xff] }
 0x106   : > { %2612 = vmatmul.msk.bf16.vlgmr.msra.gmra.mxu3 %vm493_vm0, %v3260_v48  ;;  %v1067_v63 = vpop.f32.mrf.mxu2  ;;  %v277_v48 = vunpack.c.l.bf16 %v238_v17 }
 0x107   : > { %v884_v30 = vpop.f32.mrf.mxu1  ;;  %v1068_v53 = vadd.f32 %v1067_v63, %v1038_v60  ;;  %v1766_v63 = vrot.slane %v3639_v59, 2 }
 0x108   : > { %v914_v44 = vadd.f32 %v913_v41, %v884_v30  ;;  %v1046_v40 = vpop.f32.mrf.mxu0  ;;  %v1604_v55 = vrot.slane %v277_v48, 1  ;;  %v1763_v30 = vrot.slane %v3655_v9, 2 }
 0x109   : > { %v1086_v4 = vadd.f32 %v1068_v53, %v919_v29  ;;  %v1244_v23 = vpop.f32.mrf.mxu3 }
 0x10a   : > { %v3664_v57 = vadd.f32 %v914_v44, %v3614_v38  ;;  %1556 = vmatmul.bf16.gmra.mxu1 %v1447_v20  ;;  %v1605_v25 = vsel %vm339_vm1, %v1603_v21, %v1604_v55 }
 0x10b   : > { %1715 = vmatmul.bf16.gmra.mxu0 %v3274_v49  ;;  %2549 = vmatmul.msk.bf16.gmra.mxu2 %vm493_vm0, %v3800_v5  ;;  %v3801_v49 = vld [vmem:[#allocation4_spill] sm:$0xff]  ;;  %v1611_v3 = vpack.c.bf16 %v1605_v25, %v3563_v32 }
 0x10e   : > { %v1070_v51 = vpop.f32.mrf.mxu2 }
 0x10f   : > { %v886_v16 = vpop.f32.mrf.mxu1  ;;  %v1071_v14 = vadd.f32 %v1070_v51, %v1041_v26 }
 0x110   : > { %v916_v2 = vadd.f32 %v915_v45, %v886_v16  ;;  %v1048_v39 = vpop.f32.mrf.mxu0 }
 0x111   : > { %v1087_v24 = vadd.f32 %v1071_v14, %v3630_v15  ;;  %v1246_v58 = vpop.f32.mrf.mxu3  ;;  %v3802_v15 = vld [vmem:[#allocation3_spill] sm:$0xff] }
 0x112   : > { %v925_v38 = vadd.f32 %v916_v2, %v3627_v42  ;;  %v278_v42 = vunpack.c.h.bf16 %v238_v17 }
 0x114   : > { %v1607_v32 = vrot.slane %v278_v42, 1  ;;  %v1767_v20 = vrot.slane %v278_v42, 2 }
 0x116   : > { %2613 = vmatmul.msk.bf16.gmra.mxu3 %vm493_vm0, %v3801_v49  ;;  %v1072_v56 = vpop.f32.mrf.mxu2  ;;  %v1608_v29 = vsel %vm339_vm1, %v1606_v13, %v1607_v32 }
 0x117   : > { %v1215_v19 = vpop.f32.mrf.mxu1  ;;  %v1073_v62 = vadd.f32 %v1072_v56, %v1043_v37  ;;  %v1612_v41 = vpack.c.bf16 %v1608_v29, %v3512_v61  ;;  %v1764_v61 = vrot.slane %v277_v48, 2 }
 0x118   : > { %v1245_v50 = vadd.f32 %v1244_v23, %v1215_v19  ;;  %v1051_v27 = vpop.f32.mrf.mxu0 }
 0x119   : > { %v1088_v54 = vadd.f32 %v1073_v62, %v921_v8  ;;  %v1249_v60 = vpop.f32.mrf.mxu3  ;;  %v1765_v51 = vsel %vm694_vm2, %v1763_v30, %v1764_v61 }
 0x11a   : > { %v1264_v47 = vadd.f32 %v1245_v50, %v1085_v11  ;;  %1870 = vmatmul.bf16.vlgmr.msra.gmra.mxu1 %v3381_v35  ;;  %v1771_v59 = vpack.c.bf16 %v1765_v51, %v3594_v52 }
 0x11b   : > { %1720 = vmatmul.bf16.gmra.mxu0 %v1611_v3  ;;  %2550 = vmatmul.msk.bf16.gmra.mxu2 %vm493_vm0, %v3802_v15 }
 0x11e   : > { %v1075_v10 = vpop.f32.mrf.mxu2 }
 0x11f   : > { %v1217_v33 = vpop.f32.mrf.mxu1  ;;  %v1076_v43 = vadd.f32 %v1075_v10, %v1046_v40  ;;  %v1768_v40 = vsel %vm694_vm2, %v1766_v63, %v1767_v20 }
 0x120   : > { %v1247_v18 = vadd.f32 %v1246_v58, %v1217_v33  ;;  %v1053_v22 = vpop.f32.mrf.mxu0  ;;  %v1772_v5 = vpack.c.bf16 %v1768_v40, %v3620_v12 }
 0x121   : > { %v1089_v0 = vadd.f32 %v1076_v43, %v922_v7  ;;  %v1251_v26 = vpop.f32.mrf.mxu3  ;;  %v3803_v7 = vld [vmem:[#allocation5_spill] sm:$0xff] }
 0x122   : > { %v1265_v8 = vadd.f32 %v1247_v18, %v1086_v4 }
 0x126   : > { %2614 = vmatmul.msk.bf16.gmra.mxu3 %vm493_vm0, %v3369_v31  ;;  %v1077_v35 = vpop.f32.mrf.mxu2 }
 0x127   : > { %v1220_v6 = vpop.f32.mrf.mxu1  ;;  %v1078_v28 = vadd.f32 %v1077_v35, %v1048_v39 }
 0x128   : > { %v1250_v34 = vadd.f32 %v1249_v60, %v1220_v6  ;;  %v1390_v1 = vpop.f32.mrf.mxu0 }
 0x129   : > { %v1090_v37 = vadd.f32 %v1078_v28, %v923_v46  ;;  %v1254_v11 = vpop.f32.mrf.mxu3 }
 0x12a   : > { %v1266_v45 = vadd.f32 %v1250_v34, %v1087_v24  ;;  %1875 = vmatmul.bf16.gmra.mxu1 %v3425_v36 }
 0x12b   : > { %2551 = vmatmul.msk.bf16.gmra.mxu2 %vm493_vm0, %v1612_v41  ;;  %1865 = vmatmul.bf16.vlgmr.msra.gmra.mxu0 %v3803_v7 }
 0x12e   : > { %v1080_v31 = vpop.f32.mrf.mxu2 }
 0x12f   : > { %v1222_v53 = vpop.f32.mrf.mxu1  ;;  %v1081_v44 = vadd.f32 %v1080_v31, %v1051_v27 }
 0x130   : > { %v1252_v46 = vadd.f32 %v1251_v26, %v1222_v53  ;;  %v1392_v17 = vpop.f32.mrf.mxu0 }
 0x131   : > { %v1091_v4 = vadd.f32 %v1081_v44, %v3664_v57  ;;  %v1256_v36 = vpop.f32.mrf.mxu3 }
 0x132   : > { %v1267_v23 = vadd.f32 %v1252_v46, %v1088_v54 }
 0x136   : > { %2615 = vmatmul.msk.bf16.gmra.mxu3 %vm493_vm0, %v1772_v5  ;;  %v1082_v9 = vpop.f32.mrf.mxu2 }
 0x137   : > { %v1225_v48 = vpop.f32.mrf.mxu1  ;;  %v1083_v16 = vadd.f32 %v1082_v9, %v1053_v22 }
 0x138   : > { %v1255_v14 = vadd.f32 %v1254_v11, %v1225_v48  ;;  %v1395_v21 = vpop.f32.mrf.mxu0 }
 0x139   : > { %v1092_v55 = vadd.f32 %v1083_v16, %v925_v38  ;;  %v1259_v2 = vpop.f32.mrf.mxu3 }
 0x13a   : > { %v1268_v39 = vadd.f32 %v1255_v14, %v1089_v0  ;;  %1880 = vmatmul.bf16.gmra.mxu1 %v1771_v59 }
 0x13e   : > { %v1419_v57 = vpop.f32.mrf.mxu2 }
 0x13f   : > { %v1227_v24 = vpop.f32.mrf.mxu1  ;;  %v1420_v58 = vadd.f32 %v1419_v57, %v1390_v1 }
 0x140   : > { %v1257_v25 = vadd.f32 %v1256_v36, %v1227_v24  ;;  %v1397_v12 = vpop.f32.mrf.mxu0 }
 0x141   : > { %v1439_v49 = vadd.f32 %v1420_v58, %v1264_v47  ;;  %v1261_v56 = vpop.f32.mrf.mxu3 }
 0x142   : > { %v1269_v3 = vadd.f32 %v1257_v25, %v1090_v37 }
 0x146   : > { %v1421_v52 = vpop.f32.mrf.mxu2 }
 0x147   : > { %v1230_v19 = vpop.f32.mrf.mxu1  ;;  %v1422_v62 = vadd.f32 %v1421_v52, %v1392_v17 }
 0x148   : > { %v1260_v50 = vadd.f32 %v1259_v2, %v1230_v19  ;;  %v1400_v27 = vpop.f32.mrf.mxu0 }
 0x149   : > { %v1440_v54 = vadd.f32 %v1422_v62, %v1265_v8  ;;  %v1571_v60 = vpop.f32.mrf.mxu3 }
 0x14a   : > { %v1270_v15 = vadd.f32 %v1260_v50, %v1091_v4 }
 0x14e   : > { %v1424_v38 = vpop.f32.mrf.mxu2 }
 0x14f   : > { %v1232_v42 = vpop.f32.mrf.mxu1  ;;  %v1425_v10 = vadd.f32 %v1424_v38, %v1395_v21 }
 0x150   : > { %v1262_v33 = vadd.f32 %v1261_v56, %v1232_v42  ;;  %v1402_v43 = vpop.f32.mrf.mxu0 }
 0x151   : > { %v1441_v13 = vadd.f32 %v1425_v10, %v1266_v45  ;;  %v1573_v32 = vpop.f32.mrf.mxu3 }
 0x152   : > { %v1271_v18 = vadd.f32 %v1262_v33, %v1092_v55 }
 0x156   : > { %v1426_v22 = vpop.f32.mrf.mxu2 }
 0x157   : > { %v1542_v47 = vpop.f32.mrf.mxu1  ;;  %v1427_v0 = vadd.f32 %v1426_v22, %v1397_v12  ;;  %v3726_v22 = vld [vmem:[%s3769_s2] ss:$0 sm:$0xff] }
 0x158   : > { %v1572_v26 = vadd.f32 %v1571_v60, %v1542_v47  ;;  %v1405_v29 = vpop.f32.mrf.mxu0 }
 0x159   : > { %v3695_v35 = vadd.f32 %v1427_v0, %v1267_v23  ;;  %v1576_v41 = vpop.f32.mrf.mxu3  ;;  %v2746_v0 = vld [vmem:[%s3721_s17 + $0x8] sm:$0xff]  }
 0x15a   : > { %v1591_v6 = vadd.f32 %v1572_v26, %v1439_v49 }
 0x15e   : > { %v1429_v8 = vpop.f32.mrf.mxu2 }
 0x15f   : > { %v1544_v28 = vpop.f32.mrf.mxu1  ;;  %v1430_v34 = vadd.f32 %v1429_v8, %v1400_v27 }
 0x160   : > { %v1574_v1 = vadd.f32 %v1573_v32, %v1544_v28  ;;  %v1407_v37 = vpop.f32.mrf.mxu0 }
 0x161   : > { %v1443_v11 = vadd.f32 %v1430_v34, %v1268_v39  ;;  %v1578_v7 = vpop.f32.mrf.mxu3  ;;  %v2716_v34 = vunpack.c.l.bf16 %v2746_v0 }
 0x162   : > { %v3697_v63 = vadd.f32 %v1574_v1, %v1440_v54 }
 0x166   : > { %v1431_v45 = vpop.f32.mrf.mxu2 }
 0x167   : > { %v1547_v20 = vpop.f32.mrf.mxu1  ;;  %v1432_v31 = vadd.f32 %v1431_v45, %v1402_v43 }
 0x168   : > { %v1577_v30 = vadd.f32 %v1576_v41, %v1547_v20  ;;  %v1706_v61 = vpop.f32.mrf.mxu0 }
 0x169   : > { %v3699_v53 = vadd.f32 %v1432_v31, %v1269_v3  ;;  %v1581_v44 = vpop.f32.mrf.mxu3 }
 0x16a   : > { %v1593_v40 = vadd.f32 %v1577_v30, %v1441_v13 }
 0x16e   : > { %v1434_v46 = vpop.f32.mrf.mxu2 }
 0x16f   : > { %v1549_v17 = vpop.f32.mrf.mxu1  ;;  %v1435_v4 = vadd.f32 %v1434_v46, %v1405_v29 }
 0x170   : > { %v3701_v36 = vpop.f32.mrf.mxu0  ;;  %v1579_v43 = vadd.f32 %v1578_v7, %v1549_v17 }
 0x171   : > { %v1445_v23 = vadd.f32 %v1435_v4, %v1270_v15  ;;  %v3703_v5 = vpop.f32.mrf.mxu3 }
 0x172   : > { %v1594_v29 = vadd.f32 %v1579_v43, %v3695_v35 }
 0x176   : > { %v1436_v51 = vpop.f32.mrf.mxu2 }
 0x177   : > { %v1552_v59 = vpop.f32.mrf.mxu1  ;;  %v1437_v9 = vadd.f32 %v1436_v51, %v1407_v37 }
 0x178   : > { %v1582_v48 = vadd.f32 %v1581_v44, %v1552_v59  ;;  %v1711_v16 = vpop.f32.mrf.mxu0 }
 0x179   : > { %v3705_v14 = vadd.f32 %v1437_v9, %v1271_v18  ;;  %v1586_v21 = vpop.f32.mrf.mxu3 }
 0x17a   : > { %v1595_v55 = vadd.f32 %v1582_v48, %v1443_v11  ;;  %v2717_v11 = vunpack.c.h.bf16 %v2746_v0 }
 0x17e   : > { %v1735_v2 = vpop.f32.mrf.mxu2 }
 0x17f   : > { %v1554_v39 = vpop.f32.mrf.mxu1  ;;  %v1736_v57 = vadd.f32 %v1735_v2, %v1706_v61 }
 0x180   : > { %v1713_v24 = vpop.f32.mrf.mxu0 }
 0x181   : > { %v1755_v58 = vadd.f32 %v1736_v57, %v1591_v6  ;;  %v3707_v25 = vpop.f32.mrf.mxu3  ;;  %v2747_v57 = vld [vmem:[%s3721_s17 + $0x10] sm:$0xff]  }
 0x186   : > { %v1737_v12 = vpop.f32.mrf.mxu2 }
 0x187   : > { %v1557_v49 = vpop.f32.mrf.mxu1  ;;  %v1738_v9 = vadd.f32 %v1737_v12, %v3701_v36 }
 0x188   : > { %v1587_v56 = vadd.f32 %v1586_v21, %v1557_v49  ;;  %v1716_v3 = vpop.f32.mrf.mxu0  ;;  %v2711_v21 = vld [vmem:[%s3721_s17] sm:$0xff]  }
 0x189   : > { %v1895_v52 = vpop.f32.mrf.mxu3 }
 0x18a   : > { %v3709_v19 = vadd.f32 %v1587_v56, %v1445_v23  ;;  %v1584_v23 = vadd.f32 %v3703_v5, %v1554_v39 }
 0x18c   : > { %v1596_v49 = vadd.f32 %v1584_v23, %v3699_v53 }
 0x18e   : > { %v1740_v62 = vpop.f32.mrf.mxu2 }
 0x18f   : > { %v3711_v50 = vpop.f32.mrf.mxu1  ;;  %v1741_v38 = vadd.f32 %v1740_v62, %v1711_v16  ;;  %v2712_v62 = vunpack.c.l.bf16 %v2711_v21 }
 0x190   : > { %v1718_v27 = vpop.f32.mrf.mxu0 }
 0x191   : > { %v1897_v54 = vpop.f32.mrf.mxu3  ;;  %v1757_v13 = vadd.f32 %v1741_v38, %v1593_v40 }
 0x196   : > { %v1742_v60 = vpop.f32.mrf.mxu2 }
 0x197   : > { %v1871_v15 = vpop.f32.mrf.mxu1  ;;  %v1743_v32 = vadd.f32 %v1742_v60, %v1713_v24 }
 0x198   : > { %v3713_v42 = vpop.f32.mrf.mxu0 }
 0x199   : > { %v1900_v10 = vpop.f32.mrf.mxu3  ;;  %v1758_v8 = vadd.f32 %v1743_v32, %v1594_v29 }
 0x19a   : > { %v1901_v33 = vadd.f32 %v1900_v10, %v1871_v15  ;;  %v2713_v15 = vunpack.c.h.bf16 %v2711_v21  ;;  %v2721_v10 = vunpack.c.h.bf16 %v2747_v57 }
 0x19c   : > { %v1917_v18 = vadd.f32 %v1901_v33, %v1757_v13 }
 0x19e   : > { %v1745_v47 = vpop.f32.mrf.mxu2  ;;  %v1929_v28 = vadd.f32 %v3726_v22, %v1917_v18 }
 0x19f   : > { %v1873_v26 = vpop.f32.mrf.mxu1  ;;  %v1746_v30 = vadd.f32 %v1745_v47, %v1716_v3  ;;  %v1756_v3 = vadd.f32 %v1738_v9, %v3697_v63 }
 0x1a0   : > { %v3730_v41 = vpop.f32.mrf.mxu0  ;;  %v1953_v7 = vadd.f32 %v2716_v34, %v1929_v28 }
 0x1a1   : > { %v1902_v6 = vpop.f32.mrf.mxu3  ;;  %v1759_v51 = vadd.f32 %v1746_v30, %v1595_v55 }
 0x1a2   : > { %v1903_v1 = vadd.f32 %v1902_v6, %v1873_v26  ;;  %v1961_v46 = vmax.f32 %v1953_v7, 0.0 }
 0x1a4   : > { %v1918_v37 = vadd.f32 %v1903_v1, %v1758_v8  ;;  %v1589_v1 = vadd.f32 %v3707_v25, %v3711_v50 }
 0x1a6   : > { %v1930_v45 = vadd.f32 %v3726_v22, %v1918_v37  ;;  %v1747_v31 = vpop.f32.mrf.mxu2 }
 0x1a7   : > { %v1876_v20 = vpop.f32.mrf.mxu1  ;;  %v1748_v16 = vadd.f32 %v1747_v31, %v1718_v27 }
 0x1a8   : > { %v1954_v61 = vadd.f32 %v2717_v11, %v1930_v45  ;;  %v1866_v35 = vpop.f32.mrf.mxu0  ;;  %v2748_v45 = vld [vmem:[%s3721_s17 + $0x18] sm:$0xff]  }
 0x1a9   : > { %v1896_v44 = vadd.f32 %v1895_v52, %v1866_v35  ;;  %v1905_v40 = vpop.f32.mrf.mxu3  ;;  %v1760_v60 = vadd.f32 %v1748_v16, %v1596_v49  ;;  %v2725_v50 = vunpack.c.h.bf16 %v2748_v45 }
 0x1aa   : > { %v1962_v17 = vmax.f32 %v1954_v61, 0.0  ;;  %v1906_v4 = vadd.f32 %v1905_v40, %v1876_v20  ;;  %v1598_v20 = vadd.f32 %v1589_v1, %v3705_v14 }
 0x1ab   : > { %v1915_v48 = vadd.f32 %v1896_v44, %v1755_v58  ;;  %v2720_v58 = vunpack.c.l.bf16 %v2747_v57  ;;  %v2724_v44 = vunpack.c.l.bf16 %v2748_v45 }
 0x1ac   : > { %v2734_v59 = vpack.c.bf16 %v1962_v17, %v1961_v46  ;;  %v1919_v2 = vadd.f32 %v1906_v4, %v1759_v51 }
 0x1ad   : > { %v1927_v52 = vadd.f32 %v3726_v22, %v1915_v48 }
 0x1ae   : > { %2749 = vst [vmem:[%s3739_s23 + $0x8] sm:$0xff] %v2734_v59   ;;  %v1750_v5 = vpop.f32.mrf.mxu2  ;;  %v1931_v36 = vadd.f32 %v3726_v22, %v1919_v2 }
 0x1af   : > { %v1878_v24 = vpop.f32.mrf.mxu1  ;;  %v1951_v33 = vadd.f32 %v2712_v62, %v1927_v52  ;;  %v1751_v32 = vadd.f32 %v1750_v5, %v3713_v42 }
 0x1b0   : > { %v1868_v56 = vpop.f32.mrf.mxu0  ;;  %v1955_v43 = vadd.f32 %v2720_v58, %v1931_v36 }
 0x1b1   : > { %v1898_v55 = vadd.f32 %v1897_v54, %v1868_v56  ;;  %v1907_v39 = vpop.f32.mrf.mxu3  ;;  %v1959_v47 = vmax.f32 %v1951_v33, 0.0  ;;  %v1761_v37 = vadd.f32 %v1751_v32, %v3709_v19 }
 0x1b2   : > { %v1908_v12 = vadd.f32 %v1907_v39, %v1878_v24  ;;  %v1963_v29 = vmax.f32 %v1955_v43, 0.0 }
 0x1b3   : > { %v1916_v27 = vadd.f32 %v1898_v55, %v1756_v3 }
 0x1b4   : > { %v1920_v38 = vadd.f32 %v1908_v12, %v1760_v60 }
 0x1b5   : > { %v1928_v53 = vadd.f32 %v3726_v22, %v1916_v27 }
 0x1b6   : > { %v1932_v63 = vadd.f32 %v3726_v22, %v1920_v38  ;;  %v1752_v34 = vpop.f32.mrf.mxu2 }
 0x1b7   : > { %v1952_v13 = vadd.f32 %v2713_v15, %v1928_v53  ;;  %v1881_v54 = vpop.f32.mrf.mxu1  ;;  %v1753_v42 = vadd.f32 %v1752_v34, %v3730_v41 }
 0x1b8   : > { %v1956_v18 = vadd.f32 %v2721_v10, %v1932_v63 }
 0x1b9   : > { %v1960_v0 = vmax.f32 %v1952_v13, 0.0  ;;  %v1910_v26 = vpop.f32.mrf.mxu3  ;;  %v1762_v61 = vadd.f32 %v1753_v42, %v1598_v20 }
 0x1ba   : > { %v1964_v6 = vmax.f32 %v1956_v18, 0.0  ;;  %v1911_v8 = vadd.f32 %v1910_v26, %v1881_v54 }
 0x1bb   : > { %v2729_v28 = vpack.c.bf16 %v1960_v0, %v1959_v47 }
 0x1bc   : > { %v2739_v11 = vpack.c.bf16 %v1964_v6, %v1963_v29  ;;  %v1921_v7 = vadd.f32 %v1911_v8, %v1761_v37 }
 0x1bd   : > { %2730 = vst [vmem:[%s3739_s23] sm:$0xff] %v2729_v28  }
 0x1be   : > { %2750 = vst [vmem:[%s3739_s23 + $0x10] sm:$0xff] %v2739_v11   ;;  %v1933_v35 = vadd.f32 %v3726_v22, %v1921_v7 }
 0x1bf   : > { %v1883_v31 = vpop.f32.mrf.mxu1 }
 0x1c0   : > { %v1957_v19 = vadd.f32 %v2724_v44, %v1933_v35 }
 0x1c1   : > { %v1912_v30 = vpop.f32.mrf.mxu3 }
 0x1c2   : > { %v1913_v40 = vadd.f32 %v1912_v30, %v1883_v31  ;;  %v1965_v4 = vmax.f32 %v1957_v19, 0.0 }
 0x1c4   : > { %v1922_v25 = vadd.f32 %v1913_v40, %v1762_v61 }
 0x1c6   : > { %v1934_v46 = vadd.f32 %v3726_v22, %v1922_v25 }
 0x1c8   : > { %v1958_v17 = vadd.f32 %v2725_v50, %v1934_v46 }
 0x1ca   : > { %v1966_v41 = vmax.f32 %v1958_v17, 0.0 }
 0x1cc   : > { %v2744_v23 = vpack.c.bf16 %v1966_v41, %v1965_v4 }
 0x1ce   : > { %2751 = vst [vmem:[%s3739_s23 + $0x18] sm:$0xff] %v2744_v23  }
 0x1cf PF: > { %s14_s15 = sadd.s32 1, %s2778_s15  }
 0x1d0   : > { %p11_p4 = scmp.ge.s32.totalorder %s14_s15, 4  }
 0x1d2   :  { %13 = sbr.rel (!%p11_p4) target bundleno = 1 (0x1), region = 77 }

// kernel: c3d_tf_forward.12
= control target key start
LH: loop header
LB: loop body
LE: loop exit
PB: predicated region body
PF: predicated region fallthrough
CT: control target
= control target key end

     0   :  { %vm419_vm0 = vcmask 392192   ;;  %vm672_vm1 = vcmask 257024   ;;  %s1383_s1 = inlined_call_operand.vmem [shape: bf16[432,32], index: 1, kind: input, shape index: {}]   ;;  %s1384_s0 = inlined_call_operand.vmem [shape: bf16[128,432], index: 0, kind: input, shape index: {}]   ;;  %s1385_s2 = inlined_call_operand.vmem [shape: f32[1,32], index: 2, kind: input, shape index: {}]   ;;  %s1386_s3 = inlined_call_operand.vmem [shape: bf16[128,32], index: 3, kind: output, shape index: {}]  }
   0x1   :  { %v976_v0 = vld [vmem:[%s1383_s1 + $0x38] sm:$0xff]  ;;  %v975_v3 = vld [vmem:[%s1383_s1 + $0x30] sm:$0xff]  ;;  %v974_v7 = vld [vmem:[%s1383_s1 + $0x28] sm:$0xff] }
   0x2   :  { %v984_v1 = vld [vmem:[%s1383_s1 + $0x78] sm:$0xff]  ;;  %444 = vmatpush.bf16.msra.mxu0 %v976_v0  ;;  %v983_v4 = vld [vmem:[%s1383_s1 + $0x70] sm:$0xff]  ;;  %v982_v8 = vld [vmem:[%s1383_s1 + $0x68] sm:$0xff] }
   0x3   :  { %v992_v2 = vld [vmem:[%s1383_s1 + $0xb8] sm:$0xff]  ;;  %493 = vmatpush.bf16.msra.mxu1 %v984_v1  ;;  %v991_v5 = vld [vmem:[%s1383_s1 + $0xb0] sm:$0xff]  ;;  %v990_v9 = vld [vmem:[%s1383_s1 + $0xa8] sm:$0xff] }
   0x4   :  { %542 = vmatpush.bf16.msra.mxu2 %v992_v2  ;;  %v995_v6 = vld [vmem:[%s1383_s1 + $0xd0] sm:$0xff]  ;;  %v994_v10 = vld [vmem:[%s1383_s1 + $0xc8] sm:$0xff]  ;;  %v973_v11 = vld [vmem:[%s1383_s1 + $0x20] sm:$0xff] }
   0x5   :  { %596 = vmatpush.bf16.msra.mxu3 %v995_v6  ;;  %v981_v12 = vld [vmem:[%s1383_s1 + $0x60] sm:$0xff]  ;;  %v938_v15 = vld [vmem:[%s1384_s0 + $0xc] sm:$0xf]  ;;  %v705_v16 = vld [vmem:[%s1384_s0 + $0x18] sm:$0xf0] }
   0x6   :  { %445 = vmatpush.bf16.msra.mxu0 %v975_v3  ;;  %v989_v13 = vld [vmem:[%s1383_s1 + $0xa0] sm:$0xff]  ;;  %v972_v17 = vld [vmem:[%s1383_s1 + $0x18] sm:$0xff]  ;;  %v708_v20 = vor.u32 %v938_v15, %v705_v16  ;;  %v971_v21 = vld [vmem:[%s1383_s1 + $0x10] sm:$0xff] }
   0x7   :  { %494 = vmatpush.bf16.msra.mxu1 %v983_v4  ;;  %v993_v14 = vld [vmem:[%s1383_s1 + $0xc0] sm:$0xff]  ;;  %v980_v18 = vld [vmem:[%s1383_s1 + $0x58] sm:$0xff]  ;;  %v979_v22 = vld [vmem:[%s1383_s1 + $0x50] sm:$0xff] }
   0x8   :  { %543 = vmatpush.bf16.msra.mxu2 %v991_v5  ;;  %v988_v19 = vld [vmem:[%s1383_s1 + $0x98] sm:$0xff]  ;;  %v987_v23 = vld [vmem:[%s1383_s1 + $0x90] sm:$0xff]  ;;  %v970_v24 = vld [vmem:[%s1383_s1 + $0x8] sm:$0xff] }
   0x9   :  { %597 = vmatpush.bf16.msra.mxu3 %v994_v10  ;;  %v978_v25 = vld [vmem:[%s1383_s1 + $0x48] sm:$0xff]  ;;  %v969_v27 = vld [vmem:[%s1383_s1] sm:$0xff]  ;;  %v939_v30 = vld [vmem:[%s1384_s0 + $0xc] sm:$0xf0] }
   0xa   :  { %446 = vmatpush.bf16.msra.mxu0 %v974_v7  ;;  %v986_v26 = vld [vmem:[%s1383_s1 + $0x88] sm:$0xff]  ;;  %v977_v28 = vld [vmem:[%s1383_s1 + $0x40] sm:$0xff]  ;;  %v697_v32 = vld [vmem:[%s1384_s0 + $0x10] sm:$0xf0] }
   0xb   :  { %495 = vmatpush.bf16.msra.mxu1 %v982_v8  ;;  %v695_v29 = vld [vmem:[%s1384_s0] sm:$0xf]  ;;  %v937_v31 = vld [vmem:[%s1384_s0 + $0x4] sm:$0xf]  ;;  %v703_v34 = vld [vmem:[%s1384_s0 + $0x8] sm:$0xf] }
   0xc   :  { %544 = vmatpush.bf16.msra.mxu2 %v990_v9  ;;  %v985_v33 = vld [vmem:[%s1383_s1 + $0x80] sm:$0xff]  ;;  %v940_v35 = vld [vmem:[%s1384_s0 + $0x14] sm:$0xf0]  ;;  %v942_v36 = vld [vmem:[%s1384_s0 + $0x2c] sm:$0xf]  ;;  %v696_v38 = vor.u32 %v939_v30, %v695_v29  ;;  %v700_v39 = vor.u32 %v937_v31, %v697_v32 }
   0xd   :  { %598 = vmatpush.bf16.msra.mxu3 %v993_v14  ;;  %v721_v37 = vld [vmem:[%s1384_s0 + $0x38] sm:$0xf0]  ;;  %v704_v40 = vor.u32 %v940_v35, %v703_v34  ;;  %v711_v42 = vld [vmem:[%s1384_s0 + $0x20] sm:$0xf]  ;;  %v943_v43 = vld [vmem:[%s1384_s0 + $0x2c] sm:$0xf0] }
   0xe   :  { %447 = vmatpush.bf16.msra.mxu0 %v973_v11  ;;  %v724_v41 = vor.u32 %v942_v36, %v721_v37  ;;  %v941_v44 = vld [vmem:[%s1384_s0 + $0x24] sm:$0xf]  ;;  %v713_v45 = vld [vmem:[%s1384_s0 + $0x30] sm:$0xf0]  ;;  %v719_v46 = vld [vmem:[%s1384_s0 + $0x28] sm:$0xf]  ;;  %v712_v50 = vor.u32 %v943_v43, %v711_v42 }
   0xf   :  { %496 = vmatpush.bf16.msra.mxu1 %v981_v12  ;;  %v944_v47 = vld [vmem:[%s1384_s0 + $0x34] sm:$0xf0]  ;;  %v946_v48 = vld [vmem:[%s1384_s0 + $0x4c] sm:$0xf]  ;;  %v737_v49 = vld [vmem:[%s1384_s0 + $0x58] sm:$0xf0]  ;;  %v716_v51 = vor.u32 %v941_v44, %v713_v45 }
  0x10   :  { %545 = vmatpush.bf16.msra.mxu2 %v989_v13  ;;  %929 = vmatmul.msk.bf16.vlgmr.msra.gmra.mxu3 %vm419_vm0, %v708_v20  ;;  %v720_v52 = vor.u32 %v944_v47, %v719_v46  ;;  %v740_v53 = vor.u32 %v946_v48, %v737_v49  ;;  %v727_v54 = vld [vmem:[%s1384_s0 + $0x40] sm:$0xf]  ;;  %v947_v55 = vld [vmem:[%s1384_s0 + $0x4c] sm:$0xf0]  ;;  %v945_v56 = vld [vmem:[%s1384_s0 + $0x44] sm:$0xf] }
  0x11   :  { %v729_v57 = vld [vmem:[%s1384_s0 + $0x50] sm:$0xf0]  ;;  %v735_v58 = vld [vmem:[%s1384_s0 + $0x48] sm:$0xf]  ;;  %v948_v59 = vld [vmem:[%s1384_s0 + $0x54] sm:$0xf0]  ;;  %v728_v62 = vor.u32 %v947_v55, %v727_v54 }
  0x12   :  { %448 = vmatpush.bf16.msra.mxu0 %v972_v17  ;;  %v950_v60 = vld [vmem:[%s1384_s0 + $0x6c] sm:$0xf]  ;;  %v753_v61 = vld [vmem:[%s1384_s0 + $0x78] sm:$0xf0]  ;;  %v732_v63 = vor.u32 %v945_v56, %v729_v57  ;;  %v736_v0 = vor.u32 %v948_v59, %v735_v58  ;;  %v743_v2 = vld [vmem:[%s1384_s0 + $0x60] sm:$0xf] }
  0x13   :  { %497 = vmatpush.bf16.msra.mxu1 %v980_v18  ;;  %v756_v1 = vor.u32 %v950_v60, %v753_v61  ;;  %v951_v3 = vld [vmem:[%s1384_s0 + $0x6c] sm:$0xf0]  ;;  %v949_v4 = vld [vmem:[%s1384_s0 + $0x64] sm:$0xf]  ;;  %v745_v5 = vld [vmem:[%s1384_s0 + $0x70] sm:$0xf0] }
  0x14   :  { %546 = vmatpush.bf16.msra.mxu2 %v988_v19  ;;  %v751_v6 = vld [vmem:[%s1384_s0 + $0x68] sm:$0xf]  ;;  %v952_v7 = vld [vmem:[%s1384_s0 + $0x74] sm:$0xf0]  ;;  %v954_v8 = vld [vmem:[%s1384_s0 + $0x8c] sm:$0xf]  ;;  %v744_v10 = vor.u32 %v951_v3, %v743_v2  ;;  %v748_v11 = vor.u32 %v949_v4, %v745_v5 }
  0x15   :  { %v769_v9 = vld [vmem:[%s1384_s0 + $0x98] sm:$0xf0]  ;;  %v752_v12 = vor.u32 %v952_v7, %v751_v6  ;;  %v759_v14 = vld [vmem:[%s1384_s0 + $0x80] sm:$0xf]  ;;  %v955_v15 = vld [vmem:[%s1384_s0 + $0x8c] sm:$0xf0] }
  0x16   :  { %449 = vmatpush.bf16.msra.mxu0 %v971_v21  ;;  %v772_v13 = vor.u32 %v954_v8, %v769_v9  ;;  %v953_v16 = vld [vmem:[%s1384_s0 + $0x84] sm:$0xf]  ;;  %v761_v17 = vld [vmem:[%s1384_s0 + $0x90] sm:$0xf0]  ;;  %v767_v18 = vld [vmem:[%s1384_s0 + $0x88] sm:$0xf] }
  0x17   :  { %498 = vmatpush.bf16.msra.mxu1 %v979_v22  ;;  %v956_v19 = vld [vmem:[%s1384_s0 + $0x94] sm:$0xf0]  ;;  %v958_v20 = vld [vmem:[%s1384_s0 + $0xac] sm:$0xf]  ;;  %v785_v21 = vld [vmem:[%s1384_s0 + $0xb8] sm:$0xf0]  ;;  %v760_v22 = vor.u32 %v955_v15, %v759_v14 }
  0x18   :  { %547 = vmatpush.bf16.msra.mxu2 %v987_v23  ;;  %v764_v23 = vor.u32 %v953_v16, %v761_v17  ;;  %v777_v29 = vld [vmem:[%s1384_s0 + $0xb0] sm:$0xf0]  ;;  %v783_v30 = vld [vmem:[%s1384_s0 + $0xa8] sm:$0xf]  ;;  %v960_v31 = vld [vmem:[%s1384_s0 + $0xb4] sm:$0xf0] }
  0x19   :  { %v962_v32 = vld [vmem:[%s1384_s0 + $0xcc] sm:$0xf]  ;;  %v784_v36 = vor.u32 %v960_v31, %v783_v30  ;;  %v799_v42 = vld [vmem:[%s1384_s0 + $0xc8] sm:$0xf]  ;;  %v964_v43 = vld [vmem:[%s1384_s0 + $0xd4] sm:$0xf0] }
  0x1a   :  { %450 = vmatpush.bf16.msra.mxu0 %v970_v24  ;;  %v768_v24 = vor.u32 %v956_v19, %v767_v18  ;;  %v966_v44 = vld [vmem:[%s1384_s0 + $0xec] sm:$0xf]  ;;  %v817_v45 = vld [vmem:[%s1384_s0 + $0xf8] sm:$0xf0]  ;;  %v800_v48 = vor.u32 %v964_v43, %v799_v42  ;;  %v815_v54 = vld [vmem:[%s1384_s0 + $0xe8] sm:$0xf] }
  0x1b   :  { %499 = vmatpush.bf16.msra.mxu1 %v978_v25  ;;  %v788_v25 = vor.u32 %v958_v20, %v785_v21  ;;  %v820_v49 = vor.u32 %v966_v44, %v817_v45  ;;  %v968_v55 = vld [vmem:[%s1384_s0 + $0xf4] sm:$0xf0]  ;;  %v1301_v60 = vld [vmem:[%s1385_s2] ss:$0 sm:$0xff] }
  0x1c   :  { %548 = vmatpush.bf16.msra.mxu2 %v986_v26  ;;  %v775_v26 = vld [vmem:[%s1384_s0 + $0xa0] sm:$0xf]  ;;  %v816_v58 = vor.u32 %v968_v55, %v815_v54 }
  0x1e   :  { %451 = vmatpush.bf16.msra.mxu0 %v969_v27  ;;  %v959_v27 = vld [vmem:[%s1384_s0 + $0xac] sm:$0xf0] }
  0x1f   :  { %500 = vmatpush.bf16.msra.mxu1 %v977_v28  ;;  %v957_v28 = vld [vmem:[%s1384_s0 + $0xa4] sm:$0xf]  ;;  %v776_v34 = vor.u32 %v959_v27, %v775_v26 }
  0x20   :  { %549 = vmatpush.bf16.msra.mxu2 %v985_v33  ;;  %930 = vmatmul.msk.bf16.gmra.mxu3 %vm419_vm0, %v724_v41  ;;  %v801_v33 = vld [vmem:[%s1384_s0 + $0xd8] sm:$0xf0]  ;;  %v780_v35 = vor.u32 %v957_v28, %v777_v29  ;;  %v793_v41 = vld [vmem:[%s1384_s0 + $0xd0] sm:$0xf0] }
  0x21   :  { %452 = vmatmul.bf16.vlgmr.msra.gmra.mxu0 %v696_v38  ;;  %v804_v37 = vor.u32 %v962_v32, %v801_v33  ;;  %v791_v38 = vld [vmem:[%s1384_s0 + $0xc0] sm:$0xf] }
  0x22   :  { %501 = vmatmul.bf16.vlgmr.msra.gmra.mxu1 %v700_v39  ;;  %v963_v39 = vld [vmem:[%s1384_s0 + $0xcc] sm:$0xf0] }
  0x23   :  { %550 = vmatmul.bf16.vlgmr.msra.gmra.mxu2 %v704_v40  ;;  %v961_v40 = vld [vmem:[%s1384_s0 + $0xc4] sm:$0xf]  ;;  %v792_v46 = vor.u32 %v963_v39, %v791_v38 }
  0x24   :  { %v796_v47 = vor.u32 %v961_v40, %v793_v41 }
  0x30   :  { %931 = vmatmul.msk.bf16.gmra.mxu3 %vm419_vm0, %v740_v53  ;;  %v809_v53 = vld [vmem:[%s1384_s0 + $0xf0] sm:$0xf0] }
  0x31   :  { %457 = vmatmul.bf16.gmra.mxu0 %v712_v50  ;;  %v807_v50 = vld [vmem:[%s1384_s0 + $0xe0] sm:$0xf] }
  0x32   :  { %506 = vmatmul.bf16.gmra.mxu1 %v716_v51  ;;  %v967_v51 = vld [vmem:[%s1384_s0 + $0xec] sm:$0xf0] }
  0x33   :  { %555 = vmatmul.bf16.gmra.mxu2 %v720_v52  ;;  %v965_v52 = vld [vmem:[%s1384_s0 + $0xe4] sm:$0xf]  ;;  %v808_v56 = vor.u32 %v967_v51, %v807_v50 }
  0x34   :  { %v812_v57 = vor.u32 %v965_v52, %v809_v53 }
  0x40   :  { %932 = vmatmul.msk.bf16.gmra.mxu3 %vm419_vm0, %v756_v1 }
  0x41   :  { %462 = vmatmul.bf16.gmra.mxu0 %v728_v62 }
  0x42   :  { %511 = vmatmul.bf16.gmra.mxu1 %v732_v63 }
  0x43   :  { %560 = vmatmul.bf16.gmra.mxu2 %v736_v0 }
  0x50   :  { %933 = vmatmul.msk.bf16.gmra.mxu3 %vm419_vm0, %v772_v13 }
  0x51   :  { %467 = vmatmul.bf16.gmra.mxu0 %v744_v10 }
  0x52   :  { %516 = vmatmul.bf16.gmra.mxu1 %v748_v11 }
  0x53   :  { %565 = vmatmul.bf16.gmra.mxu2 %v752_v12 }
  0x60   :  { %934 = vmatmul.msk.bf16.gmra.mxu3 %vm419_vm0, %v788_v25 }
  0x61   :  { %472 = vmatmul.bf16.gmra.mxu0 %v760_v22 }
  0x62   :  { %521 = vmatmul.bf16.gmra.mxu1 %v764_v23 }
  0x63   :  { %570 = vmatmul.bf16.gmra.mxu2 %v768_v24 }
  0x70   :  { %935 = vmatmul.msk.bf16.gmra.mxu3 %vm419_vm0, %v804_v37 }
  0x71   :  { %477 = vmatmul.bf16.gmra.mxu0 %v776_v34 }
  0x72   :  { %526 = vmatmul.bf16.gmra.mxu1 %v780_v35 }
  0x73   :  { %575 = vmatmul.bf16.gmra.mxu2 %v784_v36 }
  0x80   :  { %936 = vmatmul.msk.bf16.gmra.mxu3 %vm419_vm0, %v820_v49 }
  0x81   :  { %482 = vmatmul.bf16.gmra.mxu0 %v792_v46 }
  0x82   :  { %531 = vmatmul.bf16.gmra.mxu1 %v796_v47 }
  0x83   :  { %580 = vmatmul.bf16.gmra.mxu2 %v800_v48 }
  0x91   :  { %487 = vmatmul.bf16.gmra.mxu0 %v808_v56 }
  0x92   :  { %536 = vmatmul.bf16.gmra.mxu1 %v812_v57 }
  0x93   :  { %585 = vmatmul.bf16.gmra.mxu2 %v816_v58  ;;  %v600_v59 = vpop.f32.mrf.mxu3 }
  0x9b   :  { %v602_v0 = vpop.f32.mrf.mxu3 }
  0x9e   :  { %v453_v61 = vpop.f32.mrf.mxu0 }
  0x9f   :  { %v502_v62 = vpop.f32.mrf.mxu1  ;;  %v454_v63 = vadd.f32 %v1301_v60, %v453_v61 }
  0xa1   :  { %v503_v1 = vadd.f32 %v502_v62, %v454_v63 }
  0xa3   :  { %v605_v6 = vpop.f32.mrf.mxu3 }
  0xa6   :  { %v551_v2 = vpop.f32.mrf.mxu2  ;;  %v455_v4 = vpop.f32.mrf.mxu0 }
  0xa7   :  { %v552_v3 = vadd.f32 %v551_v2, %v503_v1  ;;  %v504_v5 = vpop.f32.mrf.mxu1  ;;  %v456_v8 = vadd.f32 %v1301_v60, %v455_v4 }
  0xa9   :  { %v601_v7 = vadd.f32 %v600_v59, %v552_v3  ;;  %v505_v11 = vadd.f32 %v504_v5, %v456_v8 }
  0xab   :  { %v640_v9 = vmax.f32 %v601_v7, 0.0  ;;  %v607_v17 = vpop.f32.mrf.mxu3 }
  0xad   :  { %v656_v10 = vpack.c.bf16 %v640_v9, %v640_v9 }
  0xae   :  { %v553_v12 = vpop.f32.mrf.mxu2  ;;  %v458_v14 = vpop.f32.mrf.mxu0 }
  0xaf   :  { %673 = vst.msk [vmem:[%s1386_s3] sm:$0xf] %vm672_vm1, %v656_v10  ;;  %v554_v13 = vadd.f32 %v553_v12, %v505_v11  ;;  %v507_v15 = vpop.f32.mrf.mxu1  ;;  %v459_v16 = vadd.f32 %v1301_v60, %v458_v14 }
  0xb1   :  { %v603_v18 = vadd.f32 %v602_v0, %v554_v13  ;;  %v508_v20 = vadd.f32 %v507_v15, %v459_v16 }
  0xb3   :  { %v641_v19 = vmax.f32 %v603_v18, 0.0  ;;  %v610_v26 = vpop.f32.mrf.mxu3 }
  0xb5   :  { %v657_v21 = vpack.c.bf16 %v641_v19, %v641_v19 }
  0xb6   :  { %v556_v22 = vpop.f32.mrf.mxu2  ;;  %v460_v24 = vpop.f32.mrf.mxu0 }
  0xb7   :  { %674 = vst.msk [vmem:[%s1386_s3 + $0x4] sm:$0xf] %vm672_vm1, %v657_v21  ;;  %v557_v23 = vadd.f32 %v556_v22, %v508_v20  ;;  %v509_v25 = vpop.f32.mrf.mxu1  ;;  %v461_v28 = vadd.f32 %v1301_v60, %v460_v24 }
  0xb9   :  { %v606_v27 = vadd.f32 %v605_v6, %v557_v23  ;;  %v510_v31 = vadd.f32 %v509_v25, %v461_v28 }
  0xbb   :  { %v642_v29 = vmax.f32 %v606_v27, 0.0  ;;  %v612_v37 = vpop.f32.mrf.mxu3 }
  0xbd   :  { %v658_v30 = vpack.c.bf16 %v642_v29, %v642_v29 }
  0xbe   :  { %v558_v32 = vpop.f32.mrf.mxu2  ;;  %v463_v34 = vpop.f32.mrf.mxu0 }
  0xbf   :  { %675 = vst.msk [vmem:[%s1386_s3 + $0x8] sm:$0xf] %vm672_vm1, %v658_v30  ;;  %v559_v33 = vadd.f32 %v558_v32, %v510_v31  ;;  %v512_v35 = vpop.f32.mrf.mxu1  ;;  %v464_v36 = vadd.f32 %v1301_v60, %v463_v34 }
  0xc1   :  { %v608_v38 = vadd.f32 %v607_v17, %v559_v33  ;;  %v513_v40 = vadd.f32 %v512_v35, %v464_v36 }
  0xc3   :  { %v643_v39 = vmax.f32 %v608_v38, 0.0  ;;  %v615_v46 = vpop.f32.mrf.mxu3 }
  0xc5   :  { %v659_v41 = vpack.c.bf16 %v643_v39, %v643_v39 }
  0xc6   :  { %v561_v42 = vpop.f32.mrf.mxu2  ;;  %v465_v44 = vpop.f32.mrf.mxu0 }
  0xc7   :  { %676 = vst.msk [vmem:[%s1386_s3 + $0xc] sm:$0xf] %vm672_vm1, %v659_v41  ;;  %v562_v43 = vadd.f32 %v561_v42, %v513_v40  ;;  %v514_v45 = vpop.f32.mrf.mxu1  ;;  %v466_v48 = vadd.f32 %v1301_v60, %v465_v44 }
  0xc9   :  { %v611_v47 = vadd.f32 %v610_v26, %v562_v43  ;;  %v515_v51 = vadd.f32 %v514_v45, %v466_v48 }
  0xcb   :  { %v644_v49 = vmax.f32 %v611_v47, 0.0  ;;  %v617_v57 = vpop.f32.mrf.mxu3 }
  0xcd   :  { %v660_v50 = vpack.c.bf16 %v644_v49, %v644_v49 }
  0xce   :  { %v563_v52 = vpop.f32.mrf.mxu2  ;;  %v468_v54 = vpop.f32.mrf.mxu0 }
  0xcf   :  { %677 = vst.msk [vmem:[%s1386_s3 + $0x10] sm:$0xf] %vm672_vm1, %v660_v50  ;;  %v564_v53 = vadd.f32 %v563_v52, %v515_v51  ;;  %v517_v55 = vpop.f32.mrf.mxu1  ;;  %v469_v56 = vadd.f32 %v1301_v60, %v468_v54 }
  0xd1   :  { %v613_v58 = vadd.f32 %v612_v37, %v564_v53  ;;  %v518_v61 = vadd.f32 %v517_v55, %v469_v56 }
  0xd3   :  { %v645_v59 = vmax.f32 %v613_v58, 0.0  ;;  %v620_v5 = vpop.f32.mrf.mxu3 }
  0xd5   :  { %v661_v62 = vpack.c.bf16 %v645_v59, %v645_v59 }
  0xd6   :  { %v566_v63 = vpop.f32.mrf.mxu2  ;;  %v470_v1 = vpop.f32.mrf.mxu0 }
  0xd7   :  { %678 = vst.msk [vmem:[%s1386_s3 + $0x14] sm:$0xf] %vm672_vm1, %v661_v62  ;;  %v567_v0 = vadd.f32 %v566_v63, %v518_v61  ;;  %v519_v2 = vpop.f32.mrf.mxu1  ;;  %v471_v4 = vadd.f32 %v1301_v60, %v470_v1 }
  0xd9   :  { %v616_v3 = vadd.f32 %v615_v46, %v567_v0  ;;  %v520_v8 = vadd.f32 %v519_v2, %v471_v4 }
  0xdb   :  { %v646_v6 = vmax.f32 %v616_v3, 0.0  ;;  %v622_v17 = vpop.f32.mrf.mxu3 }
  0xdd   :  { %v662_v7 = vpack.c.bf16 %v646_v6, %v646_v6 }
  0xde   :  { %v568_v9 = vpop.f32.mrf.mxu2  ;;  %v473_v11 = vpop.f32.mrf.mxu0 }
  0xdf   :  { %679 = vst.msk [vmem:[%s1386_s3 + $0x18] sm:$0xf] %vm672_vm1, %v662_v7  ;;  %v569_v10 = vadd.f32 %v568_v9, %v520_v8  ;;  %v522_v12 = vpop.f32.mrf.mxu1  ;;  %v474_v13 = vadd.f32 %v1301_v60, %v473_v11 }
  0xe1   :  { %v618_v14 = vadd.f32 %v617_v57, %v569_v10  ;;  %v523_v16 = vadd.f32 %v522_v12, %v474_v13 }
  0xe3   :  { %v647_v15 = vmax.f32 %v618_v14, 0.0  ;;  %v625_v29 = vpop.f32.mrf.mxu3 }
  0xe5   :  { %v663_v18 = vpack.c.bf16 %v647_v15, %v647_v15 }
  0xe6   :  { %v571_v19 = vpop.f32.mrf.mxu2  ;;  %v475_v21 = vpop.f32.mrf.mxu0 }
  0xe7   :  { %680 = vst.msk [vmem:[%s1386_s3 + $0x1c] sm:$0xf] %vm672_vm1, %v663_v18  ;;  %v572_v20 = vadd.f32 %v571_v19, %v523_v16  ;;  %v524_v22 = vpop.f32.mrf.mxu1  ;;  %v476_v24 = vadd.f32 %v1301_v60, %v475_v21 }
  0xe9   :  { %v621_v23 = vadd.f32 %v620_v5, %v572_v20  ;;  %v525_v27 = vadd.f32 %v524_v22, %v476_v24 }
  0xeb   :  { %v648_v25 = vmax.f32 %v621_v23, 0.0  ;;  %v627_v42 = vpop.f32.mrf.mxu3 }
  0xed   :  { %v664_v26 = vpack.c.bf16 %v648_v25, %v648_v25 }
  0xee   :  { %v573_v28 = vpop.f32.mrf.mxu2  ;;  %v478_v31 = vpop.f32.mrf.mxu0 }
  0xef   :  { %681 = vst.msk [vmem:[%s1386_s3 + $0x20] sm:$0xf] %vm672_vm1, %v664_v26  ;;  %v574_v30 = vadd.f32 %v573_v28, %v525_v27  ;;  %v527_v32 = vpop.f32.mrf.mxu1  ;;  %v479_v33 = vadd.f32 %v1301_v60, %v478_v31 }
  0xf1   :  { %v623_v34 = vadd.f32 %v622_v17, %v574_v30  ;;  %v528_v36 = vadd.f32 %v527_v32, %v479_v33 }
  0xf3   :  { %v649_v35 = vmax.f32 %v623_v34, 0.0  ;;  %v630_v54 = vpop.f32.mrf.mxu3 }
  0xf5   :  { %v665_v37 = vpack.c.bf16 %v649_v35, %v649_v35 }
  0xf6   :  { %v576_v38 = vpop.f32.mrf.mxu2  ;;  %v480_v40 = vpop.f32.mrf.mxu0 }
  0xf7   :  { %682 = vst.msk [vmem:[%s1386_s3 + $0x24] sm:$0xf] %vm672_vm1, %v665_v37  ;;  %v577_v39 = vadd.f32 %v576_v38, %v528_v36  ;;  %v529_v41 = vpop.f32.mrf.mxu1  ;;  %v481_v44 = vadd.f32 %v1301_v60, %v480_v40 }
  0xf9   :  { %v626_v43 = vadd.f32 %v625_v29, %v577_v39  ;;  %v530_v47 = vadd.f32 %v529_v41, %v481_v44 }
  0xfb   :  { %v650_v45 = vmax.f32 %v626_v43, 0.0  ;;  %v632_v2 = vpop.f32.mrf.mxu3 }
  0xfd   :  { %v666_v46 = vpack.c.bf16 %v650_v45, %v650_v45 }
  0xfe   :  { %v578_v48 = vpop.f32.mrf.mxu2  ;;  %v483_v50 = vpop.f32.mrf.mxu0 }
  0xff   :  { %683 = vst.msk [vmem:[%s1386_s3 + $0x28] sm:$0xf] %vm672_vm1, %v666_v46  ;;  %v579_v49 = vadd.f32 %v578_v48, %v530_v47  ;;  %v532_v51 = vpop.f32.mrf.mxu1  ;;  %v484_v52 = vadd.f32 %v1301_v60, %v483_v50 }
 0x101   :  { %v628_v53 = vadd.f32 %v627_v42, %v579_v49  ;;  %v533_v56 = vadd.f32 %v532_v51, %v484_v52 }
 0x103   :  { %v651_v55 = vmax.f32 %v628_v53, 0.0  ;;  %v635_v14 = vpop.f32.mrf.mxu3 }
 0x105   :  { %v667_v57 = vpack.c.bf16 %v651_v55, %v651_v55 }
 0x106   :  { %v581_v58 = vpop.f32.mrf.mxu2  ;;  %v485_v61 = vpop.f32.mrf.mxu0 }
 0x107   :  { %684 = vst.msk [vmem:[%s1386_s3 + $0x2c] sm:$0xf] %vm672_vm1, %v667_v57  ;;  %v582_v59 = vadd.f32 %v581_v58, %v533_v56  ;;  %v534_v62 = vpop.f32.mrf.mxu1  ;;  %v486_v0 = vadd.f32 %v1301_v60, %v485_v61 }
 0x109   :  { %v631_v63 = vadd.f32 %v630_v54, %v582_v59  ;;  %v535_v4 = vadd.f32 %v534_v62, %v486_v0 }
 0x10b   :  { %v652_v1 = vmax.f32 %v631_v63, 0.0  ;;  %v637_v26 = vpop.f32.mrf.mxu3 }
 0x10d   :  { %v668_v3 = vpack.c.bf16 %v652_v1, %v652_v1 }
 0x10e   :  { %v583_v5 = vpop.f32.mrf.mxu2  ;;  %v488_v7 = vpop.f32.mrf.mxu0 }
 0x10f   :  { %685 = vst.msk [vmem:[%s1386_s3 + $0x30] sm:$0xf] %vm672_vm1, %v668_v3  ;;  %v584_v6 = vadd.f32 %v583_v5, %v535_v4  ;;  %v489_v8 = vadd.f32 %v1301_v60, %v488_v7  ;;  %v537_v10 = vpop.f32.mrf.mxu1 }
 0x111   :  { %v633_v9 = vadd.f32 %v632_v2, %v584_v6  ;;  %v538_v12 = vadd.f32 %v537_v10, %v489_v8 }
 0x113   :  { %v653_v11 = vmax.f32 %v633_v9, 0.0 }
 0x115   :  { %v669_v13 = vpack.c.bf16 %v653_v11, %v653_v11 }
 0x116   :  { %v586_v15 = vpop.f32.mrf.mxu2  ;;  %v490_v17 = vpop.f32.mrf.mxu0 }
 0x117   :  { %686 = vst.msk [vmem:[%s1386_s3 + $0x34] sm:$0xf] %vm672_vm1, %v669_v13  ;;  %v587_v16 = vadd.f32 %v586_v15, %v538_v12  ;;  %v491_v19 = vadd.f32 %v1301_v60, %v490_v17  ;;  %v539_v21 = vpop.f32.mrf.mxu1 }
 0x119   :  { %v636_v18 = vadd.f32 %v635_v14, %v587_v16  ;;  %v540_v23 = vadd.f32 %v539_v21, %v491_v19 }
 0x11b   :  { %v654_v20 = vmax.f32 %v636_v18, 0.0 }
 0x11d   :  { %v670_v22 = vpack.c.bf16 %v654_v20, %v654_v20 }
 0x11e   :  { %v588_v24 = vpop.f32.mrf.mxu2 }
 0x11f   :  { %687 = vst.msk [vmem:[%s1386_s3 + $0x38] sm:$0xf] %vm672_vm1, %v670_v22  ;;  %v589_v25 = vadd.f32 %v588_v24, %v540_v23 }
 0x121   :  { %v638_v27 = vadd.f32 %v637_v26, %v589_v25 }
 0x123   :  { %v655_v28 = vmax.f32 %v638_v27, 0.0 }
 0x125   :  { %v671_v29 = vpack.c.bf16 %v655_v28, %v655_v28 }
 0x127   :  { %688 = vst.msk [vmem:[%s1386_s3 + $0x3c] sm:$0xf] %vm672_vm1, %v671_v29 }

// kernel: c3d_tf_forward.13
= control target key start
LH: loop header
LB: loop body
LE: loop exit
PB: predicated region body
PF: predicated region fallthrough
CT: control target
= control target key end

     0   :  { %vm83_vm0 = vcmask 130048   ;;  %vm173_vm1 = vcmask 257024   ;;  %s373_s1 = inlined_call_operand.vmem [shape: bf16[16,32], index: 1, kind: input, shape index: {}]   ;;  %s374_s0 = inlined_call_operand.vmem [shape: bf16[128,16], index: 0, kind: input, shape index: {}]   ;;  %s375_s2 = inlined_call_operand.vmem [shape: f32[1,32], index: 2, kind: input, shape index: {}]   ;;  %s376_s3 = inlined_call_operand.vmem [shape: bf16[128,32], index: 3, kind: output, shape index: {}]  }
   0x1   :  { %v246_v0 = vld [vmem:[%s373_s1] sm:$0xff]  ;;  %v240_v2 = vld [vmem:[%s374_s0 + $0x10] sm:$0xff]  ;;  %v239_v5 = vld [vmem:[%s374_s0 + $0x8] sm:$0xff] }
   0x2   :  { %v238_v1 = vld [vmem:[%s374_s0] sm:$0xff]  ;;  %115 = vmatpush.bf16.msra.mxu0 %v246_v0  ;;  %247 = vmatpush.bf16.msra.mxu1 %v246_v0  ;;  %v244_v4 = vld [vmem:[%s374_s0 + $0x30] sm:$0xff]  ;;  %v241_v6 = vld [vmem:[%s374_s0 + $0x18] sm:$0xff] }
   0x3   :  { %v242_v3 = vld [vmem:[%s374_s0 + $0x20] sm:$0xff]  ;;  %248 = vmatpush.bf16.msra.mxu2 %v246_v0  ;;  %249 = vmatpush.bf16.msra.mxu3 %v246_v0  ;;  %v243_v7 = vld [vmem:[%s374_s0 + $0x28] sm:$0xff]  ;;  %v245_v8 = vld [vmem:[%s374_s0 + $0x38] sm:$0xff] }
   0x4   :  { %v250_v9 = vld [vmem:[%s375_s2] ss:$0 sm:$0xff] }
   0x5   :  { %230 = vmatmul.msk.bf16.vlgmr.msra.gmra.mxu0 %vm83_vm0, %v238_v1  ;;  %232 = vmatmul.msk.bf16.vlgmr.msra.gmra.mxu1 %vm83_vm0, %v240_v2 }
   0x6   :  { %234 = vmatmul.msk.bf16.vlgmr.msra.gmra.mxu2 %vm83_vm0, %v242_v3  ;;  %236 = vmatmul.msk.bf16.vlgmr.msra.gmra.mxu3 %vm83_vm0, %v244_v4 }
  0x15   :  { %231 = vmatmul.msk.bf16.gmra.mxu0 %vm83_vm0, %v239_v5  ;;  %233 = vmatmul.msk.bf16.gmra.mxu1 %vm83_vm0, %v241_v6 }
  0x16   :  { %235 = vmatmul.msk.bf16.gmra.mxu2 %vm83_vm0, %v243_v7  ;;  %237 = vmatmul.msk.bf16.gmra.mxu3 %vm83_vm0, %v245_v8 }
  0x82   :  { %v117_v10 = vpop.f32.mrf.mxu0  ;;  %v127_v11 = vpop.f32.mrf.mxu1 }
  0x83   :  { %v118_v12 = vadd.f32 %v250_v9, %v117_v10  ;;  %v128_v13 = vadd.f32 %v250_v9, %v127_v11 }
  0x85   :  { %v157_v14 = vpack.c.bf16 %v118_v12, %v118_v12  ;;  %v161_v15 = vpack.c.bf16 %v128_v13, %v128_v13 }
  0x87   :  { %174 = vst.msk [vmem:[%s376_s3] sm:$0xf] %vm173_vm1, %v157_v14 }
  0x88   :  { %178 = vst.msk [vmem:[%s376_s3 + $0x10] sm:$0xf] %vm173_vm1, %v161_v15 }
  0x89   :  { %v137_v16 = vpop.f32.mrf.mxu2  ;;  %v147_v17 = vpop.f32.mrf.mxu3 }
  0x8a   :  { %v138_v18 = vadd.f32 %v250_v9, %v137_v16  ;;  %v148_v19 = vadd.f32 %v250_v9, %v147_v17  ;;  %v119_v20 = vpop.f32.mrf.mxu0  ;;  %v129_v21 = vpop.f32.mrf.mxu1 }
  0x8b   :  { %v120_v22 = vadd.f32 %v250_v9, %v119_v20  ;;  %v130_v23 = vadd.f32 %v250_v9, %v129_v21 }
  0x8c   :  { %v165_v24 = vpack.c.bf16 %v138_v18, %v138_v18  ;;  %v169_v25 = vpack.c.bf16 %v148_v19, %v148_v19 }
  0x8d   :  { %v158_v26 = vpack.c.bf16 %v120_v22, %v120_v22  ;;  %v162_v27 = vpack.c.bf16 %v130_v23, %v130_v23 }
  0x8e   :  { %182 = vst.msk [vmem:[%s376_s3 + $0x20] sm:$0xf] %vm173_vm1, %v165_v24 }
  0x8f   :  { %186 = vst.msk [vmem:[%s376_s3 + $0x30] sm:$0xf] %vm173_vm1, %v169_v25 }
  0x90   :  { %175 = vst.msk [vmem:[%s376_s3 + $0x4] sm:$0xf] %vm173_vm1, %v158_v26 }
  0x91   :  { %179 = vst.msk [vmem:[%s376_s3 + $0x14] sm:$0xf] %vm173_vm1, %v162_v27  ;;  %v139_v28 = vpop.f32.mrf.mxu2  ;;  %v149_v29 = vpop.f32.mrf.mxu3 }
  0x92   :  { %v140_v30 = vadd.f32 %v250_v9, %v139_v28  ;;  %v150_v31 = vadd.f32 %v250_v9, %v149_v29  ;;  %v122_v32 = vpop.f32.mrf.mxu0  ;;  %v132_v33 = vpop.f32.mrf.mxu1 }
  0x93   :  { %v123_v34 = vadd.f32 %v250_v9, %v122_v32  ;;  %v133_v35 = vadd.f32 %v250_v9, %v132_v33 }
  0x94   :  { %v166_v36 = vpack.c.bf16 %v140_v30, %v140_v30  ;;  %v170_v37 = vpack.c.bf16 %v150_v31, %v150_v31 }
  0x95   :  { %v159_v38 = vpack.c.bf16 %v123_v34, %v123_v34  ;;  %v163_v39 = vpack.c.bf16 %v133_v35, %v133_v35 }
  0x96   :  { %183 = vst.msk [vmem:[%s376_s3 + $0x24] sm:$0xf] %vm173_vm1, %v166_v36 }
  0x97   :  { %187 = vst.msk [vmem:[%s376_s3 + $0x34] sm:$0xf] %vm173_vm1, %v170_v37 }
  0x98   :  { %176 = vst.msk [vmem:[%s376_s3 + $0x8] sm:$0xf] %vm173_vm1, %v159_v38 }
  0x99   :  { %180 = vst.msk [vmem:[%s376_s3 + $0x18] sm:$0xf] %vm173_vm1, %v163_v39  ;;  %v142_v40 = vpop.f32.mrf.mxu2  ;;  %v152_v41 = vpop.f32.mrf.mxu3 }
  0x9a   :  { %v143_v42 = vadd.f32 %v250_v9, %v142_v40  ;;  %v153_v43 = vadd.f32 %v250_v9, %v152_v41  ;;  %v124_v44 = vpop.f32.mrf.mxu0  ;;  %v134_v45 = vpop.f32.mrf.mxu1 }
  0x9b   :  { %v125_v46 = vadd.f32 %v250_v9, %v124_v44  ;;  %v135_v47 = vadd.f32 %v250_v9, %v134_v45 }
  0x9c   :  { %v167_v48 = vpack.c.bf16 %v143_v42, %v143_v42  ;;  %v171_v49 = vpack.c.bf16 %v153_v43, %v153_v43 }
  0x9d   :  { %v160_v50 = vpack.c.bf16 %v125_v46, %v125_v46  ;;  %v164_v51 = vpack.c.bf16 %v135_v47, %v135_v47 }
  0x9e   :  { %184 = vst.msk [vmem:[%s376_s3 + $0x28] sm:$0xf] %vm173_vm1, %v167_v48 }
  0x9f   :  { %188 = vst.msk [vmem:[%s376_s3 + $0x38] sm:$0xf] %vm173_vm1, %v171_v49 }
  0xa0   :  { %177 = vst.msk [vmem:[%s376_s3 + $0xc] sm:$0xf] %vm173_vm1, %v160_v50 }
  0xa1   :  { %181 = vst.msk [vmem:[%s376_s3 + $0x1c] sm:$0xf] %vm173_vm1, %v164_v51  ;;  %v144_v52 = vpop.f32.mrf.mxu2  ;;  %v154_v53 = vpop.f32.mrf.mxu3 }
  0xa2   :  { %v145_v54 = vadd.f32 %v250_v9, %v144_v52  ;;  %v155_v55 = vadd.f32 %v250_v9, %v154_v53 }
  0xa4   :  { %v168_v56 = vpack.c.bf16 %v145_v54, %v145_v54  ;;  %v172_v57 = vpack.c.bf16 %v155_v55, %v155_v55 }
  0xa6   :  { %185 = vst.msk [vmem:[%s376_s3 + $0x2c] sm:$0xf] %vm173_vm1, %v168_v56 }
  0xa7   :  { %189 = vst.msk [vmem:[%s376_s3 + $0x3c] sm:$0xf] %vm173_vm1, %v172_v57 }

// kernel: tile.38
= control target key start
LH: loop header
LB: loop body
LE: loop exit
PB: predicated region body
PF: predicated region fallthrough
CT: control target
= control target key end

     0   :  { %s22_s0 = inlined_call_operand.vmem [shape: f32[32], index: 0, kind: input, shape index: {}]   ;;  %s23_s1 = inlined_call_operand.vmem [shape: f32[4,32], index: 1, kind: output, shape index: {}]  }
   0x1   :  { %v4_v0 = vld [vmem:[%s22_s0] ss:$0 sm:$0xff] }
   0x2   :  { %5 = vst [vmem:[%s23_s1] sm:$0xf] %v4_v0 }

// kernel: tile.39
= control target key start
LH: loop header
LB: loop body
LE: loop exit
PB: predicated region body
PF: predicated region fallthrough
CT: control target
= control target key end

     0   :  { %s37_s8 = smov 32   ;;  %s38_s9 = smov 64   ;;  %vm7_vm0 = vcmask 261120   ;;  %vm13_vm1 = vcmask 1048320   ;;  %vm19_vm2 = vcmask 785920   ;;  %vm25_vm3 = vcmask 523520   ;;  %s55_s0 = inlined_call_operand.vmem [shape: f32[4,32], index: 0, kind: input, shape index: {}]   ;;  %s56_s1 = inlined_call_operand.vmem [shape: f32[1,128], index: 1, kind: output, shape index: {}]  }
   0x1   :  { %v4_v0 = vld [vmem:[%s55_s0] sm:$0xf]  ;;  %s36_s0 = smov 96  }
   0x2   :  { %5 = vst [vmem:[#allocation1] sm:$0xf] %v4_v0 }
   0x9   :  { %v10_v1 = vld [vmem:[#allocation1 + $0x3] sm:$0x1]   ;;  %v22_v2 = vld [vmem:[#allocation1 + $0x1] sm:$0x1]   ;;  %v16_v3 = vld [vmem:[#allocation1 + $0x2] sm:$0x1]  }
   0xa   :  { %11 = vrot.lane.b32.xlu0 %v10_v1, %s36_s0  ;;  %23 = vrot.lane.b32.xlu1 %v22_v2, %s37_s8  ;;  %v6_v4 = vld [vmem:[#allocation1] sm:$0x1]  }
   0xb   :  { %8 = vst.msk [vmem:[#allocation0] sm:$0x1] %vm7_vm0, %v6_v4  }
  0x12   :  { %17 = vrot.lane.b32.xlu0 %v16_v3, %s38_s9 }
  0x7c   :  { %v12_v5 = vpop.permute.xlu0 %11   ;;  %v24_v6 = vpop.permute.xlu1 %23  }
  0x7d   :  { %14 = vst.msk [vmem:[#allocation0] sm:$0x1] %vm13_vm1, %v12_v5  }
  0x84   :  { %v18_v7 = vpop.permute.xlu0 %17  }
  0x85   :  { %20 = vst.msk [vmem:[#allocation0] sm:$0x1] %vm19_vm2, %v18_v7  }
  0x86   :  { %26 = vst.msk [vmem:[#allocation0] sm:$0x1] %vm25_vm3, %v24_v6  }
  0x8d   :  { %v29_v8 = vld [vmem:[#allocation0] sm:$0x1] }
  0x8e   :  { %32 = vst [vmem:[%s56_s1] sm:$0x1] %v29_v8 }

// kernel: c3d_tf_forward.14
= control target key start
LH: loop header
LB: loop body
LE: loop exit
PB: predicated region body
PF: predicated region fallthrough
CT: control target
= control target key end

     0   :  { %s2621_s15 = smov 0   ;;  %s3244_s0 = inlined_call_operand.vmem [shape: bf16[2,6,10,192], index: 0, kind: input, shape index: {}]   ;;  %s3245_s1 = inlined_call_operand.vmem [shape: bf16[9,192,128], index: 1, kind: input, shape index: {}]   ;;  %s3246_s2 = inlined_call_operand.vmem [shape: f32[1,128], index: 2, kind: input, shape index: {}]   ;;  %s3247_s3 = inlined_call_operand.vmem [shape: bf16[2,32,128], index: 3, kind: input, shape index: {}]   ;;  %s3248_s4 = inlined_call_operand.vmem [shape: bf16[2,32,128], index: 4, kind: output, shape index: {}]  }
   0x1 LB: > { %s1794_s16 = sadd.s32 4294967295, %s2594_s15   ;;  %p1798_p0 = scmp.ge.s32.totalorder %s2594_s15, 1  ;;  %s2594_s15 = sphi %s2621_s15, %s14_s15  }
   0x2   : > { %p172_p1 = scmp.lt.s32.totalorder %s2594_s15, 3 }
   0x4   : > { %p173_p2 = pnand %p1798_p0, %p172_p1 }
   0x5   : > { %p203_p3 = scmp.lt.s32.totalorder (!%p173_p2), %s1794_s16, 1 }
   0x6   : > { %176 = sbr.rel (%p173_p2) target bundleno = 327 (0x147), region = 36 }
   0xb   : > { %v2469_v0 = vld [vmem:[%s3245_s1 + $0x98] sm:$0xff]  ;;  %v2468_v4 = vld [vmem:[%s3245_s1 + $0x90] sm:$0xff]  ;;  %s3250_s16 = smov (!%p203_p3, %s1794_s16), 1  ;;  %v2467_v8 = vld [vmem:[%s3245_s1 + $0x88] sm:$0xff]  ;;  %vm299_vm0 = vcmask 1046528   ;;  %vm433_vm1 = vcmask 523264  }
   0xc   : > { %v2473_v1 = vld [vmem:[%s3245_s1 + $0xb8] sm:$0xff]  ;;  %440 = vmatpush.bf16.msra.mxu0 %v2469_v0  ;;  %v2472_v5 = vld [vmem:[%s3245_s1 + $0xb0] sm:$0xff]  ;;  %s2578_s7 = smul.u32 96, %s3250_s16  ;;  %v2471_v9 = vld [vmem:[%s3245_s1 + $0xa8] sm:$0xff]  ;;  %vm594_vm2 = vcmask 1045504  }
   0xd   : > { %v2457_v2 = vld [vmem:[%s3245_s1 + $0x38] sm:$0xff]  ;;  %463 = vmatpush.bf16.msra.mxu1 %v2473_v1  ;;  %v2456_v6 = vld [vmem:[%s3245_s1 + $0x30] sm:$0xff]  ;;  %v2455_v10 = vld [vmem:[%s3245_s1 + $0x28] sm:$0xff] }
   0xe   : > { %v2461_v3 = vld [vmem:[%s3245_s1 + $0x58] sm:$0xff]  ;;  %556 = vmatpush.bf16.msra.mxu2 %v2457_v2  ;;  %v2460_v7 = vld [vmem:[%s3245_s1 + $0x50] sm:$0xff]  ;;  %v2459_v11 = vld [vmem:[%s3245_s1 + $0x48] sm:$0xff]  ;;  %s2671_s20 = scalar_lea.vmem %s3244_s0, %s2578_s7 }
   0xf   : > { %579 = vmatpush.bf16.msra.mxu3 %v2461_v3  ;;  %v219_v12 = vld [vmem:[%s2671_s20] sm:$0xff]  ;;  %v2675_v13 = vld [vmem:[%s2671_s20 + $0x8] sm:$0x11]  ;;  %v221_v14 = vld [vmem:[%s2671_s20 + $0x10] sm:$0xff] }
  0x10   : > { %441 = vmatpush.bf16.msra.mxu0 %v2468_v4  ;;  %v2679_v15 = vld [vmem:[%s2671_s20 + $0x18] sm:$0x11]  ;;  %v2681_v16 = vunpack.c.h.bf16 %v219_v12  ;;  %v234_v17 = vunpack.c.h.bf16 %v2675_v13  ;;  %v2684_v18 = vunpack.c.h.bf16 %v221_v14  ;;  %v2466_v20 = vld [vmem:[%s3245_s1 + $0x80] sm:$0xff]  ;;  %v2728_v37 = vld [vmem:[%s2671_s20 + $0x28] sm:$0x11]  ;;  %v2743_v42 = vunpack.c.l.bf16 %v219_v12 }
  0x11   : > { %464 = vmatpush.bf16.msra.mxu1 %v2472_v5  ;;  %v238_v19 = vunpack.c.h.bf16 %v2679_v15  ;;  %v2470_v21 = vld [vmem:[%s3245_s1 + $0xa0] sm:$0xff]  ;;  %v2485_v29 = vld [vmem:[%s3245_s1 + $0x118] sm:$0xff]  ;;  %v2731_v38 = vld [vmem:[%s2671_s20 + $0x30] sm:$0xff]  ;;  %v233_v43 = vunpack.c.l.bf16 %v2675_v13  ;;  %v2746_v44 = vunpack.c.l.bf16 %v221_v14  ;;  %v237_v45 = vunpack.c.l.bf16 %v2679_v15 }
  0x12   : > { %557 = vmatpush.bf16.msra.mxu2 %v2456_v6  ;;  %v303_v22 = vrot.slane %v2681_v16, 1  ;;  %v304_v23 = vrot.slane %v234_v17, 1  ;;  %v309_v24 = vrot.slane %v2684_v18, 1  ;;  %v2454_v25 = vld [vmem:[%s3245_s1 + $0x20] sm:$0xff]  ;;  %v2481_v30 = vld [vmem:[%s3245_s1 + $0xf8] sm:$0xff]  ;;  %v256_v33 = vpack.c.bf16 %v2684_v18, %v2681_v16  ;;  %v2480_v40 = vld [vmem:[%s3245_s1 + $0xf0] sm:$0xff] }
  0x13   : > { %580 = vmatpush.bf16.msra.mxu3 %v2460_v7  ;;  %v2458_v26 = vld [vmem:[%s3245_s1 + $0x40] sm:$0xff]  ;;  %v310_v27 = vrot.slane %v238_v19, 1  ;;  %v2465_v34 = vld [vmem:[%s3245_s1 + $0x78] sm:$0xff]  ;;  %v2484_v41 = vld [vmem:[%s3245_s1 + $0x110] sm:$0xff]  ;;  %v242_v48 = vunpack.c.h.bf16 %v2728_v37  ;;  %v2758_v49 = vunpack.c.h.bf16 %v2731_v38  ;;  %v300_v54 = vrot.slane %v2743_v42, 1 }
  0x14   : > { %442 = vmatpush.bf16.msra.mxu0 %v2467_v8  ;;  %v305_v28 = vsel %vm299_vm0, %v303_v22, %v304_v23  ;;  %v2453_v35 = vld [vmem:[%s3245_s1 + $0x18] sm:$0xff]  ;;  %v2725_v36 = vld [vmem:[%s2671_s20 + $0x20] sm:$0xff]  ;;  %v2464_v46 = vld [vmem:[%s3245_s1 + $0x70] sm:$0xff]  ;;  %v301_v55 = vrot.slane %v233_v43, 1  ;;  %v306_v56 = vrot.slane %v2746_v44, 1  ;;  %v307_v57 = vrot.slane %v237_v45, 1 }
  0x15   : > { %465 = vmatpush.bf16.msra.mxu1 %v2471_v9  ;;  %v2713_v31 = vsel %vm299_vm0, %v309_v24, %v310_v27  ;;  %v2734_v39 = vld [vmem:[%s2671_s20 + $0x38] sm:$0x11]  ;;  %v2754_v47 = vunpack.c.h.bf16 %v2725_v36  ;;  %v2452_v51 = vld [vmem:[%s3245_s1 + $0x10] sm:$0xff]  ;;  %v2479_v52 = vld [vmem:[%s3245_s1 + $0xe8] sm:$0xff]  ;;  %v316_v60 = vrot.slane %v242_v48, 1  ;;  %v321_v61 = vrot.slane %v2758_v49, 1 }
  0x16   : > { %558 = vmatpush.bf16.msra.mxu2 %v2455_v10  ;;  %v333_v32 = vpack.c.bf16 %v2713_v31, %v305_v28  ;;  %v246_v50 = vunpack.c.h.bf16 %v2734_v39  ;;  %v2483_v53 = vld [vmem:[%s3245_s1 + $0x108] sm:$0xff]  ;;  %v2478_v0 = vld [vmem:[%s3245_s1 + $0xe0] sm:$0xff]  ;;  %v2509_v2 = vld [vmem:[%s3245_s1 + $0x1d8] sm:$0xff]  ;;  %v302_v4 = vsel %vm299_vm0, %v300_v54, %v301_v55  ;;  %v2802_v5 = vsel %vm299_vm0, %v306_v56, %v307_v57 }
  0x17   : > { %581 = vmatpush.bf16.msra.mxu3 %v2459_v11  ;;  %v2463_v58 = vld [vmem:[%s3245_s1 + $0x68] sm:$0xff]  ;;  %v315_v59 = vrot.slane %v2754_v47, 1  ;;  %v2482_v1 = vld [vmem:[%s3245_s1 + $0x100] sm:$0xff]  ;;  %v2493_v9 = vld [vmem:[%s3245_s1 + $0x158] sm:$0xff]  ;;  %v332_v12 = vpack.c.bf16 %v2802_v5, %v302_v4  ;;  %v241_v27 = vunpack.c.l.bf16 %v2728_v37  ;;  %v2852_v28 = vunpack.c.l.bf16 %v2731_v38 }
  0x18   : > { %443 = vmatpush.bf16.msra.mxu0 %v2466_v20  ;;  %v322_v62 = vrot.slane %v246_v50, 1  ;;  %v2451_v63 = vld [vmem:[%s3245_s1 + $0x8] sm:$0xff]  ;;  %v2462_v3 = vld [vmem:[%s3245_s1 + $0x60] sm:$0xff]  ;;  %v2477_v10 = vld [vmem:[%s3245_s1 + $0xd8] sm:$0xff]  ;;  %v255_v20 = vpack.c.bf16 %v2746_v44, %v2743_v42  ;;  %v599_v54 = vrot.slane %v234_v17, 2  ;;  %v604_v55 = vrot.slane %v2684_v18, 2 }
  0x19   : > { %466 = vmatpush.bf16.msra.mxu1 %v2470_v21  ;;  %v2805_v6 = vsel %vm299_vm0, %v315_v59, %v316_v60  ;;  %v2450_v8 = vld [vmem:[%s3245_s1] sm:$0xff]  ;;  %v2497_v11 = vld [vmem:[%s3245_s1 + $0x178] sm:$0xff]  ;;  %v2831_v21 = vpack.c.bf16 %v2758_v49, %v2754_v47  ;;  %v2492_v22 = vld [vmem:[%s3245_s1 + $0x150] sm:$0xff]  ;;  %v318_v38 = vrot.slane %v2852_v28, 1 }
  0x1a   : > { %559 = vmatpush.bf16.msra.mxu2 %v2454_v25  ;;  %v2808_v7 = vsel %vm299_vm0, %v321_v61, %v322_v62  ;;  %v2508_v23 = vld [vmem:[%s3245_s1 + $0x1d0] sm:$0xff]  ;;  %v2474_v13 = vld [vmem:[%s3245_s1 + $0xc0] sm:$0xff]  ;;  %v2489_v60 = vld [vmem:[%s3245_s1 + $0x138] sm:$0xff] }
  0x1b   : > { %582 = vmatpush.bf16.msra.mxu3 %v2458_v26  ;;  %v2825_v14 = vpack.c.bf16 %v2808_v7, %v2805_v6  ;;  %v2476_v24 = vld [vmem:[%s3245_s1 + $0xd0] sm:$0xff]  ;;  %v2848_v26 = vunpack.c.l.bf16 %v2725_v36  ;;  %v313_v36 = vrot.slane %v241_v27, 1  ;;  %v2494_v15 = vld [vmem:[%s3245_s1 + $0x160] sm:$0xff]  ;;  %v2521_v61 = vld [vmem:[%s3245_s1 + $0x238] sm:$0xff] }
  0x1c   : > { %1876 = vmatmul.msk.bf16.vlgmr.msra.gmra.mxu1 %vm433_vm1, %v333_v32  ;;  %444 = vmatpush.bf16.msra.mxu0 %v2465_v34  ;;  %v2496_v25 = vld [vmem:[%s3245_s1 + $0x170] sm:$0xff]  ;;  %v2507_v32 = vld [vmem:[%s3245_s1 + $0x1c8] sm:$0xff]  ;;  %v2533_v4 = vld [vmem:[%s3245_s1 + $0x298] sm:$0xff] }
  0x1d   : > { %734 = vmatpush.bf16.msrb.mxu1 %v2481_v30  ;;  %v2491_v30 = vld [vmem:[%s3245_s1 + $0x148] sm:$0xff]  ;;  %v2518_v37 = vld [vmem:[%s3245_s1 + $0x220] sm:$0xff] }
  0x1e   : > { %1926 = vmatmul.msk.bf16.vlgmr.msra.gmra.mxu3 %vm433_vm1, %v256_v33  ;;  %560 = vmatpush.bf16.msra.mxu2 %v2453_v35  ;;  %v2475_v33 = vld [vmem:[%s3245_s1 + $0xc8] sm:$0xff]  ;;  %v312_v35 = vrot.slane %v2848_v26, 1 }
  0x1f   : > { %757 = vmatpush.bf16.msrb.mxu3 %v2485_v29  ;;  %v245_v29 = vunpack.c.l.bf16 %v2734_v39  ;;  %v2495_v34 = vld [vmem:[%s3245_s1 + $0x168] sm:$0xff] }
  0x20   : > { %445 = vmatpush.bf16.msra.mxu0 %v2464_v46  ;;  %v596_v46 = vrot.slane %v233_v43, 2  ;;  %v2490_v43 = vld [vmem:[%s3245_s1 + $0x140] sm:$0xff]  ;;  %v2903_v17 = vsel %vm299_vm0, %v312_v35, %v313_v36  ;;  %v2501_v36 = vld [vmem:[%s3245_s1 + $0x198] sm:$0xff] }
  0x21   : > { %735 = vmatpush.bf16.msrb.mxu1 %v2480_v40  ;;  %v595_v40 = vrot.slane %v2743_v42, 2  ;;  %v605_v42 = vrot.slane %v238_v19, 2 }
  0x22   : > { %561 = vmatpush.bf16.msra.mxu2 %v2452_v51  ;;  %v601_v51 = vrot.slane %v2746_v44, 2 }
  0x23   : > { %758 = vmatpush.bf16.msrb.mxu3 %v2484_v41  ;;  %v319_v41 = vrot.slane %v245_v29, 1  ;;  %v597_v56 = vsel %vm594_vm2, %v595_v40, %v596_v46  ;;  %v2914_v59 = vsel %vm594_vm2, %v604_v55, %v605_v42  ;;  %v227_v55 = vld [vmem:[%s2671_s20 + $0x40] sm:$0xff]  ;;  %v2529_v42 = vld [vmem:[%s3245_s1 + $0x278] sm:$0xff] }
  0x24   : > { %446 = vmatpush.bf16.msra.mxu0 %v2463_v58 }
  0x25   : > { %736 = vmatpush.bf16.msrb.mxu1 %v2479_v52  ;;  %v602_v52 = vrot.slane %v237_v45, 2  ;;  %v2506_v45 = vld [vmem:[%s3245_s1 + $0x1c0] sm:$0xff]  ;;  %v2906_v19 = vsel %vm299_vm0, %v318_v38, %v319_v41  ;;  %v2516_v38 = vld [vmem:[%s3245_s1 + $0x210] sm:$0xff]  ;;  %v776_v41 = vpack.c.bf16 %v2848_v26, %v2746_v44  ;;  %v2499_v44 = vld [vmem:[%s3245_s1 + $0x188] sm:$0xff] }
  0x26   : > { %562 = vmatpush.bf16.msra.mxu2 %v2451_v63  ;;  %v2924_v62 = vpack.c.bf16 %v2906_v19, %v2903_v17 }
  0x27   : > { %759 = vmatpush.bf16.msrb.mxu3 %v2483_v53  ;;  %v598_v53 = vrot.slane %v2681_v16, 2  ;;  %v2505_v16 = vld [vmem:[%s3245_s1 + $0x1b8] sm:$0xff]  ;;  %v2910_v57 = vsel %vm594_vm2, %v601_v51, %v602_v52  ;;  %v777_v51 = vpack.c.bf16 %v2754_v47, %v2684_v18  ;;  %v2500_v52 = vld [vmem:[%s3245_s1 + $0x190] sm:$0xff]  ;;  %v2531_v18 = vld [vmem:[%s3245_s1 + $0x288] sm:$0xff] }
  0x28   : > { %447 = vmatpush.bf16.msra.mxu0 %v2462_v3  ;;  %v627_v63 = vpack.c.bf16 %v2910_v57, %v597_v56  ;;  %v2488_v3 = vld [vmem:[%s3245_s1 + $0x130] sm:$0xff] }
  0x29   : > { %737 = vmatpush.bf16.msrb.mxu1 %v2478_v0  ;;  %v600_v58 = vsel %vm594_vm2, %v598_v53, %v599_v54  ;;  %v2929_v0 = vpack.c.bf16 %v2852_v28, %v2848_v26  ;;  %v2515_v53 = vld [vmem:[%s3245_s1 + $0x208] sm:$0xff]  ;;  %v2498_v54 = vld [vmem:[%s3245_s1 + $0x180] sm:$0xff]  ;;  %v2512_v56 = vld [vmem:[%s3245_s1 + $0x1f0] sm:$0xff] }
  0x2a   : > { %563 = vmatpush.bf16.msra.mxu2 %v2450_v8  ;;  %v2520_v8 = vld [vmem:[%s3245_s1 + $0x230] sm:$0xff] }
  0x2b   : > { %760 = vmatpush.bf16.msrb.mxu3 %v2482_v1  ;;  %448 = vmatmul.bf16.vlgmr.msra.gmra.mxu0 %v332_v12  ;;  %v628_v1 = vpack.c.bf16 %v2914_v59, %v600_v58  ;;  %v2519_v12 = vld [vmem:[%s3245_s1 + $0x228] sm:$0xff]  ;;  %v937_v58 = vpack.c.bf16 %v2903_v17, %v2802_v5  ;;  %v2526_v17 = vld [vmem:[%s3245_s1 + $0x260] sm:$0xff] }
  0x2c   : > { %883 = vmatpush.bf16.msrb.mxu0 %v2493_v9  ;;  %1877 = vmatmul.msk.bf16.gmra.mxu1 %vm433_vm1, %v2825_v14  ;;  %v2503_v9 = vld [vmem:[%s3245_s1 + $0x1a8] sm:$0xff] }
  0x2d   : > { %738 = vmatpush.bf16.msrb.mxu1 %v2477_v10  ;;  %564 = vmatmul.bf16.vlgmr.msra.gmra.mxu2 %v255_v20  ;;  %v2487_v10 = vld [vmem:[%s3245_s1 + $0x128] sm:$0xff]  ;;  %v607_v20 = vrot.slane %v2848_v26, 2  ;;  %v2530_v26 = vld [vmem:[%s3245_s1 + $0x280] sm:$0xff] }
  0x2e   : > { %906 = vmatpush.bf16.msrb.mxu2 %v2497_v11  ;;  %1927 = vmatmul.msk.bf16.gmra.mxu3 %vm433_vm1, %v2831_v21  ;;  %v2532_v11 = vld [vmem:[%s3245_s1 + $0x290] sm:$0xff]  ;;  %v2511_v5 = vld [vmem:[%s3245_s1 + $0x1e8] sm:$0xff] }
  0x2f   : > { %1067 = vmatpush.bf16.msra.mxu3 %v2509_v2  ;;  %v2504_v2 = vld [vmem:[%s3245_s1 + $0x1b0] sm:$0xff] }
  0x30   : > { %884 = vmatpush.bf16.msrb.mxu0 %v2492_v22  ;;  %v608_v22 = vrot.slane %v241_v27, 2  ;;  %v617_v27 = vrot.slane %v246_v50, 2 }
  0x31   : > { %739 = vmatpush.bf16.msrb.mxu1 %v2476_v24  ;;  %v614_v24 = vrot.slane %v245_v29, 2  ;;  %v2486_v29 = vld [vmem:[%s3245_s1 + $0x120] sm:$0xff] }
  0x32   : > { %907 = vmatpush.bf16.msrb.mxu2 %v2496_v25  ;;  %v2502_v25 = vld [vmem:[%s3245_s1 + $0x1a0] sm:$0xff] }
  0x33   : > { %1068 = vmatpush.bf16.msra.mxu3 %v2508_v23  ;;  %v613_v23 = vrot.slane %v2852_v28, 2 }
  0x34   : > { %885 = vmatpush.bf16.msrb.mxu0 %v2491_v30  ;;  %v610_v30 = vrot.slane %v2754_v47, 2  ;;  %v2514_v47 = vld [vmem:[%s3245_s1 + $0x200] sm:$0xff] }
  0x35   : > { %740 = vmatpush.bf16.msrb.mxu1 %v2475_v33  ;;  %v616_v33 = vrot.slane %v2758_v49, 2  ;;  %v2987_v39 = vsel %vm594_vm2, %v613_v23, %v614_v24  ;;  %v2540_v23 = vld [vmem:[%s3245_s1 + $0x2d0] sm:$0xff] }
  0x36   : > { %908 = vmatpush.bf16.msrb.mxu2 %v2495_v34  ;;  %v2517_v34 = vld [vmem:[%s3245_s1 + $0x218] sm:$0xff] }
  0x37   : > { %1069 = vmatpush.bf16.msra.mxu3 %v2507_v32  ;;  %v611_v32 = vrot.slane %v242_v48, 2  ;;  %v2984_v48 = vsel %vm594_vm2, %v607_v20, %v608_v22  ;;  %v2993_v35 = vsel %vm594_vm2, %v616_v33, %v617_v27  ;;  %v2525_v22 = vld [vmem:[%s3245_s1 + $0x258] sm:$0xff] }
  0x38   : > { %886 = vmatpush.bf16.msrb.mxu0 %v2490_v43  ;;  %v3003_v40 = vpack.c.bf16 %v2987_v39, %v2984_v48  ;;  %v2513_v43 = vld [vmem:[%s3245_s1 + $0x1f8] sm:$0xff]  ;;  %v1094_v33 = vpack.c.bf16 %v2984_v48, %v2910_v57  ;;  %v2523_v57 = vld [vmem:[%s3245_s1 + $0x248] sm:$0xff]  ;;  %v2554_v48 = vld [vmem:[%s3245_s1 + $0x340] sm:$0xff] }
  0x39   : > { %741 = vmatpush.bf16.msrb.mxu1 %v2474_v13  ;;  %v2990_v50 = vsel %vm594_vm2, %v610_v30, %v611_v32  ;;  %v3048_v13 = vunpack.c.l.bf16 %v227_v55  ;;  %v2524_v32 = vld [vmem:[%s3245_s1 + $0x250] sm:$0xff] }
  0x3a   : > { %909 = vmatpush.bf16.msrb.mxu2 %v2494_v15  ;;  %v3009_v46 = vpack.c.bf16 %v2993_v35, %v2990_v50  ;;  %v3050_v15 = vunpack.c.h.bf16 %v227_v55  ;;  %v2551_v55 = vld [vmem:[%s3245_s1 + $0x328] sm:$0xff] }
  0x3b   : > { %1070 = vmatpush.bf16.msra.mxu3 %v2506_v45  ;;  %453 = vmatmul.bf16.gmra.mxu0 %v2924_v62  ;;  %v2545_v45 = vld [vmem:[%s3245_s1 + $0x2f8] sm:$0xff] }
  0x3c   : > { %887 = vmatpush.bf16.msrb.mxu0 %v2489_v60  ;;  %742 = vmatmul.bf16.vlgmr.msrb.gmra.mxu1 %v627_v63  ;;  %v778_v60 = vpack.c.bf16 %v3048_v13, %v2852_v28  ;;  %v779_v63 = vpack.c.bf16 %v3050_v15, %v2758_v49  ;;  %v2557_v49 = vld [vmem:[%s3245_s1 + $0x358] sm:$0xff] }
  0x3d   : > { %1044 = vmatpush.bf16.msra.mxu1 %v2505_v16  ;;  %569 = vmatmul.bf16.gmra.mxu2 %v2929_v0  ;;  %v2528_v16 = vld [vmem:[%s3245_s1 + $0x270] sm:$0xff] }
  0x3e   : > { %1224 = vmatpush.bf16.msra.mxu2 %v2521_v61  ;;  %2000 = vmatmul.msk.bf16.vlgmr.msrb.gmra.mxu3 %vm433_vm1, %v628_v1  ;;  %v938_v61 = vpack.c.bf16 %v2805_v6, %v2713_v31  ;;  %v228_v1 = vld [vmem:[%s2671_s20 + $0x48] sm:$0x11]  ;;  %v2544_v6 = vld [vmem:[%s3245_s1 + $0x2f0] sm:$0xff] }
  0x3f   : > { %1368 = vmatpush.bf16.msrb.mxu3 %v2533_v4  ;;  %v249_v31 = vunpack.c.l.bf16 %v228_v1  ;;  %v250_v28 = vunpack.c.h.bf16 %v228_v1  ;;  %v2541_v4 = vld [vmem:[%s3245_s1 + $0x2d8] sm:$0xff] }
  0x40   : > { %888 = vmatpush.bf16.msrb.mxu0 %v2488_v3  ;;  %v2510_v3 = vld [vmem:[%s3245_s1 + $0x1e0] sm:$0xff] }
  0x41   : > { %1045 = vmatpush.bf16.msra.mxu1 %v2504_v2  ;;  %v2527_v2 = vld [vmem:[%s3245_s1 + $0x268] sm:$0xff]  ;;  %v933_v20 = vrot.slane %v250_v28, 1 }
  0x42   : > { %1225 = vmatpush.bf16.msra.mxu2 %v2520_v8  ;;  %v2556_v8 = vld [vmem:[%s3245_s1 + $0x350] sm:$0xff] }
  0x43   : > { %1369 = vmatpush.bf16.msrb.mxu3 %v2532_v11  ;;  %v2543_v11 = vld [vmem:[%s3245_s1 + $0x2e8] sm:$0xff] }
  0x44   : > { %889 = vmatpush.bf16.msrb.mxu0 %v2487_v10  ;;  %v930_v10 = vrot.slane %v249_v31, 1 }
  0x45   : > { %1046 = vmatpush.bf16.msra.mxu1 %v2503_v9  ;;  %v929_v9 = vrot.slane %v3048_v13, 1 }
  0x46   : > { %1226 = vmatpush.bf16.msra.mxu2 %v2519_v12  ;;  %v932_v12 = vrot.slane %v3050_v15, 1 }
  0x47   : > { %1370 = vmatpush.bf16.msrb.mxu3 %v2531_v18  ;;  %v3105_v24 = vsel %vm299_vm0, %v929_v9, %v930_v10 }
  0x48   : > { %890 = vmatpush.bf16.msrb.mxu0 %v2486_v29  ;;  %v3111_v30 = vsel %vm299_vm0, %v932_v12, %v933_v20  ;;  %v939_v27 = vpack.c.bf16 %v3105_v24, %v2906_v19  ;;  %v1095_v29 = vpack.c.bf16 %v2990_v50, %v2914_v59  ;;  %v2538_v19 = vld [vmem:[%s3245_s1 + $0x2c0] sm:$0xff]  ;;  %v2553_v50 = vld [vmem:[%s3245_s1 + $0x338] sm:$0xff] }
  0x49   : > { %1047 = vmatpush.bf16.msra.mxu1 %v2502_v25  ;;  %v2542_v25 = vld [vmem:[%s3245_s1 + $0x2e0] sm:$0xff] }
  0x4a   : > { %1227 = vmatpush.bf16.msra.mxu2 %v2518_v37  ;;  %v2539_v37 = vld [vmem:[%s3245_s1 + $0x2c8] sm:$0xff]  ;;  %v2522_v59 = vld [vmem:[%s3245_s1 + $0x240] sm:$0xff] }
  0x4b   : > { %891 = vmatmul.bf16.vlgmr.msrb.gmra.mxu0 %v776_v41  ;;  %1371 = vmatpush.bf16.msrb.mxu3 %v2530_v26  ;;  %v1089_v41 = vrot.slane %v3050_v15, 2 }
  0x4c   : > { %1201 = vmatpush.bf16.msra.mxu0 %v2517_v34  ;;  %747 = vmatmul.bf16.gmra.mxu1 %v3003_v40  ;;  %v940_v34 = vpack.c.bf16 %v3111_v30, %v2808_v7  ;;  %v2555_v7 = vld [vmem:[%s3245_s1 + $0x348] sm:$0xff] }
  0x4d   : > { %1048 = vmatpush.bf16.msra.mxu1 %v2501_v36  ;;  %2074 = vmatmul.msk.bf16.vlgmr.msrb.gmra.mxu2 %vm433_vm1, %v777_v51  ;;  %v1086_v36 = vrot.slane %v3048_v13, 2  ;;  %v1090_v51 = vrot.slane %v250_v28, 2 }
  0x4e   : > { %2001 = vmatmul.msk.bf16.gmra.mxu3 %vm433_vm1, %v3009_v46  ;;  %1524 = vmatpush.bf16.msrb.mxu2 %v2545_v45 }
  0x50   : > { %1202 = vmatpush.bf16.msra.mxu0 %v2516_v38  ;;  %v1087_v38 = vrot.slane %v249_v31, 2 }
  0x51   : > { %1049 = vmatpush.bf16.msra.mxu1 %v2500_v52  ;;  %v2537_v52 = vld [vmem:[%s3245_s1 + $0x2b8] sm:$0xff] }
  0x52   : > { %1525 = vmatpush.bf16.msrb.mxu2 %v2544_v6  ;;  %v3156_v18 = vsel %vm594_vm2, %v1086_v36, %v1087_v38 }
  0x53   : > { %v1096_v26 = vpack.c.bf16 %v3156_v18, %v2987_v39  ;;  %v2550_v39 = vld [vmem:[%s3245_s1 + $0x320] sm:$0xff] }
  0x54   : > { %1203 = vmatpush.bf16.msra.mxu0 %v2515_v53  ;;  %v2552_v53 = vld [vmem:[%s3245_s1 + $0x330] sm:$0xff] }
  0x55   : > { %1050 = vmatpush.bf16.msra.mxu1 %v2499_v44  ;;  %v3159_v44 = vsel %vm594_vm2, %v1089_v41, %v1090_v51 }
  0x56   : > { %1526 = vmatpush.bf16.msrb.mxu2 %v2543_v11 }
  0x58   : > { %1204 = vmatpush.bf16.msra.mxu0 %v2514_v47  ;;  %v2536_v47 = vld [vmem:[%s3245_s1 + $0x2b0] sm:$0xff] }
  0x59   : > { %1051 = vmatpush.bf16.msra.mxu1 %v2498_v54  ;;  %v1097_v54 = vpack.c.bf16 %v3159_v44, %v2993_v35  ;;  %v2534_v35 = vld [vmem:[%s3245_s1 + $0x2a0] sm:$0xff] }
  0x5a   : > { %1527 = vmatpush.bf16.msrb.mxu2 %v2542_v25 }
  0x5b   : > { %896 = vmatmul.bf16.gmra.mxu0 %v778_v60  ;;  %v2547_v60 = vld [vmem:[%s3245_s1 + $0x308] sm:$0xff] }
  0x5c   : > { %1205 = vmatpush.bf16.msra.mxu0 %v2513_v43  ;;  %1052 = vmatmul.bf16.vlgmr.msra.gmra.mxu1 %v937_v58  ;;  %v229_v43 = vld [vmem:[%s2671_s20 + $0x50] sm:$0xff] }
  0x5d   : > { %1345 = vmatpush.bf16.msrb.mxu1 %v2529_v42  ;;  %2075 = vmatmul.msk.bf16.gmra.mxu2 %vm433_vm1, %v779_v63  ;;  %v2535_v42 = vld [vmem:[%s3245_s1 + $0x2a8] sm:$0xff]  ;;  %v251_v45 = vunpack.c.l.bf16 %v229_v43 }
  0x5e   : > { %2148 = vmatmul.msk.bf16.vlgmr.msra.gmra.mxu3 %vm433_vm1, %v938_v61  ;;  %v230_v61 = vld [vmem:[%s2671_s20 + $0x58] sm:$0x11]  ;;  %s2448_s20 = sshll.u32 %s3250_s16, 4 }
  0x5f   : > { %1676 = vmatpush.bf16.msra.mxu3 %v2557_v49  ;;  %v253_v63 = vunpack.c.l.bf16 %v230_v61  ;;  %v1391_v1 = vrot.slane %v251_v45, 1  ;;  %s3227_s5 = scalar_lea.vmem %s3247_s3, %s2448_s20  ;;  %s217_s10 = scalar_lea.vmem %s3248_s4, %s2448_s20 }
  0x60   : > { %1206 = vmatpush.bf16.msra.mxu0 %v2512_v56  ;;  %v1243_v56 = vpack.c.bf16 %v251_v45, %v3048_v13  ;;  %v2546_v13 = vld [vmem:[%s3245_s1 + $0x300] sm:$0xff] }
  0x61   : > { %1346 = vmatpush.bf16.msrb.mxu1 %v2528_v16  ;;  %v2548_v16 = vld [vmem:[%s3245_s1 + $0x310] sm:$0xff] }
  0x63   : > { %1677 = vmatpush.bf16.msra.mxu3 %v2556_v8  ;;  %v1544_v8 = vrot.slane %v253_v63, 2 }
  0x64   : > { %1207 = vmatpush.bf16.msra.mxu0 %v2511_v5 }
  0x65   : > { %1347 = vmatpush.bf16.msrb.mxu1 %v2527_v2  ;;  %v1392_v2 = vrot.slane %v253_v63, 1 }
  0x67   : > { %1678 = vmatpush.bf16.msra.mxu3 %v2555_v7  ;;  %v1393_v49 = vsel %vm299_vm0, %v1391_v1, %v1392_v2 }
  0x68   : > { %1208 = vmatpush.bf16.msra.mxu0 %v2510_v3  ;;  %v1399_v6 = vpack.c.bf16 %v1393_v49, %v3105_v24 }
  0x69   : > { %1348 = vmatpush.bf16.msrb.mxu1 %v2526_v17 }
  0x6b   : > { %1209 = vmatmul.bf16.vlgmr.msra.gmra.mxu0 %v1094_v33  ;;  %1679 = vmatpush.bf16.msra.mxu3 %v2554_v48 }
  0x6c   : > { %1501 = vmatpush.bf16.msrb.mxu0 %v2541_v4  ;;  %1057 = vmatmul.bf16.gmra.mxu1 %v939_v27  ;;  %v1543_v4 = vrot.slane %v251_v45, 2 }
  0x6d   : > { %1349 = vmatpush.bf16.msrb.mxu1 %v2525_v22  ;;  %2222 = vmatmul.msk.bf16.vlgmr.msra.gmra.mxu2 %vm433_vm1, %v1095_v29 }
  0x6e   : > { %2149 = vmatmul.msk.bf16.gmra.mxu3 %vm433_vm1, %v940_v34  ;;  %v1545_v11 = vsel %vm594_vm2, %v1543_v4, %v1544_v8 }
  0x6f   : > { %v1551_v22 = vpack.c.bf16 %v1545_v11, %v3156_v18 }
  0x70   : > { %1502 = vmatpush.bf16.msrb.mxu0 %v2540_v23 }
  0x71   : > { %1350 = vmatpush.bf16.msrb.mxu1 %v2524_v32 }
  0x74   : > { %1503 = vmatpush.bf16.msrb.mxu0 %v2539_v37 }
  0x75   : > { %1351 = vmatpush.bf16.msrb.mxu1 %v2523_v57 }
  0x78   : > { %1504 = vmatpush.bf16.msrb.mxu0 %v2538_v19 }
  0x79   : > { %1352 = vmatpush.bf16.msrb.mxu1 %v2522_v59 }
  0x7b   : > { %1214 = vmatmul.bf16.gmra.mxu0 %v1096_v26 }
  0x7c   : > { %1505 = vmatpush.bf16.msrb.mxu0 %v2537_v52  ;;  %1353 = vmatmul.bf16.vlgmr.msrb.gmra.mxu1 %v2929_v0  ;;  %v2549_v0 = vld [vmem:[%s3245_s1 + $0x318] sm:$0xff] }
  0x7d   : > { %1653 = vmatpush.bf16.msra.mxu1 %v2553_v50  ;;  %2223 = vmatmul.msk.bf16.gmra.mxu2 %vm433_vm1, %v1097_v54 }
  0x7e   : > { %2296 = vmatmul.msk.bf16.vlgmr.msrb.gmra.mxu3 %vm433_vm1, %v2831_v21  ;;  %v252_v21 = vunpack.c.h.bf16 %v229_v43 }
  0x80   : > { %1506 = vmatpush.bf16.msrb.mxu0 %v2536_v47  ;;  %v1244_v58 = vpack.c.bf16 %v252_v21, %v3050_v15  ;;  %v254_v15 = vunpack.c.h.bf16 %v230_v61  ;;  %v1394_v5 = vrot.slane %v252_v21, 1  ;;  %v1546_v9 = vrot.slane %v252_v21, 2 }
  0x81   : > { %1654 = vmatpush.bf16.msra.mxu1 %v2552_v53 }
  0x82   : > { %v1395_v31 = vrot.slane %v254_v15, 1  ;;  %v1547_v10 = vrot.slane %v254_v15, 2 }
  0x84   : > { %1507 = vmatpush.bf16.msrb.mxu0 %v2535_v42  ;;  %v1548_v12 = vsel %vm594_vm2, %v1546_v9, %v1547_v10 }
  0x85   : > { %1655 = vmatpush.bf16.msra.mxu1 %v2551_v55  ;;  %v1552_v24 = vpack.c.bf16 %v1548_v12, %v3159_v44 }
  0x88   : > { %1508 = vmatpush.bf16.msrb.mxu0 %v2534_v35 }
  0x89   : > { %1656 = vmatpush.bf16.msra.mxu1 %v2550_v39 }
  0x8b   : > { %1509 = vmatmul.bf16.vlgmr.msrb.gmra.mxu0 %v2924_v62  ;;  %v1396_v62 = vsel %vm299_vm0, %v1394_v5, %v1395_v31 }
  0x8c   : > { %1358 = vmatmul.bf16.gmra.mxu1 %v1243_v56 }
  0x8d   : > { %1657 = vmatpush.bf16.msra.mxu1 %v2549_v0  ;;  %2370 = vmatmul.msk.bf16.vlgmr.msrb.gmra.mxu2 %vm433_vm1, %v2825_v14  ;;  %v1400_v14 = vpack.c.bf16 %v1396_v62, %v3111_v30 }
  0x8e   : > { %2297 = vmatmul.msk.bf16.gmra.mxu3 %vm433_vm1, %v1244_v58 }
  0x91   : > { %1658 = vmatpush.bf16.msra.mxu1 %v2548_v16 }
  0x95   : > { %1659 = vmatpush.bf16.msra.mxu1 %v2547_v60 }
  0x99   : > { %1660 = vmatpush.bf16.msra.mxu1 %v2546_v13  ;;  %v468_v28 = vpop.f32.mrf.mxu1 }
  0x9b   : > { %1514 = vmatmul.bf16.gmra.mxu0 %v1399_v6 }
  0x9c   : > { %1661 = vmatmul.bf16.vlgmr.msra.gmra.mxu1 %v3003_v40 }
  0x9d   : > { %2371 = vmatmul.msk.bf16.gmra.mxu2 %vm433_vm1, %v1400_v14 }
  0x9e   : > { %2444 = vmatmul.msk.bf16.vlgmr.msra.gmra.mxu3 %vm433_vm1, %v3009_v46 }
  0xa1   : > { %v584_v17 = vpop.f32.mrf.mxu3  ;;  %v470_v3 = vpop.f32.mrf.mxu1 }
  0xa8   : > { %v449_v40 = vpop.f32.mrf.mxu0 }
  0xa9   : > { %v586_v20 = vpop.f32.mrf.mxu3  ;;  %v473_v23 = vpop.f32.mrf.mxu1  ;;  %v469_v25 = vadd.f32 %v468_v28, %v449_v40 }
  0xac   : > { %1666 = vmatmul.bf16.gmra.mxu1 %v1551_v22 }
  0xae   : > { %2445 = vmatmul.msk.bf16.gmra.mxu3 %vm433_vm1, %v1552_v24 }
  0xb0   : > { %v565_v46 = vpop.f32.mrf.mxu2  ;;  %v451_v33 = vpop.f32.mrf.mxu0 }
  0xb1   : > { %v589_v30 = vpop.f32.mrf.mxu3  ;;  %v566_v32 = vadd.f32 %v565_v46, %v469_v25  ;;  %v475_v27 = vpop.f32.mrf.mxu1  ;;  %v471_v29 = vadd.f32 %v470_v3, %v451_v33 }
  0xb3   : > { %v585_v34 = vadd.f32 %v584_v17, %v566_v32 }
  0xb8   : > { %v567_v37 = vpop.f32.mrf.mxu2  ;;  %v454_v19 = vpop.f32.mrf.mxu0 }
  0xb9   : > { %v591_v57 = vpop.f32.mrf.mxu3  ;;  %v568_v7 = vadd.f32 %v567_v37, %v471_v29  ;;  %v743_v59 = vpop.f32.mrf.mxu1  ;;  %v474_v48 = vadd.f32 %v473_v23, %v454_v19 }
  0xbb   : > { %v587_v50 = vadd.f32 %v586_v20, %v568_v7 }
  0xc0   : > { %v570_v36 = vpop.f32.mrf.mxu2  ;;  %v456_v52 = vpop.f32.mrf.mxu0 }
  0xc1   : > { %v762_v38 = vpop.f32.mrf.mxu3  ;;  %v571_v41 = vadd.f32 %v570_v36, %v474_v48  ;;  %v745_v53 = vpop.f32.mrf.mxu1  ;;  %v476_v18 = vadd.f32 %v475_v27, %v456_v52 }
  0xc2   : > { %v763_v51 = vadd.f32 %v762_v38, %v743_v59 }
  0xc3   : > { %v590_v44 = vadd.f32 %v589_v30, %v571_v41 }
  0xc4   : > { %v772_v47 = vadd.f32 %v763_v51, %v585_v34 }
  0xc8   : > { %v572_v26 = vpop.f32.mrf.mxu2  ;;  %v892_v35 = vpop.f32.mrf.mxu0 }
  0xc9   : > { %v764_v54 = vpop.f32.mrf.mxu3  ;;  %v573_v55 = vadd.f32 %v572_v26, %v476_v18  ;;  %v748_v39 = vpop.f32.mrf.mxu1 }
  0xca   : > { %v765_v42 = vadd.f32 %v764_v54, %v745_v53 }
  0xcb   : > { %v592_v43 = vadd.f32 %v591_v57, %v573_v55 }
  0xcc   : > { %v773_v0 = vadd.f32 %v765_v42, %v587_v50 }
  0xd0   : > { %v911_v21 = vpop.f32.mrf.mxu2  ;;  %v894_v60 = vpop.f32.mrf.mxu0 }
  0xd1   : > { %v767_v45 = vpop.f32.mrf.mxu3  ;;  %v912_v56 = vadd.f32 %v911_v21, %v892_v35  ;;  %v750_v58 = vpop.f32.mrf.mxu1 }
  0xd2   : > { %v768_v16 = vadd.f32 %v767_v45, %v748_v39 }
  0xd3   : > { %v921_v63 = vadd.f32 %v912_v56, %v772_v47 }
  0xd4   : > { %v774_v61 = vadd.f32 %v768_v16, %v590_v44 }
  0xd8   : > { %v913_v15 = vpop.f32.mrf.mxu2  ;;  %v897_v5 = vpop.f32.mrf.mxu0 }
  0xd9   : > { %v769_v13 = vpop.f32.mrf.mxu3  ;;  %v1053_v2 = vpop.f32.mrf.mxu1  ;;  %v914_v51 = vadd.f32 %v913_v15, %v894_v60 }
  0xda   : > { %v770_v1 = vadd.f32 %v769_v13, %v750_v58 }
  0xdb   : > { %v922_v55 = vadd.f32 %v914_v51, %v773_v0  ;;  %v2587_v0 = vld [vmem:[%s3246_s2] ss:$0 sm:$0xff] }
  0xdc   : > { %v3217_v31 = vadd.f32 %v770_v1, %v592_v43 }
  0xe0   : > { %v916_v49 = vpop.f32.mrf.mxu2  ;;  %v3219_v17 = vpop.f32.mrf.mxu0 }
  0xe1   : > { %v1072_v62 = vpop.f32.mrf.mxu3  ;;  %v917_v6 = vadd.f32 %v916_v49, %v897_v5  ;;  %v1055_v14 = vpop.f32.mrf.mxu1 }
  0xe2   : > { %v1073_v28 = vadd.f32 %v1072_v62, %v1053_v2 }
  0xe3   : > { %v923_v3 = vadd.f32 %v917_v6, %v774_v61  ;;  %v2559_v61 = vld [vmem:[%s3227_s5] sm:$0xff]  }
  0xe4   : > { %v1082_v4 = vadd.f32 %v1073_v28, %v921_v63  ;;  %v2560_v49 = vunpack.c.l.bf16 %v2559_v61 }
  0xe8   : > { %v918_v8 = vpop.f32.mrf.mxu2  ;;  %v1210_v11 = vpop.f32.mrf.mxu0 }
  0xe9   : > { %v1074_v9 = vpop.f32.mrf.mxu3  ;;  %v1058_v10 = vpop.f32.mrf.mxu1 }
  0xea   : > { %v1075_v44 = vadd.f32 %v1074_v9, %v1055_v14  ;;  %v2561_v14 = vunpack.c.h.bf16 %v2559_v61 }
  0xec   : > { %v1083_v43 = vadd.f32 %v1075_v44, %v922_v55 }
  0xf0   : > { %v1229_v20 = vpop.f32.mrf.mxu2  ;;  %v1212_v24 = vpop.f32.mrf.mxu0 }
  0xf1   : > { %v1077_v12 = vpop.f32.mrf.mxu3  ;;  %v1060_v40 = vpop.f32.mrf.mxu1  ;;  %v1230_v41 = vadd.f32 %v1229_v20, %v1210_v11 }
  0xf2   : > { %v1078_v22 = vadd.f32 %v1077_v12, %v1058_v10 }
  0xf3   : > { %v1239_v47 = vadd.f32 %v1230_v41, %v1082_v4 }
  0xf4   : > { %v1084_v23 = vadd.f32 %v1078_v22, %v923_v3  ;;  %v919_v3 = vadd.f32 %v918_v8, %v3219_v17 }
  0xf8   : > { %v1231_v46 = vpop.f32.mrf.mxu2  ;;  %v1215_v32 = vpop.f32.mrf.mxu0 }
  0xf9   : > { %v1079_v25 = vpop.f32.mrf.mxu3  ;;  %v1354_v30 = vpop.f32.mrf.mxu1  ;;  %v1232_v42 = vadd.f32 %v1231_v46, %v1212_v24  ;;  %v924_v46 = vadd.f32 %v919_v3, %v3217_v31 }
  0xfa   : > { %v1080_v12 = vadd.f32 %v1079_v25, %v1060_v40 }
  0xfb   : > { %v1240_v56 = vadd.f32 %v1232_v42, %v1083_v43 }
  0xfc   : > { %v1085_v8 = vadd.f32 %v1080_v12, %v924_v46 }
 0x100   : > { %v1234_v33 = vpop.f32.mrf.mxu2  ;;  %v1217_v37 = vpop.f32.mrf.mxu0 }
 0x101   : > { %v1373_v27 = vpop.f32.mrf.mxu3  ;;  %v1356_v29 = vpop.f32.mrf.mxu1  ;;  %v1235_v6 = vadd.f32 %v1234_v33, %v1215_v32 }
 0x102   : > { %v1374_v52 = vadd.f32 %v1373_v27, %v1354_v30 }
 0x103   : > { %v1241_v20 = vadd.f32 %v1235_v6, %v1084_v23 }
 0x104   : > { %v1383_v39 = vadd.f32 %v1374_v52, %v1239_v47 }
 0x108   : > { %v1236_v7 = vpop.f32.mrf.mxu2  ;;  %v1510_v48 = vpop.f32.mrf.mxu0 }
 0x109   : > { %v1375_v34 = vpop.f32.mrf.mxu3  ;;  %v1359_v57 = vpop.f32.mrf.mxu1  ;;  %v1237_v30 = vadd.f32 %v1236_v7, %v1217_v37  ;;  %v2576_v7 = vld [vmem:[%s3227_s5 + $0x8] sm:$0xff]  }
 0x10a   : > { %v1376_v45 = vadd.f32 %v1375_v34, %v1356_v29  ;;  %v2564_v52 = vunpack.c.l.bf16 %v2576_v7  ;;  %v2565_v44 = vunpack.c.h.bf16 %v2576_v7 }
 0x10c   : > { %v1384_v63 = vadd.f32 %v1376_v45, %v1240_v56 }
 0x110   : > { %v1529_v50 = vpop.f32.mrf.mxu2  ;;  %v1512_v53 = vpop.f32.mrf.mxu0 }
 0x111   : > { %v1378_v19 = vpop.f32.mrf.mxu3  ;;  %v1361_v59 = vpop.f32.mrf.mxu1  ;;  %v1530_v26 = vadd.f32 %v1529_v50, %v1510_v48 }
 0x112   : > { %v1379_v4 = vadd.f32 %v1378_v19, %v1359_v57  ;;  %v1242_v57 = vadd.f32 %v1237_v30, %v1085_v8 }
 0x113   : > { %v1539_v21 = vadd.f32 %v1530_v26, %v1383_v39 }
 0x114   : > { %v1385_v29 = vadd.f32 %v1379_v4, %v1241_v20 }
 0x118   : > { %v1531_v18 = vpop.f32.mrf.mxu2  ;;  %v1515_v13 = vpop.f32.mrf.mxu0 }
 0x119   : > { %v1380_v36 = vpop.f32.mrf.mxu3  ;;  %v1662_v38 = vpop.f32.mrf.mxu1  ;;  %v1532_v58 = vadd.f32 %v1531_v18, %v1512_v53 }
 0x11a   : > { %v1381_v40 = vadd.f32 %v1380_v36, %v1361_v59 }
 0x11b   : > { %v1540_v2 = vadd.f32 %v1532_v58, %v1384_v63 }
 0x11c   : > { %v1386_v19 = vadd.f32 %v1381_v40, %v1242_v57 }
 0x120   : > { %v1534_v15 = vpop.f32.mrf.mxu2  ;;  %v1517_v48 = vpop.f32.mrf.mxu0 }
 0x121   : > { %v1681_v54 = vpop.f32.mrf.mxu3  ;;  %v1664_v16 = vpop.f32.mrf.mxu1  ;;  %v1535_v22 = vadd.f32 %v1534_v15, %v1515_v13 }
 0x122   : > { %v1682_v35 = vadd.f32 %v1681_v54, %v1662_v38 }
 0x123   : > { %v1541_v23 = vadd.f32 %v1535_v22, %v1385_v29 }
 0x124   : > { %v1691_v60 = vadd.f32 %v1682_v35, %v1539_v21 }
 0x126   : > { %v1699_v5 = vadd.f32 %v2587_v0, %v1691_v60 }
 0x128   : > { %v1711_v9 = vadd.f32 %v2560_v49, %v1699_v5  ;;  %v1536_v17 = vpop.f32.mrf.mxu2 }
 0x129   : > { %v1683_v1 = vpop.f32.mrf.mxu3  ;;  %v1667_v11 = vpop.f32.mrf.mxu1  ;;  %v1537_v31 = vadd.f32 %v1536_v17, %v1517_v48 }
 0x12a   : > { %v1684_v62 = vadd.f32 %v1683_v1, %v1664_v16  ;;  %v1715_v32 = vmax.f32 %v1711_v9, 0.0 }
 0x12b   : > { %v1542_v41 = vadd.f32 %v1537_v31, %v1386_v19 }
 0x12c   : > { %v1692_v28 = vadd.f32 %v1684_v62, %v1540_v2 }
 0x12e   : > { %v1700_v10 = vadd.f32 %v2587_v0, %v1692_v28 }
 0x130   : > { %v1712_v24 = vadd.f32 %v2561_v14, %v1700_v10 }
 0x131   : > { %v1686_v27 = vpop.f32.mrf.mxu3  ;;  %v1669_v50 = vpop.f32.mrf.mxu1 }
 0x132   : > { %v1716_v33 = vmax.f32 %v1712_v24, 0.0  ;;  %v1687_v34 = vadd.f32 %v1686_v27, %v1667_v11 }
 0x134   : > { %v2569_v25 = vpack.c.bf16 %v1716_v33, %v1715_v32  ;;  %v1693_v37 = vadd.f32 %v1687_v34, %v1541_v23 }
 0x136   : > { %2570 = vst [vmem:[%s217_s10] sm:$0xff] %v2569_v25   ;;  %v1701_v51 = vadd.f32 %v2587_v0, %v1693_v37 }
 0x138   : > { %v1713_v47 = vadd.f32 %v2564_v52, %v1701_v51 }
 0x139   : > { %v1688_v38 = vpop.f32.mrf.mxu3 }
 0x13a   : > { %v1689_v53 = vadd.f32 %v1688_v38, %v1669_v50  ;;  %v1717_v59 = vmax.f32 %v1713_v47, 0.0 }
 0x13c   : > { %v1694_v18 = vadd.f32 %v1689_v53, %v1542_v41 }
 0x13e   : > { %v1702_v26 = vadd.f32 %v2587_v0, %v1694_v18 }
 0x140   : > { %v1714_v54 = vadd.f32 %v2565_v44, %v1702_v26 }
 0x142   : > { %v1718_v36 = vmax.f32 %v1714_v54, 0.0 }
 0x144   : > { %v2574_v55 = vpack.c.bf16 %v1718_v36, %v1717_v59 }
 0x146   : > { %2577 = vst [vmem:[%s217_s10 + $0x8] sm:$0xff] %v2574_v55  }
 0x147 PF: > { %s14_s15 = sadd.s32 1, %s2594_s15  }
 0x148   : > { %p11_p4 = scmp.ge.s32.totalorder %s14_s15, 4  }
 0x14a   :  { %13 = sbr.rel (!%p11_p4) target bundleno = 1 (0x1), region = 77 }

// kernel: c3d_tf_forward.15
= control target key start
LH: loop header
LB: loop body
LE: loop exit
PB: predicated region body
PF: predicated region fallthrough
CT: control target
= control target key end

     0   :  { %s2533_s12 = smov 0   ;;  %s3142_s0 = inlined_call_operand.vmem [shape: bf16[2,6,10,192], index: 0, kind: input, shape index: {}]   ;;  %s3143_s1 = inlined_call_operand.vmem [shape: bf16[9,192,128], index: 1, kind: input, shape index: {}]   ;;  %s3144_s2 = inlined_call_operand.vmem [shape: f32[1,128], index: 2, kind: input, shape index: {}]   ;;  %s3145_s3 = inlined_call_operand.vmem [shape: bf16[2,32,128], index: 3, kind: output, shape index: {}]  }
   0x1 LB: > { %s1723_s13 = sadd.s32 4294967295, %s2511_s12   ;;  %p1727_p0 = scmp.ge.s32.totalorder %s2511_s12, 1  ;;  %s2511_s12 = sphi %s2533_s12, %s13_s12  }
   0x2   : > { %p137_p1 = scmp.lt.s32.totalorder %s2511_s12, 3 }
   0x4   : > { %p138_p2 = pnand %p1727_p0, %p137_p1 }
   0x5   : > { %p161_p3 = scmp.lt.s32.totalorder (!%p138_p2), %s1723_s13, 1 }
   0x6   : > { %141 = sbr.rel (%p138_p2) target bundleno = 325 (0x145), region = 32 }
   0xb   : > { %v2395_v0 = vld [vmem:[%s3143_s1 + $0x98] sm:$0xff]  ;;  %v2394_v4 = vld [vmem:[%s3143_s1 + $0x90] sm:$0xff]  ;;  %s3147_s13 = smov (!%p161_p3, %s1723_s13), 1  ;;  %v2393_v8 = vld [vmem:[%s3143_s1 + $0x88] sm:$0xff]  ;;  %vm252_vm0 = vcmask 1046528   ;;  %vm386_vm1 = vcmask 523264  }
   0xc   : > { %v2399_v1 = vld [vmem:[%s3143_s1 + $0xb8] sm:$0xff]  ;;  %393 = vmatpush.bf16.msra.mxu0 %v2395_v0  ;;  %v2398_v5 = vld [vmem:[%s3143_s1 + $0xb0] sm:$0xff]  ;;  %s2495_s30 = smul.u32 96, %s3147_s13  ;;  %v2397_v9 = vld [vmem:[%s3143_s1 + $0xa8] sm:$0xff]  ;;  %vm547_vm2 = vcmask 1045504   ;;  %s2375_s18 = sshll.u32 %s3147_s13, 4 }
   0xd   : > { %v2383_v2 = vld [vmem:[%s3143_s1 + $0x38] sm:$0xff]  ;;  %416 = vmatpush.bf16.msra.mxu1 %v2399_v1  ;;  %v2382_v6 = vld [vmem:[%s3143_s1 + $0x30] sm:$0xff]  ;;  %v2381_v10 = vld [vmem:[%s3143_s1 + $0x28] sm:$0xff]  ;;  %s170_s21 = scalar_lea.vmem %s3145_s3, %s2375_s18 }
   0xe   : > { %v2387_v3 = vld [vmem:[%s3143_s1 + $0x58] sm:$0xff]  ;;  %509 = vmatpush.bf16.msra.mxu2 %v2383_v2  ;;  %v2386_v7 = vld [vmem:[%s3143_s1 + $0x50] sm:$0xff]  ;;  %v2385_v11 = vld [vmem:[%s3143_s1 + $0x48] sm:$0xff]  ;;  %s2583_s16 = scalar_lea.vmem %s3142_s0, %s2495_s30 }
   0xf   : > { %532 = vmatpush.bf16.msra.mxu3 %v2387_v3  ;;  %v172_v12 = vld [vmem:[%s2583_s16] sm:$0xff]  ;;  %v2587_v13 = vld [vmem:[%s2583_s16 + $0x8] sm:$0x11]  ;;  %v174_v14 = vld [vmem:[%s2583_s16 + $0x10] sm:$0xff] }
  0x10   : > { %394 = vmatpush.bf16.msra.mxu0 %v2394_v4  ;;  %v2591_v15 = vld [vmem:[%s2583_s16 + $0x18] sm:$0x11]  ;;  %v2593_v16 = vunpack.c.h.bf16 %v172_v12  ;;  %v187_v17 = vunpack.c.h.bf16 %v2587_v13  ;;  %v2596_v18 = vunpack.c.h.bf16 %v174_v14  ;;  %v2392_v20 = vld [vmem:[%s3143_s1 + $0x80] sm:$0xff]  ;;  %v2640_v37 = vld [vmem:[%s2583_s16 + $0x28] sm:$0x11]  ;;  %v2655_v42 = vunpack.c.l.bf16 %v172_v12 }
  0x11   : > { %417 = vmatpush.bf16.msra.mxu1 %v2398_v5  ;;  %v191_v19 = vunpack.c.h.bf16 %v2591_v15  ;;  %v2396_v21 = vld [vmem:[%s3143_s1 + $0xa0] sm:$0xff]  ;;  %v2411_v29 = vld [vmem:[%s3143_s1 + $0x118] sm:$0xff]  ;;  %v2643_v38 = vld [vmem:[%s2583_s16 + $0x30] sm:$0xff]  ;;  %v186_v43 = vunpack.c.l.bf16 %v2587_v13  ;;  %v2658_v44 = vunpack.c.l.bf16 %v174_v14  ;;  %v190_v45 = vunpack.c.l.bf16 %v2591_v15 }
  0x12   : > { %510 = vmatpush.bf16.msra.mxu2 %v2382_v6  ;;  %v256_v22 = vrot.slane %v2593_v16, 1  ;;  %v257_v23 = vrot.slane %v187_v17, 1  ;;  %v262_v24 = vrot.slane %v2596_v18, 1  ;;  %v2380_v25 = vld [vmem:[%s3143_s1 + $0x20] sm:$0xff]  ;;  %v2407_v30 = vld [vmem:[%s3143_s1 + $0xf8] sm:$0xff]  ;;  %v209_v33 = vpack.c.bf16 %v2596_v18, %v2593_v16  ;;  %v2406_v40 = vld [vmem:[%s3143_s1 + $0xf0] sm:$0xff] }
  0x13   : > { %533 = vmatpush.bf16.msra.mxu3 %v2386_v7  ;;  %v2384_v26 = vld [vmem:[%s3143_s1 + $0x40] sm:$0xff]  ;;  %v263_v27 = vrot.slane %v191_v19, 1  ;;  %v2391_v34 = vld [vmem:[%s3143_s1 + $0x78] sm:$0xff]  ;;  %v2410_v41 = vld [vmem:[%s3143_s1 + $0x110] sm:$0xff]  ;;  %v195_v48 = vunpack.c.h.bf16 %v2640_v37  ;;  %v2670_v49 = vunpack.c.h.bf16 %v2643_v38  ;;  %v253_v54 = vrot.slane %v2655_v42, 1 }
  0x14   : > { %395 = vmatpush.bf16.msra.mxu0 %v2393_v8  ;;  %v258_v28 = vsel %vm252_vm0, %v256_v22, %v257_v23  ;;  %v2379_v35 = vld [vmem:[%s3143_s1 + $0x18] sm:$0xff]  ;;  %v2637_v36 = vld [vmem:[%s2583_s16 + $0x20] sm:$0xff]  ;;  %v2390_v46 = vld [vmem:[%s3143_s1 + $0x70] sm:$0xff]  ;;  %v254_v55 = vrot.slane %v186_v43, 1  ;;  %v259_v56 = vrot.slane %v2658_v44, 1  ;;  %v260_v57 = vrot.slane %v190_v45, 1 }
  0x15   : > { %418 = vmatpush.bf16.msra.mxu1 %v2397_v9  ;;  %v2625_v31 = vsel %vm252_vm0, %v262_v24, %v263_v27  ;;  %v2646_v39 = vld [vmem:[%s2583_s16 + $0x38] sm:$0x11]  ;;  %v2666_v47 = vunpack.c.h.bf16 %v2637_v36  ;;  %v2378_v51 = vld [vmem:[%s3143_s1 + $0x10] sm:$0xff]  ;;  %v2405_v52 = vld [vmem:[%s3143_s1 + $0xe8] sm:$0xff]  ;;  %v269_v60 = vrot.slane %v195_v48, 1  ;;  %v274_v61 = vrot.slane %v2670_v49, 1 }
  0x16   : > { %511 = vmatpush.bf16.msra.mxu2 %v2381_v10  ;;  %v286_v32 = vpack.c.bf16 %v2625_v31, %v258_v28  ;;  %v199_v50 = vunpack.c.h.bf16 %v2646_v39  ;;  %v2409_v53 = vld [vmem:[%s3143_s1 + $0x108] sm:$0xff]  ;;  %v2404_v0 = vld [vmem:[%s3143_s1 + $0xe0] sm:$0xff]  ;;  %v2435_v2 = vld [vmem:[%s3143_s1 + $0x1d8] sm:$0xff]  ;;  %v255_v4 = vsel %vm252_vm0, %v253_v54, %v254_v55  ;;  %v2714_v5 = vsel %vm252_vm0, %v259_v56, %v260_v57 }
  0x17   : > { %534 = vmatpush.bf16.msra.mxu3 %v2385_v11  ;;  %v2389_v58 = vld [vmem:[%s3143_s1 + $0x68] sm:$0xff]  ;;  %v268_v59 = vrot.slane %v2666_v47, 1  ;;  %v2408_v1 = vld [vmem:[%s3143_s1 + $0x100] sm:$0xff]  ;;  %v2419_v9 = vld [vmem:[%s3143_s1 + $0x158] sm:$0xff]  ;;  %v285_v12 = vpack.c.bf16 %v2714_v5, %v255_v4  ;;  %v194_v27 = vunpack.c.l.bf16 %v2640_v37  ;;  %v2764_v28 = vunpack.c.l.bf16 %v2643_v38 }
  0x18   : > { %396 = vmatpush.bf16.msra.mxu0 %v2392_v20  ;;  %v275_v62 = vrot.slane %v199_v50, 1  ;;  %v2377_v63 = vld [vmem:[%s3143_s1 + $0x8] sm:$0xff]  ;;  %v2388_v3 = vld [vmem:[%s3143_s1 + $0x60] sm:$0xff]  ;;  %v2403_v10 = vld [vmem:[%s3143_s1 + $0xd8] sm:$0xff]  ;;  %v208_v20 = vpack.c.bf16 %v2658_v44, %v2655_v42  ;;  %v552_v54 = vrot.slane %v187_v17, 2  ;;  %v557_v55 = vrot.slane %v2596_v18, 2 }
  0x19   : > { %419 = vmatpush.bf16.msra.mxu1 %v2396_v21  ;;  %v2717_v6 = vsel %vm252_vm0, %v268_v59, %v269_v60  ;;  %v2376_v8 = vld [vmem:[%s3143_s1] sm:$0xff]  ;;  %v2423_v11 = vld [vmem:[%s3143_s1 + $0x178] sm:$0xff]  ;;  %v2743_v21 = vpack.c.bf16 %v2670_v49, %v2666_v47  ;;  %v2418_v22 = vld [vmem:[%s3143_s1 + $0x150] sm:$0xff]  ;;  %v271_v38 = vrot.slane %v2764_v28, 1 }
  0x1a   : > { %512 = vmatpush.bf16.msra.mxu2 %v2380_v25  ;;  %v2720_v7 = vsel %vm252_vm0, %v274_v61, %v275_v62  ;;  %v2434_v23 = vld [vmem:[%s3143_s1 + $0x1d0] sm:$0xff]  ;;  %v2400_v13 = vld [vmem:[%s3143_s1 + $0xc0] sm:$0xff]  ;;  %v2415_v60 = vld [vmem:[%s3143_s1 + $0x138] sm:$0xff] }
  0x1b   : > { %535 = vmatpush.bf16.msra.mxu3 %v2384_v26  ;;  %v2737_v14 = vpack.c.bf16 %v2720_v7, %v2717_v6  ;;  %v2402_v24 = vld [vmem:[%s3143_s1 + $0xd0] sm:$0xff]  ;;  %v2760_v26 = vunpack.c.l.bf16 %v2637_v36  ;;  %v266_v36 = vrot.slane %v194_v27, 1  ;;  %v2420_v15 = vld [vmem:[%s3143_s1 + $0x160] sm:$0xff]  ;;  %v2447_v61 = vld [vmem:[%s3143_s1 + $0x238] sm:$0xff] }
  0x1c   : > { %1803 = vmatmul.msk.bf16.vlgmr.msra.gmra.mxu1 %vm386_vm1, %v286_v32  ;;  %397 = vmatpush.bf16.msra.mxu0 %v2391_v34  ;;  %v2422_v25 = vld [vmem:[%s3143_s1 + $0x170] sm:$0xff]  ;;  %v2433_v32 = vld [vmem:[%s3143_s1 + $0x1c8] sm:$0xff]  ;;  %v2459_v4 = vld [vmem:[%s3143_s1 + $0x298] sm:$0xff] }
  0x1d   : > { %687 = vmatpush.bf16.msrb.mxu1 %v2407_v30  ;;  %v2417_v30 = vld [vmem:[%s3143_s1 + $0x148] sm:$0xff]  ;;  %v2444_v37 = vld [vmem:[%s3143_s1 + $0x220] sm:$0xff] }
  0x1e   : > { %1853 = vmatmul.msk.bf16.vlgmr.msra.gmra.mxu3 %vm386_vm1, %v209_v33  ;;  %513 = vmatpush.bf16.msra.mxu2 %v2379_v35  ;;  %v2401_v33 = vld [vmem:[%s3143_s1 + $0xc8] sm:$0xff]  ;;  %v265_v35 = vrot.slane %v2760_v26, 1 }
  0x1f   : > { %710 = vmatpush.bf16.msrb.mxu3 %v2411_v29  ;;  %v198_v29 = vunpack.c.l.bf16 %v2646_v39  ;;  %v2421_v34 = vld [vmem:[%s3143_s1 + $0x168] sm:$0xff] }
  0x20   : > { %398 = vmatpush.bf16.msra.mxu0 %v2390_v46  ;;  %v549_v46 = vrot.slane %v186_v43, 2  ;;  %v2416_v43 = vld [vmem:[%s3143_s1 + $0x140] sm:$0xff]  ;;  %v2815_v17 = vsel %vm252_vm0, %v265_v35, %v266_v36  ;;  %v2427_v36 = vld [vmem:[%s3143_s1 + $0x198] sm:$0xff] }
  0x21   : > { %688 = vmatpush.bf16.msrb.mxu1 %v2406_v40  ;;  %v548_v40 = vrot.slane %v2655_v42, 2  ;;  %v558_v42 = vrot.slane %v191_v19, 2 }
  0x22   : > { %514 = vmatpush.bf16.msra.mxu2 %v2378_v51  ;;  %v554_v51 = vrot.slane %v2658_v44, 2 }
  0x23   : > { %711 = vmatpush.bf16.msrb.mxu3 %v2410_v41  ;;  %v272_v41 = vrot.slane %v198_v29, 1  ;;  %v550_v56 = vsel %vm547_vm2, %v548_v40, %v549_v46  ;;  %v2826_v59 = vsel %vm547_vm2, %v557_v55, %v558_v42  ;;  %v180_v55 = vld [vmem:[%s2583_s16 + $0x40] sm:$0xff]  ;;  %v2455_v42 = vld [vmem:[%s3143_s1 + $0x278] sm:$0xff] }
  0x24   : > { %399 = vmatpush.bf16.msra.mxu0 %v2389_v58 }
  0x25   : > { %689 = vmatpush.bf16.msrb.mxu1 %v2405_v52  ;;  %v555_v52 = vrot.slane %v190_v45, 2  ;;  %v2432_v45 = vld [vmem:[%s3143_s1 + $0x1c0] sm:$0xff]  ;;  %v2818_v19 = vsel %vm252_vm0, %v271_v38, %v272_v41  ;;  %v2442_v38 = vld [vmem:[%s3143_s1 + $0x210] sm:$0xff]  ;;  %v729_v41 = vpack.c.bf16 %v2760_v26, %v2658_v44  ;;  %v2425_v44 = vld [vmem:[%s3143_s1 + $0x188] sm:$0xff] }
  0x26   : > { %515 = vmatpush.bf16.msra.mxu2 %v2377_v63  ;;  %v2836_v62 = vpack.c.bf16 %v2818_v19, %v2815_v17 }
  0x27   : > { %712 = vmatpush.bf16.msrb.mxu3 %v2409_v53  ;;  %v551_v53 = vrot.slane %v2593_v16, 2  ;;  %v2431_v16 = vld [vmem:[%s3143_s1 + $0x1b8] sm:$0xff]  ;;  %v2822_v57 = vsel %vm547_vm2, %v554_v51, %v555_v52  ;;  %v730_v51 = vpack.c.bf16 %v2666_v47, %v2596_v18  ;;  %v2426_v52 = vld [vmem:[%s3143_s1 + $0x190] sm:$0xff]  ;;  %v2457_v18 = vld [vmem:[%s3143_s1 + $0x288] sm:$0xff] }
  0x28   : > { %400 = vmatpush.bf16.msra.mxu0 %v2388_v3  ;;  %v580_v63 = vpack.c.bf16 %v2822_v57, %v550_v56  ;;  %v2414_v3 = vld [vmem:[%s3143_s1 + $0x130] sm:$0xff] }
  0x29   : > { %690 = vmatpush.bf16.msrb.mxu1 %v2404_v0  ;;  %v553_v58 = vsel %vm547_vm2, %v551_v53, %v552_v54  ;;  %v2841_v0 = vpack.c.bf16 %v2764_v28, %v2760_v26  ;;  %v2441_v53 = vld [vmem:[%s3143_s1 + $0x208] sm:$0xff]  ;;  %v2424_v54 = vld [vmem:[%s3143_s1 + $0x180] sm:$0xff]  ;;  %v2438_v56 = vld [vmem:[%s3143_s1 + $0x1f0] sm:$0xff] }
  0x2a   : > { %516 = vmatpush.bf16.msra.mxu2 %v2376_v8  ;;  %v2446_v8 = vld [vmem:[%s3143_s1 + $0x230] sm:$0xff] }
  0x2b   : > { %713 = vmatpush.bf16.msrb.mxu3 %v2408_v1  ;;  %401 = vmatmul.bf16.vlgmr.msra.gmra.mxu0 %v285_v12  ;;  %v581_v1 = vpack.c.bf16 %v2826_v59, %v553_v58  ;;  %v2445_v12 = vld [vmem:[%s3143_s1 + $0x228] sm:$0xff]  ;;  %v890_v58 = vpack.c.bf16 %v2815_v17, %v2714_v5  ;;  %v2452_v17 = vld [vmem:[%s3143_s1 + $0x260] sm:$0xff] }
  0x2c   : > { %836 = vmatpush.bf16.msrb.mxu0 %v2419_v9  ;;  %1804 = vmatmul.msk.bf16.gmra.mxu1 %vm386_vm1, %v2737_v14  ;;  %v2429_v9 = vld [vmem:[%s3143_s1 + $0x1a8] sm:$0xff] }
  0x2d   : > { %691 = vmatpush.bf16.msrb.mxu1 %v2403_v10  ;;  %517 = vmatmul.bf16.vlgmr.msra.gmra.mxu2 %v208_v20  ;;  %v2413_v10 = vld [vmem:[%s3143_s1 + $0x128] sm:$0xff]  ;;  %v560_v20 = vrot.slane %v2760_v26, 2  ;;  %v2456_v26 = vld [vmem:[%s3143_s1 + $0x280] sm:$0xff] }
  0x2e   : > { %859 = vmatpush.bf16.msrb.mxu2 %v2423_v11  ;;  %1854 = vmatmul.msk.bf16.gmra.mxu3 %vm386_vm1, %v2743_v21  ;;  %v2458_v11 = vld [vmem:[%s3143_s1 + $0x290] sm:$0xff]  ;;  %v2437_v5 = vld [vmem:[%s3143_s1 + $0x1e8] sm:$0xff] }
  0x2f   : > { %1020 = vmatpush.bf16.msra.mxu3 %v2435_v2  ;;  %v2430_v2 = vld [vmem:[%s3143_s1 + $0x1b0] sm:$0xff] }
  0x30   : > { %837 = vmatpush.bf16.msrb.mxu0 %v2418_v22  ;;  %v561_v22 = vrot.slane %v194_v27, 2  ;;  %v570_v27 = vrot.slane %v199_v50, 2 }
  0x31   : > { %692 = vmatpush.bf16.msrb.mxu1 %v2402_v24  ;;  %v567_v24 = vrot.slane %v198_v29, 2  ;;  %v2412_v29 = vld [vmem:[%s3143_s1 + $0x120] sm:$0xff] }
  0x32   : > { %860 = vmatpush.bf16.msrb.mxu2 %v2422_v25  ;;  %v2428_v25 = vld [vmem:[%s3143_s1 + $0x1a0] sm:$0xff] }
  0x33   : > { %1021 = vmatpush.bf16.msra.mxu3 %v2434_v23  ;;  %v566_v23 = vrot.slane %v2764_v28, 2 }
  0x34   : > { %838 = vmatpush.bf16.msrb.mxu0 %v2417_v30  ;;  %v563_v30 = vrot.slane %v2666_v47, 2  ;;  %v2440_v47 = vld [vmem:[%s3143_s1 + $0x200] sm:$0xff] }
  0x35   : > { %693 = vmatpush.bf16.msrb.mxu1 %v2401_v33  ;;  %v569_v33 = vrot.slane %v2670_v49, 2  ;;  %v2899_v39 = vsel %vm547_vm2, %v566_v23, %v567_v24  ;;  %v2466_v23 = vld [vmem:[%s3143_s1 + $0x2d0] sm:$0xff] }
  0x36   : > { %861 = vmatpush.bf16.msrb.mxu2 %v2421_v34  ;;  %v2443_v34 = vld [vmem:[%s3143_s1 + $0x218] sm:$0xff] }
  0x37   : > { %1022 = vmatpush.bf16.msra.mxu3 %v2433_v32  ;;  %v564_v32 = vrot.slane %v195_v48, 2  ;;  %v2896_v48 = vsel %vm547_vm2, %v560_v20, %v561_v22  ;;  %v2905_v35 = vsel %vm547_vm2, %v569_v33, %v570_v27  ;;  %v2451_v22 = vld [vmem:[%s3143_s1 + $0x258] sm:$0xff] }
  0x38   : > { %839 = vmatpush.bf16.msrb.mxu0 %v2416_v43  ;;  %v2915_v40 = vpack.c.bf16 %v2899_v39, %v2896_v48  ;;  %v2439_v43 = vld [vmem:[%s3143_s1 + $0x1f8] sm:$0xff]  ;;  %v1047_v33 = vpack.c.bf16 %v2896_v48, %v2822_v57  ;;  %v2449_v57 = vld [vmem:[%s3143_s1 + $0x248] sm:$0xff]  ;;  %v2480_v48 = vld [vmem:[%s3143_s1 + $0x340] sm:$0xff] }
  0x39   : > { %694 = vmatpush.bf16.msrb.mxu1 %v2400_v13  ;;  %v2902_v50 = vsel %vm547_vm2, %v563_v30, %v564_v32  ;;  %v2960_v13 = vunpack.c.l.bf16 %v180_v55  ;;  %v2450_v32 = vld [vmem:[%s3143_s1 + $0x250] sm:$0xff] }
  0x3a   : > { %862 = vmatpush.bf16.msrb.mxu2 %v2420_v15  ;;  %v2921_v46 = vpack.c.bf16 %v2905_v35, %v2902_v50  ;;  %v2962_v15 = vunpack.c.h.bf16 %v180_v55  ;;  %v2477_v55 = vld [vmem:[%s3143_s1 + $0x328] sm:$0xff] }
  0x3b   : > { %1023 = vmatpush.bf16.msra.mxu3 %v2432_v45  ;;  %406 = vmatmul.bf16.gmra.mxu0 %v2836_v62  ;;  %v2471_v45 = vld [vmem:[%s3143_s1 + $0x2f8] sm:$0xff] }
  0x3c   : > { %840 = vmatpush.bf16.msrb.mxu0 %v2415_v60  ;;  %695 = vmatmul.bf16.vlgmr.msrb.gmra.mxu1 %v580_v63  ;;  %v731_v60 = vpack.c.bf16 %v2960_v13, %v2764_v28  ;;  %v732_v63 = vpack.c.bf16 %v2962_v15, %v2670_v49  ;;  %v2483_v49 = vld [vmem:[%s3143_s1 + $0x358] sm:$0xff] }
  0x3d   : > { %997 = vmatpush.bf16.msra.mxu1 %v2431_v16  ;;  %522 = vmatmul.bf16.gmra.mxu2 %v2841_v0  ;;  %v2454_v16 = vld [vmem:[%s3143_s1 + $0x270] sm:$0xff] }
  0x3e   : > { %1177 = vmatpush.bf16.msra.mxu2 %v2447_v61  ;;  %1927 = vmatmul.msk.bf16.vlgmr.msrb.gmra.mxu3 %vm386_vm1, %v581_v1  ;;  %v891_v61 = vpack.c.bf16 %v2717_v6, %v2625_v31  ;;  %v181_v1 = vld [vmem:[%s2583_s16 + $0x48] sm:$0x11]  ;;  %v2470_v6 = vld [vmem:[%s3143_s1 + $0x2f0] sm:$0xff] }
  0x3f   : > { %1321 = vmatpush.bf16.msrb.mxu3 %v2459_v4  ;;  %v202_v31 = vunpack.c.l.bf16 %v181_v1  ;;  %v203_v28 = vunpack.c.h.bf16 %v181_v1  ;;  %v2467_v4 = vld [vmem:[%s3143_s1 + $0x2d8] sm:$0xff] }
  0x40   : > { %841 = vmatpush.bf16.msrb.mxu0 %v2414_v3  ;;  %v2436_v3 = vld [vmem:[%s3143_s1 + $0x1e0] sm:$0xff] }
  0x41   : > { %998 = vmatpush.bf16.msra.mxu1 %v2430_v2  ;;  %v2453_v2 = vld [vmem:[%s3143_s1 + $0x268] sm:$0xff]  ;;  %v886_v20 = vrot.slane %v203_v28, 1 }
  0x42   : > { %1178 = vmatpush.bf16.msra.mxu2 %v2446_v8  ;;  %v2482_v8 = vld [vmem:[%s3143_s1 + $0x350] sm:$0xff] }
  0x43   : > { %1322 = vmatpush.bf16.msrb.mxu3 %v2458_v11  ;;  %v2469_v11 = vld [vmem:[%s3143_s1 + $0x2e8] sm:$0xff] }
  0x44   : > { %842 = vmatpush.bf16.msrb.mxu0 %v2413_v10  ;;  %v883_v10 = vrot.slane %v202_v31, 1 }
  0x45   : > { %999 = vmatpush.bf16.msra.mxu1 %v2429_v9  ;;  %v882_v9 = vrot.slane %v2960_v13, 1 }
  0x46   : > { %1179 = vmatpush.bf16.msra.mxu2 %v2445_v12  ;;  %v885_v12 = vrot.slane %v2962_v15, 1 }
  0x47   : > { %1323 = vmatpush.bf16.msrb.mxu3 %v2457_v18  ;;  %v3017_v24 = vsel %vm252_vm0, %v882_v9, %v883_v10 }
  0x48   : > { %843 = vmatpush.bf16.msrb.mxu0 %v2412_v29  ;;  %v3023_v30 = vsel %vm252_vm0, %v885_v12, %v886_v20  ;;  %v892_v27 = vpack.c.bf16 %v3017_v24, %v2818_v19  ;;  %v1048_v29 = vpack.c.bf16 %v2902_v50, %v2826_v59  ;;  %v2464_v19 = vld [vmem:[%s3143_s1 + $0x2c0] sm:$0xff]  ;;  %v2479_v50 = vld [vmem:[%s3143_s1 + $0x338] sm:$0xff] }
  0x49   : > { %1000 = vmatpush.bf16.msra.mxu1 %v2428_v25  ;;  %v2468_v25 = vld [vmem:[%s3143_s1 + $0x2e0] sm:$0xff] }
  0x4a   : > { %1180 = vmatpush.bf16.msra.mxu2 %v2444_v37  ;;  %v2465_v37 = vld [vmem:[%s3143_s1 + $0x2c8] sm:$0xff]  ;;  %v2448_v59 = vld [vmem:[%s3143_s1 + $0x240] sm:$0xff] }
  0x4b   : > { %844 = vmatmul.bf16.vlgmr.msrb.gmra.mxu0 %v729_v41  ;;  %1324 = vmatpush.bf16.msrb.mxu3 %v2456_v26  ;;  %v1042_v41 = vrot.slane %v2962_v15, 2 }
  0x4c   : > { %1154 = vmatpush.bf16.msra.mxu0 %v2443_v34  ;;  %700 = vmatmul.bf16.gmra.mxu1 %v2915_v40  ;;  %v893_v34 = vpack.c.bf16 %v3023_v30, %v2720_v7  ;;  %v2481_v7 = vld [vmem:[%s3143_s1 + $0x348] sm:$0xff] }
  0x4d   : > { %1001 = vmatpush.bf16.msra.mxu1 %v2427_v36  ;;  %2001 = vmatmul.msk.bf16.vlgmr.msrb.gmra.mxu2 %vm386_vm1, %v730_v51  ;;  %v1039_v36 = vrot.slane %v2960_v13, 2  ;;  %v1043_v51 = vrot.slane %v203_v28, 2 }
  0x4e   : > { %1928 = vmatmul.msk.bf16.gmra.mxu3 %vm386_vm1, %v2921_v46  ;;  %1477 = vmatpush.bf16.msrb.mxu2 %v2471_v45 }
  0x50   : > { %1155 = vmatpush.bf16.msra.mxu0 %v2442_v38  ;;  %v1040_v38 = vrot.slane %v202_v31, 2 }
  0x51   : > { %1002 = vmatpush.bf16.msra.mxu1 %v2426_v52  ;;  %v2463_v52 = vld [vmem:[%s3143_s1 + $0x2b8] sm:$0xff] }
  0x52   : > { %1478 = vmatpush.bf16.msrb.mxu2 %v2470_v6  ;;  %v3068_v18 = vsel %vm547_vm2, %v1039_v36, %v1040_v38 }
  0x53   : > { %v1049_v26 = vpack.c.bf16 %v3068_v18, %v2899_v39  ;;  %v2476_v39 = vld [vmem:[%s3143_s1 + $0x320] sm:$0xff] }
  0x54   : > { %1156 = vmatpush.bf16.msra.mxu0 %v2441_v53  ;;  %v2478_v53 = vld [vmem:[%s3143_s1 + $0x330] sm:$0xff] }
  0x55   : > { %1003 = vmatpush.bf16.msra.mxu1 %v2425_v44  ;;  %v3071_v44 = vsel %vm547_vm2, %v1042_v41, %v1043_v51 }
  0x56   : > { %1479 = vmatpush.bf16.msrb.mxu2 %v2469_v11 }
  0x58   : > { %1157 = vmatpush.bf16.msra.mxu0 %v2440_v47  ;;  %v2462_v47 = vld [vmem:[%s3143_s1 + $0x2b0] sm:$0xff] }
  0x59   : > { %1004 = vmatpush.bf16.msra.mxu1 %v2424_v54  ;;  %v1050_v54 = vpack.c.bf16 %v3071_v44, %v2905_v35  ;;  %v2460_v35 = vld [vmem:[%s3143_s1 + $0x2a0] sm:$0xff] }
  0x5a   : > { %1480 = vmatpush.bf16.msrb.mxu2 %v2468_v25 }
  0x5b   : > { %849 = vmatmul.bf16.gmra.mxu0 %v731_v60  ;;  %v2473_v60 = vld [vmem:[%s3143_s1 + $0x308] sm:$0xff] }
  0x5c   : > { %1158 = vmatpush.bf16.msra.mxu0 %v2439_v43  ;;  %1005 = vmatmul.bf16.vlgmr.msra.gmra.mxu1 %v890_v58  ;;  %v182_v43 = vld [vmem:[%s2583_s16 + $0x50] sm:$0xff] }
  0x5d   : > { %1298 = vmatpush.bf16.msrb.mxu1 %v2455_v42  ;;  %2002 = vmatmul.msk.bf16.gmra.mxu2 %vm386_vm1, %v732_v63  ;;  %v2461_v42 = vld [vmem:[%s3143_s1 + $0x2a8] sm:$0xff]  ;;  %v204_v45 = vunpack.c.l.bf16 %v182_v43 }
  0x5e   : > { %2075 = vmatmul.msk.bf16.vlgmr.msra.gmra.mxu3 %vm386_vm1, %v891_v61  ;;  %v183_v61 = vld [vmem:[%s2583_s16 + $0x58] sm:$0x11] }
  0x5f   : > { %1629 = vmatpush.bf16.msra.mxu3 %v2483_v49  ;;  %v206_v63 = vunpack.c.l.bf16 %v183_v61  ;;  %v1344_v1 = vrot.slane %v204_v45, 1 }
  0x60   : > { %1159 = vmatpush.bf16.msra.mxu0 %v2438_v56  ;;  %v1196_v56 = vpack.c.bf16 %v204_v45, %v2960_v13  ;;  %v2472_v13 = vld [vmem:[%s3143_s1 + $0x300] sm:$0xff] }
  0x61   : > { %1299 = vmatpush.bf16.msrb.mxu1 %v2454_v16  ;;  %v2474_v16 = vld [vmem:[%s3143_s1 + $0x310] sm:$0xff] }
  0x63   : > { %1630 = vmatpush.bf16.msra.mxu3 %v2482_v8  ;;  %v1497_v8 = vrot.slane %v206_v63, 2 }
  0x64   : > { %1160 = vmatpush.bf16.msra.mxu0 %v2437_v5 }
  0x65   : > { %1300 = vmatpush.bf16.msrb.mxu1 %v2453_v2  ;;  %v1345_v2 = vrot.slane %v206_v63, 1 }
  0x67   : > { %1631 = vmatpush.bf16.msra.mxu3 %v2481_v7  ;;  %v1346_v49 = vsel %vm252_vm0, %v1344_v1, %v1345_v2 }
  0x68   : > { %1161 = vmatpush.bf16.msra.mxu0 %v2436_v3  ;;  %v1352_v6 = vpack.c.bf16 %v1346_v49, %v3017_v24 }
  0x69   : > { %1301 = vmatpush.bf16.msrb.mxu1 %v2452_v17 }
  0x6b   : > { %1162 = vmatmul.bf16.vlgmr.msra.gmra.mxu0 %v1047_v33  ;;  %1632 = vmatpush.bf16.msra.mxu3 %v2480_v48 }
  0x6c   : > { %1454 = vmatpush.bf16.msrb.mxu0 %v2467_v4  ;;  %1010 = vmatmul.bf16.gmra.mxu1 %v892_v27  ;;  %v1496_v4 = vrot.slane %v204_v45, 2 }
  0x6d   : > { %1302 = vmatpush.bf16.msrb.mxu1 %v2451_v22  ;;  %2149 = vmatmul.msk.bf16.vlgmr.msra.gmra.mxu2 %vm386_vm1, %v1048_v29 }
  0x6e   : > { %2076 = vmatmul.msk.bf16.gmra.mxu3 %vm386_vm1, %v893_v34  ;;  %v1498_v11 = vsel %vm547_vm2, %v1496_v4, %v1497_v8 }
  0x6f   : > { %v1504_v22 = vpack.c.bf16 %v1498_v11, %v3068_v18 }
  0x70   : > { %1455 = vmatpush.bf16.msrb.mxu0 %v2466_v23 }
  0x71   : > { %1303 = vmatpush.bf16.msrb.mxu1 %v2450_v32 }
  0x74   : > { %1456 = vmatpush.bf16.msrb.mxu0 %v2465_v37 }
  0x75   : > { %1304 = vmatpush.bf16.msrb.mxu1 %v2449_v57 }
  0x78   : > { %1457 = vmatpush.bf16.msrb.mxu0 %v2464_v19 }
  0x79   : > { %1305 = vmatpush.bf16.msrb.mxu1 %v2448_v59 }
  0x7b   : > { %1167 = vmatmul.bf16.gmra.mxu0 %v1049_v26 }
  0x7c   : > { %1458 = vmatpush.bf16.msrb.mxu0 %v2463_v52  ;;  %1306 = vmatmul.bf16.vlgmr.msrb.gmra.mxu1 %v2841_v0  ;;  %v2475_v0 = vld [vmem:[%s3143_s1 + $0x318] sm:$0xff] }
  0x7d   : > { %1606 = vmatpush.bf16.msra.mxu1 %v2479_v50  ;;  %2150 = vmatmul.msk.bf16.gmra.mxu2 %vm386_vm1, %v1050_v54 }
  0x7e   : > { %2223 = vmatmul.msk.bf16.vlgmr.msrb.gmra.mxu3 %vm386_vm1, %v2743_v21  ;;  %v205_v21 = vunpack.c.h.bf16 %v182_v43 }
  0x80   : > { %1459 = vmatpush.bf16.msrb.mxu0 %v2462_v47  ;;  %v1197_v58 = vpack.c.bf16 %v205_v21, %v2962_v15  ;;  %v207_v15 = vunpack.c.h.bf16 %v183_v61  ;;  %v1347_v5 = vrot.slane %v205_v21, 1  ;;  %v1499_v9 = vrot.slane %v205_v21, 2 }
  0x81   : > { %1607 = vmatpush.bf16.msra.mxu1 %v2478_v53 }
  0x82   : > { %v1348_v31 = vrot.slane %v207_v15, 1  ;;  %v1500_v10 = vrot.slane %v207_v15, 2 }
  0x84   : > { %1460 = vmatpush.bf16.msrb.mxu0 %v2461_v42  ;;  %v1501_v12 = vsel %vm547_vm2, %v1499_v9, %v1500_v10 }
  0x85   : > { %1608 = vmatpush.bf16.msra.mxu1 %v2477_v55  ;;  %v1505_v24 = vpack.c.bf16 %v1501_v12, %v3071_v44 }
  0x88   : > { %1461 = vmatpush.bf16.msrb.mxu0 %v2460_v35 }
  0x89   : > { %1609 = vmatpush.bf16.msra.mxu1 %v2476_v39 }
  0x8b   : > { %1462 = vmatmul.bf16.vlgmr.msrb.gmra.mxu0 %v2836_v62  ;;  %v1349_v62 = vsel %vm252_vm0, %v1347_v5, %v1348_v31 }
  0x8c   : > { %1311 = vmatmul.bf16.gmra.mxu1 %v1196_v56 }
  0x8d   : > { %1610 = vmatpush.bf16.msra.mxu1 %v2475_v0  ;;  %2297 = vmatmul.msk.bf16.vlgmr.msrb.gmra.mxu2 %vm386_vm1, %v2737_v14  ;;  %v1353_v14 = vpack.c.bf16 %v1349_v62, %v3023_v30 }
  0x8e   : > { %2224 = vmatmul.msk.bf16.gmra.mxu3 %vm386_vm1, %v1197_v58 }
  0x91   : > { %1611 = vmatpush.bf16.msra.mxu1 %v2474_v16 }
  0x95   : > { %1612 = vmatpush.bf16.msra.mxu1 %v2473_v60 }
  0x99   : > { %1613 = vmatpush.bf16.msra.mxu1 %v2472_v13  ;;  %v421_v28 = vpop.f32.mrf.mxu1 }
  0x9b   : > { %1467 = vmatmul.bf16.gmra.mxu0 %v1352_v6 }
  0x9c   : > { %1614 = vmatmul.bf16.vlgmr.msra.gmra.mxu1 %v2915_v40 }
  0x9d   : > { %2298 = vmatmul.msk.bf16.gmra.mxu2 %vm386_vm1, %v1353_v14 }
  0x9e   : > { %2371 = vmatmul.msk.bf16.vlgmr.msra.gmra.mxu3 %vm386_vm1, %v2921_v46 }
  0xa1   : > { %v537_v17 = vpop.f32.mrf.mxu3  ;;  %v423_v3 = vpop.f32.mrf.mxu1 }
  0xa8   : > { %v402_v40 = vpop.f32.mrf.mxu0 }
  0xa9   : > { %v539_v20 = vpop.f32.mrf.mxu3  ;;  %v426_v23 = vpop.f32.mrf.mxu1  ;;  %v422_v25 = vadd.f32 %v421_v28, %v402_v40 }
  0xac   : > { %1619 = vmatmul.bf16.gmra.mxu1 %v1504_v22 }
  0xae   : > { %2372 = vmatmul.msk.bf16.gmra.mxu3 %vm386_vm1, %v1505_v24 }
  0xb0   : > { %v518_v46 = vpop.f32.mrf.mxu2  ;;  %v404_v33 = vpop.f32.mrf.mxu0 }
  0xb1   : > { %v542_v30 = vpop.f32.mrf.mxu3  ;;  %v519_v32 = vadd.f32 %v518_v46, %v422_v25  ;;  %v428_v27 = vpop.f32.mrf.mxu1  ;;  %v424_v29 = vadd.f32 %v423_v3, %v404_v33 }
  0xb3   : > { %v538_v34 = vadd.f32 %v537_v17, %v519_v32 }
  0xb8   : > { %v520_v37 = vpop.f32.mrf.mxu2  ;;  %v407_v19 = vpop.f32.mrf.mxu0 }
  0xb9   : > { %v544_v57 = vpop.f32.mrf.mxu3  ;;  %v521_v7 = vadd.f32 %v520_v37, %v424_v29  ;;  %v696_v59 = vpop.f32.mrf.mxu1  ;;  %v427_v48 = vadd.f32 %v426_v23, %v407_v19 }
  0xbb   : > { %v540_v50 = vadd.f32 %v539_v20, %v521_v7 }
  0xc0   : > { %v523_v36 = vpop.f32.mrf.mxu2  ;;  %v409_v52 = vpop.f32.mrf.mxu0 }
  0xc1   : > { %v715_v38 = vpop.f32.mrf.mxu3  ;;  %v524_v41 = vadd.f32 %v523_v36, %v427_v48  ;;  %v698_v53 = vpop.f32.mrf.mxu1  ;;  %v429_v18 = vadd.f32 %v428_v27, %v409_v52 }
  0xc2   : > { %v716_v51 = vadd.f32 %v715_v38, %v696_v59 }
  0xc3   : > { %v543_v44 = vadd.f32 %v542_v30, %v524_v41 }
  0xc4   : > { %v725_v47 = vadd.f32 %v716_v51, %v538_v34 }
  0xc8   : > { %v525_v26 = vpop.f32.mrf.mxu2  ;;  %v845_v35 = vpop.f32.mrf.mxu0 }
  0xc9   : > { %v717_v54 = vpop.f32.mrf.mxu3  ;;  %v526_v55 = vadd.f32 %v525_v26, %v429_v18  ;;  %v701_v39 = vpop.f32.mrf.mxu1 }
  0xca   : > { %v718_v42 = vadd.f32 %v717_v54, %v698_v53 }
  0xcb   : > { %v545_v43 = vadd.f32 %v544_v57, %v526_v55 }
  0xcc   : > { %v726_v0 = vadd.f32 %v718_v42, %v540_v50 }
  0xd0   : > { %v864_v21 = vpop.f32.mrf.mxu2  ;;  %v847_v60 = vpop.f32.mrf.mxu0 }
  0xd1   : > { %v720_v45 = vpop.f32.mrf.mxu3  ;;  %v865_v56 = vadd.f32 %v864_v21, %v845_v35  ;;  %v703_v58 = vpop.f32.mrf.mxu1 }
  0xd2   : > { %v721_v16 = vadd.f32 %v720_v45, %v701_v39 }
  0xd3   : > { %v874_v63 = vadd.f32 %v865_v56, %v725_v47 }
  0xd4   : > { %v727_v61 = vadd.f32 %v721_v16, %v543_v44 }
  0xd8   : > { %v866_v15 = vpop.f32.mrf.mxu2  ;;  %v850_v5 = vpop.f32.mrf.mxu0 }
  0xd9   : > { %v722_v13 = vpop.f32.mrf.mxu3  ;;  %v1006_v2 = vpop.f32.mrf.mxu1  ;;  %v867_v41 = vadd.f32 %v866_v15, %v847_v60 }
  0xda   : > { %v723_v1 = vadd.f32 %v722_v13, %v703_v58  ;;  %v2504_v13 = vld [vmem:[%s3144_s2] ss:$0 sm:$0xff] }
  0xdb   : > { %v875_v26 = vadd.f32 %v867_v41, %v726_v0 }
  0xdc   : > { %v3129_v31 = vadd.f32 %v723_v1, %v545_v43 }
  0xe0   : > { %v869_v49 = vpop.f32.mrf.mxu2  ;;  %v852_v17 = vpop.f32.mrf.mxu0 }
  0xe1   : > { %v1025_v62 = vpop.f32.mrf.mxu3  ;;  %v870_v6 = vadd.f32 %v869_v49, %v850_v5  ;;  %v1008_v14 = vpop.f32.mrf.mxu1 }
  0xe2   : > { %v1026_v28 = vadd.f32 %v1025_v62, %v1006_v2 }
  0xe3   : > { %v876_v3 = vadd.f32 %v870_v6, %v727_v61 }
  0xe4   : > { %v1035_v4 = vadd.f32 %v1026_v28, %v874_v63 }
  0xe8   : > { %v871_v8 = vpop.f32.mrf.mxu2  ;;  %v1163_v11 = vpop.f32.mrf.mxu0 }
  0xe9   : > { %v1027_v9 = vpop.f32.mrf.mxu3  ;;  %v1011_v10 = vpop.f32.mrf.mxu1  ;;  %v872_v62 = vadd.f32 %v871_v8, %v852_v17 }
  0xea   : > { %v1028_v18 = vadd.f32 %v1027_v9, %v1008_v14 }
  0xec   : > { %v1036_v39 = vadd.f32 %v1028_v18, %v875_v26 }
  0xf0   : > { %v1182_v20 = vpop.f32.mrf.mxu2  ;;  %v1165_v24 = vpop.f32.mrf.mxu0 }
  0xf1   : > { %v1030_v12 = vpop.f32.mrf.mxu3  ;;  %v1013_v40 = vpop.f32.mrf.mxu1  ;;  %v1183_v51 = vadd.f32 %v1182_v20, %v1163_v11  ;;  %v877_v11 = vadd.f32 %v872_v62, %v3129_v31 }
  0xf2   : > { %v1031_v22 = vadd.f32 %v1030_v12, %v1011_v10 }
  0xf3   : > { %v1192_v54 = vadd.f32 %v1183_v51, %v1035_v4 }
  0xf4   : > { %v1037_v23 = vadd.f32 %v1031_v22, %v876_v3 }
  0xf8   : > { %v1184_v46 = vpop.f32.mrf.mxu2  ;;  %v1168_v32 = vpop.f32.mrf.mxu0 }
  0xf9   : > { %v1032_v25 = vpop.f32.mrf.mxu3  ;;  %v1307_v30 = vpop.f32.mrf.mxu1  ;;  %v1185_v55 = vadd.f32 %v1184_v46, %v1165_v24 }
  0xfa   : > { %v1033_v3 = vadd.f32 %v1032_v25, %v1013_v40 }
  0xfb   : > { %v1193_v16 = vadd.f32 %v1185_v55, %v1036_v39 }
 0x100   : > { %v1187_v33 = vpop.f32.mrf.mxu2  ;;  %v1170_v37 = vpop.f32.mrf.mxu0 }
 0x101   : > { %v1326_v27 = vpop.f32.mrf.mxu3  ;;  %v1309_v29 = vpop.f32.mrf.mxu1  ;;  %v1188_v6 = vadd.f32 %v1187_v33, %v1168_v32 }
 0x102   : > { %v1327_v44 = vadd.f32 %v1326_v27, %v1307_v30  ;;  %v1038_v30 = vadd.f32 %v1033_v3, %v877_v11 }
 0x103   : > { %v1194_v20 = vadd.f32 %v1188_v6, %v1037_v23 }
 0x104   : > { %v1336_v35 = vadd.f32 %v1327_v44, %v1192_v54 }
 0x108   : > { %v1189_v7 = vpop.f32.mrf.mxu2  ;;  %v1463_v48 = vpop.f32.mrf.mxu0 }
 0x109   : > { %v1328_v34 = vpop.f32.mrf.mxu3  ;;  %v1312_v57 = vpop.f32.mrf.mxu1  ;;  %v1190_v22 = vadd.f32 %v1189_v7, %v1170_v37 }
 0x10a   : > { %v1329_v43 = vadd.f32 %v1328_v34, %v1309_v29 }
 0x10b   : > { %v1195_v25 = vadd.f32 %v1190_v22, %v1038_v30 }
 0x10c   : > { %v1337_v60 = vadd.f32 %v1329_v43, %v1193_v16 }
 0x110   : > { %v1482_v50 = vpop.f32.mrf.mxu2  ;;  %v1465_v52 = vpop.f32.mrf.mxu0 }
 0x111   : > { %v1331_v19 = vpop.f32.mrf.mxu3  ;;  %v1314_v59 = vpop.f32.mrf.mxu1  ;;  %v1483_v42 = vadd.f32 %v1482_v50, %v1463_v48 }
 0x112   : > { %v1332_v4 = vadd.f32 %v1331_v19, %v1312_v57 }
 0x113   : > { %v1492_v56 = vadd.f32 %v1483_v42, %v1336_v35 }
 0x114   : > { %v1338_v32 = vadd.f32 %v1332_v4, %v1194_v20 }
 0x118   : > { %v1484_v53 = vpop.f32.mrf.mxu2  ;;  %v1468_v61 = vpop.f32.mrf.mxu0 }
 0x119   : > { %v1333_v36 = vpop.f32.mrf.mxu3  ;;  %v1615_v38 = vpop.f32.mrf.mxu1  ;;  %v1485_v58 = vadd.f32 %v1484_v53, %v1465_v52 }
 0x11a   : > { %v1334_v33 = vadd.f32 %v1333_v36, %v1314_v59 }
 0x11b   : > { %v1493_v1 = vadd.f32 %v1485_v58, %v1337_v60 }
 0x11c   : > { %v1339_v31 = vadd.f32 %v1334_v33, %v1195_v25 }
 0x120   : > { %v1487_v0 = vpop.f32.mrf.mxu2  ;;  %v1470_v17 = vpop.f32.mrf.mxu0 }
 0x121   : > { %v1634_v47 = vpop.f32.mrf.mxu3  ;;  %v1617_v21 = vpop.f32.mrf.mxu1  ;;  %v1488_v24 = vadd.f32 %v1487_v0, %v1468_v61 }
 0x122   : > { %v1635_v45 = vadd.f32 %v1634_v47, %v1615_v38 }
 0x123   : > { %v1494_v27 = vadd.f32 %v1488_v24, %v1338_v32 }
 0x124   : > { %v1644_v63 = vadd.f32 %v1635_v45, %v1492_v56 }
 0x126   : > { %v1652_v5 = vadd.f32 %v2504_v13, %v1644_v63 }
 0x128   : > { %v1656_v9 = vmax.f32 %v1652_v5, 0.0  ;;  %v1489_v8 = vpop.f32.mrf.mxu2 }
 0x129   : > { %v1636_v15 = vpop.f32.mrf.mxu3  ;;  %v1620_v14 = vpop.f32.mrf.mxu1  ;;  %v1490_v29 = vadd.f32 %v1489_v8, %v1470_v17 }
 0x12a   : > { %v1637_v2 = vadd.f32 %v1636_v15, %v1617_v21 }
 0x12b   : > { %v1495_v48 = vadd.f32 %v1490_v29, %v1339_v31 }
 0x12c   : > { %v1645_v49 = vadd.f32 %v1637_v2, %v1493_v1 }
 0x12e   : > { %v1653_v28 = vadd.f32 %v2504_v13, %v1645_v49 }
 0x130   : > { %v1657_v10 = vmax.f32 %v1653_v28, 0.0 }
 0x131   : > { %v1639_v12 = vpop.f32.mrf.mxu3  ;;  %v1622_v57 = vpop.f32.mrf.mxu1 }
 0x132   : > { %v2487_v46 = vpack.c.bf16 %v1657_v10, %v1656_v9  ;;  %v1640_v40 = vadd.f32 %v1639_v12, %v1620_v14 }
 0x134   : > { %2488 = vst [vmem:[%s170_s21] sm:$0xff] %v2487_v46   ;;  %v1646_v34 = vadd.f32 %v1640_v40, %v1494_v27 }
 0x136   : > { %v1654_v23 = vadd.f32 %v2504_v13, %v1646_v34 }
 0x138   : > { %v1658_v38 = vmax.f32 %v1654_v23, 0.0 }
 0x139   : > { %v1641_v19 = vpop.f32.mrf.mxu3 }
 0x13a   : > { %v1642_v50 = vadd.f32 %v1641_v19, %v1622_v57 }
 0x13c   : > { %v1647_v37 = vadd.f32 %v1642_v50, %v1495_v48 }
 0x13e   : > { %v1655_v7 = vadd.f32 %v2504_v13, %v1647_v37 }
 0x140   : > { %v1659_v41 = vmax.f32 %v1655_v7, 0.0 }
 0x142   : > { %v2492_v51 = vpack.c.bf16 %v1659_v41, %v1658_v38 }
 0x144   : > { %2494 = vst [vmem:[%s170_s21 + $0x8] sm:$0xff] %v2492_v51  }
 0x145 PF: > { %s13_s12 = sadd.s32 1, %s2511_s12  }
 0x146   : > { %p10_p4 = scmp.ge.s32.totalorder %s13_s12, 4  }
 0x148   :  { %12 = sbr.rel (!%p10_p4) target bundleno = 1 (0x1), region = 70 }

// kernel: c3d_tf_forward.17
= control target key start
LH: loop header
LB: loop body
LE: loop exit
PB: predicated region body
PF: predicated region fallthrough
CT: control target
= control target key end

     0   :  { %vm19_vm0 = vcmask 254976   ;;  %v228_v2 = vmov 0.0   ;;  %vm54_vm1 = vcmask 261120   ;;  %s311_s0 = inlined_call_operand.vmem [shape: bf16[2,64,32], index: 0, kind: input, shape index: {}]   ;;  %s312_s1 = inlined_call_operand.vmem [shape: f32[32,10], index: 1, kind: input, shape index: {}]   ;;  %s313_s2 = inlined_call_operand.vmem [shape: f32[1,10], index: 2, kind: input, shape index: {}]   ;;  %s314_s3 = inlined_call_operand.hbm [shape: f32[2,10], index: 3, kind: output, shape index: {}]  }
   0x1   :  { %v113_v0 = vld [vmem:[%s312_s1 + $0x18] sm:$0xff]  ;;  %v112_v1 = vld [vmem:[%s312_s1 + $0x10] sm:$0xff]  ;;  %20 = vst.msk [vmem:[#allocation2] sm:$0x3] %vm19_vm0, %v228_v2  ;;  %v161_v3 = vld [vmem:[%s311_s0] sm:$0xff]  }
   0x2   :  { %133 = vmatpush.msra.mxu0 %v113_v0  ;;  %v192_v4 = vld [vmem:[%s311_s0 + $0x8] sm:$0xff]   ;;  %v162_v6 = vunpack.c.l.bf16 %v161_v3  ;;  %v163_v7 = vunpack.c.h.bf16 %v161_v3  ;;  %v193_v9 = vld [vmem:[%s311_s0 + $0x10] sm:$0xff]   ;;  %v195_v10 = vld [vmem:[%s311_s0 + $0x20] sm:$0xff]  }
   0x3   :  { %v111_v5 = vld [vmem:[%s312_s1 + $0x8] sm:$0xff]  ;;  %v166_v8 = vunpack.c.l.bf16 %v192_v4  ;;  %v110_v11 = vld [vmem:[%s312_s1] sm:$0xff]  ;;  %v167_v13 = vunpack.c.h.bf16 %v192_v4  ;;  %v178_v14 = vunpack.c.l.bf16 %v195_v10  ;;  %v179_v15 = vunpack.c.h.bf16 %v195_v10  ;;  %v197_v17 = vld [vmem:[%s311_s0 + $0x30] sm:$0xff]  }
   0x4   :  { %134 = vmatpush.msra.mxu0 %v112_v1  ;;  %v196_v12 = vld [vmem:[%s311_s0 + $0x28] sm:$0xff]  }
   0x5   :  { %v182_v16 = vunpack.c.l.bf16 %v196_v12 }
   0x6   :  { %8 = vsyncpa [#allocation4], 0  ;;  %135 = vmatpush.msra.mxu0 %v111_v5  ;;  %v170_v18 = vunpack.c.l.bf16 %v193_v9  ;;  %v183_v19 = vunpack.c.h.bf16 %v196_v12  ;;  %v55_v20 = vsel %vm54_vm1, %v162_v6, 0.0  ;;  %v56_v21 = vsel %vm54_vm1, %v163_v7, 0.0  ;;  %v194_v24 = vld [vmem:[%s311_s0 + $0x18] sm:$0xff]   ;;  %s229_s9 = smov [#allocation3]  }
   0x7   :  { %v58_v22 = vsel %vm54_vm1, %v166_v8, 0.0  ;;  %v171_v23 = vunpack.c.h.bf16 %v193_v9  ;;  %v186_v25 = vunpack.c.l.bf16 %v197_v17  ;;  %v57_v26 = vadd.f32 %v56_v21, %v55_v20  ;;  %v198_v31 = vld [vmem:[%s311_s0 + $0x38] sm:$0xff]   ;;  %v201_v12 = vld [vmem:[%s313_s2] ss:$0 sm:$0xff]  ;;  %s148_s10 = sshll.u32 %s229_s9, 4  ;;  %s150_s13 = sshll.u32 %s314_s3, 4  ;;  %s149_s10 = int_to_ptr.vmem [resolvable:$true] %s148_s10  ;;  %s151_s13 = int_to_ptr.hbm [resolvable:$true] %s150_s13 }
   0x8   :  { %136 = vmatpush.msra.mxu0 %v110_v11  ;;  %v60_v27 = vsel %vm54_vm1, %v167_v13, 0.0  ;;  %v76_v28 = vsel %vm54_vm1, %v178_v14, 0.0  ;;  %v77_v29 = vsel %vm54_vm1, %v179_v15, 0.0  ;;  %v79_v30 = vsel %vm54_vm1, %v182_v16, 0.0  ;;  %v21_v6 = vld [vmem:[#allocation2] sm:$0x3] }
   0x9   :  { %v59_v32 = vadd.f32 %v58_v22, %v57_v26  ;;  %v78_v33 = vadd.f32 %v77_v29, %v76_v28  ;;  %v174_v34 = vunpack.c.l.bf16 %v194_v24  ;;  %v187_v35 = vunpack.c.h.bf16 %v197_v17 }
   0xa   :  { %v62_v36 = vsel %vm54_vm1, %v170_v18, 0.0  ;;  %v81_v37 = vsel %vm54_vm1, %v183_v19, 0.0  ;;  %v175_v40 = vunpack.c.h.bf16 %v194_v24  ;;  %v190_v41 = vunpack.c.l.bf16 %v198_v31 }
   0xb   :  { %v61_v38 = vadd.f32 %v60_v27, %v59_v32  ;;  %v80_v39 = vadd.f32 %v79_v30, %v78_v33  ;;  %v64_v42 = vsel %vm54_vm1, %v171_v23, 0.0  ;;  %v83_v43 = vsel %vm54_vm1, %v186_v25, 0.0 }
   0xc   :  { %v191_v46 = vunpack.c.h.bf16 %v198_v31  ;;  %v66_v47 = vsel %vm54_vm1, %v174_v34, 0.0  ;;  %v85_v48 = vsel %vm54_vm1, %v187_v35, 0.0  ;;  %v68_v51 = vsel %vm54_vm1, %v175_v40, 0.0 }
   0xd   :  { %v63_v44 = vadd.f32 %v62_v36, %v61_v38  ;;  %v82_v45 = vadd.f32 %v81_v37, %v80_v39  ;;  %v87_v52 = vsel %vm54_vm1, %v190_v41, 0.0  ;;  %vm99_vm2 = vcmask 1041409  }
   0xe   :  { %v89_v55 = vsel %vm54_vm1, %v191_v46, 0.0  ;;  %vm141_vm3 = vcmask 74752  }
   0xf   :  { %v65_v49 = vadd.f32 %v64_v42, %v63_v44  ;;  %v84_v50 = vadd.f32 %v83_v43, %v82_v45 }
  0x11   :  { %v67_v53 = vadd.f32 %v66_v47, %v65_v49  ;;  %v86_v54 = vadd.f32 %v85_v48, %v84_v50 }
  0x13   :  { %v69_v56 = vadd.f32 %v68_v51, %v67_v53  ;;  %v88_v57 = vadd.f32 %v87_v52, %v86_v54 }
  0x15   :  { %v70_v58 = vrot.slane %v69_v56, 4  ;;  %v90_v59 = vadd.f32 %v89_v55, %v88_v57 }
  0x17   :  { %v71_v60 = vadd.f32 %v70_v58, %v69_v56  ;;  %v91_v61 = vrot.slane %v90_v59, 4 }
  0x19   :  { %v72_v62 = vrot.slane %v71_v60, 2  ;;  %v92_v63 = vadd.f32 %v91_v61, %v90_v59 }
  0x1b   :  { %v73_v0 = vadd.f32 %v72_v62, %v71_v60  ;;  %v93_v1 = vrot.slane %v92_v63, 2 }
  0x1d   :  { %v74_v2 = vrot.slane %v73_v0, 1  ;;  %v94_v3 = vadd.f32 %v93_v1, %v92_v63 }
  0x1f   :  { %v75_v4 = vadd.f32 %v74_v2, %v73_v0  ;;  %v95_v5 = vrot.slane %v94_v3, 1 }
  0x21   :  { %v96_v7 = vadd.f32 %v95_v5, %v94_v3 }
  0x23   :  { %v100_v8 = vsel %vm99_vm2, %v96_v7, %v75_v4 }
  0x24   :  { %v102_v9 = vadd.f32 %v100_v8, %v21_v6 }
  0x26   :  { %104 = vst.msk [vmem:[#allocation2] sm:$0x3] %vm19_vm0, %v102_v9 }
  0x2d   :  { %v108_v10 = vld [vmem:[#allocation2] sm:$0x3] }
  0x2e   :  { %v109_v11 = vmul.f32 0.015625, %v108_v10 }
  0x30   :  { %159 = vmatmul.msk.f32.vlgmr.msra.gmra.mxu0 %vm54_vm1, %v109_v11 }
  0xad   :  { %v138_v13 = vpop.f32.mrf.mxu0 }
  0xae   :  { %v139_v14 = vadd.f32 %v201_v12, %v138_v13 }
  0xb0   :  { %142 = vst.msk [vmem:[#allocation3] sm:$0x3] %vm141_vm3, %v139_v14 }
  0xb1   :  { %153 = dma.vmem_to_hbm [thread:$0]  %s149_s10, 32, %s151_s13, [#allocation4]  }
  0xb2   :  { %226 = dma.done.wait [#allocation4], 32  }
  0xb3   :  { %227 = vsyncadd [#allocation4], 4294967264 }
  0xb4   :  { %158 = vsyncpa [#allocation4], 1 }

</bundles_post_ra>
